<compile_context>
chip_gen: v6e
topology: v6e:2x2x1
jax: 0.10.0
libtpu: 0.0.40
codegen_flags: <defaults>
</compile_context>

<pallas_src>
import jax
import jax.numpy as jnp
from jax.experimental import pallas as pl
from jax.experimental.pallas import tpu as pltpu

K_IN = 256 * 66 * 2          # 33792 : flattened input features
K_HALF = K_IN // 2           # 16896 : rows of the lane-dense packed W1
HIDDEN = 64
OUTPUT_DIM = 1
LEAKY_SLOPE = 0.1

NCORES = 2                   # leading "parallel" grid axis (one K-half chunk per v7x TC)
TK = 8448                    # packed-K tile (rows of the (K_HALF, 128) packed W1)
N_HALF_BLOCKS = K_HALF // TK            # x column-blocks per K-half
NK_PER_CORE = N_HALF_BLOCKS // NCORES   # inner ("arbitrary") reduction grid extent

assert K_HALF % TK == 0 and TK % 128 == 0
assert N_HALF_BLOCKS % NCORES == 0


def _reg1_partial_kernel(x_lo_ref, x_hi_ref, w1p_ref, o_ref, acc_ref):
    """Per-core partial of the first Linear (no bias): acc += x_lo@W1_lo + x_hi@W1_hi.

    w1p_ref is a lane-dense (TK, 128) tile of the packed W1: lanes [0:64] are the
    rows [0, K/2) of the original (K, 64) weight, lanes [64:128] are rows [K/2, K).
    The grid is (NCORES, NK_PER_CORE); axis 0 is "parallel" (megacore), axis 1 is
    the K reduction.  Each core writes its (B, HIDDEN) partial hidden to its own
    output block; the combine + nonlinearity + second Linear happen in the wrapper.
    """
    k = pl.program_id(1)

    partial = jnp.dot(x_lo_ref[...], w1p_ref[:, :HIDDEN],
                      preferred_element_type=jnp.float32)
    partial = partial + jnp.dot(x_hi_ref[...], w1p_ref[:, HIDDEN:],
                                preferred_element_type=jnp.float32)

    @pl.when(k == 0)
    def _():
        acc_ref[...] = partial          # direct write: no separate zero pass

    @pl.when(k > 0)
    def _():
        acc_ref[...] += partial

    @pl.when(k == pl.num_programs(1) - 1)
    def _():
        o_ref[...] = acc_ref[...].astype(o_ref.dtype)


def pack_w1(w1):
    """One-time weight prep (do OUTSIDE the hot path): lane-dense packing of the
    (K_IN, 64) first-layer weight into (K_IN//2, 128)."""
    assert w1.shape == (K_IN, HIDDEN)
    return jnp.concatenate([w1[:K_HALF], w1[K_HALF:]], axis=1)


@jax.jit
def regularizer_forward(x, w1_packed, b1, w2, b2):
    B, K = x.shape
    assert K == K_IN
    assert w1_packed.shape == (K_HALF, 2 * HIDDEN)

    partials = pl.pallas_call(
        _reg1_partial_kernel,
        out_shape=jax.ShapeDtypeStruct((NCORES, B, HIDDEN), jnp.float32),
        grid_spec=pltpu.PrefetchScalarGridSpec(
            num_scalar_prefetch=0,
            grid=(NCORES, NK_PER_CORE),
            in_specs=[
                # x lower half tile: columns [p*TK, (p+1)*TK), p = c*NK_PER_CORE + k
                pl.BlockSpec((B, TK),
                             lambda c, k: (0, c * NK_PER_CORE + k)),
                # x upper half tile: columns [K/2 + p*TK, K/2 + (p+1)*TK)
                pl.BlockSpec((B, TK),
                             lambda c, k: (0, N_HALF_BLOCKS + c * NK_PER_CORE + k)),
                # lane-dense packed W1 tile (TK, 128)
                pl.BlockSpec((TK, 2 * HIDDEN),
                             lambda c, k: (c * NK_PER_CORE + k, 0)),
            ],
            # one (B, HIDDEN) partial per core; distinct block per parallel index
            out_specs=pl.BlockSpec((None, B, HIDDEN), lambda c, k: (c, 0, 0)),
            scratch_shapes=[pltpu.VMEM((B, HIDDEN), jnp.float32)],
        ),
        compiler_params=pltpu.CompilerParams(
            dimension_semantics=("parallel", "arbitrary"),
        ),
    )(x, x, w1_packed)

    # Tiny epilogue in plain JAX (fuses to one trivial XLA op): cross-core sum,
    # bias + LeakyReLU(0.1), and the 64 -> output_dim second Linear.
    h = partials.sum(axis=0) + b1.reshape(1, HIDDEN)
    h = jnp.where(h > 0, h, LEAKY_SLOPE * h)
    out = h @ w2 + b2.reshape(1, OUTPUT_DIM)
    return out.astype(x.dtype).reshape(-1)     # reg.view(-1)


def init_params(key):
    """Deterministic init mimicking PyTorch's default Linear init
    (uniform in +/- 1/sqrt(fan_in)).  W1/W2 are stored as (in, out)."""
    k1, k2, k3, k4 = jax.random.split(key, 4)
    bound1 = 1.0 / jnp.sqrt(jnp.float32(K_IN))
    bound2 = 1.0 / jnp.sqrt(jnp.float32(HIDDEN))
    w1 = jax.random.uniform(k1, (K_IN, HIDDEN), jnp.float32, -bound1, bound1)
    b1 = jax.random.uniform(k2, (HIDDEN,), jnp.float32, -bound1, bound1)
    w2 = jax.random.uniform(k3, (HIDDEN, OUTPUT_DIM), jnp.float32, -bound2, bound2)
    b2 = jax.random.uniform(k4, (OUTPUT_DIM,), jnp.float32, -bound2, bound2)
    return w1, b1, w2, b2


def reference_forward(x, w1, b1, w2, b2):
    h = x @ w1 + b1.reshape(1, HIDDEN)
    h = jnp.where(h > 0, h, LEAKY_SLOPE * h)
    return (h @ w2 + b2.reshape(1, OUTPUT_DIM)).reshape(-1)


if __name__ == "__main__":
    key = jax.random.PRNGKey(0)
    kx, kp = jax.random.split(key)

    B = 2
    x = jax.random.normal(kx, (B, K_IN), jnp.float32)
    w1, b1, w2, b2 = init_params(kp)

    # One-time weight packing (not part of the per-step forward).
    w1_packed = jax.block_until_ready(pack_w1(w1))

    out = regularizer_forward(x, w1_packed, b1, w2, b2)
    out = jax.block_until_ready(out)

    ref = reference_forward(x, w1, b1, w2, b2)
    assert out.shape == (B * OUTPUT_DIM,)
    assert jnp.allclose(out, ref, atol=1e-3, rtol=1e-3), (out, ref)

    print("KERNEL_OK")
</pallas_src>

<mosaic_0001>
module attributes {stable_mosaic.version = 11 : i64} {
  func.func @_reg1_partial_kernel(%arg0: i32, %arg1: i32, %arg2: memref<2x8448xf32, #tpu.memory_space<vmem>>, %arg3: memref<2x8448xf32, #tpu.memory_space<vmem>>, %arg4: memref<8448x128xf32, #tpu.memory_space<vmem>>, %arg5: memref<1x2x64xf32, #tpu.memory_space<vmem>>, %arg6: memref<2x64xf32, #tpu.memory_space<vmem>>) attributes {dimension_semantics = [#tpu.dimension_semantics<parallel>, #tpu.dimension_semantics<arbitrary>], iteration_bounds = array<i64: 2, 1>, scalar_prefetch = 0 : i64, scratch_operands = 1 : i64, tpu.core_type = #tpu.core_type<tc>, window_params = [{transform_indices = @transform_0, window_bounds = array<i64: 2, 8448>}, {transform_indices = @transform_1, window_bounds = array<i64: 2, 8448>}, {transform_indices = @transform_2, window_bounds = array<i64: 8448, 128>}, {transform_indices = @transform_3, window_bounds = array<i64: 1, 2, 64>}]} {
    %c0 = arith.constant 0 : index
    %c0_0 = arith.constant 0 : index
    %0 = vector.load %arg2[%c0, %c0_0] : memref<2x8448xf32, #tpu.memory_space<vmem>>, vector<2x8448xf32>
    %c0_1 = arith.constant 0 : index
    %c0_2 = arith.constant 0 : index
    %1 = vector.load %arg4[%c0_1, %c0_2] : memref<8448x128xf32, #tpu.memory_space<vmem>>, vector<8448x64xf32>
    %cst = arith.constant dense<0.000000e+00> : vector<2x64xf32>
    %2 = tpu.matmul %0, %1, %cst {dimension_numbers = #tpu.dot_dimension_numbers<[1], [0], [0], [1], [0, 0, 1, 1], [], []>} : vector<2x8448xf32>, vector<8448x64xf32>, vector<2x64xf32> -> vector<2x64xf32>
    %c0_3 = arith.constant 0 : index
    %c0_4 = arith.constant 0 : index
    %3 = vector.load %arg3[%c0_3, %c0_4] : memref<2x8448xf32, #tpu.memory_space<vmem>>, vector<2x8448xf32>
    %c0_5 = arith.constant 0 : index
    %c64 = arith.constant 64 : index
    %4 = vector.load %arg4[%c0_5, %c64] : memref<8448x128xf32, #tpu.memory_space<vmem>>, vector<8448x64xf32>
    %cst_6 = arith.constant dense<0.000000e+00> : vector<2x64xf32>
    %5 = tpu.matmul %3, %4, %cst_6 {dimension_numbers = #tpu.dot_dimension_numbers<[1], [0], [0], [1], [0, 0, 1, 1], [], []>} : vector<2x8448xf32>, vector<8448x64xf32>, vector<2x64xf32> -> vector<2x64xf32>
    %6 = arith.addf %2, %5 : vector<2x64xf32>
    %c0_i32 = arith.constant 0 : i32
    %7 = arith.cmpi eq, %arg1, %c0_i32 : i32
    %8 = arith.extui %7 : i1 to i32
    %c0_i32_7 = arith.constant 0 : i32
    %9 = arith.cmpi ne, %8, %c0_i32_7 : i32
    scf.if %9 {
      %c0_12 = arith.constant 0 : index
      %c0_13 = arith.constant 0 : index
      %16 = vector.load %arg6[%c0_12, %c0_13] : memref<2x64xf32, #tpu.memory_space<vmem>>, vector<2x64xf32>
      tpu.vector_store %arg6[%c0_12, %c0_13], %6 {strides = array<i32>} : memref<2x64xf32, #tpu.memory_space<vmem>>, vector<2x64xf32>,
    } else {
    }
    %c0_i32_8 = arith.constant 0 : i32
    %10 = arith.cmpi sgt, %arg1, %c0_i32_8 : i32
    %11 = arith.extui %10 : i1 to i32
    %c0_i32_9 = arith.constant 0 : i32
    %12 = arith.cmpi ne, %11, %c0_i32_9 : i32
    scf.if %12 {
      %c0_12 = arith.constant 0 : index
      %c0_13 = arith.constant 0 : index
      %16 = vector.load %arg6[%c0_12, %c0_13] : memref<2x64xf32, #tpu.memory_space<vmem>>, vector<2x64xf32>
      %17 = arith.addf %16, %6 : vector<2x64xf32>
      %c0_14 = arith.constant 0 : index
      %c0_15 = arith.constant 0 : index
      %18 = vector.load %arg6[%c0_14, %c0_15] : memref<2x64xf32, #tpu.memory_space<vmem>>, vector<2x64xf32>
      tpu.vector_store %arg6[%c0_14, %c0_15], %17 {strides = array<i32>} : memref<2x64xf32, #tpu.memory_space<vmem>>, vector<2x64xf32>,
    } else {
    }
    %c0_i32_10 = arith.constant 0 : i32
    %13 = arith.cmpi eq, %arg1, %c0_i32_10 : i32
    %14 = arith.extui %13 : i1 to i32
    %c0_i32_11 = arith.constant 0 : i32
    %15 = arith.cmpi ne, %14, %c0_i32_11 : i32
    scf.if %15 {
      %c0_12 = arith.constant 0 : index
      %c0_13 = arith.constant 0 : index
      %16 = vector.load %arg6[%c0_12, %c0_13] : memref<2x64xf32, #tpu.memory_space<vmem>>, vector<2x64xf32>
      %c0_14 = arith.constant 0 : index
      %c0_15 = arith.constant 0 : index
      %c0_16 = arith.constant 0 : index
      %17 = vector.load %arg5[%c0_14, %c0_15, %c0_16] : memref<1x2x64xf32, #tpu.memory_space<vmem>>, vector<1x2x64xf32>
      %18 = vector.shape_cast %17 : vector<1x2x64xf32> to vector<2x64xf32>
      %19 = vector.shape_cast %16 : vector<2x64xf32> to vector<1x2x64xf32>
      tpu.vector_store %arg5[%c0_14, %c0_15, %c0_16], %19 {strides = array<i32>} : memref<1x2x64xf32, #tpu.memory_space<vmem>>, vector<1x2x64xf32>,
    } else {
    }
    return
  }
  func.func @transform_0(%arg0: i32, %arg1: i32) -> (i32, i32) {
    %c1_i32 = arith.constant 1 : i32
    %0 = arith.muli %arg0, %c1_i32 : i32
    %1 = arith.addi %0, %arg1 : i32
    %c0_i32 = arith.constant 0 : i32
    %c0_i32_0 = arith.constant 0 : i32
    return %c0_i32, %1 : i32, i32
  }
  func.func @transform_1(%arg0: i32, %arg1: i32) -> (i32, i32) {
    %c1_i32 = arith.constant 1 : i32
    %0 = arith.muli %arg0, %c1_i32 : i32
    %c2_i32 = arith.constant 2 : i32
    %1 = arith.addi %c2_i32, %0 : i32
    %2 = arith.addi %1, %arg1 : i32
    %c0_i32 = arith.constant 0 : i32
    %c0_i32_0 = arith.constant 0 : i32
    return %c0_i32, %2 : i32, i32
  }
  func.func @transform_2(%arg0: i32, %arg1: i32) -> (i32, i32) {
    %c1_i32 = arith.constant 1 : i32
    %0 = arith.muli %arg0, %c1_i32 : i32
    %1 = arith.addi %0, %arg1 : i32
    %c0_i32 = arith.constant 0 : i32
    %c0_i32_0 = arith.constant 0 : i32
    return %1, %c0_i32 : i32, i32
  }
  func.func @transform_3(%arg0: i32, %arg1: i32) -> (i32, i32, i32) {
    %c0_i32 = arith.constant 0 : i32
    %c0_i32_0 = arith.constant 0 : i32
    %c0_i32_1 = arith.constant 0 : i32
    return %arg0, %c0_i32, %c0_i32_0 : i32, i32, i32
  }
}

</mosaic_0001>

<bundles_post_ra>
// kernel: regularizer_forward.1
= control target key start
LH: loop header
LB: loop body
LE: loop exit
PB: predicated region body
PF: predicated region fallthrough
CT: control target
= control target key end

     0   :  { %s19710_s0 = inlined_call_operand.hbm [shape: f32[2,33792], index: 0, kind: input, shape index: {}, may-alias: {0,1}]   ;;  %s19711_s1 = inlined_call_operand.hbm [shape: f32[2,33792], index: 1, kind: input, shape index: {}, may-alias: {0,1}]   ;;  %s19712_s2 = inlined_call_operand.hbm [shape: f32[16896,128], index: 2, kind: input, shape index: {}]   ;;  %s19713_s3 = inlined_call_operand.vmem [shape: f32[2,2,64], index: 3, kind: output, shape index: {}]  }
   0x1   :  { %19716 = sst [smem:[#allocation12_spill]] %s19710_s0 }
   0x2   :  { %19717 = sst [smem:[#allocation13_spill]] %s19711_s1 }
   0x3   :  { %8 = vsyncpa [#allocation4], 0 }
   0x4   :  { %10 = vsyncpa [#allocation4 + $0x1], 0 }
   0x5   :  { %11 = vsyncpa [#allocation6], 0 }
   0x6   :  { %13 = vsyncpa [#allocation6 + $0x1], 0  ;;  %s14800_s12 = smov 0   ;;  %s14802_s13 = smov 0  }
   0x7   :  { %s14804_s14 = smov 0   ;;  %s14806_s15 = smov 0  }
   0x8   :  { %s14808_s16 = smov 0   ;;  %s14810_s17 = smov 0  }
   0x9   :  { %s14812_s18 = smov 0   ;;  %s14814_s19 = smov 0  }
   0xa   :  { %s14816_s20 = smov 0  }
   0xb LB: > { %s19714_s21 = sadd.s32 4294967295, %s14771_s20   ;;  %s31_s22 = sadd.s32 1, %s14767_s19  ;;  %s14771_s20 = sphi %s14816_s20, %s19_s20   ;;  %s14767_s19 = sphi %s14814_s19, %s19736_s19   ;;  %s14763_s18 = sphi %s14812_s18, %s19735_s18   ;;  %s14759_s17 = sphi %s14810_s17, %s19734_s17   ;;  %s14755_s16 = sphi %s14808_s16, %s19733_s16   ;;  %s14751_s15 = sphi %s14806_s15, %s19732_s15   ;;  %s14747_s14 = sphi %s14804_s14, %s19731_s14   ;;  %s14743_s13 = sphi %s14802_s13, %s19730_s13   ;;  %s14739_s12 = sphi %s14800_s12, %s19729_s12  }
   0xc   : > { %p33_p0 = scmp.ge.s32.totalorder %s31_s22, 2  ;;  %p48_p1 = scmp.eq.s32.totalorder %s14771_s20, 0 }
   0xd   : > { %p14848_p2 = scmp.eq.s32.totalorder %s19714_s21, 0  ;;  %s63_s24 = sadd.s32 2, %s14767_s19 }
   0xe   : > { %s19738_s22 = smov (%p33_p0, %s31_s22), 0  ;;  %s70_s25 = sadd.s32 1, %s14747_s14 }
   0xf   : > { %19719 = sst [smem:[#allocation11_spill]] %s19738_s22  ;;  %p77_p3 = scmp.ne.s32.totalorder %s14747_s14, %s14743_s13 }
  0x10   : > { %s37_s26 = ssub.s32 %s14767_s19, %s19738_s22  ;;  %s65_s27 = sadd.s32 2, %s19738_s22 }
  0x11   : > { %s67_s28 = ssub.s32 %s63_s24, %s65_s27  ;;  %p79_p4 = por %p77_p3, %p48_p1 }
  0x12   : > { %p68_p5 = scmp.eq.s32.totalorder %s67_s28, 0  ;;  %p83_p6 = scmp.ne.s32.totalorder %s14743_s13, %s14739_s12 }
  0x13   : > { %p13439_p7 = scmp.lt.s32.totalorder %s14771_s20, 2  ;;  %s11105_s4 = smul.u32 2112, %s14767_s19 }
  0x14   : > { %s14866_s29 = scalar_select %p68_p5, %s14747_s14, %s70_s25  }
  0x15   : > { %p14870_p8 = por %p83_p6, %p14848_p2  ;;  %s181_s5 = sand.u32 1, %s14771_s20  }
  0x16   : > { %s183_s6 = sand.u32 1, %s14747_s14   ;;  %s19721_s1 = sld [smem:[#allocation13_spill]] }
  0x17   : > { %s13418_s7 = smul.u32 132, %s183_s6  ;;  %p14884_p9 = pnand %p13439_p7, %p79_p4 }
  0x18   : > { %p11099_p10 = scmp.ge.s32.totalorder %s14771_s20, 1  ;;  %s14889_s27 = scalar_lea.sflag [#allocation6], %s181_s5 }
  0x19   : > { %s185_s24 = scalar_lea.vmem [#allocation5], %s13418_s7  ;;  %p14606_p11 = pneg %p14884_p9 }
  0x1a   : > { %s195_s25 = sshll.u32 %s185_s24, 4  ;;  %s14773_s6 = smov [#allocation5]   ;;  %s196_s25 = int_to_ptr.vmem [resolvable:$true] %s195_s25 }
  0x1b   : > { %s14617_s28 = scalar_lea.vmem %s196_s25, 2112  ;;  %s14622_s8 = sshll.u32 %s14773_s6, 4  ;;  %s14623_s8 = int_to_ptr.vmem [resolvable:$false] %s14622_s8 }
  0x1c   : > { %s11009_s10 = scalar_lea.hbm %s19721_s1, %s11105_s4  ;;  %p14618_p12 = scmp.ne.s32.totalorder %s196_s25, %s14617_s28 }
  0x1d   : > { %s11010_s12 = scalar_lea.hbm %s11009_s10, 4224  ;;  %s14624_s9 = scalar_lea.vmem %s14623_s8, 4224 }
  0x1e   : > { %p14620_p13 = pnand %p14618_p12, %p14606_p11  ;;  %p14625_p3 = scmp.lt.s32.totalorder %s196_s25, %s14623_s8 }
  0x1f   : > { %p14626_p4 = scmp.lt.s32.totalorder %s14624_s9, %s14617_s28 }
  0x20   : > { %p14621_p0 = pneg %p14620_p13 }
  0x21   : > { %p14627_p5 = por %p14626_p4, %p14625_p3 }
  0x23   : > { %p14628_p6 = pnand %p14627_p5, %p14621_p0 }
  0x25   : > { %14631 = shalt.err (!%p14628_p6)
}
  0x26   : > { %13435 = dma.hbm_to_vmem [thread:$0]  (!%p14884_p9), %s11010_s12, 2112, %s196_s25, %s14889_s27  }
  0x27   : > { %p222_p11 = scmp.lt.s32.totalorder %s14771_s20, 3  ;;  %p38_p13 = scmp.eq.s32.totalorder %s37_s26, 0 }
  0x28   : > { %s40_s7 = sadd.s32 1, %s14759_s17  ;;  %p47_p0 = scmp.ne.s32.totalorder %s14759_s17, %s14755_s16 }
  0x29   : > { %p14899_p12 = pnand %p11099_p10, %p222_p11  ;;  %p53_p3 = scmp.ne.s32.totalorder %s14755_s16, %s14751_s15 }
  0x2a   : > { %s14912_s10 = scalar_select %p38_p13, %s14759_s17, %s40_s7  }
  0x2b   : > { %p49_p4 = por %p48_p1, %p47_p0  ;;  %p14918_p5 = por %p14848_p2, %p53_p3 }
  0x2c   : > { %s161_s12 = sand.u32 1, %s14759_s17   ;;  %s19725_s0 = sld [smem:[#allocation12_spill]] }
  0x2d   : > { %s13417_s6 = smul.u32 132, %s161_s12  ;;  %p14930_p9 = pnand %p13439_p7, %p49_p4 }
  0x2e   : > { %s13419_s15 = smul.u32 8448, %s161_s12  ;;  %s162_s7 = scalar_lea.sflag [#allocation4], %s161_s12 }
  0x2f   : > { %s11106_s23 = smul.u32 135168, %s14767_s19  ;;  %s165_s8 = scalar_lea.vmem [#allocation3], %s13417_s6 }
  0x30   : > { %s174_s9 = sshll.u32 %s165_s8, 4  ;;  %p14635_p1 = pneg %p14930_p9  ;;  %s175_s9 = int_to_ptr.vmem [resolvable:$true] %s174_s9 }
  0x31   : > { %s14646_s21 = scalar_lea.vmem %s175_s9, 2112 }
  0x32   : > { %s172_s28 = scalar_lea.hbm %s19725_s0, %s11105_s4  ;;  %p14647_p2 = scmp.ne.s32.totalorder %s175_s9, %s14646_s21 }
  0x33   : > { %s14774_s4 = smov [#allocation3]  }
  0x34   : > { %p14649_p10 = pnand %p14647_p2, %p14635_p1  ;;  %s14651_s24 = sshll.u32 %s14774_s4, 4  ;;  %s14652_s24 = int_to_ptr.vmem [resolvable:$false] %s14651_s24 }
  0x35   : > { %s14653_s25 = scalar_lea.vmem %s14652_s24, 4224  ;;  %p14654_p7 = scmp.lt.s32.totalorder %s175_s9, %s14652_s24 }
  0x36   : > { %p14650_p6 = pneg %p14649_p10  ;;  %p14655_p11 = scmp.lt.s32.totalorder %s14653_s25, %s14646_s21 }
  0x38   : > { %p14656_p13 = por %p14655_p11, %p14654_p7 }
  0x3a   : > { %p14657_p0 = pnand %p14656_p13, %p14650_p6 }
  0x3c   : > { %14660 = shalt.err (!%p14657_p0)
}
  0x3d   : > { %13432 = dma.hbm_to_vmem [thread:$0]  (!%p14930_p9), %s172_s28, 2112, %s175_s9, %s162_s7  }
  0x3e   : > { %s206_s12 = scalar_lea.vmem [#allocation7], %s13419_s15  ;;  %s213_s1 = scalar_lea.hbm %s19712_s2, %s11106_s23 }
  0x3f   : > { %s214_s6 = sshll.u32 %s206_s12, 4  ;;  %s14775_s21 = smov [#allocation7]   ;;  %s215_s6 = int_to_ptr.vmem [resolvable:$true] %s214_s6 }
  0x40   : > { %s14674_s22 = scalar_lea.vmem %s215_s6, 135168  ;;  %s14679_s4 = sshll.u32 %s14775_s21, 4  ;;  %s14680_s4 = int_to_ptr.vmem [resolvable:$false] %s14679_s4 }
  0x41   : > { %p14675_p3 = scmp.ne.s32.totalorder %s215_s6, %s14674_s22  ;;  %s14681_s24 = scalar_lea.vmem %s14680_s4, 270336 }
  0x42   : > { %p14682_p10 = scmp.lt.s32.totalorder %s215_s6, %s14680_s4  ;;  %p14683_p6 = scmp.lt.s32.totalorder %s14681_s24, %s14674_s22 }
  0x43   : > { %p14677_p4 = pnand %p14675_p3, %p14635_p1 }
  0x44   : > { %p14684_p7 = por %p14683_p6, %p14682_p10 }
  0x45   : > { %p14678_p2 = pneg %p14677_p4 }
  0x47   : > { %p14685_p11 = pnand %p14684_p7, %p14678_p2 }
  0x49   : > { %14688 = shalt.err (!%p14685_p11)
}
  0x4a   : > { %s14776_s28 = smov 128   ;;  %s14777_s0 = smov 8  }
  0x4b   : > { %13438 = dma.hbm_to_vmem [thread:$0]  (!%p14930_p9), %s213_s1, 135168, %s215_s6, %s14889_s27, %s14776_s28, %s14776_s28, %s14777_s0  }
  0x4c   : > { %226 = sbr.rel (%p14899_p12) target bundleno = 3057 (0xbf1), region = 32  ;;  %s228_s15 = sand.u32 (!%p14899_p12), 1, %s14755_s16  }
  0x4d   : > { %s13420_s23 = smul.u32 (!%p14899_p12), 132, %s228_s15  ;;  %s229_s9 = scalar_lea.sflag (!%p14899_p12), [#allocation4], %s228_s15 }
  0x4f   : > { %s14954_s7 = scalar_lea.vmem (!%p14899_p12), [#allocation3], %s13420_s23 }
  0x51   : > { %14726 = dma.done.wait (%p14918_p5), %s229_s9, 2112  }
  0x52   : > { %14728 = vsyncadd (%p14918_p5), %s229_s9, 4294965184  ;;  %s19727_s22 = sadd.s32 4294967295, %s14771_s20   ;;  %s239_s27 = sand.u32 1, %s14743_s13  }
  0x53   : > { %s237_s1 = sand.u32 1, %s19727_s22   ;;  %s13421_s5 = smul.u32 132, %s239_s27 }
  0x54   : > { %s238_s26 = scalar_lea.sflag [#allocation6], %s237_s1 }
  0x55   : > { %s14963_s25 = scalar_lea.vmem [#allocation5], %s13421_s5 }
  0x56   : > { %14730 = dma.done.wait (%p14870_p8), %s238_s26, 2112  }
  0x57   : > { %14732 = vsyncadd (%p14870_p8), %s238_s26, 4294965184  ;;  %s13422_s12 = smul.u32 8448, %s228_s15 }
  0x59   : > { %s14969_s6 = scalar_lea.vmem [#allocation7], %s13422_s12 }
  0x5a   : > { %14734 = dma.done.wait (%p14918_p5), %s238_s26, 135168  }
  0x5b   : > { %14736 = vsyncadd (%p14918_p5), %s238_s26, 4294832128  ;;  %v312_v0 = vld [vmem:[%s14969_s6 + $0x10] sm:$0xff]  ;;  %v310_v1 = vld [vmem:[%s14969_s6] sm:$0xff]  ;;  %s14778_s30 = smov 64   ;;  %p289_p8 = scmp.lt.s32.totalorder %s14763_s18, 1  ;;  %vm10957_vm0 = vcmask 517120  }
  0x5c   : > { %2806 = vrot.lane.b32.xlu1 %v312_v0, %s14778_s30  ;;  %2802 = vrot.lane.b32.xlu0 %v310_v1, %s14778_s30  ;;  %v313_v2 = vld [vmem:[%s14969_s6 + $0x18] sm:$0xff]  ;;  %v311_v3 = vld [vmem:[%s14969_s6 + $0x8] sm:$0xff] }
  0x5d   : > { %v315_v4 = vld [vmem:[%s14969_s6 + $0x28] sm:$0xff]  ;;  %v314_v5 = vld [vmem:[%s14969_s6 + $0x20] sm:$0xff]  ;;  %v317_v6 = vld [vmem:[%s14969_s6 + $0x38] sm:$0xff]  ;;  %s19740_s18 = smov (!%p289_p8, %s14763_s18), 1 }
  0x5e   : > { %v316_v7 = vld [vmem:[%s14969_s6 + $0x30] sm:$0xff]  ;;  %v319_v8 = vld [vmem:[%s14969_s6 + $0x48] sm:$0xff]  ;;  %v318_v9 = vld [vmem:[%s14969_s6 + $0x40] sm:$0xff]  ;;  %s11100_s11 = sshll.u32 %s19740_s18, 1 }
  0x5f   : > { %v321_v10 = vld [vmem:[%s14969_s6 + $0x58] sm:$0xff]  ;;  %v320_v11 = vld [vmem:[%s14969_s6 + $0x50] sm:$0xff]  ;;  %v323_v12 = vld [vmem:[%s14969_s6 + $0x68] sm:$0xff]  ;;  %s292_s4 = scalar_lea.vmem %s19713_s3, %s11100_s11 }
  0x60   : > { %2808 = vrot.lane.b32.xlu1 %v313_v2, %s14778_s30  ;;  %2804 = vrot.lane.b32.xlu0 %v311_v3, %s14778_s30  ;;  %v322_v13 = vld [vmem:[%s14969_s6 + $0x60] sm:$0xff]  ;;  %v325_v14 = vld [vmem:[%s14969_s6 + $0x78] sm:$0xff] }
  0x61   : > { %v324_v15 = vld [vmem:[%s14969_s6 + $0x70] sm:$0xff]  ;;  %v327_v16 = vld [vmem:[%s14969_s6 + $0x88] sm:$0xff]  ;;  %v326_v17 = vld [vmem:[%s14969_s6 + $0x80] sm:$0xff] }
  0x62   : > { %v329_v18 = vld [vmem:[%s14969_s6 + $0x98] sm:$0xff]  ;;  %v328_v19 = vld [vmem:[%s14969_s6 + $0x90] sm:$0xff]  ;;  %v331_v20 = vld [vmem:[%s14969_s6 + $0xa8] sm:$0xff] }
  0x63   : > { %v330_v21 = vld [vmem:[%s14969_s6 + $0xa0] sm:$0xff]  ;;  %v333_v22 = vld [vmem:[%s14969_s6 + $0xb8] sm:$0xff]  ;;  %v332_v23 = vld [vmem:[%s14969_s6 + $0xb0] sm:$0xff] }
  0x64   : > { %2812 = vrot.lane.b32.xlu1 %v315_v4, %s14778_s30  ;;  %2810 = vrot.lane.b32.xlu0 %v314_v5, %s14778_s30  ;;  %v335_v24 = vld [vmem:[%s14969_s6 + $0xc8] sm:$0xff]  ;;  %v334_v25 = vld [vmem:[%s14969_s6 + $0xc0] sm:$0xff] }
  0x65   : > { %v337_v26 = vld [vmem:[%s14969_s6 + $0xd8] sm:$0xff]  ;;  %v336_v27 = vld [vmem:[%s14969_s6 + $0xd0] sm:$0xff]  ;;  %v339_v28 = vld [vmem:[%s14969_s6 + $0xe8] sm:$0xff] }
  0x66   : > { %v338_v29 = vld [vmem:[%s14969_s6 + $0xe0] sm:$0xff]  ;;  %v341_v30 = vld [vmem:[%s14969_s6 + $0xf8] sm:$0xff]  ;;  %v340_v31 = vld [vmem:[%s14969_s6 + $0xf0] sm:$0xff] }
  0x67   : > { %v343_v32 = vld [vmem:[%s14969_s6 + $0x108] sm:$0xff]  ;;  %v342_v33 = vld [vmem:[%s14969_s6 + $0x100] sm:$0xff]  ;;  %v345_v34 = vld [vmem:[%s14969_s6 + $0x118] sm:$0xff] }
  0x68   : > { %2816 = vrot.lane.b32.xlu1 %v317_v6, %s14778_s30  ;;  %2814 = vrot.lane.b32.xlu0 %v316_v7, %s14778_s30  ;;  %v344_v35 = vld [vmem:[%s14969_s6 + $0x110] sm:$0xff]  ;;  %v347_v36 = vld [vmem:[%s14969_s6 + $0x128] sm:$0xff] }
  0x69   : > { %v346_v37 = vld [vmem:[%s14969_s6 + $0x120] sm:$0xff]  ;;  %v349_v38 = vld [vmem:[%s14969_s6 + $0x138] sm:$0xff]  ;;  %v348_v39 = vld [vmem:[%s14969_s6 + $0x130] sm:$0xff] }
  0x6a   : > { %v351_v40 = vld [vmem:[%s14969_s6 + $0x148] sm:$0xff]  ;;  %v350_v41 = vld [vmem:[%s14969_s6 + $0x140] sm:$0xff]  ;;  %v353_v42 = vld [vmem:[%s14969_s6 + $0x158] sm:$0xff] }
  0x6b   : > { %v352_v43 = vld [vmem:[%s14969_s6 + $0x150] sm:$0xff]  ;;  %v355_v44 = vld [vmem:[%s14969_s6 + $0x168] sm:$0xff]  ;;  %v354_v45 = vld [vmem:[%s14969_s6 + $0x160] sm:$0xff] }
  0x6c   : > { %2820 = vrot.lane.b32.xlu1 %v319_v8, %s14778_s30  ;;  %2818 = vrot.lane.b32.xlu0 %v318_v9, %s14778_s30  ;;  %v357_v46 = vld [vmem:[%s14969_s6 + $0x178] sm:$0xff]  ;;  %v356_v47 = vld [vmem:[%s14969_s6 + $0x170] sm:$0xff] }
  0x6d   : > { %v359_v48 = vld [vmem:[%s14969_s6 + $0x188] sm:$0xff]  ;;  %v358_v49 = vld [vmem:[%s14969_s6 + $0x180] sm:$0xff]  ;;  %v361_v50 = vld [vmem:[%s14969_s6 + $0x198] sm:$0xff] }
  0x6e   : > { %v360_v51 = vld [vmem:[%s14969_s6 + $0x190] sm:$0xff]  ;;  %v363_v52 = vld [vmem:[%s14969_s6 + $0x1a8] sm:$0xff]  ;;  %v362_v53 = vld [vmem:[%s14969_s6 + $0x1a0] sm:$0xff] }
  0x6f   : > { %v365_v54 = vld [vmem:[%s14969_s6 + $0x1b8] sm:$0xff]  ;;  %v364_v55 = vld [vmem:[%s14969_s6 + $0x1b0] sm:$0xff]  ;;  %v367_v56 = vld [vmem:[%s14969_s6 + $0x1c8] sm:$0xff] }
  0x70   : > { %2824 = vrot.lane.b32.xlu1 %v321_v10, %s14778_s30  ;;  %2822 = vrot.lane.b32.xlu0 %v320_v11, %s14778_s30  ;;  %v366_v57 = vld [vmem:[%s14969_s6 + $0x1c0] sm:$0xff]  ;;  %v369_v58 = vld [vmem:[%s14969_s6 + $0x1d8] sm:$0xff] }
  0x71   : > { %v368_v59 = vld [vmem:[%s14969_s6 + $0x1d0] sm:$0xff]  ;;  %v371_v62 = vld [vmem:[%s14969_s6 + $0x1e8] sm:$0xff]  ;;  %v370_v63 = vld [vmem:[%s14969_s6 + $0x1e0] sm:$0xff] }
  0x72   : > { %v373_v2 = vld [vmem:[%s14969_s6 + $0x1f8] sm:$0xff]  ;;  %v372_v3 = vld [vmem:[%s14969_s6 + $0x1f0] sm:$0xff]  ;;  %v375_v6 = vld [vmem:[%s14969_s6 + $0x208] sm:$0xff] }
  0x73   : > { %v374_v7 = vld [vmem:[%s14969_s6 + $0x200] sm:$0xff]  ;;  %v377_v10 = vld [vmem:[%s14969_s6 + $0x218] sm:$0xff]  ;;  %v376_v11 = vld [vmem:[%s14969_s6 + $0x210] sm:$0xff] }
  0x74   : > { %2828 = vrot.lane.b32.xlu1 %v323_v12, %s14778_s30  ;;  %2826 = vrot.lane.b32.xlu0 %v322_v13, %s14778_s30 }
  0x78   : > { %2832 = vrot.lane.b32.xlu1 %v325_v14, %s14778_s30  ;;  %2830 = vrot.lane.b32.xlu0 %v324_v15, %s14778_s30  ;;  %v379_v14 = vld [vmem:[%s14969_s6 + $0x228] sm:$0xff]  ;;  %v378_v15 = vld [vmem:[%s14969_s6 + $0x220] sm:$0xff] }
  0x7c   : > { %2836 = vrot.lane.b32.xlu1 %v327_v16, %s14778_s30  ;;  %2834 = vrot.lane.b32.xlu0 %v326_v17, %s14778_s30 }
  0x80   : > { %2840 = vrot.lane.b32.xlu1 %v329_v18, %s14778_s30  ;;  %2838 = vrot.lane.b32.xlu0 %v328_v19, %s14778_s30  ;;  %v381_v18 = vld [vmem:[%s14969_s6 + $0x238] sm:$0xff]  ;;  %v380_v19 = vld [vmem:[%s14969_s6 + $0x230] sm:$0xff] }
  0x84   : > { %2844 = vrot.lane.b32.xlu1 %v331_v20, %s14778_s30  ;;  %2842 = vrot.lane.b32.xlu0 %v330_v21, %s14778_s30 }
  0x88   : > { %2848 = vrot.lane.b32.xlu1 %v333_v22, %s14778_s30  ;;  %2846 = vrot.lane.b32.xlu0 %v332_v23, %s14778_s30  ;;  %v383_v22 = vld [vmem:[%s14969_s6 + $0x248] sm:$0xff]  ;;  %v382_v23 = vld [vmem:[%s14969_s6 + $0x240] sm:$0xff] }
  0x8c   : > { %2852 = vrot.lane.b32.xlu1 %v335_v24, %s14778_s30  ;;  %2850 = vrot.lane.b32.xlu0 %v334_v25, %s14778_s30 }
  0x90   : > { %2856 = vrot.lane.b32.xlu1 %v337_v26, %s14778_s30  ;;  %2854 = vrot.lane.b32.xlu0 %v336_v27, %s14778_s30  ;;  %v385_v26 = vld [vmem:[%s14969_s6 + $0x258] sm:$0xff]  ;;  %v384_v27 = vld [vmem:[%s14969_s6 + $0x250] sm:$0xff] }
  0x94   : > { %2860 = vrot.lane.b32.xlu1 %v339_v28, %s14778_s30  ;;  %2858 = vrot.lane.b32.xlu0 %v338_v29, %s14778_s30 }
  0x98   : > { %2864 = vrot.lane.b32.xlu1 %v341_v30, %s14778_s30  ;;  %2862 = vrot.lane.b32.xlu0 %v340_v31, %s14778_s30  ;;  %v387_v30 = vld [vmem:[%s14969_s6 + $0x268] sm:$0xff]  ;;  %v386_v31 = vld [vmem:[%s14969_s6 + $0x260] sm:$0xff] }
  0x9c   : > { %2868 = vrot.lane.b32.xlu1 %v343_v32, %s14778_s30  ;;  %2866 = vrot.lane.b32.xlu0 %v342_v33, %s14778_s30 }
  0xa0   : > { %2872 = vrot.lane.b32.xlu1 %v345_v34, %s14778_s30  ;;  %2870 = vrot.lane.b32.xlu0 %v344_v35, %s14778_s30  ;;  %v389_v34 = vld [vmem:[%s14969_s6 + $0x278] sm:$0xff]  ;;  %v388_v35 = vld [vmem:[%s14969_s6 + $0x270] sm:$0xff] }
  0xa4   : > { %2876 = vrot.lane.b32.xlu1 %v347_v36, %s14778_s30  ;;  %2874 = vrot.lane.b32.xlu0 %v346_v37, %s14778_s30 }
  0xa8   : > { %2880 = vrot.lane.b32.xlu1 %v349_v38, %s14778_s30  ;;  %2878 = vrot.lane.b32.xlu0 %v348_v39, %s14778_s30  ;;  %v391_v38 = vld [vmem:[%s14969_s6 + $0x288] sm:$0xff]  ;;  %v390_v39 = vld [vmem:[%s14969_s6 + $0x280] sm:$0xff] }
  0xac   : > { %2884 = vrot.lane.b32.xlu1 %v351_v40, %s14778_s30  ;;  %2882 = vrot.lane.b32.xlu0 %v350_v41, %s14778_s30 }
  0xb0   : > { %2888 = vrot.lane.b32.xlu1 %v353_v42, %s14778_s30  ;;  %2886 = vrot.lane.b32.xlu0 %v352_v43, %s14778_s30  ;;  %v393_v42 = vld [vmem:[%s14969_s6 + $0x298] sm:$0xff]  ;;  %v392_v43 = vld [vmem:[%s14969_s6 + $0x290] sm:$0xff] }
  0xb4   : > { %2892 = vrot.lane.b32.xlu1 %v355_v44, %s14778_s30  ;;  %2890 = vrot.lane.b32.xlu0 %v354_v45, %s14778_s30 }
  0xb8   : > { %2896 = vrot.lane.b32.xlu1 %v357_v46, %s14778_s30  ;;  %2894 = vrot.lane.b32.xlu0 %v356_v47, %s14778_s30  ;;  %v395_v46 = vld [vmem:[%s14969_s6 + $0x2a8] sm:$0xff]  ;;  %v394_v47 = vld [vmem:[%s14969_s6 + $0x2a0] sm:$0xff] }
  0xbc   : > { %2900 = vrot.lane.b32.xlu1 %v359_v48, %s14778_s30  ;;  %2898 = vrot.lane.b32.xlu0 %v358_v49, %s14778_s30 }
  0xc0   : > { %2904 = vrot.lane.b32.xlu1 %v361_v50, %s14778_s30  ;;  %2902 = vrot.lane.b32.xlu0 %v360_v51, %s14778_s30  ;;  %v14779_v50 = vmov 1983009808  }
  0xc1   : > { %v1402_v51 = vunpack.c.l.s4 %v14779_v50  ;;  %v422_v50 = vld [vmem:[%s14969_s6 + $0x380] sm:$0xff] }
  0xc4   : > { %2908 = vrot.lane.b32.xlu1 %v363_v52, %s14778_s30  ;;  %2906 = vrot.lane.b32.xlu0 %v362_v53, %s14778_s30  ;;  %v1404_v52 = vlaneseq  ;;  %v1403_v53 = vunpack.c.0.s8 %v1402_v51  ;;  %v425_v51 = vld [vmem:[%s14969_s6 + $0x398] sm:$0xff] }
  0xc8   : > { %2912 = vrot.lane.b32.xlu1 %v365_v54, %s14778_s30  ;;  %2910 = vrot.lane.b32.xlu0 %v364_v55, %s14778_s30  ;;  %v1405_v54 = vshrl.u32 %v1404_v52, 7  ;;  %v397_v55 = vld [vmem:[%s14969_s6 + $0x2b8] sm:$0xff] }
  0xcc   : > { %2916 = vrot.lane.b32.xlu1 %v367_v56, %s14778_s30  ;;  %2914 = vrot.lane.b32.xlu0 %v366_v57, %s14778_s30  ;;  %v396_v56 = vld [vmem:[%s14969_s6 + $0x2b0] sm:$0xff] }
  0xce   : > { %v15093_v60 = vpop.permute.xlu1 %2806  ;;  %v15095_v61 = vpop.permute.xlu0 %2802 }
  0xd0   : > { %2920 = vrot.lane.b32.xlu1 %v369_v58, %s14778_s30  ;;  %2918 = vrot.lane.b32.xlu0 %v368_v59, %s14778_s30  ;;  %v15195_v59 = vsub.s32 %v1403_v53, %v1405_v54  ;;  %v424_v54 = vld [vmem:[%s14969_s6 + $0x390] sm:$0xff] }
  0xd2   : > { %v15101_v0 = vpop.permute.xlu1 %2808  ;;  %v15103_v1 = vpop.permute.xlu0 %2804 }
  0xd4   : > { %2924 = vrot.lane.b32.xlu1 %v371_v62, %s14778_s30  ;;  %2922 = vrot.lane.b32.xlu0 %v370_v63, %s14778_s30  ;;  %v15198_v62 = vld [vmem:[%s14963_s25] sm:$0xff] }
  0xd5   : > { %v15204_v63 = vrot.slane %v15198_v62, %v15195_v59 }
  0xd6   : > { %v15109_v4 = vpop.permute.xlu1 %2812  ;;  %v15111_v5 = vpop.permute.xlu0 %2810 }
  0xd8   : > { %2928 = vrot.lane.b32.xlu1 %v373_v2, %s14778_s30  ;;  %2926 = vrot.lane.b32.xlu0 %v372_v3, %s14778_s30  ;;  %v399_v2 = vld [vmem:[%s14969_s6 + $0x2c8] sm:$0xff] }
  0xda   : > { %v15117_v8 = vpop.permute.xlu1 %2816  ;;  %v15119_v9 = vpop.permute.xlu0 %2814 }
  0xdc   : > { %2932 = vrot.lane.b32.xlu1 %v375_v6, %s14778_s30  ;;  %2930 = vrot.lane.b32.xlu0 %v374_v7, %s14778_s30  ;;  %v398_v7 = vld [vmem:[%s14969_s6 + $0x2c0] sm:$0xff] }
  0xde   : > { %v15125_v12 = vpop.permute.xlu1 %2820  ;;  %v15127_v13 = vpop.permute.xlu0 %2818 }
  0xe0   : > { %2936 = vrot.lane.b32.xlu1 %v377_v10, %s14778_s30  ;;  %2934 = vrot.lane.b32.xlu0 %v376_v11, %s14778_s30  ;;  %v1415_v10 = vcombine.high %v15204_v63, %v15204_v63  ;;  %v401_v11 = vld [vmem:[%s14969_s6 + $0x2d8] sm:$0xff] }
  0xe2   : > { %v15133_v16 = vpop.permute.xlu1 %2824  ;;  %v15135_v17 = vpop.permute.xlu0 %2822  ;;  %6034 = vmatprep.mubr.f32.mxu0 %v1415_v10 }
  0xe4   : > { %2940 = vrot.lane.b32.xlu1 %v379_v14, %s14778_s30  ;;  %2938 = vrot.lane.b32.xlu0 %v378_v15, %s14778_s30 }
  0xe6   : > { %v15141_v20 = vpop.permute.xlu1 %2828  ;;  %v15143_v21 = vpop.permute.xlu0 %2826 }
  0xe8   : > { %2944 = vrot.lane.b32.xlu1 %v381_v18, %s14778_s30  ;;  %2942 = vrot.lane.b32.xlu0 %v380_v19, %s14778_s30  ;;  %v400_v18 = vld [vmem:[%s14969_s6 + $0x2d0] sm:$0xff]  ;;  %v403_v19 = vld [vmem:[%s14969_s6 + $0x2e8] sm:$0xff] }
  0xea   : > { %v2833_v24 = vpop.permute.xlu1 %2832  ;;  %v15149_v25 = vpop.permute.xlu0 %2830 }
  0xec   : > { %2948 = vrot.lane.b32.xlu1 %v383_v22, %s14778_s30  ;;  %2946 = vrot.lane.b32.xlu0 %v382_v23, %s14778_s30 }
  0xee   : > { %v15155_v28 = vpop.permute.xlu1 %2836  ;;  %v15157_v29 = vpop.permute.xlu0 %2834 }
  0xf0   : > { %2952 = vrot.lane.b32.xlu1 %v385_v26, %s14778_s30  ;;  %2950 = vrot.lane.b32.xlu0 %v384_v27, %s14778_s30 }
  0xf2   : > { %v15163_v32 = vpop.permute.xlu1 %2840  ;;  %v15165_v33 = vpop.permute.xlu0 %2838 }
  0xf4   : > { %2956 = vrot.lane.b32.xlu1 %v387_v30, %s14778_s30  ;;  %2954 = vrot.lane.b32.xlu0 %v386_v31, %s14778_s30 }
  0xf6   : > { %v15171_v36 = vpop.permute.xlu1 %2844  ;;  %v15173_v37 = vpop.permute.xlu0 %2842 }
  0xf8   : > { %2960 = vrot.lane.b32.xlu1 %v389_v34, %s14778_s30  ;;  %2958 = vrot.lane.b32.xlu0 %v388_v35, %s14778_s30  ;;  %v408_v34 = vld [vmem:[%s14969_s6 + $0x310] sm:$0xff] }
  0xfa   : > { %v15179_v40 = vpop.permute.xlu1 %2848  ;;  %v15181_v41 = vpop.permute.xlu0 %2846 }
  0xfc   : > { %2964 = vrot.lane.b32.xlu1 %v391_v38, %s14778_s30  ;;  %2962 = vrot.lane.b32.xlu0 %v390_v39, %s14778_s30  ;;  %v410_v38 = vld [vmem:[%s14969_s6 + $0x320] sm:$0xff] }
  0xfe   : > { %v2853_v44 = vpop.permute.xlu1 %2852  ;;  %v2851_v45 = vpop.permute.xlu0 %2850 }
 0x100   : > { %2968 = vrot.lane.b32.xlu1 %v393_v42, %s14778_s30  ;;  %2966 = vrot.lane.b32.xlu0 %v392_v43, %s14778_s30  ;;  %v418_v42 = vld [vmem:[%s14969_s6 + $0x360] sm:$0xff]  ;;  %v421_v43 = vld [vmem:[%s14969_s6 + $0x378] sm:$0xff] }
 0x102   : > { %v2857_v48 = vpop.permute.xlu1 %2856  ;;  %v2855_v49 = vpop.permute.xlu0 %2854 }
 0x104   : > { %2972 = vrot.lane.b32.xlu1 %v395_v46, %s14778_s30  ;;  %2970 = vrot.lane.b32.xlu0 %v394_v47, %s14778_s30  ;;  %v420_v46 = vld [vmem:[%s14969_s6 + $0x370] sm:$0xff]  ;;  %v423_v47 = vld [vmem:[%s14969_s6 + $0x388] sm:$0xff] }
 0x106   : > { %v2861_v57 = vpop.permute.xlu1 %2860  ;;  %v2859_v58 = vpop.permute.xlu0 %2858 }
 0x108   : > { %2976 = vrot.lane.b32.xlu1 %v397_v55, %s14778_s30  ;;  %2974 = vrot.lane.b32.xlu0 %v396_v56, %s14778_s30  ;;  %v427_v55 = vld [vmem:[%s14969_s6 + $0x3a8] sm:$0xff] }
 0x10a   : > { %v2865_v3 = vpop.permute.xlu1 %2864  ;;  %v2863_v6 = vpop.permute.xlu0 %2862 }
 0x10b   : > { %11107 = vmatprep.subr.mxu0 %v2865_v3 }
 0x10c   : > { %2980 = vrot.lane.b32.xlu1 %v399_v2, %s14778_s30  ;;  %11108 = vmatpush3.msra.mxu0 %v2833_v24  ;;  %v402_v24 = vld [vmem:[%s14969_s6 + $0x2e0] sm:$0xff] }
 0x10d   : > { %2978 = vrot.lane.b32.xlu0 %v398_v7, %s14778_s30  ;;  %11109 = vmatprep.subr.mxu0 %v2863_v6  ;;  %v428_v6 = vld [vmem:[%s14969_s6 + $0x3b0] sm:$0xff]  ;;  %v1400_v7 = vcombine.high %v15198_v62, %v15198_v62  ;;  %v433_v62 = vld [vmem:[%s14969_s6 + $0x3d8] sm:$0xff] }
 0x10e   : > { %v15213_v14 = vpop.permute.xlu1 %2868  ;;  %11110 = vmatpush3.msra.mxu0 %v15149_v25  ;;  %v15216_v15 = vpop.permute.xlu0 %2866 }
 0x10f   : > { %11111 = vmatprep.subr.mxu0 %v2861_v57  ;;  %v15342_v10 = vrot.slane %v1400_v7, %v15195_v59  ;;  %v461_v7 = vld [vmem:[%s14969_s6 + $0x4b8] sm:$0xff] }
 0x110   : > { %2984 = vrot.lane.b32.xlu1 %v401_v11, %s14778_s30  ;;  %11112 = vmatpush3.msra.mxu0 %v15141_v20  ;;  %v405_v20 = vld [vmem:[%s14969_s6 + $0x2f8] sm:$0xff]  ;;  %v431_v11 = vld [vmem:[%s14969_s6 + $0x3c8] sm:$0xff] }
 0x111   : > { %2982 = vrot.lane.b32.xlu0 %v400_v18, %s14778_s30  ;;  %11113 = vmatprep.subr.mxu0 %v2859_v58  ;;  %v426_v58 = vld [vmem:[%s14969_s6 + $0x3a0] sm:$0xff] }
 0x112   : > { %v15223_v22 = vpop.permute.xlu1 %2872  ;;  %11114 = vmatpush3.msra.mxu0 %v15143_v21  ;;  %v15226_v23 = vpop.permute.xlu0 %2870  ;;  %v404_v21 = vld [vmem:[%s14969_s6 + $0x2f0] sm:$0xff] }
 0x113   : > { %11115 = vmatprep.subr.mxu0 %v2857_v48 }
 0x114   : > { %2988 = vrot.lane.b32.xlu1 %v403_v19, %s14778_s30  ;;  %11116 = vmatpush3.msra.mxu0 %v15133_v16  ;;  %v407_v16 = vld [vmem:[%s14969_s6 + $0x308] sm:$0xff] }
 0x115   : > { %2986 = vrot.lane.b32.xlu0 %v402_v24, %s14778_s30  ;;  %11117 = vmatprep.subr.mxu0 %v2855_v49  ;;  %v430_v24 = vld [vmem:[%s14969_s6 + $0x3c0] sm:$0xff] }
 0x116   : > { %v15233_v25 = vpop.permute.xlu1 %2876  ;;  %11118 = vmatpush3.msra.mxu0 %v15135_v17  ;;  %v15236_v26 = vpop.permute.xlu0 %2874  ;;  %v406_v17 = vld [vmem:[%s14969_s6 + $0x300] sm:$0xff] }
 0x117   : > { %11119 = vmatprep.subr.mxu0 %v2853_v44 }
 0x118   : > { %2992 = vrot.lane.b32.xlu1 %v405_v20, %s14778_s30  ;;  %11120 = vmatpush3.msra.mxu0 %v15125_v12  ;;  %v409_v12 = vld [vmem:[%s14969_s6 + $0x318] sm:$0xff]  ;;  %v1416_v20 = vcombine.high %v15342_v10, %v15342_v10 }
 0x119   : > { %2990 = vrot.lane.b32.xlu0 %v404_v21, %s14778_s30  ;;  %11121 = vmatprep.subr.mxu0 %v2851_v45 }
 0x11a   : > { %v15243_v27 = vpop.permute.xlu1 %2880  ;;  %11122 = vmatpush3.msra.mxu0 %v15127_v13  ;;  %v15246_v30 = vpop.permute.xlu0 %2878  ;;  %6104 = vmatprep.mubr.f32.mxu1 %v1416_v20  ;;  %v463_v20 = vld [vmem:[%s14969_s6 + $0x4c8] sm:$0xff] }
 0x11b   : > { %11123 = vmatprep.subr.mxu0 %v15179_v40 }
 0x11c   : > { %2996 = vrot.lane.b32.xlu1 %v407_v16, %s14778_s30  ;;  %11124 = vmatpush3.msra.mxu0 %v15117_v8  ;;  %v411_v8 = vld [vmem:[%s14969_s6 + $0x328] sm:$0xff] }
 0x11d   : > { %2994 = vrot.lane.b32.xlu0 %v406_v17, %s14778_s30  ;;  %11125 = vmatprep.subr.mxu0 %v15181_v41  ;;  %v432_v17 = vld [vmem:[%s14969_s6 + $0x3d0] sm:$0xff] }
 0x11e   : > { %v15255_v31 = vpop.permute.xlu1 %2884  ;;  %11126 = vmatpush3.msra.mxu0 %v15119_v9  ;;  %v15258_v13 = vpop.permute.xlu0 %2882 }
 0x11f   : > { %11127 = vmatprep.subr.mxu0 %v15171_v36 }
 0x120   : > { %3000 = vrot.lane.b32.xlu1 %v409_v12, %s14778_s30  ;;  %11128 = vmatpush3.msra.mxu0 %v15109_v4  ;;  %v413_v4 = vld [vmem:[%s14969_s6 + $0x338] sm:$0xff]  ;;  %v435_v12 = vld [vmem:[%s14969_s6 + $0x3e8] sm:$0xff] }
 0x121   : > { %2998 = vrot.lane.b32.xlu0 %v408_v34, %s14778_s30  ;;  %11129 = vmatprep.subr.mxu0 %v15173_v37  ;;  %v412_v37 = vld [vmem:[%s14969_s6 + $0x330] sm:$0xff] }
 0x122   : > { %v15267_v35 = vpop.permute.xlu1 %2888  ;;  %11130 = vmatpush3.msra.mxu0 %v15111_v5  ;;  %v15270_v9 = vpop.permute.xlu0 %2886 }
 0x123   : > { %11131 = vmatprep.subr.mxu0 %v15163_v32 }
 0x124   : > { %3004 = vrot.lane.b32.xlu1 %v411_v8, %s14778_s30  ;;  %11132 = vmatpush3.msra.mxu0 %v15101_v0  ;;  %v415_v0 = vld [vmem:[%s14969_s6 + $0x348] sm:$0xff] }
 0x125   : > { %3002 = vrot.lane.b32.xlu0 %v410_v38, %s14778_s30  ;;  %11133 = vmatprep.subr.mxu0 %v15165_v33  ;;  %v414_v33 = vld [vmem:[%s14969_s6 + $0x340] sm:$0xff] }
 0x126   : > { %v15279_v36 = vpop.permute.xlu1 %2892  ;;  %11134 = vmatpush3.msra.mxu0 %v15093_v60  ;;  %v15282_v5 = vpop.permute.xlu0 %2890  ;;  %v434_v38 = vld [vmem:[%s14969_s6 + $0x3e0] sm:$0xff] }
 0x127   : > { %11135 = vmatprep.subr.mxu0 %v15155_v28 }
 0x128   : > { %3008 = vrot.lane.b32.xlu1 %v413_v4, %s14778_s30  ;;  %11136 = vmatpush3.msra.mxu0 %v15103_v1  ;;  %v417_v1 = vld [vmem:[%s14969_s6 + $0x358] sm:$0xff] }
 0x129   : > { %3006 = vrot.lane.b32.xlu0 %v412_v37, %s14778_s30  ;;  %11137 = vmatprep.subr.mxu0 %v15157_v29  ;;  %v416_v29 = vld [vmem:[%s14969_s6 + $0x350] sm:$0xff]  ;;  %v437_v4 = vld [vmem:[%s14969_s6 + $0x3f8] sm:$0xff] }
 0x12a   : > { %v2897_v32 = vpop.permute.xlu1 %2896  ;;  %11138 = vmatpush3.msra.mxu0 %v15095_v61  ;;  %v2895_v60 = vpop.permute.xlu0 %2894  ;;  %v419_v61 = vld [vmem:[%s14969_s6 + $0x368] sm:$0xff] }
 0x12b   : > { %6035 = vmatmul.mubr.f32.vlgmr.msra.gmra.mxu0 %v15204_v63  ;;  %v429_v63 = vld [vmem:[%s14969_s6 + $0x3b8] sm:$0xff] }
 0x12c   : > { %3012 = vrot.lane.b32.xlu1 %v415_v0, %s14778_s30 }
 0x12d   : > { %3010 = vrot.lane.b32.xlu0 %v414_v33, %s14778_s30  ;;  %v440_v33 = vld [vmem:[%s14969_s6 + $0x410] sm:$0xff] }
 0x12e   : > { %v15297_v28 = vpop.permute.xlu1 %2900  ;;  %v15299_v39 = vpop.permute.xlu0 %2898 }
 0x130   : > { %3016 = vrot.lane.b32.xlu1 %v417_v1, %s14778_s30 }
 0x131   : > { %3014 = vrot.lane.b32.xlu0 %v416_v29, %s14778_s30  ;;  %v442_v29 = vld [vmem:[%s14969_s6 + $0x420] sm:$0xff] }
 0x132   : > { %v15305_v40 = vpop.permute.xlu1 %2904  ;;  %v15307_v41 = vpop.permute.xlu0 %2902 }
 0x134   : > { %3020 = vrot.lane.b32.xlu1 %v419_v61, %s14778_s30 }
 0x135   : > { %3018 = vrot.lane.b32.xlu0 %v418_v42, %s14778_s30  ;;  %v444_v42 = vld [vmem:[%s14969_s6 + $0x430] sm:$0xff] }
 0x136   : > { %v15313_v44 = vpop.permute.xlu1 %2908  ;;  %v15315_v45 = vpop.permute.xlu0 %2906 }
 0x138   : > { %3024 = vrot.lane.b32.xlu1 %v421_v43, %s14778_s30 }
 0x139   : > { %3022 = vrot.lane.b32.xlu0 %v420_v46, %s14778_s30  ;;  %v450_v46 = vld [vmem:[%s14969_s6 + $0x460] sm:$0xff] }
 0x13a   : > { %v15321_v48 = vpop.permute.xlu1 %2912  ;;  %v15323_v49 = vpop.permute.xlu0 %2910 }
 0x13c   : > { %3028 = vrot.lane.b32.xlu1 %v423_v47, %s14778_s30  ;;  %v453_v47 = vld [vmem:[%s14969_s6 + $0x478] sm:$0xff] }
 0x13d   : > { %3026 = vrot.lane.b32.xlu0 %v422_v50, %s14778_s30  ;;  %v452_v50 = vld [vmem:[%s14969_s6 + $0x470] sm:$0xff] }
 0x13e   : > { %v2917_v52 = vpop.permute.xlu1 %2916  ;;  %v2915_v53 = vpop.permute.xlu0 %2914 }
 0x140   : > { %3032 = vrot.lane.b32.xlu1 %v425_v51, %s14778_s30  ;;  %v455_v51 = vld [vmem:[%s14969_s6 + $0x488] sm:$0xff] }
 0x141   : > { %3030 = vrot.lane.b32.xlu0 %v424_v54, %s14778_s30  ;;  %v454_v54 = vld [vmem:[%s14969_s6 + $0x480] sm:$0xff] }
 0x142   : > { %v2921_v56 = vpop.permute.xlu1 %2920  ;;  %v2919_v57 = vpop.permute.xlu0 %2918 }
 0x144   : > { %3036 = vrot.lane.b32.xlu1 %v427_v55, %s14778_s30  ;;  %v457_v55 = vld [vmem:[%s14969_s6 + $0x498] sm:$0xff] }
 0x145   : > { %3034 = vrot.lane.b32.xlu0 %v426_v58, %s14778_s30 }
 0x146   : > { %v2925_v2 = vpop.permute.xlu1 %2924  ;;  %v2923_v3 = vpop.permute.xlu0 %2922 }
 0x148   : > { %3040 = vrot.lane.b32.xlu1 %v429_v63, %s14778_s30  ;;  %v459_v63 = vld [vmem:[%s14969_s6 + $0x4a8] sm:$0xff] }
 0x149   : > { %3038 = vrot.lane.b32.xlu0 %v428_v6, %s14778_s30 }
 0x14a   : > { %v2929_v18 = vpop.permute.xlu1 %2928  ;;  %v2927_v19 = vpop.permute.xlu0 %2926 }
 0x14b   : > { %11142 = vmatprep.subr.mxu1 %v2929_v18 }
 0x14c   : > { %3044 = vrot.lane.b32.xlu1 %v431_v11, %s14778_s30  ;;  %11143 = vmatpush3.msra.mxu1 %v2897_v32  ;;  %v460_v11 = vld [vmem:[%s14969_s6 + $0x4b0] sm:$0xff] }
 0x14d   : > { %3042 = vrot.lane.b32.xlu0 %v430_v24, %s14778_s30  ;;  %11144 = vmatprep.subr.mxu1 %v2927_v19  ;;  %v15477_v19 = vld [vmem:[%s14963_s25 + $0x8] sm:$0xff] }
 0x14e   : > { %v15352_v21 = vpop.permute.xlu1 %2932  ;;  %11145 = vmatpush3.msra.mxu1 %v2895_v60  ;;  %v15354_v16 = vpop.permute.xlu0 %2930  ;;  %v15482_v24 = vrot.slane %v15477_v19, %v15195_v59 }
 0x14f   : > { %11146 = vmatprep.subr.mxu1 %v2925_v2 }
 0x150   : > { %3048 = vrot.lane.b32.xlu1 %v433_v62, %s14778_s30  ;;  %11147 = vmatpush3.msra.mxu1 %v15279_v36 }
 0x151   : > { %3046 = vrot.lane.b32.xlu0 %v432_v17, %s14778_s30  ;;  %11148 = vmatprep.subr.mxu1 %v2923_v3  ;;  %v458_v3 = vld [vmem:[%s14969_s6 + $0x4a0] sm:$0xff] }
 0x152   : > { %v15361_v34 = vpop.permute.xlu1 %2936  ;;  %11149 = vmatpush3.msra.mxu1 %v15282_v5  ;;  %v15364_v8 = vpop.permute.xlu0 %2934  ;;  %v436_v5 = vld [vmem:[%s14969_s6 + $0x3f0] sm:$0xff]  ;;  %v462_v17 = vld [vmem:[%s14969_s6 + $0x4c0] sm:$0xff] }
 0x153   : > { %11150 = vmatprep.subr.mxu1 %v2921_v56 }
 0x154   : > { %3052 = vrot.lane.b32.xlu1 %v435_v12, %s14778_s30  ;;  %11151 = vmatpush3.msra.mxu1 %v15267_v35  ;;  %v439_v35 = vld [vmem:[%s14969_s6 + $0x408] sm:$0xff]  ;;  %v1432_v12 = vcombine.high %v15482_v24, %v15482_v24 }
 0x155   : > { %3050 = vrot.lane.b32.xlu0 %v434_v38, %s14778_s30  ;;  %11152 = vmatprep.subr.mxu1 %v2919_v57  ;;  %v456_v57 = vld [vmem:[%s14969_s6 + $0x490] sm:$0xff] }
 0x156   : > { %v15371_v36 = vpop.permute.xlu1 %2940  ;;  %11153 = vmatpush3.msra.mxu1 %v15270_v9  ;;  %v15374_v37 = vpop.permute.xlu0 %2938  ;;  %v438_v9 = vld [vmem:[%s14969_s6 + $0x400] sm:$0xff]  ;;  %6174 = vmatprep.mubr.f32.mxu0 %v1432_v12 }
 0x157   : > { %11154 = vmatprep.subr.mxu1 %v2917_v52 }
 0x158   : > { %3056 = vrot.lane.b32.xlu1 %v437_v4, %s14778_s30  ;;  %11155 = vmatpush3.msra.mxu1 %v15255_v31  ;;  %v441_v31 = vld [vmem:[%s14969_s6 + $0x418] sm:$0xff] }
 0x159   : > { %3054 = vrot.lane.b32.xlu0 %v436_v5, %s14778_s30  ;;  %11156 = vmatprep.subr.mxu1 %v2915_v53  ;;  %v465_v4 = vld [vmem:[%s14969_s6 + $0x4d8] sm:$0xff] }
 0x15a   : > { %v15381_v0 = vpop.permute.xlu1 %2944  ;;  %11157 = vmatpush3.msra.mxu1 %v15258_v13  ;;  %v15384_v32 = vpop.permute.xlu0 %2942 }
 0x15b   : > { %11158 = vmatprep.subr.mxu1 %v15321_v48 }
 0x15c   : > { %3060 = vrot.lane.b32.xlu1 %v439_v35, %s14778_s30  ;;  %11159 = vmatpush3.msra.mxu1 %v15243_v27  ;;  %v443_v27 = vld [vmem:[%s14969_s6 + $0x428] sm:$0xff]  ;;  %v464_v35 = vld [vmem:[%s14969_s6 + $0x4d0] sm:$0xff] }
 0x15d   : > { %3058 = vrot.lane.b32.xlu0 %v438_v9, %s14778_s30  ;;  %11160 = vmatprep.subr.mxu1 %v15323_v49 }
 0x15e   : > { %v15393_v60 = vpop.permute.xlu1 %2948  ;;  %11161 = vmatpush3.msra.mxu1 %v15246_v30  ;;  %v15396_v13 = vpop.permute.xlu0 %2946 }
 0x15f   : > { %11162 = vmatprep.subr.mxu1 %v15313_v44 }
 0x160   : > { %3064 = vrot.lane.b32.xlu1 %v441_v31, %s14778_s30  ;;  %11163 = vmatpush3.msra.mxu1 %v15233_v25  ;;  %v445_v25 = vld [vmem:[%s14969_s6 + $0x438] sm:$0xff]  ;;  %v467_v31 = vld [vmem:[%s14969_s6 + $0x4e8] sm:$0xff] }
 0x161   : > { %3062 = vrot.lane.b32.xlu0 %v440_v33, %s14778_s30  ;;  %11164 = vmatprep.subr.mxu1 %v15315_v45 }
 0x162   : > { %v15405_v1 = vpop.permute.xlu1 %2952  ;;  %11165 = vmatpush3.msra.mxu1 %v15236_v26  ;;  %v15408_v30 = vpop.permute.xlu0 %2950 }
 0x163   : > { %11166 = vmatprep.subr.mxu1 %v15305_v40 }
 0x164   : > { %3068 = vrot.lane.b32.xlu1 %v443_v27, %s14778_s30  ;;  %11167 = vmatpush3.msra.mxu1 %v15223_v22  ;;  %v447_v22 = vld [vmem:[%s14969_s6 + $0x448] sm:$0xff]  ;;  %v466_v27 = vld [vmem:[%s14969_s6 + $0x4e0] sm:$0xff] }
 0x165   : > { %3066 = vrot.lane.b32.xlu0 %v442_v29, %s14778_s30  ;;  %11168 = vmatprep.subr.mxu1 %v15307_v41  ;;  %v446_v41 = vld [vmem:[%s14969_s6 + $0x440] sm:$0xff] }
 0x166   : > { %v15417_v61 = vpop.permute.xlu1 %2956  ;;  %11169 = vmatpush3.msra.mxu1 %v15226_v23  ;;  %v15420_v26 = vpop.permute.xlu0 %2954 }
 0x167   : > { %11170 = vmatprep.subr.mxu1 %v15297_v28 }
 0x168   : > { %3072 = vrot.lane.b32.xlu1 %v445_v25, %s14778_s30  ;;  %11171 = vmatpush3.msra.mxu1 %v15213_v14  ;;  %v449_v14 = vld [vmem:[%s14969_s6 + $0x458] sm:$0xff] }
 0x169   : > { %3070 = vrot.lane.b32.xlu0 %v444_v42, %s14778_s30  ;;  %11172 = vmatprep.subr.mxu1 %v15299_v39  ;;  %v448_v39 = vld [vmem:[%s14969_s6 + $0x450] sm:$0xff]  ;;  %v469_v25 = vld [vmem:[%s14969_s6 + $0x4f8] sm:$0xff] }
 0x16a   : > { %v2961_v40 = vpop.permute.xlu1 %2960  ;;  %11173 = vmatpush3.msra.mxu1 %v15216_v15  ;;  %v2959_v23 = vpop.permute.xlu0 %2958  ;;  %v451_v15 = vld [vmem:[%s14969_s6 + $0x468] sm:$0xff]  ;;  %v468_v42 = vld [vmem:[%s14969_s6 + $0x4f0] sm:$0xff] }
 0x16b   : > { %6105 = vmatmul.mubr.f32.vlgmr.msra.gmra.mxu1 %v15342_v10 }
 0x16c   : > { %3076 = vrot.lane.b32.xlu1 %v447_v22, %s14778_s30 }
 0x16d   : > { %3074 = vrot.lane.b32.xlu0 %v446_v41, %s14778_s30 }
 0x16e   : > { %v15435_v28 = vpop.permute.xlu1 %2964  ;;  %v15437_v43 = vpop.permute.xlu0 %2962 }
 0x170   : > { %3080 = vrot.lane.b32.xlu1 %v449_v14, %s14778_s30 }
 0x171   : > { %3078 = vrot.lane.b32.xlu0 %v448_v39, %s14778_s30 }
 0x172   : > { %v15443_v44 = vpop.permute.xlu1 %2968  ;;  %v15445_v45 = vpop.permute.xlu0 %2966 }
 0x174   : > { %3084 = vrot.lane.b32.xlu1 %v451_v15, %s14778_s30 }
 0x175   : > { %3082 = vrot.lane.b32.xlu0 %v450_v46, %s14778_s30 }
 0x176   : > { %v15451_v48 = vpop.permute.xlu1 %2972  ;;  %v15453_v49 = vpop.permute.xlu0 %2970 }
 0x178   : > { %3088 = vrot.lane.b32.xlu1 %v453_v47, %s14778_s30  ;;  %v480_v47 = vld [vmem:[%s14969_s6 + $0x550] sm:$0xff] }
 0x179   : > { %3086 = vrot.lane.b32.xlu0 %v452_v50, %s14778_s30 }
 0x17a   : > { %v15459_v52 = vpop.permute.xlu1 %2976  ;;  %v15461_v53 = vpop.permute.xlu0 %2974 }
 0x17c   : > { %3092 = vrot.lane.b32.xlu1 %v455_v51, %s14778_s30  ;;  %v485_v51 = vld [vmem:[%s14969_s6 + $0x578] sm:$0xff] }
 0x17d   : > { %3090 = vrot.lane.b32.xlu0 %v454_v54, %s14778_s30 }
 0x17e   : > { %v2981_v56 = vpop.permute.xlu1 %2980 }
 0x17f   : > { %v2979_v58 = vpop.permute.xlu0 %2978 }
 0x180   : > { %3096 = vrot.lane.b32.xlu1 %v457_v55, %s14778_s30  ;;  %v487_v55 = vld [vmem:[%s14969_s6 + $0x588] sm:$0xff] }
 0x181   : > { %3094 = vrot.lane.b32.xlu0 %v456_v57, %s14778_s30  ;;  %v486_v57 = vld [vmem:[%s14969_s6 + $0x580] sm:$0xff] }
 0x182   : > { %v2985_v2 = vpop.permute.xlu1 %2984 }
 0x183   : > { %v2983_v6 = vpop.permute.xlu0 %2982 }
 0x184   : > { %3100 = vrot.lane.b32.xlu1 %v459_v63, %s14778_s30  ;;  %v489_v63 = vld [vmem:[%s14969_s6 + $0x598] sm:$0xff] }
 0x185   : > { %3098 = vrot.lane.b32.xlu0 %v458_v3, %s14778_s30  ;;  %v488_v3 = vld [vmem:[%s14969_s6 + $0x590] sm:$0xff] }
 0x186   : > { %v2989_v10 = vpop.permute.xlu1 %2988 }
 0x187   : > { %v2987_v18 = vpop.permute.xlu0 %2986 }
 0x188   : > { %3104 = vrot.lane.b32.xlu1 %v461_v7, %s14778_s30  ;;  %v491_v7 = vld [vmem:[%s14969_s6 + $0x5a8] sm:$0xff] }
 0x189   : > { %3102 = vrot.lane.b32.xlu0 %v460_v11, %s14778_s30  ;;  %v490_v11 = vld [vmem:[%s14969_s6 + $0x5a0] sm:$0xff] }
 0x18a   : > { %v2993_v62 = vpop.permute.xlu1 %2992 }
 0x18b   : > { %v2991_v38 = vpop.permute.xlu0 %2990  ;;  %11177 = vmatprep.subr.mxu0 %v2993_v62  ;;  %v492_v62 = vld [vmem:[%s14969_s6 + $0x5b0] sm:$0xff] }
 0x18c   : > { %3108 = vrot.lane.b32.xlu1 %v463_v20, %s14778_s30  ;;  %11178 = vmatpush3.msra.mxu0 %v2961_v40  ;;  %v470_v40 = vld [vmem:[%s14969_s6 + $0x500] sm:$0xff] }
 0x18d   : > { %3106 = vrot.lane.b32.xlu0 %v462_v17, %s14778_s30  ;;  %11179 = vmatprep.subr.mxu0 %v2991_v38  ;;  %v1417_v17 = vcombine.high %v15477_v19, %v15477_v19  ;;  %v497_v19 = vld [vmem:[%s14969_s6 + $0x5d8] sm:$0xff] }
 0x18e   : > { %v15492_v5 = vpop.permute.xlu1 %2996  ;;  %11180 = vmatpush3.msra.mxu0 %v2959_v23 }
 0x18f   : > { %v15495_v9 = vpop.permute.xlu0 %2994  ;;  %11181 = vmatprep.subr.mxu0 %v2989_v10  ;;  %v15620_v38 = vrot.slane %v1417_v17, %v15195_v59 }
 0x190   : > { %3112 = vrot.lane.b32.xlu1 %v465_v4, %s14778_s30  ;;  %11182 = vmatpush3.msra.mxu0 %v15417_v61  ;;  %v495_v4 = vld [vmem:[%s14969_s6 + $0x5c8] sm:$0xff] }
 0x191   : > { %3110 = vrot.lane.b32.xlu0 %v464_v35, %s14778_s30  ;;  %11183 = vmatprep.subr.mxu0 %v2987_v18 }
 0x192   : > { %v15501_v33 = vpop.permute.xlu1 %3000  ;;  %11184 = vmatpush3.msra.mxu0 %v15420_v26 }
 0x193   : > { %v15505_v29 = vpop.permute.xlu0 %2998  ;;  %11185 = vmatprep.subr.mxu0 %v2985_v2 }
 0x194   : > { %3116 = vrot.lane.b32.xlu1 %v467_v31, %s14778_s30  ;;  %11186 = vmatpush3.msra.mxu0 %v15405_v1  ;;  %v471_v1 = vld [vmem:[%s14969_s6 + $0x508] sm:$0xff]  ;;  %v494_v31 = vld [vmem:[%s14969_s6 + $0x5c0] sm:$0xff] }
 0x195   : > { %3114 = vrot.lane.b32.xlu0 %v466_v27, %s14778_s30  ;;  %11187 = vmatprep.subr.mxu0 %v2983_v6  ;;  %v1433_v27 = vcombine.high %v15620_v38, %v15620_v38 }
 0x196   : > { %v15511_v61 = vpop.permute.xlu1 %3004  ;;  %11188 = vmatpush3.msra.mxu0 %v15408_v30 }
 0x197   : > { %v15515_v26 = vpop.permute.xlu0 %3002  ;;  %11189 = vmatprep.subr.mxu0 %v2981_v56  ;;  %6244 = vmatprep.mubr.f32.mxu1 %v1433_v27 }
 0x198   : > { %3120 = vrot.lane.b32.xlu1 %v469_v25, %s14778_s30  ;;  %11190 = vmatpush3.msra.mxu0 %v15393_v60  ;;  %v473_v60 = vld [vmem:[%s14969_s6 + $0x518] sm:$0xff] }
 0x199   : > { %3118 = vrot.lane.b32.xlu0 %v468_v42, %s14778_s30  ;;  %11191 = vmatprep.subr.mxu0 %v2979_v58 }
 0x19a   : > { %v15521_v22 = vpop.permute.xlu1 %3008  ;;  %11192 = vmatpush3.msra.mxu0 %v15396_v13  ;;  %v472_v13 = vld [vmem:[%s14969_s6 + $0x510] sm:$0xff] }
 0x19b   : > { %v15525_v30 = vpop.permute.xlu0 %3006  ;;  %11193 = vmatprep.subr.mxu0 %v15459_v52 }
 0x19c   : > { %3124 = vrot.lane.b32.xlu1 %v471_v1, %s14778_s30  ;;  %11194 = vmatpush3.msra.mxu0 %v15381_v0  ;;  %v475_v0 = vld [vmem:[%s14969_s6 + $0x528] sm:$0xff]  ;;  %v496_v1 = vld [vmem:[%s14969_s6 + $0x5d0] sm:$0xff] }
 0x19d   : > { %3122 = vrot.lane.b32.xlu0 %v470_v40, %s14778_s30  ;;  %11195 = vmatprep.subr.mxu0 %v15461_v53  ;;  %v484_v53 = vld [vmem:[%s14969_s6 + $0x570] sm:$0xff] }
 0x19e   : > { %v15533_v23 = vpop.permute.xlu1 %3012  ;;  %11196 = vmatpush3.msra.mxu0 %v15384_v32  ;;  %v474_v32 = vld [vmem:[%s14969_s6 + $0x520] sm:$0xff] }
 0x19f   : > { %v15537_v41 = vpop.permute.xlu0 %3010  ;;  %11197 = vmatprep.subr.mxu0 %v15451_v48 }
 0x1a0   : > { %3128 = vrot.lane.b32.xlu1 %v473_v60, %s14778_s30  ;;  %11198 = vmatpush3.msra.mxu0 %v15371_v36  ;;  %v477_v36 = vld [vmem:[%s14969_s6 + $0x538] sm:$0xff]  ;;  %v499_v60 = vld [vmem:[%s14969_s6 + $0x5e8] sm:$0xff] }
 0x1a1   : > { %3126 = vrot.lane.b32.xlu0 %v472_v13, %s14778_s30  ;;  %11199 = vmatprep.subr.mxu0 %v15453_v49  ;;  %v482_v49 = vld [vmem:[%s14969_s6 + $0x560] sm:$0xff] }
 0x1a2   : > { %v15545_v14 = vpop.permute.xlu1 %3016  ;;  %11200 = vmatpush3.msra.mxu0 %v15374_v37  ;;  %v476_v37 = vld [vmem:[%s14969_s6 + $0x530] sm:$0xff] }
 0x1a3   : > { %v15549_v39 = vpop.permute.xlu0 %3014  ;;  %11201 = vmatprep.subr.mxu0 %v15443_v44 }
 0x1a4   : > { %3132 = vrot.lane.b32.xlu1 %v475_v0, %s14778_s30  ;;  %11202 = vmatpush3.msra.mxu0 %v15361_v34  ;;  %v479_v34 = vld [vmem:[%s14969_s6 + $0x548] sm:$0xff]  ;;  %v498_v0 = vld [vmem:[%s14969_s6 + $0x5e0] sm:$0xff] }
 0x1a5   : > { %3130 = vrot.lane.b32.xlu0 %v474_v32, %s14778_s30  ;;  %11203 = vmatprep.subr.mxu0 %v15445_v45 }
 0x1a6   : > { %v15557_v15 = vpop.permute.xlu1 %3020  ;;  %11204 = vmatpush3.msra.mxu0 %v15364_v8  ;;  %v478_v8 = vld [vmem:[%s14969_s6 + $0x540] sm:$0xff] }
 0x1a7   : > { %v15561_v46 = vpop.permute.xlu0 %3018  ;;  %11205 = vmatprep.subr.mxu0 %v15435_v28 }
 0x1a8   : > { %3136 = vrot.lane.b32.xlu1 %v477_v36, %s14778_s30  ;;  %11206 = vmatpush3.msra.mxu0 %v15352_v21  ;;  %v481_v21 = vld [vmem:[%s14969_s6 + $0x558] sm:$0xff] }
 0x1a9   : > { %3134 = vrot.lane.b32.xlu0 %v476_v37, %s14778_s30  ;;  %11207 = vmatprep.subr.mxu0 %v15437_v43  ;;  %v501_v36 = vld [vmem:[%s14969_s6 + $0x5f8] sm:$0xff]  ;;  %v500_v37 = vld [vmem:[%s14969_s6 + $0x5f0] sm:$0xff] }
 0x1aa   : > { %v3025_v44 = vpop.permute.xlu1 %3024  ;;  %11208 = vmatpush3.msra.mxu0 %v15354_v16  ;;  %v483_v16 = vld [vmem:[%s14969_s6 + $0x568] sm:$0xff] }
 0x1ab   : > { %v3023_v45 = vpop.permute.xlu0 %3022  ;;  %6175 = vmatmul.mubr.f32.vlgmr.msra.gmra.mxu0 %v15482_v24  ;;  %v493_v24 = vld [vmem:[%s14969_s6 + $0x5b8] sm:$0xff] }
 0x1ac   : > { %3140 = vrot.lane.b32.xlu1 %v479_v34, %s14778_s30 }
 0x1ad   : > { %3138 = vrot.lane.b32.xlu0 %v478_v8, %s14778_s30 }
 0x1ae   : > { %v15575_v28 = vpop.permute.xlu1 %3028 }
 0x1af   : > { %v15578_v43 = vpop.permute.xlu0 %3026 }
 0x1b0   : > { %3144 = vrot.lane.b32.xlu1 %v481_v21, %s14778_s30 }
 0x1b1   : > { %3142 = vrot.lane.b32.xlu0 %v480_v47, %s14778_s30 }
 0x1b2   : > { %v15583_v48 = vpop.permute.xlu1 %3032 }
 0x1b3   : > { %v15586_v50 = vpop.permute.xlu0 %3030 }
 0x1b4   : > { %3148 = vrot.lane.b32.xlu1 %v483_v16, %s14778_s30 }
 0x1b5   : > { %3146 = vrot.lane.b32.xlu0 %v482_v49, %s14778_s30 }
 0x1b6   : > { %v15591_v52 = vpop.permute.xlu1 %3036 }
 0x1b7   : > { %v15594_v54 = vpop.permute.xlu0 %3034 }
 0x1b8   : > { %3152 = vrot.lane.b32.xlu1 %v485_v51, %s14778_s30  ;;  %v512_v51 = vld [vmem:[%s14969_s6 + $0x650] sm:$0xff] }
 0x1b9   : > { %3150 = vrot.lane.b32.xlu0 %v484_v53, %s14778_s30  ;;  %v514_v53 = vld [vmem:[%s14969_s6 + $0x660] sm:$0xff] }
 0x1ba   : > { %v15599_v56 = vpop.permute.xlu1 %3040 }
 0x1bb   : > { %v15602_v58 = vpop.permute.xlu0 %3038 }
 0x1bc   : > { %3156 = vrot.lane.b32.xlu1 %v487_v55, %s14778_s30  ;;  %v517_v55 = vld [vmem:[%s14969_s6 + $0x678] sm:$0xff] }
 0x1bd   : > { %3154 = vrot.lane.b32.xlu0 %v486_v57, %s14778_s30  ;;  %v516_v57 = vld [vmem:[%s14969_s6 + $0x670] sm:$0xff] }
 0x1be   : > { %v3045_v2 = vpop.permute.xlu1 %3044 }
 0x1bf   : > { %v3043_v6 = vpop.permute.xlu0 %3042 }
 0x1c0   : > { %3160 = vrot.lane.b32.xlu1 %v489_v63, %s14778_s30  ;;  %v519_v63 = vld [vmem:[%s14969_s6 + $0x688] sm:$0xff] }
 0x1c1   : > { %3158 = vrot.lane.b32.xlu0 %v488_v3, %s14778_s30  ;;  %v518_v3 = vld [vmem:[%s14969_s6 + $0x680] sm:$0xff] }
 0x1c2   : > { %v3049_v10 = vpop.permute.xlu1 %3048 }
 0x1c3   : > { %v3047_v18 = vpop.permute.xlu0 %3046 }
 0x1c4   : > { %3164 = vrot.lane.b32.xlu1 %v491_v7, %s14778_s30  ;;  %v521_v7 = vld [vmem:[%s14969_s6 + $0x698] sm:$0xff] }
 0x1c5   : > { %3162 = vrot.lane.b32.xlu0 %v490_v11, %s14778_s30  ;;  %v520_v11 = vld [vmem:[%s14969_s6 + $0x690] sm:$0xff] }
 0x1c6   : > { %v3053_v20 = vpop.permute.xlu1 %3052 }
 0x1c7   : > { %v3051_v12 = vpop.permute.xlu0 %3050 }
 0x1c8   : > { %3168 = vrot.lane.b32.xlu1 %v493_v24, %s14778_s30  ;;  %v523_v24 = vld [vmem:[%s14969_s6 + $0x6a8] sm:$0xff] }
 0x1c9   : > { %3166 = vrot.lane.b32.xlu0 %v492_v62, %s14778_s30  ;;  %v522_v62 = vld [vmem:[%s14969_s6 + $0x6a0] sm:$0xff] }
 0x1ca   : > { %v3057_v35 = vpop.permute.xlu1 %3056 }
 0x1cb   : > { %v3055_v25 = vpop.permute.xlu0 %3054  ;;  %11212 = vmatprep.subr.mxu1 %v3057_v35 }
 0x1cc   : > { %3172 = vrot.lane.b32.xlu1 %v495_v4, %s14778_s30  ;;  %11213 = vmatpush3.msra.mxu1 %v3025_v44  ;;  %v502_v44 = vld [vmem:[%s14969_s6 + $0x600] sm:$0xff]  ;;  %v524_v4 = vld [vmem:[%s14969_s6 + $0x6b0] sm:$0xff] }
 0x1cd   : > { %3170 = vrot.lane.b32.xlu0 %v494_v31, %s14778_s30  ;;  %11214 = vmatprep.subr.mxu1 %v3055_v25  ;;  %v15755_v31 = vld [vmem:[%s14963_s25 + $0x10] sm:$0xff] }
 0x1ce   : > { %v15630_v42 = vpop.permute.xlu1 %3060  ;;  %11215 = vmatpush3.msra.mxu1 %v3023_v45  ;;  %v15760_v27 = vrot.slane %v15755_v31, %v15195_v59  ;;  %v527_v25 = vld [vmem:[%s14969_s6 + $0x6c8] sm:$0xff] }
 0x1cf   : > { %v15633_v40 = vpop.permute.xlu0 %3058  ;;  %11216 = vmatprep.subr.mxu1 %v3053_v20 }
 0x1d0   : > { %3176 = vrot.lane.b32.xlu1 %v497_v19, %s14778_s30  ;;  %11217 = vmatpush3.msra.mxu1 %v15557_v15 }
 0x1d1   : > { %3174 = vrot.lane.b32.xlu0 %v496_v1, %s14778_s30  ;;  %11218 = vmatprep.subr.mxu1 %v3051_v12  ;;  %v525_v12 = vld [vmem:[%s14969_s6 + $0x6b8] sm:$0xff]  ;;  %v526_v1 = vld [vmem:[%s14969_s6 + $0x6c0] sm:$0xff] }
 0x1d2   : > { %v15639_v13 = vpop.permute.xlu1 %3064  ;;  %11219 = vmatpush3.msra.mxu1 %v15561_v46 }
 0x1d3   : > { %v15643_v32 = vpop.permute.xlu0 %3062  ;;  %11220 = vmatprep.subr.mxu1 %v3049_v10 }
 0x1d4   : > { %3180 = vrot.lane.b32.xlu1 %v499_v60, %s14778_s30  ;;  %11221 = vmatpush3.msra.mxu1 %v15545_v14  ;;  %v503_v14 = vld [vmem:[%s14969_s6 + $0x608] sm:$0xff]  ;;  %v1449_v60 = vcombine.high %v15760_v27, %v15760_v27 }
 0x1d5   : > { %3178 = vrot.lane.b32.xlu0 %v498_v0, %s14778_s30  ;;  %11222 = vmatprep.subr.mxu1 %v3047_v18 }
 0x1d6   : > { %v15649_v15 = vpop.permute.xlu1 %3068  ;;  %11223 = vmatpush3.msra.mxu1 %v15549_v39  ;;  %6314 = vmatprep.mubr.f32.mxu0 %v1449_v60 }
 0x1d7   : > { %v15653_v46 = vpop.permute.xlu0 %3066  ;;  %11224 = vmatprep.subr.mxu1 %v3045_v2 }
 0x1d8   : > { %3184 = vrot.lane.b32.xlu1 %v501_v36, %s14778_s30  ;;  %11225 = vmatpush3.msra.mxu1 %v15533_v23  ;;  %v505_v23 = vld [vmem:[%s14969_s6 + $0x618] sm:$0xff] }
 0x1d9   : > { %3182 = vrot.lane.b32.xlu0 %v500_v37, %s14778_s30  ;;  %11226 = vmatprep.subr.mxu1 %v3043_v6  ;;  %v529_v36 = vld [vmem:[%s14969_s6 + $0x6d8] sm:$0xff] }
 0x1da   : > { %v15659_v34 = vpop.permute.xlu1 %3072  ;;  %11227 = vmatpush3.msra.mxu1 %v15537_v41  ;;  %v504_v41 = vld [vmem:[%s14969_s6 + $0x610] sm:$0xff] }
 0x1db   : > { %v15663_v39 = vpop.permute.xlu0 %3070  ;;  %11228 = vmatprep.subr.mxu1 %v15599_v56 }
 0x1dc   : > { %3188 = vrot.lane.b32.xlu1 %v503_v14, %s14778_s30  ;;  %11229 = vmatpush3.msra.mxu1 %v15521_v22  ;;  %v507_v22 = vld [vmem:[%s14969_s6 + $0x628] sm:$0xff]  ;;  %v528_v14 = vld [vmem:[%s14969_s6 + $0x6d0] sm:$0xff] }
 0x1dd   : > { %3186 = vrot.lane.b32.xlu0 %v502_v44, %s14778_s30  ;;  %11230 = vmatprep.subr.mxu1 %v15602_v58 }
 0x1de   : > { %v15671_v8 = vpop.permute.xlu1 %3076  ;;  %11231 = vmatpush3.msra.mxu1 %v15525_v30  ;;  %v506_v30 = vld [vmem:[%s14969_s6 + $0x620] sm:$0xff] }
 0x1df   : > { %v15675_v45 = vpop.permute.xlu0 %3074  ;;  %11232 = vmatprep.subr.mxu1 %v15591_v52 }
 0x1e0   : > { %3192 = vrot.lane.b32.xlu1 %v505_v23, %s14778_s30  ;;  %11233 = vmatpush3.msra.mxu1 %v15511_v61  ;;  %v509_v61 = vld [vmem:[%s14969_s6 + $0x638] sm:$0xff]  ;;  %v531_v23 = vld [vmem:[%s14969_s6 + $0x6e8] sm:$0xff] }
 0x1e1   : > { %3190 = vrot.lane.b32.xlu0 %v504_v41, %s14778_s30  ;;  %11234 = vmatprep.subr.mxu1 %v15594_v54 }
 0x1e2   : > { %v15683_v21 = vpop.permute.xlu1 %3080  ;;  %11235 = vmatpush3.msra.mxu1 %v15515_v26  ;;  %v508_v26 = vld [vmem:[%s14969_s6 + $0x630] sm:$0xff] }
 0x1e3   : > { %v15687_v47 = vpop.permute.xlu0 %3078  ;;  %11236 = vmatprep.subr.mxu1 %v15583_v48 }
 0x1e4   : > { %3196 = vrot.lane.b32.xlu1 %v507_v22, %s14778_s30  ;;  %11237 = vmatpush3.msra.mxu1 %v15501_v33  ;;  %v511_v33 = vld [vmem:[%s14969_s6 + $0x648] sm:$0xff]  ;;  %v530_v22 = vld [vmem:[%s14969_s6 + $0x6e0] sm:$0xff] }
 0x1e5   : > { %3194 = vrot.lane.b32.xlu0 %v506_v30, %s14778_s30  ;;  %11238 = vmatprep.subr.mxu1 %v15586_v50 }
 0x1e6   : > { %v15695_v16 = vpop.permute.xlu1 %3084  ;;  %11239 = vmatpush3.msra.mxu1 %v15505_v29  ;;  %v510_v29 = vld [vmem:[%s14969_s6 + $0x640] sm:$0xff] }
 0x1e7   : > { %v15699_v49 = vpop.permute.xlu0 %3082  ;;  %11240 = vmatprep.subr.mxu1 %v15575_v28 }
 0x1e8   : > { %3200 = vrot.lane.b32.xlu1 %v509_v61, %s14778_s30  ;;  %11241 = vmatpush3.msra.mxu1 %v15492_v5  ;;  %v513_v5 = vld [vmem:[%s14969_s6 + $0x658] sm:$0xff] }
 0x1e9   : > { %3198 = vrot.lane.b32.xlu0 %v508_v26, %s14778_s30  ;;  %11242 = vmatprep.subr.mxu1 %v15578_v43  ;;  %v533_v61 = vld [vmem:[%s14969_s6 + $0x6f8] sm:$0xff]  ;;  %v532_v26 = vld [vmem:[%s14969_s6 + $0x6f0] sm:$0xff] }
 0x1ea   : > { %v3089_v48 = vpop.permute.xlu1 %3088  ;;  %11243 = vmatpush3.msra.mxu1 %v15495_v9  ;;  %v515_v9 = vld [vmem:[%s14969_s6 + $0x668] sm:$0xff] }
 0x1eb   : > { %v3087_v50 = vpop.permute.xlu0 %3086  ;;  %6245 = vmatmul.mubr.f32.vlgmr.msra.gmra.mxu1 %v15620_v38 }
 0x1ec   : > { %3204 = vrot.lane.b32.xlu1 %v511_v33, %s14778_s30 }
 0x1ed   : > { %3202 = vrot.lane.b32.xlu0 %v510_v29, %s14778_s30 }
 0x1ee   : > { %v15713_v28 = vpop.permute.xlu1 %3092 }
 0x1ef   : > { %v15716_v43 = vpop.permute.xlu0 %3090 }
 0x1f0   : > { %3208 = vrot.lane.b32.xlu1 %v513_v5, %s14778_s30 }
 0x1f1   : > { %3206 = vrot.lane.b32.xlu0 %v512_v51, %s14778_s30 }
 0x1f2   : > { %v15721_v52 = vpop.permute.xlu1 %3096 }
 0x1f3   : > { %v15724_v54 = vpop.permute.xlu0 %3094 }
 0x1f4   : > { %3212 = vrot.lane.b32.xlu1 %v515_v9, %s14778_s30 }
 0x1f5   : > { %3210 = vrot.lane.b32.xlu0 %v514_v53, %s14778_s30 }
 0x1f6   : > { %v15729_v56 = vpop.permute.xlu1 %3100 }
 0x1f7   : > { %v15732_v58 = vpop.permute.xlu0 %3098 }
 0x1f8   : > { %3216 = vrot.lane.b32.xlu1 %v517_v55, %s14778_s30  ;;  %v544_v55 = vld [vmem:[%s14969_s6 + $0x750] sm:$0xff] }
 0x1f9   : > { %3214 = vrot.lane.b32.xlu0 %v516_v57, %s14778_s30  ;;  %v546_v57 = vld [vmem:[%s14969_s6 + $0x760] sm:$0xff] }
 0x1fa   : > { %v15737_v2 = vpop.permute.xlu1 %3104 }
 0x1fb   : > { %v15740_v6 = vpop.permute.xlu0 %3102 }
 0x1fc   : > { %3220 = vrot.lane.b32.xlu1 %v519_v63, %s14778_s30  ;;  %v549_v63 = vld [vmem:[%s14969_s6 + $0x778] sm:$0xff] }
 0x1fd   : > { %3218 = vrot.lane.b32.xlu0 %v518_v3, %s14778_s30  ;;  %v548_v3 = vld [vmem:[%s14969_s6 + $0x770] sm:$0xff] }
 0x1fe   : > { %v3109_v10 = vpop.permute.xlu1 %3108 }
 0x1ff   : > { %v3107_v18 = vpop.permute.xlu0 %3106 }
 0x200   : > { %3224 = vrot.lane.b32.xlu1 %v521_v7, %s14778_s30  ;;  %v551_v7 = vld [vmem:[%s14969_s6 + $0x788] sm:$0xff] }
 0x201   : > { %3222 = vrot.lane.b32.xlu0 %v520_v11, %s14778_s30  ;;  %v550_v11 = vld [vmem:[%s14969_s6 + $0x780] sm:$0xff] }
 0x202   : > { %v3113_v20 = vpop.permute.xlu1 %3112 }
 0x203   : > { %v3111_v17 = vpop.permute.xlu0 %3110 }
 0x204   : > { %3228 = vrot.lane.b32.xlu1 %v523_v24, %s14778_s30  ;;  %v553_v24 = vld [vmem:[%s14969_s6 + $0x798] sm:$0xff] }
 0x205   : > { %3226 = vrot.lane.b32.xlu0 %v522_v62, %s14778_s30  ;;  %v552_v62 = vld [vmem:[%s14969_s6 + $0x790] sm:$0xff] }
 0x206   : > { %v3117_v38 = vpop.permute.xlu1 %3116 }
 0x207   : > { %v3115_v35 = vpop.permute.xlu0 %3114 }
 0x208   : > { %3232 = vrot.lane.b32.xlu1 %v525_v12, %s14778_s30  ;;  %v555_v12 = vld [vmem:[%s14969_s6 + $0x7a8] sm:$0xff] }
 0x209   : > { %3230 = vrot.lane.b32.xlu0 %v524_v4, %s14778_s30  ;;  %v554_v4 = vld [vmem:[%s14969_s6 + $0x7a0] sm:$0xff] }
 0x20a   : > { %v3121_v19 = vpop.permute.xlu1 %3120 }
 0x20b   : > { %v3119_v0 = vpop.permute.xlu0 %3118  ;;  %11247 = vmatprep.subr.mxu0 %v3121_v19  ;;  %v556_v19 = vld [vmem:[%s14969_s6 + $0x7b0] sm:$0xff] }
 0x20c   : > { %3236 = vrot.lane.b32.xlu1 %v527_v25, %s14778_s30  ;;  %11248 = vmatpush3.msra.mxu0 %v3089_v48  ;;  %v534_v48 = vld [vmem:[%s14969_s6 + $0x700] sm:$0xff] }
 0x20d   : > { %3234 = vrot.lane.b32.xlu0 %v526_v1, %s14778_s30  ;;  %11249 = vmatprep.subr.mxu0 %v3119_v0  ;;  %v1434_v1 = vcombine.high %v15755_v31, %v15755_v31  ;;  %v561_v31 = vld [vmem:[%s14969_s6 + $0x7d8] sm:$0xff] }
 0x20e   : > { %v15770_v37 = vpop.permute.xlu1 %3124  ;;  %11250 = vmatpush3.msra.mxu0 %v3087_v50 }
 0x20f   : > { %v15773_v44 = vpop.permute.xlu0 %3122  ;;  %11251 = vmatprep.subr.mxu0 %v3117_v38  ;;  %v15898_v0 = vrot.slane %v1434_v1, %v15195_v59 }
 0x210   : > { %3240 = vrot.lane.b32.xlu1 %v529_v36, %s14778_s30  ;;  %11252 = vmatpush3.msra.mxu0 %v15695_v16  ;;  %v559_v36 = vld [vmem:[%s14969_s6 + $0x7c8] sm:$0xff] }
 0x211   : > { %3238 = vrot.lane.b32.xlu0 %v528_v14, %s14778_s30  ;;  %11253 = vmatprep.subr.mxu0 %v3115_v35 }
 0x212   : > { %v15779_v41 = vpop.permute.xlu1 %3128  ;;  %11254 = vmatpush3.msra.mxu0 %v15699_v49 }
 0x213   : > { %v15783_v30 = vpop.permute.xlu0 %3126  ;;  %11255 = vmatprep.subr.mxu0 %v3113_v20 }
 0x214   : > { %3244 = vrot.lane.b32.xlu1 %v531_v23, %s14778_s30  ;;  %11256 = vmatpush3.msra.mxu0 %v15683_v21  ;;  %v535_v21 = vld [vmem:[%s14969_s6 + $0x708] sm:$0xff]  ;;  %v558_v23 = vld [vmem:[%s14969_s6 + $0x7c0] sm:$0xff] }
 0x215   : > { %3242 = vrot.lane.b32.xlu0 %v530_v22, %s14778_s30  ;;  %11257 = vmatprep.subr.mxu0 %v3111_v17  ;;  %v1450_v22 = vcombine.high %v15898_v0, %v15898_v0 }
 0x216   : > { %v15789_v16 = vpop.permute.xlu1 %3132  ;;  %11258 = vmatpush3.msra.mxu0 %v15687_v47 }
 0x217   : > { %v15793_v49 = vpop.permute.xlu0 %3130  ;;  %11259 = vmatprep.subr.mxu0 %v3109_v10  ;;  %6384 = vmatprep.mubr.f32.mxu1 %v1450_v22 }
 0x218   : > { %3248 = vrot.lane.b32.xlu1 %v533_v61, %s14778_s30  ;;  %11260 = vmatpush3.msra.mxu0 %v15671_v8  ;;  %v537_v8 = vld [vmem:[%s14969_s6 + $0x718] sm:$0xff] }
 0x219   : > { %3246 = vrot.lane.b32.xlu0 %v532_v26, %s14778_s30  ;;  %11261 = vmatprep.subr.mxu0 %v3107_v18 }
 0x21a   : > { %v15799_v33 = vpop.permute.xlu1 %3136  ;;  %11262 = vmatpush3.msra.mxu0 %v15675_v45  ;;  %v536_v45 = vld [vmem:[%s14969_s6 + $0x710] sm:$0xff] }
 0x21b   : > { %v15803_v47 = vpop.permute.xlu0 %3134  ;;  %11263 = vmatprep.subr.mxu0 %v15737_v2 }
 0x21c   : > { %3252 = vrot.lane.b32.xlu1 %v535_v21, %s14778_s30  ;;  %11264 = vmatpush3.msra.mxu0 %v15659_v34  ;;  %v539_v34 = vld [vmem:[%s14969_s6 + $0x728] sm:$0xff]  ;;  %v560_v21 = vld [vmem:[%s14969_s6 + $0x7d0] sm:$0xff] }
 0x21d   : > { %3250 = vrot.lane.b32.xlu0 %v534_v48, %s14778_s30  ;;  %11265 = vmatprep.subr.mxu0 %v15740_v6 }
 0x21e   : > { %v15811_v29 = vpop.permute.xlu1 %3140  ;;  %11266 = vmatpush3.msra.mxu0 %v15663_v39  ;;  %v538_v39 = vld [vmem:[%s14969_s6 + $0x720] sm:$0xff] }
 0x21f   : > { %v15815_v50 = vpop.permute.xlu0 %3138  ;;  %11267 = vmatprep.subr.mxu0 %v15729_v56 }
 0x220   : > { %3256 = vrot.lane.b32.xlu1 %v537_v8, %s14778_s30  ;;  %11268 = vmatpush3.msra.mxu0 %v15649_v15  ;;  %v541_v15 = vld [vmem:[%s14969_s6 + $0x738] sm:$0xff]  ;;  %v563_v8 = vld [vmem:[%s14969_s6 + $0x7e8] sm:$0xff] }
 0x221   : > { %3254 = vrot.lane.b32.xlu0 %v536_v45, %s14778_s30  ;;  %11269 = vmatprep.subr.mxu0 %v15732_v58 }
 0x222   : > { %v15823_v5 = vpop.permute.xlu1 %3144  ;;  %11270 = vmatpush3.msra.mxu0 %v15653_v46  ;;  %v540_v46 = vld [vmem:[%s14969_s6 + $0x730] sm:$0xff] }
 0x223   : > { %v15827_v51 = vpop.permute.xlu0 %3142  ;;  %11271 = vmatprep.subr.mxu0 %v15721_v52 }
 0x224   : > { %3260 = vrot.lane.b32.xlu1 %v539_v34, %s14778_s30  ;;  %11272 = vmatpush3.msra.mxu0 %v15639_v13  ;;  %v543_v13 = vld [vmem:[%s14969_s6 + $0x748] sm:$0xff]  ;;  %v562_v34 = vld [vmem:[%s14969_s6 + $0x7e0] sm:$0xff] }
 0x225   : > { %3258 = vrot.lane.b32.xlu0 %v538_v39, %s14778_s30  ;;  %11273 = vmatprep.subr.mxu0 %v15724_v54 }
 0x226   : > { %v15835_v9 = vpop.permute.xlu1 %3148  ;;  %11274 = vmatpush3.msra.mxu0 %v15643_v32  ;;  %v542_v32 = vld [vmem:[%s14969_s6 + $0x740] sm:$0xff] }
 0x227   : > { %v15839_v53 = vpop.permute.xlu0 %3146  ;;  %11275 = vmatprep.subr.mxu0 %v15713_v28 }
 0x228   : > { %3264 = vrot.lane.b32.xlu1 %v541_v15, %s14778_s30  ;;  %11276 = vmatpush3.msra.mxu0 %v15630_v42  ;;  %v545_v42 = vld [vmem:[%s14969_s6 + $0x758] sm:$0xff] }
 0x229   : > { %3262 = vrot.lane.b32.xlu0 %v540_v46, %s14778_s30  ;;  %11277 = vmatprep.subr.mxu0 %v15716_v43  ;;  %v565_v15 = vld [vmem:[%s14969_s6 + $0x7f8] sm:$0xff]  ;;  %v564_v46 = vld [vmem:[%s14969_s6 + $0x7f0] sm:$0xff] }
 0x22a   : > { %v3153_v52 = vpop.permute.xlu1 %3152  ;;  %11278 = vmatpush3.msra.mxu0 %v15633_v40  ;;  %v547_v40 = vld [vmem:[%s14969_s6 + $0x768] sm:$0xff] }
 0x22b   : > { %v3151_v54 = vpop.permute.xlu0 %3150  ;;  %6315 = vmatmul.mubr.f32.vlgmr.msra.gmra.mxu0 %v15760_v27  ;;  %v557_v27 = vld [vmem:[%s14969_s6 + $0x7b8] sm:$0xff] }
 0x22c   : > { %3268 = vrot.lane.b32.xlu1 %v543_v13, %s14778_s30 }
 0x22d   : > { %3266 = vrot.lane.b32.xlu0 %v542_v32, %s14778_s30 }
 0x22e   : > { %v15853_v28 = vpop.permute.xlu1 %3156 }
 0x22f   : > { %v15856_v43 = vpop.permute.xlu0 %3154 }
 0x230   : > { %3272 = vrot.lane.b32.xlu1 %v545_v42, %s14778_s30 }
 0x231   : > { %3270 = vrot.lane.b32.xlu0 %v544_v55, %s14778_s30 }
 0x232   : > { %v15861_v56 = vpop.permute.xlu1 %3160 }
 0x233   : > { %v15864_v58 = vpop.permute.xlu0 %3158 }
 0x234   : > { %3276 = vrot.lane.b32.xlu1 %v547_v40, %s14778_s30 }
 0x235   : > { %3274 = vrot.lane.b32.xlu0 %v546_v57, %s14778_s30 }
 0x236   : > { %v15869_v2 = vpop.permute.xlu1 %3164 }
 0x237   : > { %v15872_v6 = vpop.permute.xlu0 %3162 }
 0x238   : > { %3280 = vrot.lane.b32.xlu1 %v549_v63, %s14778_s30  ;;  %v576_v63 = vld [vmem:[%s14969_s6 + $0x850] sm:$0xff] }
 0x239   : > { %3278 = vrot.lane.b32.xlu0 %v548_v3, %s14778_s30  ;;  %v578_v3 = vld [vmem:[%s14969_s6 + $0x860] sm:$0xff] }
 0x23a   : > { %v15877_v10 = vpop.permute.xlu1 %3168 }
 0x23b   : > { %v15880_v18 = vpop.permute.xlu0 %3166 }
 0x23c   : > { %3284 = vrot.lane.b32.xlu1 %v551_v7, %s14778_s30  ;;  %v581_v7 = vld [vmem:[%s14969_s6 + $0x878] sm:$0xff] }
 0x23d   : > { %3282 = vrot.lane.b32.xlu0 %v550_v11, %s14778_s30  ;;  %v580_v11 = vld [vmem:[%s14969_s6 + $0x870] sm:$0xff] }
 0x23e   : > { %v3173_v20 = vpop.permute.xlu1 %3172 }
 0x23f   : > { %v3171_v17 = vpop.permute.xlu0 %3170 }
 0x240   : > { %3288 = vrot.lane.b32.xlu1 %v553_v24, %s14778_s30  ;;  %v583_v24 = vld [vmem:[%s14969_s6 + $0x888] sm:$0xff] }
 0x241   : > { %3286 = vrot.lane.b32.xlu0 %v552_v62, %s14778_s30  ;;  %v582_v62 = vld [vmem:[%s14969_s6 + $0x880] sm:$0xff] }
 0x242   : > { %v3177_v38 = vpop.permute.xlu1 %3176 }
 0x243   : > { %v3175_v35 = vpop.permute.xlu0 %3174 }
 0x244   : > { %3292 = vrot.lane.b32.xlu1 %v555_v12, %s14778_s30  ;;  %v585_v12 = vld [vmem:[%s14969_s6 + $0x898] sm:$0xff] }
 0x245   : > { %3290 = vrot.lane.b32.xlu0 %v554_v4, %s14778_s30  ;;  %v584_v4 = vld [vmem:[%s14969_s6 + $0x890] sm:$0xff] }
 0x246   : > { %v3181_v25 = vpop.permute.xlu1 %3180 }
 0x247   : > { %v3179_v60 = vpop.permute.xlu0 %3178 }
 0x248   : > { %3296 = vrot.lane.b32.xlu1 %v557_v27, %s14778_s30  ;;  %v587_v27 = vld [vmem:[%s14969_s6 + $0x8a8] sm:$0xff] }
 0x249   : > { %3294 = vrot.lane.b32.xlu0 %v556_v19, %s14778_s30  ;;  %v586_v19 = vld [vmem:[%s14969_s6 + $0x8a0] sm:$0xff] }
 0x24a   : > { %v3185_v14 = vpop.permute.xlu1 %3184 }
 0x24b   : > { %v3183_v61 = vpop.permute.xlu0 %3182  ;;  %11282 = vmatprep.subr.mxu1 %v3185_v14 }
 0x24c   : > { %3300 = vrot.lane.b32.xlu1 %v559_v36, %s14778_s30  ;;  %11283 = vmatpush3.msra.mxu1 %v3153_v52  ;;  %v566_v52 = vld [vmem:[%s14969_s6 + $0x800] sm:$0xff]  ;;  %v588_v36 = vld [vmem:[%s14969_s6 + $0x8b0] sm:$0xff] }
 0x24d   : > { %3298 = vrot.lane.b32.xlu0 %v558_v23, %s14778_s30  ;;  %11284 = vmatprep.subr.mxu1 %v3183_v61  ;;  %v16033_v23 = vld [vmem:[%s14963_s25 + $0x18] sm:$0xff]  ;;  %v591_v61 = vld [vmem:[%s14969_s6 + $0x8c8] sm:$0xff] }
 0x24e   : > { %v15908_v26 = vpop.permute.xlu1 %3188  ;;  %11285 = vmatpush3.msra.mxu1 %v3151_v54  ;;  %v16038_v22 = vrot.slane %v16033_v23, %v15195_v59 }
 0x24f   : > { %v15911_v48 = vpop.permute.xlu0 %3186  ;;  %11286 = vmatprep.subr.mxu1 %v3181_v25 }
 0x250   : > { %3304 = vrot.lane.b32.xlu1 %v561_v31, %s14778_s30  ;;  %11287 = vmatpush3.msra.mxu1 %v15835_v9 }
 0x251   : > { %3302 = vrot.lane.b32.xlu0 %v560_v21, %s14778_s30  ;;  %11288 = vmatprep.subr.mxu1 %v3179_v60  ;;  %v589_v60 = vld [vmem:[%s14969_s6 + $0x8b8] sm:$0xff]  ;;  %v590_v21 = vld [vmem:[%s14969_s6 + $0x8c0] sm:$0xff] }
 0x252   : > { %v15917_v45 = vpop.permute.xlu1 %3192  ;;  %11289 = vmatpush3.msra.mxu1 %v15839_v53 }
 0x253   : > { %v15921_v39 = vpop.permute.xlu0 %3190  ;;  %11290 = vmatprep.subr.mxu1 %v3177_v38 }
 0x254   : > { %3308 = vrot.lane.b32.xlu1 %v563_v8, %s14778_s30  ;;  %11291 = vmatpush3.msra.mxu1 %v15823_v5  ;;  %v567_v5 = vld [vmem:[%s14969_s6 + $0x808] sm:$0xff]  ;;  %v1466_v8 = vcombine.high %v16038_v22, %v16038_v22 }
 0x255   : > { %3306 = vrot.lane.b32.xlu0 %v562_v34, %s14778_s30  ;;  %11292 = vmatprep.subr.mxu1 %v3175_v35 }
 0x256   : > { %v15927_v9 = vpop.permute.xlu1 %3196  ;;  %11293 = vmatpush3.msra.mxu1 %v15827_v51  ;;  %6454 = vmatprep.mubr.f32.mxu0 %v1466_v8 }
 0x257   : > { %v15931_v53 = vpop.permute.xlu0 %3194  ;;  %11294 = vmatprep.subr.mxu1 %v3173_v20 }
 0x258   : > { %3312 = vrot.lane.b32.xlu1 %v565_v15, %s14778_s30  ;;  %11295 = vmatpush3.msra.mxu1 %v15811_v29  ;;  %v569_v29 = vld [vmem:[%s14969_s6 + $0x818] sm:$0xff] }
 0x259   : > { %3310 = vrot.lane.b32.xlu0 %v564_v46, %s14778_s30  ;;  %11296 = vmatprep.subr.mxu1 %v3171_v17  ;;  %v593_v15 = vld [vmem:[%s14969_s6 + $0x8d8] sm:$0xff] }
 0x25a   : > { %v15937_v13 = vpop.permute.xlu1 %3200  ;;  %11297 = vmatpush3.msra.mxu1 %v15815_v50  ;;  %v568_v50 = vld [vmem:[%s14969_s6 + $0x810] sm:$0xff] }
 0x25b   : > { %v15941_v51 = vpop.permute.xlu0 %3198  ;;  %11298 = vmatprep.subr.mxu1 %v15877_v10 }
 0x25c   : > { %3316 = vrot.lane.b32.xlu1 %v567_v5, %s14778_s30  ;;  %11299 = vmatpush3.msra.mxu1 %v15799_v33  ;;  %v571_v33 = vld [vmem:[%s14969_s6 + $0x828] sm:$0xff]  ;;  %v592_v5 = vld [vmem:[%s14969_s6 + $0x8d0] sm:$0xff] }
 0x25d   : > { %3314 = vrot.lane.b32.xlu0 %v566_v52, %s14778_s30  ;;  %11300 = vmatprep.subr.mxu1 %v15880_v18 }
 0x25e   : > { %v15949_v32 = vpop.permute.xlu1 %3204  ;;  %11301 = vmatpush3.msra.mxu1 %v15803_v47  ;;  %v570_v47 = vld [vmem:[%s14969_s6 + $0x820] sm:$0xff] }
 0x25f   : > { %v15953_v54 = vpop.permute.xlu0 %3202  ;;  %11302 = vmatprep.subr.mxu1 %v15869_v2 }
 0x260   : > { %3320 = vrot.lane.b32.xlu1 %v569_v29, %s14778_s30  ;;  %11303 = vmatpush3.msra.mxu1 %v15789_v16  ;;  %v573_v16 = vld [vmem:[%s14969_s6 + $0x838] sm:$0xff]  ;;  %v595_v29 = vld [vmem:[%s14969_s6 + $0x8e8] sm:$0xff] }
 0x261   : > { %3318 = vrot.lane.b32.xlu0 %v568_v50, %s14778_s30  ;;  %11304 = vmatprep.subr.mxu1 %v15872_v6 }
 0x262   : > { %v15961_v42 = vpop.permute.xlu1 %3208  ;;  %11305 = vmatpush3.msra.mxu1 %v15793_v49  ;;  %v572_v49 = vld [vmem:[%s14969_s6 + $0x830] sm:$0xff] }
 0x263   : > { %v15965_v55 = vpop.permute.xlu0 %3206  ;;  %11306 = vmatprep.subr.mxu1 %v15861_v56 }
 0x264   : > { %3324 = vrot.lane.b32.xlu1 %v571_v33, %s14778_s30  ;;  %11307 = vmatpush3.msra.mxu1 %v15779_v41  ;;  %v575_v41 = vld [vmem:[%s14969_s6 + $0x848] sm:$0xff]  ;;  %v594_v33 = vld [vmem:[%s14969_s6 + $0x8e0] sm:$0xff] }
 0x265   : > { %3322 = vrot.lane.b32.xlu0 %v570_v47, %s14778_s30  ;;  %11308 = vmatprep.subr.mxu1 %v15864_v58 }
 0x266   : > { %v15973_v40 = vpop.permute.xlu1 %3212  ;;  %11309 = vmatpush3.msra.mxu1 %v15783_v30  ;;  %v574_v30 = vld [vmem:[%s14969_s6 + $0x840] sm:$0xff] }
 0x267   : > { %v15977_v57 = vpop.permute.xlu0 %3210  ;;  %11310 = vmatprep.subr.mxu1 %v15853_v28 }
 0x268   : > { %3328 = vrot.lane.b32.xlu1 %v573_v16, %s14778_s30  ;;  %11311 = vmatpush3.msra.mxu1 %v15770_v37  ;;  %v577_v37 = vld [vmem:[%s14969_s6 + $0x858] sm:$0xff] }
 0x269   : > { %3326 = vrot.lane.b32.xlu0 %v572_v49, %s14778_s30  ;;  %11312 = vmatprep.subr.mxu1 %v15856_v43  ;;  %v597_v16 = vld [vmem:[%s14969_s6 + $0x8f8] sm:$0xff]  ;;  %v596_v49 = vld [vmem:[%s14969_s6 + $0x8f0] sm:$0xff] }
 0x26a   : > { %v3217_v56 = vpop.permute.xlu1 %3216  ;;  %11313 = vmatpush3.msra.mxu1 %v15773_v44  ;;  %v579_v44 = vld [vmem:[%s14969_s6 + $0x868] sm:$0xff] }
 0x26b   : > { %v3215_v58 = vpop.permute.xlu0 %3214  ;;  %6385 = vmatmul.mubr.f32.vlgmr.msra.gmra.mxu1 %v15898_v0 }
 0x26c   : > { %3332 = vrot.lane.b32.xlu1 %v575_v41, %s14778_s30 }
 0x26d   : > { %3330 = vrot.lane.b32.xlu0 %v574_v30, %s14778_s30 }
 0x26e   : > { %v15991_v28 = vpop.permute.xlu1 %3220 }
 0x26f   : > { %v15994_v43 = vpop.permute.xlu0 %3218 }
 0x270   : > { %3336 = vrot.lane.b32.xlu1 %v577_v37, %s14778_s30 }
 0x271   : > { %3334 = vrot.lane.b32.xlu0 %v576_v63, %s14778_s30 }
 0x272   : > { %v15999_v2 = vpop.permute.xlu1 %3224 }
 0x273   : > { %v16002_v6 = vpop.permute.xlu0 %3222 }
 0x274   : > { %3340 = vrot.lane.b32.xlu1 %v579_v44, %s14778_s30 }
 0x275   : > { %3338 = vrot.lane.b32.xlu0 %v578_v3, %s14778_s30 }
 0x276   : > { %v16007_v10 = vpop.permute.xlu1 %3228 }
 0x277   : > { %v16010_v18 = vpop.permute.xlu0 %3226 }
 0x278   : > { %3344 = vrot.lane.b32.xlu1 %v581_v7, %s14778_s30  ;;  %v608_v7 = vld [vmem:[%s14969_s6 + $0x950] sm:$0xff] }
 0x279   : > { %3342 = vrot.lane.b32.xlu0 %v580_v11, %s14778_s30  ;;  %v610_v11 = vld [vmem:[%s14969_s6 + $0x960] sm:$0xff] }
 0x27a   : > { %v16015_v20 = vpop.permute.xlu1 %3232 }
 0x27b   : > { %v16018_v17 = vpop.permute.xlu0 %3230 }
 0x27c   : > { %3348 = vrot.lane.b32.xlu1 %v583_v24, %s14778_s30  ;;  %v613_v24 = vld [vmem:[%s14969_s6 + $0x978] sm:$0xff] }
 0x27d   : > { %3346 = vrot.lane.b32.xlu0 %v582_v62, %s14778_s30  ;;  %v612_v62 = vld [vmem:[%s14969_s6 + $0x970] sm:$0xff] }
 0x27e   : > { %v3237_v38 = vpop.permute.xlu1 %3236 }
 0x27f   : > { %v3235_v35 = vpop.permute.xlu0 %3234 }
 0x280   : > { %3352 = vrot.lane.b32.xlu1 %v585_v12, %s14778_s30  ;;  %v615_v12 = vld [vmem:[%s14969_s6 + $0x988] sm:$0xff] }
 0x281   : > { %3350 = vrot.lane.b32.xlu0 %v584_v4, %s14778_s30  ;;  %v614_v4 = vld [vmem:[%s14969_s6 + $0x980] sm:$0xff] }
 0x282   : > { %v3241_v25 = vpop.permute.xlu1 %3240 }
 0x283   : > { %v3239_v1 = vpop.permute.xlu0 %3238 }
 0x284   : > { %3356 = vrot.lane.b32.xlu1 %v587_v27, %s14778_s30  ;;  %v617_v27 = vld [vmem:[%s14969_s6 + $0x998] sm:$0xff] }
 0x285   : > { %3354 = vrot.lane.b32.xlu0 %v586_v19, %s14778_s30  ;;  %v616_v19 = vld [vmem:[%s14969_s6 + $0x990] sm:$0xff] }
 0x286   : > { %v3245_v0 = vpop.permute.xlu1 %3244 }
 0x287   : > { %v3243_v14 = vpop.permute.xlu0 %3242 }
 0x288   : > { %3360 = vrot.lane.b32.xlu1 %v589_v60, %s14778_s30  ;;  %v619_v60 = vld [vmem:[%s14969_s6 + $0x9a8] sm:$0xff] }
 0x289   : > { %3358 = vrot.lane.b32.xlu0 %v588_v36, %s14778_s30  ;;  %v618_v36 = vld [vmem:[%s14969_s6 + $0x9a0] sm:$0xff] }
 0x28a   : > { %v3249_v31 = vpop.permute.xlu1 %3248 }
 0x28b   : > { %v3247_v34 = vpop.permute.xlu0 %3246  ;;  %11317 = vmatprep.subr.mxu0 %v3249_v31  ;;  %v620_v31 = vld [vmem:[%s14969_s6 + $0x9b0] sm:$0xff] }
 0x28c   : > { %3364 = vrot.lane.b32.xlu1 %v591_v61, %s14778_s30  ;;  %11318 = vmatpush3.msra.mxu0 %v3217_v56  ;;  %v598_v56 = vld [vmem:[%s14969_s6 + $0x900] sm:$0xff] }
 0x28d   : > { %3362 = vrot.lane.b32.xlu0 %v590_v21, %s14778_s30  ;;  %11319 = vmatprep.subr.mxu0 %v3247_v34  ;;  %v1451_v21 = vcombine.high %v16033_v23, %v16033_v23  ;;  %v625_v23 = vld [vmem:[%s14969_s6 + $0x9d8] sm:$0xff] }
 0x28e   : > { %v16048_v46 = vpop.permute.xlu1 %3252  ;;  %11320 = vmatpush3.msra.mxu0 %v3215_v58 }
 0x28f   : > { %v16051_v52 = vpop.permute.xlu0 %3250  ;;  %11321 = vmatprep.subr.mxu0 %v3245_v0  ;;  %v16176_v34 = vrot.slane %v1451_v21, %v15195_v59 }
 0x290   : > { %3368 = vrot.lane.b32.xlu1 %v593_v15, %s14778_s30  ;;  %11322 = vmatpush3.msra.mxu0 %v15973_v40  ;;  %v623_v15 = vld [vmem:[%s14969_s6 + $0x9c8] sm:$0xff] }
 0x291   : > { %3366 = vrot.lane.b32.xlu0 %v592_v5, %s14778_s30  ;;  %11323 = vmatprep.subr.mxu0 %v3243_v14 }
 0x292   : > { %v16057_v50 = vpop.permute.xlu1 %3256  ;;  %11324 = vmatpush3.msra.mxu0 %v15977_v57 }
 0x293   : > { %v16061_v47 = vpop.permute.xlu0 %3254  ;;  %11325 = vmatprep.subr.mxu0 %v3241_v25 }
 0x294   : > { %3372 = vrot.lane.b32.xlu1 %v595_v29, %s14778_s30  ;;  %11326 = vmatpush3.msra.mxu0 %v15961_v42  ;;  %v599_v42 = vld [vmem:[%s14969_s6 + $0x908] sm:$0xff]  ;;  %v622_v29 = vld [vmem:[%s14969_s6 + $0x9c0] sm:$0xff] }
 0x295   : > { %3370 = vrot.lane.b32.xlu0 %v594_v33, %s14778_s30  ;;  %11327 = vmatprep.subr.mxu0 %v3239_v1  ;;  %v1467_v33 = vcombine.high %v16176_v34, %v16176_v34 }
 0x296   : > { %v16067_v40 = vpop.permute.xlu1 %3260  ;;  %11328 = vmatpush3.msra.mxu0 %v15965_v55 }
 0x297   : > { %v16071_v57 = vpop.permute.xlu0 %3258  ;;  %11329 = vmatprep.subr.mxu0 %v3237_v38  ;;  %6524 = vmatprep.mubr.f32.mxu1 %v1467_v33 }
 0x298   : > { %3376 = vrot.lane.b32.xlu1 %v597_v16, %s14778_s30  ;;  %11330 = vmatpush3.msra.mxu0 %v15949_v32  ;;  %v601_v32 = vld [vmem:[%s14969_s6 + $0x918] sm:$0xff] }
 0x299   : > { %3374 = vrot.lane.b32.xlu0 %v596_v49, %s14778_s30  ;;  %11331 = vmatprep.subr.mxu0 %v3235_v35 }
 0x29a   : > { %v16077_v41 = vpop.permute.xlu1 %3264  ;;  %11332 = vmatpush3.msra.mxu0 %v15953_v54  ;;  %v600_v54 = vld [vmem:[%s14969_s6 + $0x910] sm:$0xff] }
 0x29b   : > { %v16081_v55 = vpop.permute.xlu0 %3262  ;;  %11333 = vmatprep.subr.mxu0 %v16015_v20 }
 0x29c   : > { %3380 = vrot.lane.b32.xlu1 %v599_v42, %s14778_s30  ;;  %11334 = vmatpush3.msra.mxu0 %v15937_v13  ;;  %v603_v13 = vld [vmem:[%s14969_s6 + $0x928] sm:$0xff]  ;;  %v624_v42 = vld [vmem:[%s14969_s6 + $0x9d0] sm:$0xff] }
 0x29d   : > { %3378 = vrot.lane.b32.xlu0 %v598_v56, %s14778_s30  ;;  %11335 = vmatprep.subr.mxu0 %v16018_v17 }
 0x29e   : > { %v16089_v30 = vpop.permute.xlu1 %3268  ;;  %11336 = vmatpush3.msra.mxu0 %v15941_v51  ;;  %v602_v51 = vld [vmem:[%s14969_s6 + $0x920] sm:$0xff] }
 0x29f   : > { %v16093_v58 = vpop.permute.xlu0 %3266  ;;  %11337 = vmatprep.subr.mxu0 %v16007_v10 }
 0x2a0   : > { %3384 = vrot.lane.b32.xlu1 %v601_v32, %s14778_s30  ;;  %11338 = vmatpush3.msra.mxu0 %v15927_v9  ;;  %v605_v9 = vld [vmem:[%s14969_s6 + $0x938] sm:$0xff]  ;;  %v627_v32 = vld [vmem:[%s14969_s6 + $0x9e8] sm:$0xff] }
 0x2a1   : > { %3382 = vrot.lane.b32.xlu0 %v600_v54, %s14778_s30  ;;  %11339 = vmatprep.subr.mxu0 %v16010_v18 }
 0x2a2   : > { %v16101_v37 = vpop.permute.xlu1 %3272  ;;  %11340 = vmatpush3.msra.mxu0 %v15931_v53  ;;  %v604_v53 = vld [vmem:[%s14969_s6 + $0x930] sm:$0xff] }
 0x2a3   : > { %v16105_v63 = vpop.permute.xlu0 %3270  ;;  %11341 = vmatprep.subr.mxu0 %v15999_v2 }
 0x2a4   : > { %3388 = vrot.lane.b32.xlu1 %v603_v13, %s14778_s30  ;;  %11342 = vmatpush3.msra.mxu0 %v15917_v45  ;;  %v607_v45 = vld [vmem:[%s14969_s6 + $0x948] sm:$0xff]  ;;  %v626_v13 = vld [vmem:[%s14969_s6 + $0x9e0] sm:$0xff] }
 0x2a5   : > { %3386 = vrot.lane.b32.xlu0 %v602_v51, %s14778_s30  ;;  %11343 = vmatprep.subr.mxu0 %v16002_v6 }
 0x2a6   : > { %v16113_v44 = vpop.permute.xlu1 %3276  ;;  %11344 = vmatpush3.msra.mxu0 %v15921_v39  ;;  %v606_v39 = vld [vmem:[%s14969_s6 + $0x940] sm:$0xff] }
 0x2a7   : > { %v16117_v3 = vpop.permute.xlu0 %3274  ;;  %11345 = vmatprep.subr.mxu0 %v15991_v28 }
 0x2a8   : > { %3392 = vrot.lane.b32.xlu1 %v605_v9, %s14778_s30  ;;  %11346 = vmatpush3.msra.mxu0 %v15908_v26  ;;  %v609_v26 = vld [vmem:[%s14969_s6 + $0x958] sm:$0xff] }
 0x2a9   : > { %3390 = vrot.lane.b32.xlu0 %v604_v53, %s14778_s30  ;;  %11347 = vmatprep.subr.mxu0 %v15994_v43  ;;  %v629_v9 = vld [vmem:[%s14969_s6 + $0x9f8] sm:$0xff]  ;;  %v628_v53 = vld [vmem:[%s14969_s6 + $0x9f0] sm:$0xff] }
 0x2aa   : > { %v3281_v2 = vpop.permute.xlu1 %3280  ;;  %11348 = vmatpush3.msra.mxu0 %v15911_v48  ;;  %v611_v48 = vld [vmem:[%s14969_s6 + $0x968] sm:$0xff] }
 0x2ab   : > { %v3279_v6 = vpop.permute.xlu0 %3278  ;;  %6455 = vmatmul.mubr.f32.vlgmr.msra.gmra.mxu0 %v16038_v22  ;;  %v621_v22 = vld [vmem:[%s14969_s6 + $0x9b8] sm:$0xff] }
 0x2ac   : > { %3396 = vrot.lane.b32.xlu1 %v607_v45, %s14778_s30 }
 0x2ad   : > { %3394 = vrot.lane.b32.xlu0 %v606_v39, %s14778_s30 }
 0x2ae   : > { %v16131_v28 = vpop.permute.xlu1 %3284 }
 0x2af   : > { %v16134_v43 = vpop.permute.xlu0 %3282 }
 0x2b0   : > { %3400 = vrot.lane.b32.xlu1 %v609_v26, %s14778_s30 }
 0x2b1   : > { %3398 = vrot.lane.b32.xlu0 %v608_v7, %s14778_s30 }
 0x2b2   : > { %v16139_v10 = vpop.permute.xlu1 %3288 }
 0x2b3   : > { %v16142_v18 = vpop.permute.xlu0 %3286 }
 0x2b4   : > { %3404 = vrot.lane.b32.xlu1 %v611_v48, %s14778_s30 }
 0x2b5   : > { %3402 = vrot.lane.b32.xlu0 %v610_v11, %s14778_s30 }
 0x2b6   : > { %v16147_v20 = vpop.permute.xlu1 %3292 }
 0x2b7   : > { %v16150_v17 = vpop.permute.xlu0 %3290 }
 0x2b8   : > { %3408 = vrot.lane.b32.xlu1 %v613_v24, %s14778_s30  ;;  %v640_v24 = vld [vmem:[%s14969_s6 + $0xa50] sm:$0xff] }
 0x2b9   : > { %3406 = vrot.lane.b32.xlu0 %v612_v62, %s14778_s30  ;;  %v642_v62 = vld [vmem:[%s14969_s6 + $0xa60] sm:$0xff] }
 0x2ba   : > { %v16155_v38 = vpop.permute.xlu1 %3296 }
 0x2bb   : > { %v16158_v35 = vpop.permute.xlu0 %3294 }
 0x2bc   : > { %3412 = vrot.lane.b32.xlu1 %v615_v12, %s14778_s30  ;;  %v645_v12 = vld [vmem:[%s14969_s6 + $0xa78] sm:$0xff] }
 0x2bd   : > { %3410 = vrot.lane.b32.xlu0 %v614_v4, %s14778_s30  ;;  %v644_v4 = vld [vmem:[%s14969_s6 + $0xa70] sm:$0xff] }
 0x2be   : > { %v3301_v25 = vpop.permute.xlu1 %3300 }
 0x2bf   : > { %v3299_v1 = vpop.permute.xlu0 %3298 }
 0x2c0   : > { %3416 = vrot.lane.b32.xlu1 %v617_v27, %s14778_s30  ;;  %v647_v27 = vld [vmem:[%s14969_s6 + $0xa88] sm:$0xff] }
 0x2c1   : > { %3414 = vrot.lane.b32.xlu0 %v616_v19, %s14778_s30  ;;  %v646_v19 = vld [vmem:[%s14969_s6 + $0xa80] sm:$0xff] }
 0x2c2   : > { %v3305_v0 = vpop.permute.xlu1 %3304 }
 0x2c3   : > { %v3303_v14 = vpop.permute.xlu0 %3302 }
 0x2c4   : > { %3420 = vrot.lane.b32.xlu1 %v619_v60, %s14778_s30  ;;  %v649_v60 = vld [vmem:[%s14969_s6 + $0xa98] sm:$0xff] }
 0x2c5   : > { %3418 = vrot.lane.b32.xlu0 %v618_v36, %s14778_s30  ;;  %v648_v36 = vld [vmem:[%s14969_s6 + $0xa90] sm:$0xff] }
 0x2c6   : > { %v3309_v61 = vpop.permute.xlu1 %3308 }
 0x2c7   : > { %v3307_v8 = vpop.permute.xlu0 %3306 }
 0x2c8   : > { %3424 = vrot.lane.b32.xlu1 %v621_v22, %s14778_s30  ;;  %v651_v22 = vld [vmem:[%s14969_s6 + $0xaa8] sm:$0xff] }
 0x2c9   : > { %3422 = vrot.lane.b32.xlu0 %v620_v31, %s14778_s30  ;;  %v650_v31 = vld [vmem:[%s14969_s6 + $0xaa0] sm:$0xff] }
 0x2ca   : > { %v3313_v5 = vpop.permute.xlu1 %3312 }
 0x2cb   : > { %v3311_v16 = vpop.permute.xlu0 %3310  ;;  %11352 = vmatprep.subr.mxu1 %v3313_v5 }
 0x2cc   : > { %3428 = vrot.lane.b32.xlu1 %v623_v15, %s14778_s30  ;;  %11353 = vmatpush3.msra.mxu1 %v3281_v2  ;;  %v630_v2 = vld [vmem:[%s14969_s6 + $0xa00] sm:$0xff]  ;;  %v652_v15 = vld [vmem:[%s14969_s6 + $0xab0] sm:$0xff] }
 0x2cd   : > { %3426 = vrot.lane.b32.xlu0 %v622_v29, %s14778_s30  ;;  %11354 = vmatprep.subr.mxu1 %v3311_v16  ;;  %v16311_v29 = vld [vmem:[%s14963_s25 + $0x20] sm:$0xff]  ;;  %v655_v16 = vld [vmem:[%s14969_s6 + $0xac8] sm:$0xff] }
 0x2ce   : > { %v16186_v49 = vpop.permute.xlu1 %3316  ;;  %11355 = vmatpush3.msra.mxu1 %v3279_v6  ;;  %v16316_v33 = vrot.slane %v16311_v29, %v15195_v59 }
 0x2cf   : > { %v16189_v56 = vpop.permute.xlu0 %3314  ;;  %11356 = vmatprep.subr.mxu1 %v3309_v61 }
 0x2d0   : > { %3432 = vrot.lane.b32.xlu1 %v625_v23, %s14778_s30  ;;  %11357 = vmatpush3.msra.mxu1 %v16113_v44 }
 0x2d1   : > { %3430 = vrot.lane.b32.xlu0 %v624_v42, %s14778_s30  ;;  %11358 = vmatprep.subr.mxu1 %v3307_v8  ;;  %v653_v8 = vld [vmem:[%s14969_s6 + $0xab8] sm:$0xff]  ;;  %v654_v42 = vld [vmem:[%s14969_s6 + $0xac0] sm:$0xff] }
 0x2d2   : > { %v16195_v54 = vpop.permute.xlu1 %3320  ;;  %11359 = vmatpush3.msra.mxu1 %v16117_v3 }
 0x2d3   : > { %v16199_v51 = vpop.permute.xlu0 %3318  ;;  %11360 = vmatprep.subr.mxu1 %v3305_v0 }
 0x2d4   : > { %3436 = vrot.lane.b32.xlu1 %v627_v32, %s14778_s30  ;;  %11361 = vmatpush3.msra.mxu1 %v16101_v37  ;;  %v631_v37 = vld [vmem:[%s14969_s6 + $0xa08] sm:$0xff]  ;;  %v1483_v32 = vcombine.high %v16316_v33, %v16316_v33 }
 0x2d5   : > { %3434 = vrot.lane.b32.xlu0 %v626_v13, %s14778_s30  ;;  %11362 = vmatprep.subr.mxu1 %v3303_v14 }
 0x2d6   : > { %v16205_v44 = vpop.permute.xlu1 %3324  ;;  %11363 = vmatpush3.msra.mxu1 %v16105_v63  ;;  %6594 = vmatprep.mubr.f32.mxu0 %v1483_v32 }
 0x2d7   : > { %v16209_v3 = vpop.permute.xlu0 %3322  ;;  %11364 = vmatprep.subr.mxu1 %v3301_v25 }
 0x2d8   : > { %3440 = vrot.lane.b32.xlu1 %v629_v9, %s14778_s30  ;;  %11365 = vmatpush3.msra.mxu1 %v16089_v30  ;;  %v633_v30 = vld [vmem:[%s14969_s6 + $0xa18] sm:$0xff] }
 0x2d9   : > { %3438 = vrot.lane.b32.xlu0 %v628_v53, %s14778_s30  ;;  %11366 = vmatprep.subr.mxu1 %v3299_v1  ;;  %v657_v9 = vld [vmem:[%s14969_s6 + $0xad8] sm:$0xff] }
 0x2da   : > { %v16215_v45 = vpop.permute.xlu1 %3328  ;;  %11367 = vmatpush3.msra.mxu1 %v16093_v58  ;;  %v632_v58 = vld [vmem:[%s14969_s6 + $0xa10] sm:$0xff] }
 0x2db   : > { %v16219_v63 = vpop.permute.xlu0 %3326  ;;  %11368 = vmatprep.subr.mxu1 %v16155_v38 }
 0x2dc   : > { %3444 = vrot.lane.b32.xlu1 %v631_v37, %s14778_s30  ;;  %11369 = vmatpush3.msra.mxu1 %v16077_v41  ;;  %v635_v41 = vld [vmem:[%s14969_s6 + $0xa28] sm:$0xff]  ;;  %v656_v37 = vld [vmem:[%s14969_s6 + $0xad0] sm:$0xff] }
 0x2dd   : > { %3442 = vrot.lane.b32.xlu0 %v630_v2, %s14778_s30  ;;  %11370 = vmatprep.subr.mxu1 %v16158_v35 }
 0x2de   : > { %v16227_v39 = vpop.permute.xlu1 %3332  ;;  %11371 = vmatpush3.msra.mxu1 %v16081_v55  ;;  %v634_v55 = vld [vmem:[%s14969_s6 + $0xa20] sm:$0xff] }
 0x2df   : > { %v16231_v6 = vpop.permute.xlu0 %3330  ;;  %11372 = vmatprep.subr.mxu1 %v16147_v20 }
 0x2e0   : > { %3448 = vrot.lane.b32.xlu1 %v633_v30, %s14778_s30  ;;  %11373 = vmatpush3.msra.mxu1 %v16067_v40  ;;  %v637_v40 = vld [vmem:[%s14969_s6 + $0xa38] sm:$0xff]  ;;  %v659_v30 = vld [vmem:[%s14969_s6 + $0xae8] sm:$0xff] }
 0x2e1   : > { %3446 = vrot.lane.b32.xlu0 %v632_v58, %s14778_s30  ;;  %11374 = vmatprep.subr.mxu1 %v16150_v17 }
 0x2e2   : > { %v16239_v26 = vpop.permute.xlu1 %3336  ;;  %11375 = vmatpush3.msra.mxu1 %v16071_v57  ;;  %v636_v57 = vld [vmem:[%s14969_s6 + $0xa30] sm:$0xff] }
 0x2e3   : > { %v16243_v7 = vpop.permute.xlu0 %3334  ;;  %11376 = vmatprep.subr.mxu1 %v16139_v10 }
 0x2e4   : > { %3452 = vrot.lane.b32.xlu1 %v635_v41, %s14778_s30  ;;  %11377 = vmatpush3.msra.mxu1 %v16057_v50  ;;  %v639_v50 = vld [vmem:[%s14969_s6 + $0xa48] sm:$0xff]  ;;  %v658_v41 = vld [vmem:[%s14969_s6 + $0xae0] sm:$0xff] }
 0x2e5   : > { %3450 = vrot.lane.b32.xlu0 %v634_v55, %s14778_s30  ;;  %11378 = vmatprep.subr.mxu1 %v16142_v18 }
 0x2e6   : > { %v16251_v48 = vpop.permute.xlu1 %3340  ;;  %11379 = vmatpush3.msra.mxu1 %v16061_v47  ;;  %v638_v47 = vld [vmem:[%s14969_s6 + $0xa40] sm:$0xff] }
 0x2e7   : > { %v16255_v11 = vpop.permute.xlu0 %3338  ;;  %11380 = vmatprep.subr.mxu1 %v16131_v28 }
 0x2e8   : > { %3456 = vrot.lane.b32.xlu1 %v637_v40, %s14778_s30  ;;  %11381 = vmatpush3.msra.mxu1 %v16048_v46  ;;  %v641_v46 = vld [vmem:[%s14969_s6 + $0xa58] sm:$0xff] }
 0x2e9   : > { %3454 = vrot.lane.b32.xlu0 %v636_v57, %s14778_s30  ;;  %11382 = vmatprep.subr.mxu1 %v16134_v43  ;;  %v661_v40 = vld [vmem:[%s14969_s6 + $0xaf8] sm:$0xff]  ;;  %v660_v57 = vld [vmem:[%s14969_s6 + $0xaf0] sm:$0xff] }
 0x2ea   : > { %v3345_v10 = vpop.permute.xlu1 %3344  ;;  %11383 = vmatpush3.msra.mxu1 %v16051_v52  ;;  %v643_v52 = vld [vmem:[%s14969_s6 + $0xa68] sm:$0xff] }
 0x2eb   : > { %v3343_v18 = vpop.permute.xlu0 %3342  ;;  %6525 = vmatmul.mubr.f32.vlgmr.msra.gmra.mxu1 %v16176_v34 }
 0x2ec   : > { %3460 = vrot.lane.b32.xlu1 %v639_v50, %s14778_s30 }
 0x2ed   : > { %3458 = vrot.lane.b32.xlu0 %v638_v47, %s14778_s30 }
 0x2ee   : > { %v16269_v28 = vpop.permute.xlu1 %3348 }
 0x2ef   : > { %v16272_v43 = vpop.permute.xlu0 %3346 }
 0x2f0   : > { %3464 = vrot.lane.b32.xlu1 %v641_v46, %s14778_s30 }
 0x2f1   : > { %3462 = vrot.lane.b32.xlu0 %v640_v24, %s14778_s30 }
 0x2f2   : > { %v16277_v20 = vpop.permute.xlu1 %3352 }
 0x2f3   : > { %v16280_v17 = vpop.permute.xlu0 %3350 }
 0x2f4   : > { %3468 = vrot.lane.b32.xlu1 %v643_v52, %s14778_s30 }
 0x2f5   : > { %3466 = vrot.lane.b32.xlu0 %v642_v62, %s14778_s30 }
 0x2f6   : > { %v16285_v38 = vpop.permute.xlu1 %3356 }
 0x2f7   : > { %v16288_v35 = vpop.permute.xlu0 %3354 }
 0x2f8   : > { %3472 = vrot.lane.b32.xlu1 %v645_v12, %s14778_s30  ;;  %v672_v12 = vld [vmem:[%s14969_s6 + $0xb50] sm:$0xff] }
 0x2f9   : > { %3470 = vrot.lane.b32.xlu0 %v644_v4, %s14778_s30  ;;  %v674_v4 = vld [vmem:[%s14969_s6 + $0xb60] sm:$0xff] }
 0x2fa   : > { %v16293_v25 = vpop.permute.xlu1 %3360 }
 0x2fb   : > { %v16296_v1 = vpop.permute.xlu0 %3358 }
 0x2fc   : > { %3476 = vrot.lane.b32.xlu1 %v647_v27, %s14778_s30  ;;  %v677_v27 = vld [vmem:[%s14969_s6 + $0xb78] sm:$0xff] }
 0x2fd   : > { %3474 = vrot.lane.b32.xlu0 %v646_v19, %s14778_s30  ;;  %v676_v19 = vld [vmem:[%s14969_s6 + $0xb70] sm:$0xff] }
 0x2fe   : > { %v3365_v0 = vpop.permute.xlu1 %3364 }
 0x2ff   : > { %v3363_v14 = vpop.permute.xlu0 %3362 }
 0x300   : > { %3480 = vrot.lane.b32.xlu1 %v649_v60, %s14778_s30  ;;  %v679_v60 = vld [vmem:[%s14969_s6 + $0xb88] sm:$0xff] }
 0x301   : > { %3478 = vrot.lane.b32.xlu0 %v648_v36, %s14778_s30  ;;  %v678_v36 = vld [vmem:[%s14969_s6 + $0xb80] sm:$0xff] }
 0x302   : > { %v3369_v61 = vpop.permute.xlu1 %3368 }
 0x303   : > { %v3367_v21 = vpop.permute.xlu0 %3366 }
 0x304   : > { %3484 = vrot.lane.b32.xlu1 %v651_v22, %s14778_s30  ;;  %v681_v22 = vld [vmem:[%s14969_s6 + $0xb98] sm:$0xff] }
 0x305   : > { %3482 = vrot.lane.b32.xlu0 %v650_v31, %s14778_s30  ;;  %v680_v31 = vld [vmem:[%s14969_s6 + $0xb90] sm:$0xff] }
 0x306   : > { %v3373_v34 = vpop.permute.xlu1 %3372 }
 0x307   : > { %v3371_v5 = vpop.permute.xlu0 %3370 }
 0x308   : > { %3488 = vrot.lane.b32.xlu1 %v653_v8, %s14778_s30  ;;  %v683_v8 = vld [vmem:[%s14969_s6 + $0xba8] sm:$0xff] }
 0x309   : > { %3486 = vrot.lane.b32.xlu0 %v652_v15, %s14778_s30  ;;  %v682_v15 = vld [vmem:[%s14969_s6 + $0xba0] sm:$0xff] }
 0x30a   : > { %v3377_v23 = vpop.permute.xlu1 %3376 }
 0x30b   : > { %v3375_v13 = vpop.permute.xlu0 %3374  ;;  %11387 = vmatprep.subr.mxu0 %v3377_v23  ;;  %v684_v23 = vld [vmem:[%s14969_s6 + $0xbb0] sm:$0xff] }
 0x30c   : > { %3492 = vrot.lane.b32.xlu1 %v655_v16, %s14778_s30  ;;  %11388 = vmatpush3.msra.mxu0 %v3345_v10  ;;  %v662_v10 = vld [vmem:[%s14969_s6 + $0xb00] sm:$0xff] }
 0x30d   : > { %3490 = vrot.lane.b32.xlu0 %v654_v42, %s14778_s30  ;;  %11389 = vmatprep.subr.mxu0 %v3375_v13  ;;  %v1468_v42 = vcombine.high %v16311_v29, %v16311_v29  ;;  %v689_v29 = vld [vmem:[%s14969_s6 + $0xbd8] sm:$0xff] }
 0x30e   : > { %v16326_v53 = vpop.permute.xlu1 %3380  ;;  %11390 = vmatpush3.msra.mxu0 %v3343_v18 }
 0x30f   : > { %v16329_v2 = vpop.permute.xlu0 %3378  ;;  %11391 = vmatprep.subr.mxu0 %v3373_v34  ;;  %v16454_v13 = vrot.slane %v1468_v42, %v15195_v59 }
 0x310   : > { %3496 = vrot.lane.b32.xlu1 %v657_v9, %s14778_s30  ;;  %11392 = vmatpush3.msra.mxu0 %v16251_v48  ;;  %v687_v9 = vld [vmem:[%s14969_s6 + $0xbc8] sm:$0xff] }
 0x311   : > { %3494 = vrot.lane.b32.xlu0 %v656_v37, %s14778_s30  ;;  %11393 = vmatprep.subr.mxu0 %v3371_v5 }
 0x312   : > { %v16335_v58 = vpop.permute.xlu1 %3384  ;;  %11394 = vmatpush3.msra.mxu0 %v16255_v11 }
 0x313   : > { %v16339_v55 = vpop.permute.xlu0 %3382  ;;  %11395 = vmatprep.subr.mxu0 %v3369_v61 }
 0x314   : > { %3500 = vrot.lane.b32.xlu1 %v659_v30, %s14778_s30  ;;  %11396 = vmatpush3.msra.mxu0 %v16239_v26  ;;  %v663_v26 = vld [vmem:[%s14969_s6 + $0xb08] sm:$0xff]  ;;  %v686_v30 = vld [vmem:[%s14969_s6 + $0xbc0] sm:$0xff] }
 0x315   : > { %3498 = vrot.lane.b32.xlu0 %v658_v41, %s14778_s30  ;;  %11397 = vmatprep.subr.mxu0 %v3367_v21  ;;  %v1484_v41 = vcombine.high %v16454_v13, %v16454_v13 }
 0x316   : > { %v16345_v48 = vpop.permute.xlu1 %3388  ;;  %11398 = vmatpush3.msra.mxu0 %v16243_v7 }
 0x317   : > { %v16349_v11 = vpop.permute.xlu0 %3386  ;;  %11399 = vmatprep.subr.mxu0 %v3365_v0  ;;  %6664 = vmatprep.mubr.f32.mxu1 %v1484_v41 }
 0x318   : > { %3504 = vrot.lane.b32.xlu1 %v661_v40, %s14778_s30  ;;  %11400 = vmatpush3.msra.mxu0 %v16227_v39  ;;  %v665_v39 = vld [vmem:[%s14969_s6 + $0xb18] sm:$0xff] }
 0x319   : > { %3502 = vrot.lane.b32.xlu0 %v660_v57, %s14778_s30  ;;  %11401 = vmatprep.subr.mxu0 %v3363_v14 }
 0x31a   : > { %v16355_v50 = vpop.permute.xlu1 %3392  ;;  %11402 = vmatpush3.msra.mxu0 %v16231_v6  ;;  %v664_v6 = vld [vmem:[%s14969_s6 + $0xb10] sm:$0xff] }
 0x31b   : > { %v16359_v7 = vpop.permute.xlu0 %3390  ;;  %11403 = vmatprep.subr.mxu0 %v16293_v25 }
 0x31c   : > { %3508 = vrot.lane.b32.xlu1 %v663_v26, %s14778_s30  ;;  %11404 = vmatpush3.msra.mxu0 %v16215_v45  ;;  %v667_v45 = vld [vmem:[%s14969_s6 + $0xb28] sm:$0xff]  ;;  %v688_v26 = vld [vmem:[%s14969_s6 + $0xbd0] sm:$0xff] }
 0x31d   : > { %3506 = vrot.lane.b32.xlu0 %v662_v10, %s14778_s30  ;;  %11405 = vmatprep.subr.mxu0 %v16296_v1 }
 0x31e   : > { %v16367_v47 = vpop.permute.xlu1 %3396  ;;  %11406 = vmatpush3.msra.mxu0 %v16219_v63  ;;  %v666_v63 = vld [vmem:[%s14969_s6 + $0xb20] sm:$0xff] }
 0x31f   : > { %v16371_v18 = vpop.permute.xlu0 %3394  ;;  %11407 = vmatprep.subr.mxu0 %v16285_v38 }
 0x320   : > { %3512 = vrot.lane.b32.xlu1 %v665_v39, %s14778_s30  ;;  %11408 = vmatpush3.msra.mxu0 %v16205_v44  ;;  %v669_v44 = vld [vmem:[%s14969_s6 + $0xb38] sm:$0xff]  ;;  %v691_v39 = vld [vmem:[%s14969_s6 + $0xbe8] sm:$0xff] }
 0x321   : > { %3510 = vrot.lane.b32.xlu0 %v664_v6, %s14778_s30  ;;  %11409 = vmatprep.subr.mxu0 %v16288_v35 }
 0x322   : > { %v16379_v46 = vpop.permute.xlu1 %3400  ;;  %11410 = vmatpush3.msra.mxu0 %v16209_v3  ;;  %v668_v3 = vld [vmem:[%s14969_s6 + $0xb30] sm:$0xff] }
 0x323   : > { %v16383_v24 = vpop.permute.xlu0 %3398  ;;  %11411 = vmatprep.subr.mxu0 %v16277_v20 }
 0x324   : > { %3516 = vrot.lane.b32.xlu1 %v667_v45, %s14778_s30  ;;  %11412 = vmatpush3.msra.mxu0 %v16195_v54  ;;  %v671_v54 = vld [vmem:[%s14969_s6 + $0xb48] sm:$0xff]  ;;  %v690_v45 = vld [vmem:[%s14969_s6 + $0xbe0] sm:$0xff] }
 0x325   : > { %3514 = vrot.lane.b32.xlu0 %v666_v63, %s14778_s30  ;;  %11413 = vmatprep.subr.mxu0 %v16280_v17 }
 0x326   : > { %v16391_v52 = vpop.permute.xlu1 %3404  ;;  %11414 = vmatpush3.msra.mxu0 %v16199_v51  ;;  %v670_v51 = vld [vmem:[%s14969_s6 + $0xb40] sm:$0xff] }
 0x327   : > { %v16395_v62 = vpop.permute.xlu0 %3402  ;;  %11415 = vmatprep.subr.mxu0 %v16269_v28 }
 0x328   : > { %3520 = vrot.lane.b32.xlu1 %v669_v44, %s14778_s30  ;;  %11416 = vmatpush3.msra.mxu0 %v16186_v49  ;;  %v673_v49 = vld [vmem:[%s14969_s6 + $0xb58] sm:$0xff] }
 0x329   : > { %3518 = vrot.lane.b32.xlu0 %v668_v3, %s14778_s30  ;;  %11417 = vmatprep.subr.mxu0 %v16272_v43  ;;  %v693_v44 = vld [vmem:[%s14969_s6 + $0xbf8] sm:$0xff]  ;;  %v692_v3 = vld [vmem:[%s14969_s6 + $0xbf0] sm:$0xff] }
 0x32a   : > { %v3409_v20 = vpop.permute.xlu1 %3408  ;;  %11418 = vmatpush3.msra.mxu0 %v16189_v56  ;;  %v675_v56 = vld [vmem:[%s14969_s6 + $0xb68] sm:$0xff] }
 0x32b   : > { %v3407_v17 = vpop.permute.xlu0 %3406  ;;  %6595 = vmatmul.mubr.f32.vlgmr.msra.gmra.mxu0 %v16316_v33  ;;  %v685_v33 = vld [vmem:[%s14969_s6 + $0xbb8] sm:$0xff] }
 0x32c   : > { %3524 = vrot.lane.b32.xlu1 %v671_v54, %s14778_s30 }
 0x32d   : > { %3522 = vrot.lane.b32.xlu0 %v670_v51, %s14778_s30 }
 0x32e   : > { %v16409_v28 = vpop.permute.xlu1 %3412 }
 0x32f   : > { %v16412_v43 = vpop.permute.xlu0 %3410 }
 0x330   : > { %3528 = vrot.lane.b32.xlu1 %v673_v49, %s14778_s30 }
 0x331   : > { %3526 = vrot.lane.b32.xlu0 %v672_v12, %s14778_s30 }
 0x332   : > { %v16417_v38 = vpop.permute.xlu1 %3416 }
 0x333   : > { %v16420_v35 = vpop.permute.xlu0 %3414 }
 0x334   : > { %3532 = vrot.lane.b32.xlu1 %v675_v56, %s14778_s30 }
 0x335   : > { %3530 = vrot.lane.b32.xlu0 %v674_v4, %s14778_s30 }
 0x336   : > { %v16425_v25 = vpop.permute.xlu1 %3420 }
 0x337   : > { %v16428_v1 = vpop.permute.xlu0 %3418 }
 0x338   : > { %3536 = vrot.lane.b32.xlu1 %v677_v27, %s14778_s30  ;;  %v704_v27 = vld [vmem:[%s14969_s6 + $0xc50] sm:$0xff] }
 0x339   : > { %3534 = vrot.lane.b32.xlu0 %v676_v19, %s14778_s30  ;;  %v706_v19 = vld [vmem:[%s14969_s6 + $0xc60] sm:$0xff] }
 0x33a   : > { %v16433_v0 = vpop.permute.xlu1 %3424 }
 0x33b   : > { %v16436_v14 = vpop.permute.xlu0 %3422 }
 0x33c   : > { %3540 = vrot.lane.b32.xlu1 %v679_v60, %s14778_s30  ;;  %v709_v60 = vld [vmem:[%s14969_s6 + $0xc78] sm:$0xff] }
 0x33d   : > { %3538 = vrot.lane.b32.xlu0 %v678_v36, %s14778_s30  ;;  %v708_v36 = vld [vmem:[%s14969_s6 + $0xc70] sm:$0xff] }
 0x33e   : > { %v3429_v61 = vpop.permute.xlu1 %3428 }
 0x33f   : > { %v3427_v21 = vpop.permute.xlu0 %3426 }
 0x340   : > { %3544 = vrot.lane.b32.xlu1 %v681_v22, %s14778_s30  ;;  %v711_v22 = vld [vmem:[%s14969_s6 + $0xc88] sm:$0xff] }
 0x341   : > { %3542 = vrot.lane.b32.xlu0 %v680_v31, %s14778_s30  ;;  %v710_v31 = vld [vmem:[%s14969_s6 + $0xc80] sm:$0xff] }
 0x342   : > { %v3433_v34 = vpop.permute.xlu1 %3432 }
 0x343   : > { %v3431_v5 = vpop.permute.xlu0 %3430 }
 0x344   : > { %3548 = vrot.lane.b32.xlu1 %v683_v8, %s14778_s30  ;;  %v713_v8 = vld [vmem:[%s14969_s6 + $0xc98] sm:$0xff] }
 0x345   : > { %3546 = vrot.lane.b32.xlu0 %v682_v15, %s14778_s30  ;;  %v712_v15 = vld [vmem:[%s14969_s6 + $0xc90] sm:$0xff] }
 0x346   : > { %v3437_v16 = vpop.permute.xlu1 %3436 }
 0x347   : > { %v3435_v32 = vpop.permute.xlu0 %3434 }
 0x348   : > { %3552 = vrot.lane.b32.xlu1 %v685_v33, %s14778_s30  ;;  %v715_v33 = vld [vmem:[%s14969_s6 + $0xca8] sm:$0xff] }
 0x349   : > { %3550 = vrot.lane.b32.xlu0 %v684_v23, %s14778_s30  ;;  %v714_v23 = vld [vmem:[%s14969_s6 + $0xca0] sm:$0xff] }
 0x34a   : > { %v3441_v37 = vpop.permute.xlu1 %3440 }
 0x34b   : > { %v3439_v40 = vpop.permute.xlu0 %3438  ;;  %11422 = vmatprep.subr.mxu1 %v3441_v37 }
 0x34c   : > { %3556 = vrot.lane.b32.xlu1 %v687_v9, %s14778_s30  ;;  %11423 = vmatpush3.msra.mxu1 %v3409_v20  ;;  %v694_v20 = vld [vmem:[%s14969_s6 + $0xc00] sm:$0xff]  ;;  %v716_v9 = vld [vmem:[%s14969_s6 + $0xcb0] sm:$0xff] }
 0x34d   : > { %3554 = vrot.lane.b32.xlu0 %v686_v30, %s14778_s30  ;;  %11424 = vmatprep.subr.mxu1 %v3439_v40  ;;  %v16589_v30 = vld [vmem:[%s14963_s25 + $0x28] sm:$0xff] }
 0x34e   : > { %v16464_v57 = vpop.permute.xlu1 %3444  ;;  %11425 = vmatpush3.msra.mxu1 %v3407_v17  ;;  %v16594_v41 = vrot.slane %v16589_v30, %v15195_v59  ;;  %v719_v40 = vld [vmem:[%s14969_s6 + $0xcc8] sm:$0xff] }
 0x34f   : > { %v16467_v10 = vpop.permute.xlu0 %3442  ;;  %11426 = vmatprep.subr.mxu1 %v3437_v16 }
 0x350   : > { %3560 = vrot.lane.b32.xlu1 %v689_v29, %s14778_s30  ;;  %11427 = vmatpush3.msra.mxu1 %v16391_v52 }
 0x351   : > { %3558 = vrot.lane.b32.xlu0 %v688_v26, %s14778_s30  ;;  %11428 = vmatprep.subr.mxu1 %v3435_v32  ;;  %v717_v32 = vld [vmem:[%s14969_s6 + $0xcb8] sm:$0xff]  ;;  %v718_v26 = vld [vmem:[%s14969_s6 + $0xcc0] sm:$0xff] }
 0x352   : > { %v16473_v6 = vpop.permute.xlu1 %3448  ;;  %11429 = vmatpush3.msra.mxu1 %v16395_v62 }
 0x353   : > { %v16477_v63 = vpop.permute.xlu0 %3446  ;;  %11430 = vmatprep.subr.mxu1 %v3433_v34 }
 0x354   : > { %3564 = vrot.lane.b32.xlu1 %v691_v39, %s14778_s30  ;;  %11431 = vmatpush3.msra.mxu1 %v16379_v46  ;;  %v695_v46 = vld [vmem:[%s14969_s6 + $0xc08] sm:$0xff]  ;;  %v1500_v39 = vcombine.high %v16594_v41, %v16594_v41 }
 0x355   : > { %3562 = vrot.lane.b32.xlu0 %v690_v45, %s14778_s30  ;;  %11432 = vmatprep.subr.mxu1 %v3431_v5 }
 0x356   : > { %v16483_v52 = vpop.permute.xlu1 %3452  ;;  %11433 = vmatpush3.msra.mxu1 %v16383_v24  ;;  %6734 = vmatprep.mubr.f32.mxu0 %v1500_v39 }
 0x357   : > { %v16487_v62 = vpop.permute.xlu0 %3450  ;;  %11434 = vmatprep.subr.mxu1 %v3429_v61 }
 0x358   : > { %3568 = vrot.lane.b32.xlu1 %v693_v44, %s14778_s30  ;;  %11435 = vmatpush3.msra.mxu1 %v16367_v47  ;;  %v697_v47 = vld [vmem:[%s14969_s6 + $0xc18] sm:$0xff] }
 0x359   : > { %3566 = vrot.lane.b32.xlu0 %v692_v3, %s14778_s30  ;;  %11436 = vmatprep.subr.mxu1 %v3427_v21  ;;  %v721_v44 = vld [vmem:[%s14969_s6 + $0xcd8] sm:$0xff] }
 0x35a   : > { %v16493_v54 = vpop.permute.xlu1 %3456  ;;  %11437 = vmatpush3.msra.mxu1 %v16371_v18  ;;  %v696_v18 = vld [vmem:[%s14969_s6 + $0xc10] sm:$0xff] }
 0x35b   : > { %v16497_v24 = vpop.permute.xlu0 %3454  ;;  %11438 = vmatprep.subr.mxu1 %v16433_v0 }
 0x35c   : > { %3572 = vrot.lane.b32.xlu1 %v695_v46, %s14778_s30  ;;  %11439 = vmatpush3.msra.mxu1 %v16355_v50  ;;  %v699_v50 = vld [vmem:[%s14969_s6 + $0xc28] sm:$0xff]  ;;  %v720_v46 = vld [vmem:[%s14969_s6 + $0xcd0] sm:$0xff] }
 0x35d   : > { %3570 = vrot.lane.b32.xlu0 %v694_v20, %s14778_s30  ;;  %11440 = vmatprep.subr.mxu1 %v16436_v14 }
 0x35e   : > { %v16505_v51 = vpop.permute.xlu1 %3460  ;;  %11441 = vmatpush3.msra.mxu1 %v16359_v7  ;;  %v698_v7 = vld [vmem:[%s14969_s6 + $0xc20] sm:$0xff] }
 0x35f   : > { %v16509_v17 = vpop.permute.xlu0 %3458  ;;  %11442 = vmatprep.subr.mxu1 %v16425_v25 }
 0x360   : > { %3576 = vrot.lane.b32.xlu1 %v697_v47, %s14778_s30  ;;  %11443 = vmatpush3.msra.mxu1 %v16345_v48  ;;  %v701_v48 = vld [vmem:[%s14969_s6 + $0xc38] sm:$0xff]  ;;  %v723_v47 = vld [vmem:[%s14969_s6 + $0xce8] sm:$0xff] }
 0x361   : > { %3574 = vrot.lane.b32.xlu0 %v696_v18, %s14778_s30  ;;  %11444 = vmatprep.subr.mxu1 %v16428_v1 }
 0x362   : > { %v16517_v49 = vpop.permute.xlu1 %3464  ;;  %11445 = vmatpush3.msra.mxu1 %v16349_v11  ;;  %v700_v11 = vld [vmem:[%s14969_s6 + $0xc30] sm:$0xff] }
 0x363   : > { %v16521_v12 = vpop.permute.xlu0 %3462  ;;  %11446 = vmatprep.subr.mxu1 %v16417_v38 }
 0x364   : > { %3580 = vrot.lane.b32.xlu1 %v699_v50, %s14778_s30  ;;  %11447 = vmatpush3.msra.mxu1 %v16335_v58  ;;  %v703_v58 = vld [vmem:[%s14969_s6 + $0xc48] sm:$0xff]  ;;  %v722_v50 = vld [vmem:[%s14969_s6 + $0xce0] sm:$0xff] }
 0x365   : > { %3578 = vrot.lane.b32.xlu0 %v698_v7, %s14778_s30  ;;  %11448 = vmatprep.subr.mxu1 %v16420_v35 }
 0x366   : > { %v16529_v56 = vpop.permute.xlu1 %3468  ;;  %11449 = vmatpush3.msra.mxu1 %v16339_v55  ;;  %v702_v55 = vld [vmem:[%s14969_s6 + $0xc40] sm:$0xff] }
 0x367   : > { %v16533_v4 = vpop.permute.xlu0 %3466  ;;  %11450 = vmatprep.subr.mxu1 %v16409_v28 }
 0x368   : > { %3584 = vrot.lane.b32.xlu1 %v701_v48, %s14778_s30  ;;  %11451 = vmatpush3.msra.mxu1 %v16326_v53  ;;  %v705_v53 = vld [vmem:[%s14969_s6 + $0xc58] sm:$0xff] }
 0x369   : > { %3582 = vrot.lane.b32.xlu0 %v700_v11, %s14778_s30  ;;  %11452 = vmatprep.subr.mxu1 %v16412_v43  ;;  %v725_v48 = vld [vmem:[%s14969_s6 + $0xcf8] sm:$0xff]  ;;  %v724_v11 = vld [vmem:[%s14969_s6 + $0xcf0] sm:$0xff] }
 0x36a   : > { %v3473_v38 = vpop.permute.xlu1 %3472  ;;  %11453 = vmatpush3.msra.mxu1 %v16329_v2  ;;  %v707_v2 = vld [vmem:[%s14969_s6 + $0xc68] sm:$0xff] }
 0x36b   : > { %v3471_v35 = vpop.permute.xlu0 %3470  ;;  %6665 = vmatmul.mubr.f32.vlgmr.msra.gmra.mxu1 %v16454_v13 }
 0x36c   : > { %3588 = vrot.lane.b32.xlu1 %v703_v58, %s14778_s30 }
 0x36d   : > { %3586 = vrot.lane.b32.xlu0 %v702_v55, %s14778_s30 }
 0x36e   : > { %v16547_v28 = vpop.permute.xlu1 %3476 }
 0x36f   : > { %v16550_v43 = vpop.permute.xlu0 %3474 }
 0x370   : > { %3592 = vrot.lane.b32.xlu1 %v705_v53, %s14778_s30 }
 0x371   : > { %3590 = vrot.lane.b32.xlu0 %v704_v27, %s14778_s30 }
 0x372   : > { %v16555_v25 = vpop.permute.xlu1 %3480 }
 0x373   : > { %v16558_v1 = vpop.permute.xlu0 %3478 }
 0x374   : > { %3596 = vrot.lane.b32.xlu1 %v707_v2, %s14778_s30 }
 0x375   : > { %3594 = vrot.lane.b32.xlu0 %v706_v19, %s14778_s30 }
 0x376   : > { %v16563_v0 = vpop.permute.xlu1 %3484 }
 0x377   : > { %v16566_v14 = vpop.permute.xlu0 %3482 }
 0x378   : > { %3600 = vrot.lane.b32.xlu1 %v709_v60, %s14778_s30  ;;  %v736_v60 = vld [vmem:[%s14969_s6 + $0xd50] sm:$0xff] }
 0x379   : > { %3598 = vrot.lane.b32.xlu0 %v708_v36, %s14778_s30  ;;  %v738_v36 = vld [vmem:[%s14969_s6 + $0xd60] sm:$0xff] }
 0x37a   : > { %v16571_v61 = vpop.permute.xlu1 %3488 }
 0x37b   : > { %v16574_v21 = vpop.permute.xlu0 %3486 }
 0x37c   : > { %3604 = vrot.lane.b32.xlu1 %v711_v22, %s14778_s30  ;;  %v741_v22 = vld [vmem:[%s14969_s6 + $0xd78] sm:$0xff] }
 0x37d   : > { %3602 = vrot.lane.b32.xlu0 %v710_v31, %s14778_s30  ;;  %v740_v31 = vld [vmem:[%s14969_s6 + $0xd70] sm:$0xff] }
 0x37e   : > { %v3493_v34 = vpop.permute.xlu1 %3492 }
 0x37f   : > { %v3491_v5 = vpop.permute.xlu0 %3490 }
 0x380   : > { %3608 = vrot.lane.b32.xlu1 %v713_v8, %s14778_s30  ;;  %v743_v8 = vld [vmem:[%s14969_s6 + $0xd88] sm:$0xff] }
 0x381   : > { %3606 = vrot.lane.b32.xlu0 %v712_v15, %s14778_s30  ;;  %v742_v15 = vld [vmem:[%s14969_s6 + $0xd80] sm:$0xff] }
 0x382   : > { %v3497_v16 = vpop.permute.xlu1 %3496 }
 0x383   : > { %v3495_v42 = vpop.permute.xlu0 %3494 }
 0x384   : > { %3612 = vrot.lane.b32.xlu1 %v715_v33, %s14778_s30  ;;  %v745_v33 = vld [vmem:[%s14969_s6 + $0xd98] sm:$0xff] }
 0x385   : > { %3610 = vrot.lane.b32.xlu0 %v714_v23, %s14778_s30  ;;  %v744_v23 = vld [vmem:[%s14969_s6 + $0xd90] sm:$0xff] }
 0x386   : > { %v3501_v13 = vpop.permute.xlu1 %3500 }
 0x387   : > { %v3499_v37 = vpop.permute.xlu0 %3498 }
 0x388   : > { %3616 = vrot.lane.b32.xlu1 %v717_v32, %s14778_s30  ;;  %v747_v32 = vld [vmem:[%s14969_s6 + $0xda8] sm:$0xff] }
 0x389   : > { %3614 = vrot.lane.b32.xlu0 %v716_v9, %s14778_s30  ;;  %v746_v9 = vld [vmem:[%s14969_s6 + $0xda0] sm:$0xff] }
 0x38a   : > { %v3505_v29 = vpop.permute.xlu1 %3504 }
 0x38b   : > { %v3503_v45 = vpop.permute.xlu0 %3502  ;;  %11457 = vmatprep.subr.mxu0 %v3505_v29  ;;  %v748_v29 = vld [vmem:[%s14969_s6 + $0xdb0] sm:$0xff] }
 0x38c   : > { %3620 = vrot.lane.b32.xlu1 %v719_v40, %s14778_s30  ;;  %11458 = vmatpush3.msra.mxu0 %v3473_v38  ;;  %v726_v38 = vld [vmem:[%s14969_s6 + $0xd00] sm:$0xff] }
 0x38d   : > { %3618 = vrot.lane.b32.xlu0 %v718_v26, %s14778_s30  ;;  %11459 = vmatprep.subr.mxu0 %v3503_v45  ;;  %v1485_v26 = vcombine.high %v16589_v30, %v16589_v30  ;;  %v753_v30 = vld [vmem:[%s14969_s6 + $0xdd8] sm:$0xff] }
 0x38e   : > { %v16604_v3 = vpop.permute.xlu1 %3508  ;;  %11460 = vmatpush3.msra.mxu0 %v3471_v35 }
 0x38f   : > { %v16607_v20 = vpop.permute.xlu0 %3506  ;;  %11461 = vmatprep.subr.mxu0 %v3501_v13  ;;  %v16732_v45 = vrot.slane %v1485_v26, %v15195_v59 }
 0x390   : > { %3624 = vrot.lane.b32.xlu1 %v721_v44, %s14778_s30  ;;  %11462 = vmatpush3.msra.mxu0 %v16529_v56  ;;  %v751_v44 = vld [vmem:[%s14969_s6 + $0xdc8] sm:$0xff] }
 0x391   : > { %3622 = vrot.lane.b32.xlu0 %v720_v46, %s14778_s30  ;;  %11463 = vmatprep.subr.mxu0 %v3499_v37 }
 0x392   : > { %v16613_v18 = vpop.permute.xlu1 %3512  ;;  %11464 = vmatpush3.msra.mxu0 %v16533_v4 }
 0x393   : > { %v16617_v7 = vpop.permute.xlu0 %3510  ;;  %11465 = vmatprep.subr.mxu0 %v3497_v16 }
 0x394   : > { %3628 = vrot.lane.b32.xlu1 %v723_v47, %s14778_s30  ;;  %11466 = vmatpush3.msra.mxu0 %v16517_v49  ;;  %v727_v49 = vld [vmem:[%s14969_s6 + $0xd08] sm:$0xff]  ;;  %v750_v47 = vld [vmem:[%s14969_s6 + $0xdc0] sm:$0xff] }
 0x395   : > { %3626 = vrot.lane.b32.xlu0 %v722_v50, %s14778_s30  ;;  %11467 = vmatprep.subr.mxu0 %v3495_v42  ;;  %v1501_v50 = vcombine.high %v16732_v45, %v16732_v45 }
 0x396   : > { %v16623_v56 = vpop.permute.xlu1 %3516  ;;  %11468 = vmatpush3.msra.mxu0 %v16521_v12 }
 0x397   : > { %v16627_v4 = vpop.permute.xlu0 %3514  ;;  %11469 = vmatprep.subr.mxu0 %v3493_v34  ;;  %6804 = vmatprep.mubr.f32.mxu1 %v1501_v50 }
 0x398   : > { %3632 = vrot.lane.b32.xlu1 %v725_v48, %s14778_s30  ;;  %11470 = vmatpush3.msra.mxu0 %v16505_v51  ;;  %v729_v51 = vld [vmem:[%s14969_s6 + $0xd18] sm:$0xff] }
 0x399   : > { %3630 = vrot.lane.b32.xlu0 %v724_v11, %s14778_s30  ;;  %11471 = vmatprep.subr.mxu0 %v3491_v5 }
 0x39a   : > { %v16633_v58 = vpop.permute.xlu1 %3520  ;;  %11472 = vmatpush3.msra.mxu0 %v16509_v17  ;;  %v728_v17 = vld [vmem:[%s14969_s6 + $0xd10] sm:$0xff] }
 0x39b   : > { %v16637_v12 = vpop.permute.xlu0 %3518  ;;  %11473 = vmatprep.subr.mxu0 %v16571_v61 }
 0x39c   : > { %3636 = vrot.lane.b32.xlu1 %v727_v49, %s14778_s30  ;;  %11474 = vmatpush3.msra.mxu0 %v16493_v54  ;;  %v731_v54 = vld [vmem:[%s14969_s6 + $0xd28] sm:$0xff]  ;;  %v752_v49 = vld [vmem:[%s14969_s6 + $0xdd0] sm:$0xff] }
 0x39d   : > { %3634 = vrot.lane.b32.xlu0 %v726_v38, %s14778_s30  ;;  %11475 = vmatprep.subr.mxu0 %v16574_v21 }
 0x39e   : > { %v16645_v55 = vpop.permute.xlu1 %3524  ;;  %11476 = vmatpush3.msra.mxu0 %v16497_v24  ;;  %v730_v24 = vld [vmem:[%s14969_s6 + $0xd20] sm:$0xff] }
 0x39f   : > { %v16649_v35 = vpop.permute.xlu0 %3522  ;;  %11477 = vmatprep.subr.mxu0 %v16563_v0 }
 0x3a0   : > { %3640 = vrot.lane.b32.xlu1 %v729_v51, %s14778_s30  ;;  %11478 = vmatpush3.msra.mxu0 %v16483_v52  ;;  %v733_v52 = vld [vmem:[%s14969_s6 + $0xd38] sm:$0xff]  ;;  %v755_v51 = vld [vmem:[%s14969_s6 + $0xde8] sm:$0xff] }
 0x3a1   : > { %3638 = vrot.lane.b32.xlu0 %v728_v17, %s14778_s30  ;;  %11479 = vmatprep.subr.mxu0 %v16566_v14 }
 0x3a2   : > { %v16657_v53 = vpop.permute.xlu1 %3528  ;;  %11480 = vmatpush3.msra.mxu0 %v16487_v62  ;;  %v732_v62 = vld [vmem:[%s14969_s6 + $0xd30] sm:$0xff] }
 0x3a3   : > { %v16661_v27 = vpop.permute.xlu0 %3526  ;;  %11481 = vmatprep.subr.mxu0 %v16555_v25 }
 0x3a4   : > { %3644 = vrot.lane.b32.xlu1 %v731_v54, %s14778_s30  ;;  %11482 = vmatpush3.msra.mxu0 %v16473_v6  ;;  %v735_v6 = vld [vmem:[%s14969_s6 + $0xd48] sm:$0xff]  ;;  %v754_v54 = vld [vmem:[%s14969_s6 + $0xde0] sm:$0xff] }
 0x3a5   : > { %3642 = vrot.lane.b32.xlu0 %v730_v24, %s14778_s30  ;;  %11483 = vmatprep.subr.mxu0 %v16558_v1 }
 0x3a6   : > { %v16669_v2 = vpop.permute.xlu1 %3532  ;;  %11484 = vmatpush3.msra.mxu0 %v16477_v63  ;;  %v734_v63 = vld [vmem:[%s14969_s6 + $0xd40] sm:$0xff] }
 0x3a7   : > { %v16673_v19 = vpop.permute.xlu0 %3530  ;;  %11485 = vmatprep.subr.mxu0 %v16547_v28 }
 0x3a8   : > { %3648 = vrot.lane.b32.xlu1 %v733_v52, %s14778_s30  ;;  %11486 = vmatpush3.msra.mxu0 %v16464_v57  ;;  %v737_v57 = vld [vmem:[%s14969_s6 + $0xd58] sm:$0xff] }
 0x3a9   : > { %3646 = vrot.lane.b32.xlu0 %v732_v62, %s14778_s30  ;;  %11487 = vmatprep.subr.mxu0 %v16550_v43  ;;  %v757_v52 = vld [vmem:[%s14969_s6 + $0xdf8] sm:$0xff]  ;;  %v756_v62 = vld [vmem:[%s14969_s6 + $0xdf0] sm:$0xff] }
 0x3aa   : > { %v3537_v25 = vpop.permute.xlu1 %3536  ;;  %11488 = vmatpush3.msra.mxu0 %v16467_v10  ;;  %v739_v10 = vld [vmem:[%s14969_s6 + $0xd68] sm:$0xff] }
 0x3ab   : > { %v3535_v1 = vpop.permute.xlu0 %3534  ;;  %6735 = vmatmul.mubr.f32.vlgmr.msra.gmra.mxu0 %v16594_v41  ;;  %v749_v41 = vld [vmem:[%s14969_s6 + $0xdb8] sm:$0xff] }
 0x3ac   : > { %3652 = vrot.lane.b32.xlu1 %v735_v6, %s14778_s30 }
 0x3ad   : > { %3650 = vrot.lane.b32.xlu0 %v734_v63, %s14778_s30 }
 0x3ae   : > { %v16687_v28 = vpop.permute.xlu1 %3540 }
 0x3af   : > { %v16690_v43 = vpop.permute.xlu0 %3538 }
 0x3b0   : > { %3656 = vrot.lane.b32.xlu1 %v737_v57, %s14778_s30 }
 0x3b1   : > { %3654 = vrot.lane.b32.xlu0 %v736_v60, %s14778_s30 }
 0x3b2   : > { %v16695_v0 = vpop.permute.xlu1 %3544 }
 0x3b3   : > { %v16698_v14 = vpop.permute.xlu0 %3542 }
 0x3b4   : > { %3660 = vrot.lane.b32.xlu1 %v739_v10, %s14778_s30 }
 0x3b5   : > { %3658 = vrot.lane.b32.xlu0 %v738_v36, %s14778_s30 }
 0x3b6   : > { %v16703_v61 = vpop.permute.xlu1 %3548 }
 0x3b7   : > { %v16706_v21 = vpop.permute.xlu0 %3546 }
 0x3b8   : > { %3664 = vrot.lane.b32.xlu1 %v741_v22, %s14778_s30  ;;  %v768_v22 = vld [vmem:[%s14969_s6 + $0xe50] sm:$0xff] }
 0x3b9   : > { %3662 = vrot.lane.b32.xlu0 %v740_v31, %s14778_s30  ;;  %v770_v31 = vld [vmem:[%s14969_s6 + $0xe60] sm:$0xff] }
 0x3ba   : > { %v16711_v34 = vpop.permute.xlu1 %3552 }
 0x3bb   : > { %v16714_v5 = vpop.permute.xlu0 %3550 }
 0x3bc   : > { %3668 = vrot.lane.b32.xlu1 %v743_v8, %s14778_s30  ;;  %v773_v8 = vld [vmem:[%s14969_s6 + $0xe78] sm:$0xff] }
 0x3bd   : > { %3666 = vrot.lane.b32.xlu0 %v742_v15, %s14778_s30  ;;  %v772_v15 = vld [vmem:[%s14969_s6 + $0xe70] sm:$0xff] }
 0x3be   : > { %v3557_v16 = vpop.permute.xlu1 %3556 }
 0x3bf   : > { %v3555_v42 = vpop.permute.xlu0 %3554 }
 0x3c0   : > { %3672 = vrot.lane.b32.xlu1 %v745_v33, %s14778_s30  ;;  %v775_v33 = vld [vmem:[%s14969_s6 + $0xe88] sm:$0xff] }
 0x3c1   : > { %3670 = vrot.lane.b32.xlu0 %v744_v23, %s14778_s30  ;;  %v774_v23 = vld [vmem:[%s14969_s6 + $0xe80] sm:$0xff] }
 0x3c2   : > { %v3561_v13 = vpop.permute.xlu1 %3560 }
 0x3c3   : > { %v3559_v37 = vpop.permute.xlu0 %3558 }
 0x3c4   : > { %3676 = vrot.lane.b32.xlu1 %v747_v32, %s14778_s30  ;;  %v777_v32 = vld [vmem:[%s14969_s6 + $0xe98] sm:$0xff] }
 0x3c5   : > { %3674 = vrot.lane.b32.xlu0 %v746_v9, %s14778_s30  ;;  %v776_v9 = vld [vmem:[%s14969_s6 + $0xe90] sm:$0xff] }
 0x3c6   : > { %v3565_v40 = vpop.permute.xlu1 %3564 }
 0x3c7   : > { %v3563_v39 = vpop.permute.xlu0 %3562 }
 0x3c8   : > { %3680 = vrot.lane.b32.xlu1 %v749_v41, %s14778_s30  ;;  %v779_v41 = vld [vmem:[%s14969_s6 + $0xea8] sm:$0xff] }
 0x3c9   : > { %3678 = vrot.lane.b32.xlu0 %v748_v29, %s14778_s30  ;;  %v778_v29 = vld [vmem:[%s14969_s6 + $0xea0] sm:$0xff] }
 0x3ca   : > { %v3569_v46 = vpop.permute.xlu1 %3568 }
 0x3cb   : > { %v3567_v48 = vpop.permute.xlu0 %3566  ;;  %11492 = vmatprep.subr.mxu1 %v3569_v46 }
 0x3cc   : > { %3684 = vrot.lane.b32.xlu1 %v751_v44, %s14778_s30  ;;  %11493 = vmatpush3.msra.mxu1 %v3537_v25  ;;  %v758_v25 = vld [vmem:[%s14969_s6 + $0xe00] sm:$0xff]  ;;  %v780_v44 = vld [vmem:[%s14969_s6 + $0xeb0] sm:$0xff] }
 0x3cd   : > { %3682 = vrot.lane.b32.xlu0 %v750_v47, %s14778_s30  ;;  %11494 = vmatprep.subr.mxu1 %v3567_v48  ;;  %v16867_v47 = vld [vmem:[%s14963_s25 + $0x30] sm:$0xff] }
 0x3ce   : > { %v16742_v11 = vpop.permute.xlu1 %3572  ;;  %11495 = vmatpush3.msra.mxu1 %v3535_v1  ;;  %v16872_v50 = vrot.slane %v16867_v47, %v15195_v59  ;;  %v783_v48 = vld [vmem:[%s14969_s6 + $0xec8] sm:$0xff] }
 0x3cf   : > { %v16745_v38 = vpop.permute.xlu0 %3570  ;;  %11496 = vmatprep.subr.mxu1 %v3565_v40 }
 0x3d0   : > { %3688 = vrot.lane.b32.xlu1 %v753_v30, %s14778_s30  ;;  %11497 = vmatpush3.msra.mxu1 %v16669_v2 }
 0x3d1   : > { %3686 = vrot.lane.b32.xlu0 %v752_v49, %s14778_s30  ;;  %11498 = vmatprep.subr.mxu1 %v3563_v39  ;;  %v781_v39 = vld [vmem:[%s14969_s6 + $0xeb8] sm:$0xff]  ;;  %v782_v49 = vld [vmem:[%s14969_s6 + $0xec0] sm:$0xff] }
 0x3d2   : > { %v16751_v17 = vpop.permute.xlu1 %3576  ;;  %11499 = vmatpush3.msra.mxu1 %v16673_v19 }
 0x3d3   : > { %v16755_v24 = vpop.permute.xlu0 %3574  ;;  %11500 = vmatprep.subr.mxu1 %v3561_v13 }
 0x3d4   : > { %3692 = vrot.lane.b32.xlu1 %v755_v51, %s14778_s30  ;;  %11501 = vmatpush3.msra.mxu1 %v16657_v53  ;;  %v759_v53 = vld [vmem:[%s14969_s6 + $0xe08] sm:$0xff]  ;;  %v1517_v51 = vcombine.high %v16872_v50, %v16872_v50 }
 0x3d5   : > { %3690 = vrot.lane.b32.xlu0 %v754_v54, %s14778_s30  ;;  %11502 = vmatprep.subr.mxu1 %v3559_v37 }
 0x3d6   : > { %v16761_v2 = vpop.permute.xlu1 %3580  ;;  %11503 = vmatpush3.msra.mxu1 %v16661_v27  ;;  %6874 = vmatprep.mubr.f32.mxu0 %v1517_v51  ;;  %v812_v51 = vld [vmem:[%s14969_s6 + $0xfb0] sm:$0xff] }
 0x3d7   : > { %v16765_v19 = vpop.permute.xlu0 %3578  ;;  %11504 = vmatprep.subr.mxu1 %v3557_v16 }
 0x3d8   : > { %3696 = vrot.lane.b32.xlu1 %v757_v52, %s14778_s30  ;;  %11505 = vmatpush3.msra.mxu1 %v16645_v55  ;;  %v761_v55 = vld [vmem:[%s14969_s6 + $0xe18] sm:$0xff] }
 0x3d9   : > { %3694 = vrot.lane.b32.xlu0 %v756_v62, %s14778_s30  ;;  %11506 = vmatprep.subr.mxu1 %v3555_v42  ;;  %v785_v52 = vld [vmem:[%s14969_s6 + $0xed8] sm:$0xff] }
 0x3da   : > { %v16771_v6 = vpop.permute.xlu1 %3584  ;;  %11507 = vmatpush3.msra.mxu1 %v16649_v35  ;;  %v760_v35 = vld [vmem:[%s14969_s6 + $0xe10] sm:$0xff] }
 0x3db   : > { %v16775_v27 = vpop.permute.xlu0 %3582  ;;  %11508 = vmatprep.subr.mxu1 %v16711_v34 }
 0x3dc   : > { %3700 = vrot.lane.b32.xlu1 %v759_v53, %s14778_s30  ;;  %11509 = vmatpush3.msra.mxu1 %v16633_v58  ;;  %v763_v58 = vld [vmem:[%s14969_s6 + $0xe28] sm:$0xff]  ;;  %v784_v53 = vld [vmem:[%s14969_s6 + $0xed0] sm:$0xff] }
 0x3dd   : > { %3698 = vrot.lane.b32.xlu0 %v758_v25, %s14778_s30  ;;  %11510 = vmatprep.subr.mxu1 %v16714_v5 }
 0x3de   : > { %v16783_v63 = vpop.permute.xlu1 %3588  ;;  %11511 = vmatpush3.msra.mxu1 %v16637_v12  ;;  %v762_v12 = vld [vmem:[%s14969_s6 + $0xe20] sm:$0xff] }
 0x3df   : > { %v16787_v1 = vpop.permute.xlu0 %3586  ;;  %11512 = vmatprep.subr.mxu1 %v16703_v61 }
 0x3e0   : > { %3704 = vrot.lane.b32.xlu1 %v761_v55, %s14778_s30  ;;  %11513 = vmatpush3.msra.mxu1 %v16623_v56  ;;  %v765_v56 = vld [vmem:[%s14969_s6 + $0xe38] sm:$0xff]  ;;  %v787_v55 = vld [vmem:[%s14969_s6 + $0xee8] sm:$0xff] }
 0x3e1   : > { %3702 = vrot.lane.b32.xlu0 %v760_v35, %s14778_s30  ;;  %11514 = vmatprep.subr.mxu1 %v16706_v21 }
 0x3e2   : > { %v16795_v57 = vpop.permute.xlu1 %3592  ;;  %11515 = vmatpush3.msra.mxu1 %v16627_v4  ;;  %v764_v4 = vld [vmem:[%s14969_s6 + $0xe30] sm:$0xff] }
 0x3e3   : > { %v16799_v60 = vpop.permute.xlu0 %3590  ;;  %11516 = vmatprep.subr.mxu1 %v16695_v0 }
 0x3e4   : > { %3708 = vrot.lane.b32.xlu1 %v763_v58, %s14778_s30  ;;  %11517 = vmatpush3.msra.mxu1 %v16613_v18  ;;  %v767_v18 = vld [vmem:[%s14969_s6 + $0xe48] sm:$0xff]  ;;  %v786_v58 = vld [vmem:[%s14969_s6 + $0xee0] sm:$0xff] }
 0x3e5   : > { %3706 = vrot.lane.b32.xlu0 %v762_v12, %s14778_s30  ;;  %11518 = vmatprep.subr.mxu1 %v16698_v14 }
 0x3e6   : > { %v16807_v10 = vpop.permute.xlu1 %3596  ;;  %11519 = vmatpush3.msra.mxu1 %v16617_v7  ;;  %v766_v7 = vld [vmem:[%s14969_s6 + $0xe40] sm:$0xff] }
 0x3e7   : > { %v16811_v36 = vpop.permute.xlu0 %3594  ;;  %11520 = vmatprep.subr.mxu1 %v16687_v28 }
 0x3e8   : > { %3712 = vrot.lane.b32.xlu1 %v765_v56, %s14778_s30  ;;  %11521 = vmatpush3.msra.mxu1 %v16604_v3  ;;  %v769_v3 = vld [vmem:[%s14969_s6 + $0xe58] sm:$0xff] }
 0x3e9   : > { %3710 = vrot.lane.b32.xlu0 %v764_v4, %s14778_s30  ;;  %11522 = vmatprep.subr.mxu1 %v16690_v43  ;;  %v789_v56 = vld [vmem:[%s14969_s6 + $0xef8] sm:$0xff]  ;;  %v788_v4 = vld [vmem:[%s14969_s6 + $0xef0] sm:$0xff] }
 0x3ea   : > { %v3601_v0 = vpop.permute.xlu1 %3600  ;;  %11523 = vmatpush3.msra.mxu1 %v16607_v20  ;;  %v771_v20 = vld [vmem:[%s14969_s6 + $0xe68] sm:$0xff] }
 0x3eb   : > { %v3599_v14 = vpop.permute.xlu0 %3598  ;;  %6805 = vmatmul.mubr.f32.vlgmr.msra.gmra.mxu1 %v16732_v45 }
 0x3ec   : > { %3716 = vrot.lane.b32.xlu1 %v767_v18, %s14778_s30 }
 0x3ed   : > { %3714 = vrot.lane.b32.xlu0 %v766_v7, %s14778_s30 }
 0x3ee   : > { %v16825_v28 = vpop.permute.xlu1 %3604 }
 0x3ef   : > { %v16828_v43 = vpop.permute.xlu0 %3602 }
 0x3f0   : > { %3720 = vrot.lane.b32.xlu1 %v769_v3, %s14778_s30 }
 0x3f1   : > { %3718 = vrot.lane.b32.xlu0 %v768_v22, %s14778_s30 }
 0x3f2   : > { %v16833_v61 = vpop.permute.xlu1 %3608 }
 0x3f3   : > { %v16836_v21 = vpop.permute.xlu0 %3606 }
 0x3f4   : > { %3724 = vrot.lane.b32.xlu1 %v771_v20, %s14778_s30 }
 0x3f5   : > { %3722 = vrot.lane.b32.xlu0 %v770_v31, %s14778_s30 }
 0x3f6   : > { %v16841_v34 = vpop.permute.xlu1 %3612 }
 0x3f7   : > { %v16844_v5 = vpop.permute.xlu0 %3610 }
 0x3f8   : > { %3728 = vrot.lane.b32.xlu1 %v773_v8, %s14778_s30  ;;  %v800_v8 = vld [vmem:[%s14969_s6 + $0xf50] sm:$0xff] }
 0x3f9   : > { %3726 = vrot.lane.b32.xlu0 %v772_v15, %s14778_s30  ;;  %v802_v15 = vld [vmem:[%s14969_s6 + $0xf60] sm:$0xff] }
 0x3fa   : > { %v16849_v16 = vpop.permute.xlu1 %3616 }
 0x3fb   : > { %v16852_v42 = vpop.permute.xlu0 %3614 }
 0x3fc   : > { %3732 = vrot.lane.b32.xlu1 %v775_v33, %s14778_s30  ;;  %v805_v33 = vld [vmem:[%s14969_s6 + $0xf78] sm:$0xff] }
 0x3fd   : > { %3730 = vrot.lane.b32.xlu0 %v774_v23, %s14778_s30  ;;  %v804_v23 = vld [vmem:[%s14969_s6 + $0xf70] sm:$0xff] }
 0x3fe   : > { %v3621_v13 = vpop.permute.xlu1 %3620 }
 0x3ff   : > { %v3619_v37 = vpop.permute.xlu0 %3618 }
 0x400   : > { %3736 = vrot.lane.b32.xlu1 %v777_v32, %s14778_s30  ;;  %v807_v32 = vld [vmem:[%s14969_s6 + $0xf88] sm:$0xff] }
 0x401   : > { %3734 = vrot.lane.b32.xlu0 %v776_v9, %s14778_s30  ;;  %v806_v9 = vld [vmem:[%s14969_s6 + $0xf80] sm:$0xff] }
 0x402   : > { %v3625_v40 = vpop.permute.xlu1 %3624 }
 0x403   : > { %v3623_v26 = vpop.permute.xlu0 %3622 }
 0x404   : > { %3740 = vrot.lane.b32.xlu1 %v779_v41, %s14778_s30  ;;  %v809_v41 = vld [vmem:[%s14969_s6 + $0xf98] sm:$0xff] }
 0x405   : > { %3738 = vrot.lane.b32.xlu0 %v778_v29, %s14778_s30  ;;  %v808_v29 = vld [vmem:[%s14969_s6 + $0xf90] sm:$0xff] }
 0x406   : > { %v3629_v45 = vpop.permute.xlu1 %3628 }
 0x407   : > { %v3627_v46 = vpop.permute.xlu0 %3626 }
 0x408   : > { %3744 = vrot.lane.b32.xlu1 %v781_v39, %s14778_s30  ;;  %v811_v39 = vld [vmem:[%s14969_s6 + $0xfa8] sm:$0xff] }
 0x409   : > { %3742 = vrot.lane.b32.xlu0 %v780_v44, %s14778_s30  ;;  %v810_v44 = vld [vmem:[%s14969_s6 + $0xfa0] sm:$0xff] }
 0x40a   : > { %v3633_v30 = vpop.permute.xlu1 %3632 }
 0x40b   : > { %v3631_v54 = vpop.permute.xlu0 %3630  ;;  %11527 = vmatprep.subr.mxu0 %v3633_v30  ;;  %v813_v30 = vld [vmem:[%s14969_s6 + $0xfb8] sm:$0xff] }
 0x40c   : > { %3748 = vrot.lane.b32.xlu1 %v783_v48, %s14778_s30  ;;  %11528 = vmatpush3.msra.mxu0 %v3601_v0  ;;  %v790_v0 = vld [vmem:[%s14969_s6 + $0xf00] sm:$0xff] }
 0x40d   : > { %3746 = vrot.lane.b32.xlu0 %v782_v49, %s14778_s30  ;;  %11529 = vmatprep.subr.mxu0 %v3631_v54 }
 0x40e   : > { %v16882_v62 = vpop.permute.xlu1 %3636  ;;  %11530 = vmatpush3.msra.mxu0 %v3599_v14 }
 0x40f   : > { %v16885_v25 = vpop.permute.xlu0 %3634  ;;  %11531 = vmatprep.subr.mxu0 %v3629_v45 }
 0x410   : > { %3752 = vrot.lane.b32.xlu1 %v785_v52, %s14778_s30  ;;  %11532 = vmatpush3.msra.mxu0 %v16807_v10 }
 0x411   : > { %3750 = vrot.lane.b32.xlu0 %v784_v53, %s14778_s30  ;;  %11533 = vmatprep.subr.mxu0 %v3627_v46  ;;  %v1502_v46 = vcombine.high %v16867_v47, %v16867_v47  ;;  %v815_v47 = vld [vmem:[%s14969_s6 + $0xfc8] sm:$0xff] }
 0x412   : > { %v16891_v35 = vpop.permute.xlu1 %3640  ;;  %11534 = vmatpush3.msra.mxu0 %v16811_v36 }
 0x413   : > { %v16895_v12 = vpop.permute.xlu0 %3638  ;;  %11535 = vmatprep.subr.mxu0 %v3625_v40  ;;  %v17006_v48 = vrot.slane %v1502_v46, %v15195_v59 }
 0x414   : > { %3756 = vrot.lane.b32.xlu1 %v787_v55, %s14778_s30  ;;  %11536 = vmatpush3.msra.mxu0 %v16795_v57  ;;  %v791_v57 = vld [vmem:[%s14969_s6 + $0xf08] sm:$0xff]  ;;  %v814_v55 = vld [vmem:[%s14969_s6 + $0xfc0] sm:$0xff] }
 0x415   : > { %3754 = vrot.lane.b32.xlu0 %v786_v58, %s14778_s30  ;;  %11537 = vmatprep.subr.mxu0 %v3623_v26  ;;  %v1518_v54 = vcombine.high %v17006_v48, %v17006_v48 }
 0x416   : > { %v16901_v10 = vpop.permute.xlu1 %3644  ;;  %11538 = vmatpush3.msra.mxu0 %v16799_v60 }
 0x417   : > { %v16905_v36 = vpop.permute.xlu0 %3642  ;;  %11539 = vmatprep.subr.mxu0 %v3621_v13  ;;  %6944 = vmatprep.mubr.f32.mxu1 %v1518_v54 }
 0x418   : > { %3760 = vrot.lane.b32.xlu1 %v789_v56, %s14778_s30  ;;  %11540 = vmatpush3.msra.mxu0 %v16783_v63  ;;  %v793_v63 = vld [vmem:[%s14969_s6 + $0xf18] sm:$0xff] }
 0x419   : > { %3758 = vrot.lane.b32.xlu0 %v788_v4, %s14778_s30  ;;  %11541 = vmatprep.subr.mxu0 %v3619_v37  ;;  %v817_v56 = vld [vmem:[%s14969_s6 + $0xfd8] sm:$0xff] }
 0x41a   : > { %v16911_v18 = vpop.permute.xlu1 %3648  ;;  %11542 = vmatpush3.msra.mxu0 %v16787_v1  ;;  %v792_v1 = vld [vmem:[%s14969_s6 + $0xf10] sm:$0xff] }
 0x41b   : > { %v16915_v60 = vpop.permute.xlu0 %3646  ;;  %11543 = vmatprep.subr.mxu0 %v16849_v16 }
 0x41c   : > { %3764 = vrot.lane.b32.xlu1 %v791_v57, %s14778_s30  ;;  %11544 = vmatpush3.msra.mxu0 %v16771_v6  ;;  %v795_v6 = vld [vmem:[%s14969_s6 + $0xf28] sm:$0xff]  ;;  %v816_v57 = vld [vmem:[%s14969_s6 + $0xfd0] sm:$0xff] }
 0x41d   : > { %3762 = vrot.lane.b32.xlu0 %v790_v0, %s14778_s30  ;;  %11545 = vmatprep.subr.mxu0 %v16852_v42 }
 0x41e   : > { %v16923_v7 = vpop.permute.xlu1 %3652  ;;  %11546 = vmatpush3.msra.mxu0 %v16775_v27  ;;  %v794_v27 = vld [vmem:[%s14969_s6 + $0xf20] sm:$0xff] }
 0x41f   : > { %v16927_v14 = vpop.permute.xlu0 %3650  ;;  %11547 = vmatprep.subr.mxu0 %v16841_v34 }
 0x420   : > { %3768 = vrot.lane.b32.xlu1 %v793_v63, %s14778_s30  ;;  %11548 = vmatpush3.msra.mxu0 %v16761_v2  ;;  %v797_v2 = vld [vmem:[%s14969_s6 + $0xf38] sm:$0xff]  ;;  %v820_v63 = vld [vmem:[%s14969_s6 + $0xff0] sm:$0xff] }
 0x421   : > { %3766 = vrot.lane.b32.xlu0 %v792_v1, %s14778_s30  ;;  %11549 = vmatprep.subr.mxu0 %v16844_v5 }
 0x422   : > { %v16935_v3 = vpop.permute.xlu1 %3656  ;;  %11550 = vmatpush3.msra.mxu0 %v16765_v19  ;;  %v796_v19 = vld [vmem:[%s14969_s6 + $0xf30] sm:$0xff] }
 0x423   : > { %v16939_v22 = vpop.permute.xlu0 %3654  ;;  %11551 = vmatprep.subr.mxu0 %v16833_v61 }
 0x424   : > { %3772 = vrot.lane.b32.xlu1 %v795_v6, %s14778_s30  ;;  %11552 = vmatpush3.msra.mxu0 %v16751_v17  ;;  %v799_v17 = vld [vmem:[%s14969_s6 + $0xf48] sm:$0xff]  ;;  %v821_v6 = vld [vmem:[%s14969_s6 + $0xff8] sm:$0xff] }
 0x425   : > { %3770 = vrot.lane.b32.xlu0 %v794_v27, %s14778_s30  ;;  %11553 = vmatprep.subr.mxu0 %v16836_v21 }
 0x426   : > { %v16947_v20 = vpop.permute.xlu1 %3660  ;;  %11554 = vmatpush3.msra.mxu0 %v16755_v24  ;;  %v798_v24 = vld [vmem:[%s14969_s6 + $0xf40] sm:$0xff] }
 0x427   : > { %v16951_v31 = vpop.permute.xlu0 %3658  ;;  %11555 = vmatprep.subr.mxu0 %v16825_v28 }
 0x428   : > { %3776 = vrot.lane.b32.xlu1 %v797_v2, %s14778_s30  ;;  %11556 = vmatpush3.msra.mxu0 %v16742_v11  ;;  %v801_v11 = vld [vmem:[%s14969_s6 + $0xf58] sm:$0xff]  ;;  %v818_v2 = vld [vmem:[%s14969_s6 + $0xfe0] sm:$0xff] }
 0x429   : > { %3774 = vrot.lane.b32.xlu0 %v796_v19, %s14778_s30  ;;  %11557 = vmatprep.subr.mxu0 %v16828_v43  ;;  %v819_v19 = vld [vmem:[%s14969_s6 + $0xfe8] sm:$0xff] }
 0x42a   : > { %v3665_v61 = vpop.permute.xlu1 %3664  ;;  %11558 = vmatpush3.msra.mxu0 %v16745_v38  ;;  %v803_v38 = vld [vmem:[%s14969_s6 + $0xf68] sm:$0xff] }
 0x42b   : > { %v3663_v21 = vpop.permute.xlu0 %3662  ;;  %6875 = vmatmul.mubr.f32.vlgmr.msra.gmra.mxu0 %v16872_v50 }
 0x42c   : > { %3780 = vrot.lane.b32.xlu1 %v799_v17, %s14778_s30 }
 0x42d   : > { %3778 = vrot.lane.b32.xlu0 %v798_v24, %s14778_s30 }
 0x42e   : > { %v16965_v28 = vpop.permute.xlu1 %3668 }
 0x42f   : > { %v16968_v43 = vpop.permute.xlu0 %3666 }
 0x430   : > { %3784 = vrot.lane.b32.xlu1 %v801_v11, %s14778_s30 }
 0x431   : > { %3782 = vrot.lane.b32.xlu0 %v800_v8, %s14778_s30  ;;  %v1373_v8 = vld [vmem:[%s14963_s25 + $0x38] sm:$0xff] }
 0x432   : > { %v16973_v34 = vpop.permute.xlu1 %3672 }
 0x433   : > { %v16976_v5 = vpop.permute.xlu0 %3670 }
 0x434   : > { %3788 = vrot.lane.b32.xlu1 %v803_v38, %s14778_s30 }
 0x435   : > { %3786 = vrot.lane.b32.xlu0 %v802_v15, %s14778_s30  ;;  %v17082_v15 = vrot.slane %v1373_v8, %v15195_v59 }
 0x436   : > { %v16981_v16 = vpop.permute.xlu1 %3676 }
 0x437   : > { %v16984_v42 = vpop.permute.xlu0 %3674 }
 0x438   : > { %3792 = vrot.lane.b32.xlu1 %v805_v33, %s14778_s30 }
 0x439   : > { %3790 = vrot.lane.b32.xlu0 %v804_v23, %s14778_s30 }
 0x43a   : > { %v16989_v13 = vpop.permute.xlu1 %3680 }
 0x43b   : > { %v16992_v37 = vpop.permute.xlu0 %3678 }
 0x43c   : > { %3796 = vrot.lane.b32.xlu1 %v807_v32, %s14778_s30 }
 0x43d   : > { %3794 = vrot.lane.b32.xlu0 %v806_v9, %s14778_s30  ;;  %v852_v9 = vld [vmem:[%s14969_s6 + $0x10f0] sm:$0xff] }
 0x43e   : > { %v3685_v40 = vpop.permute.xlu1 %3684 }
 0x43f   : > { %v3683_v26 = vpop.permute.xlu0 %3682 }
 0x440   : > { %3800 = vrot.lane.b32.xlu1 %v809_v41, %s14778_s30  ;;  %v837_v41 = vld [vmem:[%s14969_s6 + $0x1078] sm:$0xff] }
 0x441   : > { %3798 = vrot.lane.b32.xlu0 %v808_v29, %s14778_s30  ;;  %v836_v29 = vld [vmem:[%s14969_s6 + $0x1070] sm:$0xff] }
 0x442   : > { %v3689_v45 = vpop.permute.xlu1 %3688 }
 0x443   : > { %v3687_v50 = vpop.permute.xlu0 %3686 }
 0x444   : > { %3804 = vrot.lane.b32.xlu1 %v811_v39, %s14778_s30  ;;  %v885_v39 = vld [vmem:[%s14969_s6 + $0x11f8] sm:$0xff] }
 0x445   : > { %3802 = vrot.lane.b32.xlu0 %v810_v44, %s14778_s30  ;;  %v851_v44 = vld [vmem:[%s14969_s6 + $0x10e8] sm:$0xff] }
 0x446   : > { %v3693_v49 = vpop.permute.xlu1 %3692 }
 0x447   : > { %v3691_v52 = vpop.permute.xlu0 %3690 }
 0x448   : > { %3808 = vrot.lane.b32.xlu1 %v813_v30, %s14778_s30  ;;  %v835_v30 = vld [vmem:[%s14969_s6 + $0x1068] sm:$0xff] }
 0x449   : > { %3806 = vrot.lane.b32.xlu0 %v812_v51, %s14778_s30  ;;  %v884_v51 = vld [vmem:[%s14969_s6 + $0x11f0] sm:$0xff] }
 0x44a   : > { %v3697_v53 = vpop.permute.xlu1 %3696 }
 0x44b   : > { %v3695_v58 = vpop.permute.xlu0 %3694  ;;  %11562 = vmatprep.subr.mxu1 %v3697_v53  ;;  %v868_v53 = vld [vmem:[%s14969_s6 + $0x1170] sm:$0xff] }
 0x44c   : > { %3812 = vrot.lane.b32.xlu1 %v815_v47, %s14778_s30  ;;  %11563 = vmatpush3.msra.mxu1 %v3665_v61  ;;  %v822_v61 = vld [vmem:[%s14969_s6 + $0x1000] sm:$0xff] }
 0x44d   : > { %3810 = vrot.lane.b32.xlu0 %v814_v55, %s14778_s30  ;;  %11564 = vmatprep.subr.mxu1 %v3695_v58  ;;  %v834_v58 = vld [vmem:[%s14969_s6 + $0x1060] sm:$0xff] }
 0x44e   : > { %v17020_v4 = vpop.permute.xlu1 %3700  ;;  %11565 = vmatpush3.msra.mxu1 %v3663_v21 }
 0x44f   : > { %v17023_v0 = vpop.permute.xlu0 %3698  ;;  %11566 = vmatprep.subr.mxu1 %v3693_v49 }
 0x450   : > { %3816 = vrot.lane.b32.xlu1 %v817_v56, %s14778_s30  ;;  %11567 = vmatpush3.msra.mxu1 %v16947_v20 }
 0x451   : > { %3814 = vrot.lane.b32.xlu0 %v816_v57, %s14778_s30  ;;  %11568 = vmatprep.subr.mxu1 %v3691_v52  ;;  %v850_v52 = vld [vmem:[%s14969_s6 + $0x10e0] sm:$0xff]  ;;  %v883_v57 = vld [vmem:[%s14969_s6 + $0x11e8] sm:$0xff] }
 0x452   : > { %v17029_v1 = vpop.permute.xlu1 %3704  ;;  %11569 = vmatpush3.msra.mxu1 %v16951_v31 }
 0x453   : > { %v17033_v27 = vpop.permute.xlu0 %3702  ;;  %11570 = vmatprep.subr.mxu1 %v3689_v45 }
 0x454   : > { %3822 = vrot.lane.b32.xlu1 %v820_v63, %s14778_s30  ;;  %11571 = vmatpush3.msra.mxu1 %v16935_v3  ;;  %v823_v3 = vld [vmem:[%s14969_s6 + $0x1008] sm:$0xff] }
 0x455   : > { %3824 = vrot.lane.b32.xlu0 %v821_v6, %s14778_s30  ;;  %11572 = vmatprep.subr.mxu1 %v3687_v50  ;;  %v869_v50 = vld [vmem:[%s14969_s6 + $0x1178] sm:$0xff] }
 0x456   : > { %v17039_v20 = vpop.permute.xlu1 %3708  ;;  %11573 = vmatpush3.msra.mxu1 %v16939_v22  ;;  %v849_v6 = vld [vmem:[%s14969_s6 + $0x10d8] sm:$0xff] }
 0x457   : > { %v17043_v31 = vpop.permute.xlu0 %3706  ;;  %11574 = vmatprep.subr.mxu1 %v3685_v40 }
 0x458   : > { %3818 = vrot.lane.b32.xlu1 %v818_v2, %s14778_s30  ;;  %11575 = vmatpush3.msra.mxu1 %v16923_v7  ;;  %v825_v7 = vld [vmem:[%s14969_s6 + $0x1018] sm:$0xff] }
 0x459   : > { %3820 = vrot.lane.b32.xlu0 %v819_v19, %s14778_s30  ;;  %11576 = vmatprep.subr.mxu1 %v3683_v26  ;;  %v867_v19 = vld [vmem:[%s14969_s6 + $0x1168] sm:$0xff] }
 0x45a   : > { %v17049_v17 = vpop.permute.xlu1 %3712  ;;  %11577 = vmatpush3.msra.mxu1 %v16927_v14  ;;  %v824_v14 = vld [vmem:[%s14969_s6 + $0x1010] sm:$0xff] }
 0x45b   : > { %v17053_v22 = vpop.permute.xlu0 %3710  ;;  %11578 = vmatprep.subr.mxu1 %v16989_v13 }
 0x45c   : > { %3828 = vrot.lane.b32.xlu1 %v823_v3, %s14778_s30  ;;  %11579 = vmatpush3.msra.mxu1 %v16911_v18  ;;  %v827_v18 = vld [vmem:[%s14969_s6 + $0x1028] sm:$0xff] }
 0x45d   : > { %3826 = vrot.lane.b32.xlu0 %v822_v61, %s14778_s30  ;;  %11580 = vmatprep.subr.mxu1 %v16992_v37  ;;  %v833_v61 = vld [vmem:[%s14969_s6 + $0x1058] sm:$0xff] }
 0x45e   : > { %v17061_v24 = vpop.permute.xlu1 %3716  ;;  %11581 = vmatpush3.msra.mxu1 %v16915_v60  ;;  %v826_v60 = vld [vmem:[%s14969_s6 + $0x1020] sm:$0xff] }
 0x45f   : > { %v17065_v21 = vpop.permute.xlu0 %3714  ;;  %11582 = vmatprep.subr.mxu1 %v16981_v16 }
 0x460   : > { %3832 = vrot.lane.b32.xlu1 %v825_v7, %s14778_s30  ;;  %11583 = vmatpush3.msra.mxu1 %v16901_v10  ;;  %v829_v10 = vld [vmem:[%s14969_s6 + $0x1038] sm:$0xff] }
 0x461   : > { %3830 = vrot.lane.b32.xlu0 %v824_v14, %s14778_s30  ;;  %11584 = vmatprep.subr.mxu1 %v16984_v42  ;;  %v882_v14 = vld [vmem:[%s14969_s6 + $0x11e0] sm:$0xff] }
 0x462   : > { %v17073_v11 = vpop.permute.xlu1 %3720  ;;  %11585 = vmatpush3.msra.mxu1 %v16905_v36  ;;  %v1534_v36 = vcombine.high %v17082_v15, %v17082_v15 }
 0x463   : > { %v17078_v38 = vpop.permute.xlu0 %3718  ;;  %11586 = vmatprep.subr.mxu1 %v16973_v34  ;;  %v828_v34 = vld [vmem:[%s14969_s6 + $0x1030] sm:$0xff] }
 0x464   : > { %3836 = vrot.lane.b32.xlu1 %v827_v18, %s14778_s30  ;;  %11587 = vmatpush3.msra.mxu1 %v16891_v35  ;;  %v831_v35 = vld [vmem:[%s14969_s6 + $0x1048] sm:$0xff] }
 0x465   : > { %3834 = vrot.lane.b32.xlu0 %v826_v60, %s14778_s30  ;;  %11588 = vmatprep.subr.mxu1 %v16976_v5  ;;  %v1519_v5 = vcombine.high %v1373_v8, %v1373_v8  ;;  %v848_v60 = vld [vmem:[%s14969_s6 + $0x10d0] sm:$0xff] }
 0x466   : > { %v17091_v33 = vpop.permute.xlu1 %3724  ;;  %11589 = vmatpush3.msra.mxu1 %v16895_v12  ;;  %7014 = vmatprep.mubr.f32.mxu0 %v1534_v36  ;;  %v830_v12 = vld [vmem:[%s14969_s6 + $0x1040] sm:$0xff] }
 0x467   : > { %v17095_v16 = vpop.permute.xlu0 %3722  ;;  %11590 = vmatprep.subr.mxu1 %v16965_v28  ;;  %v17107_v42 = vrot.slane %v1519_v5, %v15195_v59 }
 0x468   : > { %3840 = vrot.lane.b32.xlu1 %v829_v10, %s14778_s30  ;;  %11591 = vmatpush3.msra.mxu1 %v16882_v62  ;;  %v853_v62 = vld [vmem:[%s14969_s6 + $0x10f8] sm:$0xff]  ;;  %v866_v10 = vld [vmem:[%s14969_s6 + $0x1160] sm:$0xff] }
 0x469   : > { %3838 = vrot.lane.b32.xlu0 %v828_v34, %s14778_s30  ;;  %11592 = vmatprep.subr.mxu1 %v16968_v43  ;;  %v1535_v43 = vcombine.high %v17107_v42, %v17107_v42 }
 0x46a   : > { %v3729_v23 = vpop.permute.xlu1 %3728  ;;  %11593 = vmatpush3.msra.mxu1 %v16885_v25  ;;  %v832_v25 = vld [vmem:[%s14969_s6 + $0x1050] sm:$0xff] }
 0x46b   : > { %v3727_v28 = vpop.permute.xlu0 %3726  ;;  %6945 = vmatmul.mubr.f32.vlgmr.msra.gmra.mxu1 %v17006_v48 }
 0x46c   : > { %3844 = vrot.lane.b32.xlu1 %v831_v35, %s14778_s30  ;;  %7084 = vmatprep.mubr.f32.mxu1 %v1535_v43  ;;  %v881_v35 = vld [vmem:[%s14969_s6 + $0x11d8] sm:$0xff] }
 0x46d   : > { %3842 = vrot.lane.b32.xlu0 %v830_v12, %s14778_s30 }
 0x46e   : > { %v17114_v32 = vpop.permute.xlu1 %3732 }
 0x46f   : > { %v17117_v13 = vpop.permute.xlu0 %3730 }
 0x470   : > { %3888 = vrot.lane.b32.xlu1 %v853_v62, %s14778_s30 }
 0x471   : > { %3846 = vrot.lane.b32.xlu0 %v832_v25, %s14778_s30 }
 0x472   : > { %v17122_v37 = vpop.permute.xlu1 %3736 }
 0x473   : > { %v17125_v40 = vpop.permute.xlu0 %3734 }
 0x474   : > { %3886 = vrot.lane.b32.xlu1 %v852_v9, %s14778_s30 }
 0x475   : > { %3856 = vrot.lane.b32.xlu0 %v837_v41, %s14778_s30 }
 0x476   : > { %v17130_v26 = vpop.permute.xlu1 %3740 }
 0x477   : > { %v17133_v45 = vpop.permute.xlu0 %3738 }
 0x478   : > { %3854 = vrot.lane.b32.xlu1 %v836_v29, %s14778_s30 }
 0x479   : > { %3952 = vrot.lane.b32.xlu0 %v885_v39, %s14778_s30  ;;  %v842_v39 = vld [vmem:[%s14969_s6 + $0x10a0] sm:$0xff] }
 0x47a   : > { %v17138_v46 = vpop.permute.xlu1 %3744 }
 0x47b   : > { %v17141_v48 = vpop.permute.xlu0 %3742 }
 0x47c   : > { %3884 = vrot.lane.b32.xlu1 %v851_v44, %s14778_s30  ;;  %v860_v44 = vld [vmem:[%s14969_s6 + $0x1130] sm:$0xff] }
 0x47d   : > { %3920 = vrot.lane.b32.xlu0 %v869_v50, %s14778_s30  ;;  %v859_v50 = vld [vmem:[%s14969_s6 + $0x1128] sm:$0xff] }
 0x47e   : > { %v3749_v49 = vpop.permute.xlu1 %3748 }
 0x47f   : > { %v3747_v54 = vpop.permute.xlu0 %3746 }
 0x480   : > { %3852 = vrot.lane.b32.xlu1 %v835_v30, %s14778_s30  ;;  %v875_v30 = vld [vmem:[%s14969_s6 + $0x11a8] sm:$0xff] }
 0x481   : > { %3950 = vrot.lane.b32.xlu0 %v884_v51, %s14778_s30  ;;  %v874_v51 = vld [vmem:[%s14969_s6 + $0x11a0] sm:$0xff] }
 0x482   : > { %v3753_v47 = vpop.permute.xlu1 %3752 }
 0x483   : > { %v3751_v55 = vpop.permute.xlu0 %3750 }
 0x484   : > { %3882 = vrot.lane.b32.xlu1 %v850_v52, %s14778_s30  ;;  %v841_v52 = vld [vmem:[%s14969_s6 + $0x1098] sm:$0xff] }
 0x485   : > { %3918 = vrot.lane.b32.xlu0 %v868_v53, %s14778_s30  ;;  %v840_v53 = vld [vmem:[%s14969_s6 + $0x1090] sm:$0xff] }
 0x486   : > { %v3757_v56 = vpop.permute.xlu1 %3756 }
 0x487   : > { %v3755_v63 = vpop.permute.xlu0 %3754 }
 0x488   : > { %3850 = vrot.lane.b32.xlu1 %v834_v58, %s14778_s30  ;;  %v858_v58 = vld [vmem:[%s14969_s6 + $0x1120] sm:$0xff] }
 0x489   : > { %3948 = vrot.lane.b32.xlu0 %v883_v57, %s14778_s30  ;;  %v857_v57 = vld [vmem:[%s14969_s6 + $0x1118] sm:$0xff] }
 0x48a   : > { %v3761_v2 = vpop.permute.xlu1 %3760 }
 0x48b   : > { %v3759_v3 = vpop.permute.xlu0 %3758  ;;  %11597 = vmatprep.subr.mxu0 %v3761_v2 }
 0x48c   : > { %3880 = vrot.lane.b32.xlu1 %v849_v6, %s14778_s30  ;;  %11598 = vmatpush3.msra.mxu0 %v3729_v23  ;;  %v847_v23 = vld [vmem:[%s14969_s6 + $0x10c8] sm:$0xff]  ;;  %v873_v6 = vld [vmem:[%s14969_s6 + $0x1198] sm:$0xff] }
 0x48d   : > { %3916 = vrot.lane.b32.xlu0 %v867_v19, %s14778_s30  ;;  %11599 = vmatprep.subr.mxu0 %v3759_v3  ;;  %v872_v19 = vld [vmem:[%s14969_s6 + $0x1190] sm:$0xff] }
 0x48e   : > { %v17162_v7 = vpop.permute.xlu1 %3764  ;;  %11600 = vmatpush3.msra.mxu0 %v3727_v28 }
 0x48f   : > { %v17165_v18 = vpop.permute.xlu0 %3762  ;;  %11601 = vmatprep.subr.mxu0 %v3757_v56 }
 0x490   : > { %3848 = vrot.lane.b32.xlu1 %v833_v61, %s14778_s30  ;;  %11602 = vmatpush3.msra.mxu0 %v17091_v33  ;;  %v865_v33 = vld [vmem:[%s14969_s6 + $0x1158] sm:$0xff]  ;;  %v839_v61 = vld [vmem:[%s14969_s6 + $0x1088] sm:$0xff] }
 0x491   : > { %3946 = vrot.lane.b32.xlu0 %v882_v14, %s14778_s30  ;;  %11603 = vmatprep.subr.mxu0 %v3755_v63 }
 0x492   : > { %v17171_v8 = vpop.permute.xlu1 %3768  ;;  %11604 = vmatpush3.msra.mxu0 %v17095_v16 }
 0x493   : > { %v17175_v36 = vpop.permute.xlu0 %3766  ;;  %11605 = vmatprep.subr.mxu0 %v3753_v47 }
 0x494   : > { %3878 = vrot.lane.b32.xlu1 %v848_v60, %s14778_s30  ;;  %11606 = vmatpush3.msra.mxu0 %v17073_v11  ;;  %v880_v11 = vld [vmem:[%s14969_s6 + $0x11d0] sm:$0xff]  ;;  %v17291_v60 = vld [vmem:[%s14963_s25 + $0x40] sm:$0xff] }
 0x495   : > { %3914 = vrot.lane.b32.xlu0 %v866_v10, %s14778_s30  ;;  %11607 = vmatprep.subr.mxu0 %v3751_v55  ;;  %v17296_v10 = vrot.slane %v17291_v60, %v15195_v59 }
 0x496   : > { %v17181_v34 = vpop.permute.xlu1 %3772  ;;  %11608 = vmatpush3.msra.mxu0 %v17078_v38 }
 0x497   : > { %v17185_v16 = vpop.permute.xlu0 %3770  ;;  %11609 = vmatprep.subr.mxu0 %v3749_v49 }
 0x498   : > { %3912 = vrot.lane.b32.xlu1 %v865_v33, %s14778_s30  ;;  %11610 = vmatpush3.msra.mxu0 %v17061_v24  ;;  %v846_v24 = vld [vmem:[%s14969_s6 + $0x10c0] sm:$0xff] }
 0x499   : > { %3944 = vrot.lane.b32.xlu0 %v881_v35, %s14778_s30  ;;  %11611 = vmatprep.subr.mxu0 %v3747_v54  ;;  %v838_v33 = vld [vmem:[%s14969_s6 + $0x1080] sm:$0xff] }
 0x49a   : > { %v17191_v5 = vpop.permute.xlu1 %3776  ;;  %11612 = vmatpush3.msra.mxu0 %v17065_v21  ;;  %v864_v21 = vld [vmem:[%s14969_s6 + $0x1150] sm:$0xff] }
 0x49b   : > { %v17195_v38 = vpop.permute.xlu0 %3774  ;;  %11613 = vmatprep.subr.mxu0 %v17138_v46 }
 0x49c   : > { %3942 = vrot.lane.b32.xlu1 %v880_v11, %s14778_s30  ;;  %11614 = vmatpush3.msra.mxu0 %v17049_v17  ;;  %v863_v17 = vld [vmem:[%s14969_s6 + $0x1148] sm:$0xff]  ;;  %v856_v11 = vld [vmem:[%s14969_s6 + $0x1110] sm:$0xff] }
 0x49d   : > { %3876 = vrot.lane.b32.xlu0 %v847_v23, %s14778_s30  ;;  %11615 = vmatprep.subr.mxu0 %v17141_v48  ;;  %v1551_v23 = vcombine.high %v17296_v10, %v17296_v10 }
 0x49e   : > { %v17203_v12 = vpop.permute.xlu1 %3780  ;;  %11616 = vmatpush3.msra.mxu0 %v17053_v22  ;;  %v879_v22 = vld [vmem:[%s14969_s6 + $0x11c8] sm:$0xff] }
 0x49f   : > { %v17207_v28 = vpop.permute.xlu0 %3778  ;;  %11617 = vmatprep.subr.mxu0 %v17130_v26 }
 0x4a0   : > { %3874 = vrot.lane.b32.xlu1 %v846_v24, %s14778_s30  ;;  %11618 = vmatpush3.msra.mxu0 %v17039_v20  ;;  %v878_v20 = vld [vmem:[%s14969_s6 + $0x11c0] sm:$0xff] }
 0x4a1   : > { %3910 = vrot.lane.b32.xlu0 %v864_v21, %s14778_s30  ;;  %11619 = vmatprep.subr.mxu0 %v17133_v45  ;;  %v855_v21 = vld [vmem:[%s14969_s6 + $0x1108] sm:$0xff] }
 0x4a2   : > { %v17215_v62 = vpop.permute.xlu1 %3784  ;;  %11620 = vmatpush3.msra.mxu0 %v17043_v31  ;;  %v845_v31 = vld [vmem:[%s14969_s6 + $0x10b8] sm:$0xff] }
 0x4a3   : > { %v17219_v43 = vpop.permute.xlu0 %3782  ;;  %11621 = vmatprep.subr.mxu0 %v17122_v37 }
 0x4a4   : > { %3908 = vrot.lane.b32.xlu1 %v863_v17, %s14778_s30  ;;  %11622 = vmatpush3.msra.mxu0 %v17029_v1  ;;  %v844_v1 = vld [vmem:[%s14969_s6 + $0x10b0] sm:$0xff] }
 0x4a5   : > { %3940 = vrot.lane.b32.xlu0 %v879_v22, %s14778_s30  ;;  %11623 = vmatprep.subr.mxu0 %v17125_v40  ;;  %v877_v40 = vld [vmem:[%s14969_s6 + $0x11b8] sm:$0xff]  ;;  %v871_v22 = vld [vmem:[%s14969_s6 + $0x1188] sm:$0xff] }
 0x4a6   : > { %v17227_v25 = vpop.permute.xlu1 %3788  ;;  %11624 = vmatpush3.msra.mxu0 %v17033_v27  ;;  %v862_v27 = vld [vmem:[%s14969_s6 + $0x1140] sm:$0xff] }
 0x4a7   : > { %v17231_v9 = vpop.permute.xlu0 %3786  ;;  %11625 = vmatprep.subr.mxu0 %v17114_v32 }
 0x4a8   : > { %3938 = vrot.lane.b32.xlu1 %v878_v20, %s14778_s30  ;;  %11626 = vmatpush3.msra.mxu0 %v17020_v4  ;;  %v861_v4 = vld [vmem:[%s14969_s6 + $0x1138] sm:$0xff] }
 0x4a9   : > { %3872 = vrot.lane.b32.xlu0 %v845_v31, %s14778_s30  ;;  %11627 = vmatprep.subr.mxu0 %v17117_v13  ;;  %v870_v31 = vld [vmem:[%s14969_s6 + $0x1180] sm:$0xff] }
 0x4aa   : > { %v3793_v37 = vpop.permute.xlu1 %3792  ;;  %11628 = vmatpush3.msra.mxu0 %v17023_v0  ;;  %v876_v0 = vld [vmem:[%s14969_s6 + $0x11b0] sm:$0xff] }
 0x4ab   : > { %v3791_v41 = vpop.permute.xlu0 %3790  ;;  %7015 = vmatmul.mubr.f32.vlgmr.msra.gmra.mxu0 %v17082_v15  ;;  %v843_v15 = vld [vmem:[%s14969_s6 + $0x10a8] sm:$0xff] }
 0x4ac   : > { %3870 = vrot.lane.b32.xlu1 %v844_v1, %s14778_s30  ;;  %7154 = vmatprep.mubr.f32.mxu0 %v1551_v23  ;;  %v854_v1 = vld [vmem:[%s14969_s6 + $0x1100] sm:$0xff] }
 0x4ad   : > { %3906 = vrot.lane.b32.xlu0 %v862_v27, %s14778_s30  ;;  %v916_v27 = vld [vmem:[%s14969_s6 + $0x12f0] sm:$0xff] }
 0x4ae   : > { %v17245_v32 = vpop.permute.xlu1 %3796 }
 0x4af   : > { %v17248_v13 = vpop.permute.xlu0 %3794 }
 0x4b0   : > { %3904 = vrot.lane.b32.xlu1 %v861_v4, %s14778_s30 }
 0x4b1   : > { %3936 = vrot.lane.b32.xlu0 %v877_v40, %s14778_s30 }
 0x4b2   : > { %v17253_v29 = vpop.permute.xlu1 %3800 }
 0x4b3   : > { %v17256_v26 = vpop.permute.xlu0 %3798 }
 0x4b4   : > { %3934 = vrot.lane.b32.xlu1 %v876_v0, %s14778_s30 }
 0x4b5   : > { %3868 = vrot.lane.b32.xlu0 %v843_v15, %s14778_s30 }
 0x4b6   : > { %v17261_v45 = vpop.permute.xlu1 %3804 }
 0x4b7   : > { %v17264_v46 = vpop.permute.xlu0 %3802 }
 0x4b8   : > { %3866 = vrot.lane.b32.xlu1 %v842_v39, %s14778_s30  ;;  %v899_v39 = vld [vmem:[%s14969_s6 + $0x1268] sm:$0xff] }
 0x4b9   : > { %3902 = vrot.lane.b32.xlu0 %v860_v44, %s14778_s30  ;;  %v914_v44 = vld [vmem:[%s14969_s6 + $0x12e0] sm:$0xff] }
 0x4ba   : > { %v17269_v48 = vpop.permute.xlu1 %3808 }
 0x4bb   : > { %v17272_v49 = vpop.permute.xlu0 %3806 }
 0x4bc   : > { %3900 = vrot.lane.b32.xlu1 %v859_v50, %s14778_s30 }
 0x4bd   : > { %3932 = vrot.lane.b32.xlu0 %v875_v30, %s14778_s30 }
 0x4be   : > { %v3813_v54 = vpop.permute.xlu1 %3812 }
 0x4bf   : > { %v3811_v47 = vpop.permute.xlu0 %3810 }
 0x4c0   : > { %3930 = vrot.lane.b32.xlu1 %v874_v51, %s14778_s30 }
 0x4c1   : > { %3864 = vrot.lane.b32.xlu0 %v841_v52, %s14778_s30 }
 0x4c2   : > { %v3817_v55 = vpop.permute.xlu1 %3816 }
 0x4c3   : > { %v3815_v56 = vpop.permute.xlu0 %3814 }
 0x4c4   : > { %3862 = vrot.lane.b32.xlu1 %v840_v53, %s14778_s30 }
 0x4c5   : > { %3898 = vrot.lane.b32.xlu0 %v858_v58, %s14778_s30 }
 0x4c6   : > { %v3823_v63 = vpop.permute.xlu1 %3822 }
 0x4c7   : > { %v3825_v2 = vpop.permute.xlu0 %3824 }
 0x4c8   : > { %11632 = vmatprep.subr.mxu1 %v3825_v2  ;;  %3896 = vrot.lane.b32.xlu1 %v857_v57, %s14778_s30  ;;  %v929_v2 = vld [vmem:[%s14969_s6 + $0x1358] sm:$0xff] }
 0x4c9   : > { %3928 = vrot.lane.b32.xlu0 %v873_v6, %s14778_s30  ;;  %11633 = vmatpush3.msra.mxu1 %v3793_v37 }
 0x4ca   : > { %11634 = vmatprep.subr.mxu1 %v3823_v63  ;;  %v3819_v3 = vpop.permute.xlu1 %3818  ;;  %v912_v63 = vld [vmem:[%s14969_s6 + $0x12d0] sm:$0xff] }
 0x4cb   : > { %11635 = vmatpush3.msra.mxu1 %v3791_v41  ;;  %v3821_v14 = vpop.permute.xlu0 %3820  ;;  %v1536_v41 = vcombine.high %v17291_v60, %v17291_v60  ;;  %v911_v60 = vld [vmem:[%s14969_s6 + $0x12c8] sm:$0xff] }
 0x4cc   : > { %11636 = vmatprep.subr.mxu1 %v3821_v14  ;;  %3926 = vrot.lane.b32.xlu1 %v872_v19, %s14778_s30 }
 0x4cd   : > { %3860 = vrot.lane.b32.xlu0 %v839_v61, %s14778_s30  ;;  %11637 = vmatpush3.msra.mxu1 %v17227_v25  ;;  %v17366_v0 = vrot.slane %v1536_v41, %v15195_v59  ;;  %v894_v41 = vld [vmem:[%s14969_s6 + $0x1240] sm:$0xff] }
 0x4ce   : > { %11638 = vmatprep.subr.mxu1 %v3819_v3  ;;  %v17301_v35 = vpop.permute.xlu1 %3828  ;;  %v896_v3 = vld [vmem:[%s14969_s6 + $0x1250] sm:$0xff] }
 0x4cf   : > { %11639 = vmatpush3.msra.mxu1 %v17231_v9  ;;  %v17307_v24 = vpop.permute.xlu0 %3826 }
 0x4d0   : > { %11640 = vmatprep.subr.mxu1 %v3817_v55  ;;  %3858 = vrot.lane.b32.xlu1 %v838_v33, %s14778_s30  ;;  %v897_v55 = vld [vmem:[%s14969_s6 + $0x1258] sm:$0xff]  ;;  %v944_v33 = vld [vmem:[%s14969_s6 + $0x13d0] sm:$0xff] }
 0x4d1   : > { %3894 = vrot.lane.b32.xlu0 %v856_v11, %s14778_s30  ;;  %11641 = vmatpush3.msra.mxu1 %v17215_v62  ;;  %v917_v62 = vld [vmem:[%s14969_s6 + $0x12f8] sm:$0xff] }
 0x4d2   : > { %11642 = vmatprep.subr.mxu1 %v3815_v56  ;;  %v17313_v17 = vpop.permute.xlu1 %3832  ;;  %v945_v56 = vld [vmem:[%s14969_s6 + $0x13d8] sm:$0xff] }
 0x4d3   : > { %11643 = vmatpush3.msra.mxu1 %v17219_v43  ;;  %v17317_v20 = vpop.permute.xlu0 %3830 }
 0x4d4   : > { %11644 = vmatprep.subr.mxu1 %v3813_v54  ;;  %3892 = vrot.lane.b32.xlu1 %v855_v21, %s14778_s30  ;;  %v913_v54 = vld [vmem:[%s14969_s6 + $0x12d8] sm:$0xff]  ;;  %v895_v21 = vld [vmem:[%s14969_s6 + $0x1248] sm:$0xff] }
 0x4d5   : > { %3924 = vrot.lane.b32.xlu0 %v871_v22, %s14778_s30  ;;  %11645 = vmatpush3.msra.mxu1 %v17203_v12  ;;  %v901_v12 = vld [vmem:[%s14969_s6 + $0x1278] sm:$0xff] }
 0x4d6   : > { %11646 = vmatprep.subr.mxu1 %v3811_v47  ;;  %v17323_v25 = vpop.permute.xlu1 %3836  ;;  %v930_v47 = vld [vmem:[%s14969_s6 + $0x1360] sm:$0xff] }
 0x4d7   : > { %11647 = vmatpush3.msra.mxu1 %v17207_v28  ;;  %v17327_v43 = vpop.permute.xlu0 %3834 }
 0x4d8   : > { %11648 = vmatprep.subr.mxu1 %v17269_v48  ;;  %4016 = vrot.lane.b32.xlu1 %v917_v62, %s14778_s30  ;;  %v898_v48 = vld [vmem:[%s14969_s6 + $0x1260] sm:$0xff]  ;;  %v928_v62 = vld [vmem:[%s14969_s6 + $0x1350] sm:$0xff] }
 0x4d9   : > { %3922 = vrot.lane.b32.xlu0 %v870_v31, %s14778_s30  ;;  %11649 = vmatpush3.msra.mxu1 %v17191_v5  ;;  %v949_v5 = vld [vmem:[%s14969_s6 + $0x13f8] sm:$0xff] }
 0x4da   : > { %11650 = vmatprep.subr.mxu1 %v17272_v49  ;;  %v17335_v9 = vpop.permute.xlu1 %3840  ;;  %v946_v49 = vld [vmem:[%s14969_s6 + $0x13e0] sm:$0xff] }
 0x4db   : > { %11651 = vmatpush3.msra.mxu1 %v17195_v38  ;;  %v17339_v28 = vpop.permute.xlu0 %3838 }
 0x4dc   : > { %11652 = vmatprep.subr.mxu1 %v17261_v45  ;;  %3984 = vrot.lane.b32.xlu1 %v901_v12, %s14778_s30  ;;  %v910_v12 = vld [vmem:[%s14969_s6 + $0x12c0] sm:$0xff] }
 0x4dd   : > { %3890 = vrot.lane.b32.xlu0 %v854_v1, %s14778_s30  ;;  %11653 = vmatpush3.msra.mxu1 %v17181_v34  ;;  %v933_v34 = vld [vmem:[%s14969_s6 + $0x1378] sm:$0xff] }
 0x4de   : > { %11654 = vmatprep.subr.mxu1 %v17264_v46  ;;  %v17347_v37 = vpop.permute.xlu1 %3844 }
 0x4df   : > { %11655 = vmatpush3.msra.mxu1 %v17185_v16  ;;  %v17351_v38 = vpop.permute.xlu0 %3842  ;;  %v900_v16 = vld [vmem:[%s14969_s6 + $0x1270] sm:$0xff] }
 0x4e0   : > { %11656 = vmatprep.subr.mxu1 %v17253_v29  ;;  %4080 = vrot.lane.b32.xlu1 %v949_v5, %s14778_s30  ;;  %v915_v29 = vld [vmem:[%s14969_s6 + $0x12e8] sm:$0xff] }
 0x4e1   : > { %4014 = vrot.lane.b32.xlu0 %v916_v27, %s14778_s30  ;;  %11657 = vmatpush3.msra.mxu1 %v17171_v8  ;;  %v948_v8 = vld [vmem:[%s14969_s6 + $0x13f0] sm:$0xff]  ;;  %v943_v5 = vld [vmem:[%s14969_s6 + $0x13c8] sm:$0xff] }
 0x4e2   : > { %11658 = vmatprep.subr.mxu1 %v17256_v26  ;;  %v3889_v4 = vpop.permute.xlu1 %3888  ;;  %v1552_v26 = vcombine.high %v17366_v0, %v17366_v0 }
 0x4e3   : > { %11659 = vmatpush3.msra.mxu1 %v17175_v36  ;;  %v17363_v40 = vpop.permute.xlu0 %3846  ;;  %11667 = vmatprep.subr.mxu0 %v3889_v4  ;;  %v927_v4 = vld [vmem:[%s14969_s6 + $0x1348] sm:$0xff] }
 0x4e4   : > { %11660 = vmatprep.subr.mxu1 %v17245_v32  ;;  %4048 = vrot.lane.b32.xlu1 %v933_v34, %s14778_s30 }
 0x4e5   : > { %3982 = vrot.lane.b32.xlu0 %v900_v16, %s14778_s30  ;;  %11661 = vmatpush3.msra.mxu1 %v17162_v7  ;;  %v932_v7 = vld [vmem:[%s14969_s6 + $0x1370] sm:$0xff] }
 0x4e6   : > { %11662 = vmatprep.subr.mxu1 %v17248_v13  ;;  %v3887_v36 = vpop.permute.xlu1 %3886 }
 0x4e7   : > { %11663 = vmatpush3.msra.mxu1 %v17165_v18  ;;  %v3857_v15 = vpop.permute.xlu0 %3856  ;;  %v947_v18 = vld [vmem:[%s14969_s6 + $0x13e8] sm:$0xff] }
 0x4e8   : > { %11668 = vmatpush3.msra.mxu0 %v3857_v15  ;;  %4078 = vrot.lane.b32.xlu1 %v948_v8, %s14778_s30 }
 0x4e9   : > { %4012 = vrot.lane.b32.xlu0 %v915_v29, %s14778_s30  ;;  %11669 = vmatprep.subr.mxu0 %v3887_v36  ;;  %v893_v29 = vld [vmem:[%s14969_s6 + $0x1238] sm:$0xff] }
 0x4ea   : > { %v3855_v32 = vpop.permute.xlu1 %3854  ;;  %7085 = vmatmul.mubr.f32.vlgmr.msra.gmra.mxu1 %v17107_v42  ;;  %v931_v42 = vld [vmem:[%s14969_s6 + $0x1368] sm:$0xff] }
 0x4eb   : > { %v3953_v13 = vpop.permute.xlu0 %3952  ;;  %11670 = vmatpush3.msra.mxu0 %v3855_v32  ;;  %7224 = vmatprep.mubr.f32.mxu1 %v1552_v26 }
 0x4ec   : > { %11702 = vmatprep.subr.mxu1 %v3953_v13  ;;  %4046 = vrot.lane.b32.xlu1 %v932_v7, %s14778_s30  ;;  %v908_v7 = vld [vmem:[%s14969_s6 + $0x12b0] sm:$0xff] }
 0x4ed   : > { %3980 = vrot.lane.b32.xlu0 %v899_v39, %s14778_s30  ;;  %v941_v39 = vld [vmem:[%s14969_s6 + $0x13b8] sm:$0xff] }
 0x4ee   : > { %v3885_v45 = vpop.permute.xlu1 %3884 }
 0x4ef   : > { %v3921_v46 = vpop.permute.xlu0 %3920  ;;  %11671 = vmatprep.subr.mxu0 %v3885_v45 }
 0x4f0   : > { %11703 = vmatpush3.msra.mxu1 %v3921_v46  ;;  %4076 = vrot.lane.b32.xlu1 %v947_v18, %s14778_s30  ;;  %v892_v18 = vld [vmem:[%s14969_s6 + $0x1230] sm:$0xff]  ;;  %v907_v46 = vld [vmem:[%s14969_s6 + $0x12a8] sm:$0xff] }
 0x4f1   : > { %4010 = vrot.lane.b32.xlu0 %v914_v44, %s14778_s30 }
 0x4f2   : > { %v3853_v50 = vpop.permute.xlu1 %3852 }
 0x4f3   : > { %v3951_v30 = vpop.permute.xlu0 %3950  ;;  %11672 = vmatpush3.msra.mxu0 %v3853_v50 }
 0x4f4   : > { %11704 = vmatprep.subr.mxu1 %v3951_v30  ;;  %4044 = vrot.lane.b32.xlu1 %v931_v42, %s14778_s30 }
 0x4f5   : > { %3978 = vrot.lane.b32.xlu0 %v898_v48, %s14778_s30  ;;  %v891_v48 = vld [vmem:[%s14969_s6 + $0x1228] sm:$0xff] }
 0x4f6   : > { %v3883_v51 = vpop.permute.xlu1 %3882 }
 0x4f7   : > { %v3919_v52 = vpop.permute.xlu0 %3918  ;;  %11673 = vmatprep.subr.mxu0 %v3883_v51 }
 0x4f8   : > { %11705 = vmatpush3.msra.mxu1 %v3919_v52  ;;  %4074 = vrot.lane.b32.xlu1 %v946_v49, %s14778_s30  ;;  %v924_v49 = vld [vmem:[%s14969_s6 + $0x1330] sm:$0xff] }
 0x4f9   : > { %4008 = vrot.lane.b32.xlu0 %v913_v54, %s14778_s30  ;;  %v906_v54 = vld [vmem:[%s14969_s6 + $0x12a0] sm:$0xff] }
 0x4fa   : > { %v3851_v53 = vpop.permute.xlu1 %3850 }
 0x4fb   : > { %v3949_v58 = vpop.permute.xlu0 %3948  ;;  %11674 = vmatpush3.msra.mxu0 %v3851_v53  ;;  %v890_v53 = vld [vmem:[%s14969_s6 + $0x1220] sm:$0xff] }
 0x4fc   : > { %11706 = vmatprep.subr.mxu1 %v3949_v58  ;;  %4042 = vrot.lane.b32.xlu1 %v930_v47, %s14778_s30 }
 0x4fd   : > { %3976 = vrot.lane.b32.xlu0 %v897_v55, %s14778_s30 }
 0x4fe   : > { %v3881_v57 = vpop.permute.xlu1 %3880 }
 0x4ff   : > { %v3917_v6 = vpop.permute.xlu0 %3916  ;;  %11675 = vmatprep.subr.mxu0 %v3881_v57 }
 0x500   : > { %11707 = vmatpush3.msra.mxu1 %v3917_v6  ;;  %4072 = vrot.lane.b32.xlu1 %v945_v56, %s14778_s30  ;;  %v905_v56 = vld [vmem:[%s14969_s6 + $0x1298] sm:$0xff] }
 0x501   : > { %4006 = vrot.lane.b32.xlu0 %v912_v63, %s14778_s30  ;;  %v938_v63 = vld [vmem:[%s14969_s6 + $0x13a0] sm:$0xff] }
 0x502   : > { %v3849_v19 = vpop.permute.xlu1 %3848 }
 0x503   : > { %v3947_v61 = vpop.permute.xlu0 %3946  ;;  %11676 = vmatpush3.msra.mxu0 %v3849_v19 }
 0x504   : > { %11708 = vmatprep.subr.mxu1 %v3947_v61  ;;  %4040 = vrot.lane.b32.xlu1 %v929_v2, %s14778_s30  ;;  %v889_v2 = vld [vmem:[%s14969_s6 + $0x1218] sm:$0xff]  ;;  %v904_v61 = vld [vmem:[%s14969_s6 + $0x1290] sm:$0xff] }
 0x505   : > { %3974 = vrot.lane.b32.xlu0 %v896_v3, %s14778_s30 }
 0x506   : > { %v3879_v14 = vpop.permute.xlu1 %3878 }
 0x507   : > { %v3915_v11 = vpop.permute.xlu0 %3914  ;;  %11677 = vmatprep.subr.mxu0 %v3879_v14 }
 0x508   : > { %11709 = vmatpush3.msra.mxu1 %v3915_v11  ;;  %11678 = vmatpush3.msra.mxu0 %v17363_v40  ;;  %v909_v40 = vld [vmem:[%s14969_s6 + $0x12b8] sm:$0xff] }
 0x509   : > { %4004 = vrot.lane.b32.xlu0 %v911_v60, %s14778_s30  ;;  %4070 = vrot.lane.b32.xlu1 %v944_v33, %s14778_s30  ;;  %v888_v33 = vld [vmem:[%s14969_s6 + $0x1210] sm:$0xff] }
 0x50a   : > { %v3913_v23 = vpop.permute.xlu1 %3912 }
 0x50b   : > { %v3945_v22 = vpop.permute.xlu0 %3944 }
 0x50c   : > { %11710 = vmatprep.subr.mxu1 %v3945_v22 }
 0x50d   : > { %3972 = vrot.lane.b32.xlu0 %v895_v21, %s14778_s30  ;;  %11711 = vmatpush3.msra.mxu1 %v3913_v23  ;;  %v921_v23 = vld [vmem:[%s14969_s6 + $0x1318] sm:$0xff]  ;;  %v903_v21 = vld [vmem:[%s14969_s6 + $0x1288] sm:$0xff] }
 0x50e   : > { %4038 = vrot.lane.b32.xlu1 %v928_v62, %s14778_s30  ;;  %v3943_v31 = vpop.permute.xlu1 %3942  ;;  %v936_v62 = vld [vmem:[%s14969_s6 + $0x1390] sm:$0xff] }
 0x50f   : > { %v3877_v1 = vpop.permute.xlu0 %3876  ;;  %11712 = vmatprep.subr.mxu1 %v3943_v31  ;;  %v887_v31 = vld [vmem:[%s14969_s6 + $0x1208] sm:$0xff] }
 0x510   : > { %11679 = vmatprep.subr.mxu0 %v3877_v1  ;;  %v920_v1 = vld [vmem:[%s14969_s6 + $0x1310] sm:$0xff] }
 0x511   : > { %4002 = vrot.lane.b32.xlu0 %v910_v12, %s14778_s30  ;;  %11680 = vmatpush3.msra.mxu0 %v17347_v37  ;;  %v942_v37 = vld [vmem:[%s14969_s6 + $0x13c0] sm:$0xff] }
 0x512   : > { %4068 = vrot.lane.b32.xlu1 %v943_v5, %s14778_s30  ;;  %v3875_v27 = vpop.permute.xlu1 %3874 }
 0x513   : > { %v3911_v34 = vpop.permute.xlu0 %3910  ;;  %11681 = vmatprep.subr.mxu0 %v3875_v27 }
 0x514   : > { %11713 = vmatpush3.msra.mxu1 %v3911_v34  ;;  %11682 = vmatpush3.msra.mxu0 %v17351_v38  ;;  %v926_v38 = vld [vmem:[%s14969_s6 + $0x1340] sm:$0xff] }
 0x515   : > { %3970 = vrot.lane.b32.xlu0 %v894_v41, %s14778_s30  ;;  %v902_v41 = vld [vmem:[%s14969_s6 + $0x1280] sm:$0xff] }
 0x516   : > { %4036 = vrot.lane.b32.xlu1 %v927_v4, %s14778_s30  ;;  %v3909_v16 = vpop.permute.xlu1 %3908 }
 0x517   : > { %v3941_v8 = vpop.permute.xlu0 %3940 }
 0x518   : > { %11714 = vmatprep.subr.mxu1 %v3941_v8  ;;  %v886_v8 = vld [vmem:[%s14969_s6 + $0x1200] sm:$0xff] }
 0x519   : > { %4000 = vrot.lane.b32.xlu0 %v909_v40, %s14778_s30  ;;  %11715 = vmatpush3.msra.mxu1 %v3909_v16  ;;  %v935_v16 = vld [vmem:[%s14969_s6 + $0x1388] sm:$0xff] }
 0x51a   : > { %4066 = vrot.lane.b32.xlu1 %v942_v37, %s14778_s30  ;;  %v3939_v36 = vpop.permute.xlu1 %3938 }
 0x51b   : > { %v3873_v15 = vpop.permute.xlu0 %3872  ;;  %11716 = vmatprep.subr.mxu1 %v3939_v36 }
 0x51c   : > { %11683 = vmatprep.subr.mxu0 %v3873_v15 }
 0x51d   : > { %3968 = vrot.lane.b32.xlu0 %v893_v29, %s14778_s30  ;;  %11684 = vmatpush3.msra.mxu0 %v17335_v9  ;;  %v925_v9 = vld [vmem:[%s14969_s6 + $0x1338] sm:$0xff]  ;;  %v919_v29 = vld [vmem:[%s14969_s6 + $0x1308] sm:$0xff] }
 0x51e   : > { %4034 = vrot.lane.b32.xlu1 %v926_v38, %s14778_s30  ;;  %v3871_v26 = vpop.permute.xlu1 %3870  ;;  %v934_v38 = vld [vmem:[%s14969_s6 + $0x1380] sm:$0xff] }
 0x51f   : > { %v3907_v32 = vpop.permute.xlu0 %3906  ;;  %11685 = vmatprep.subr.mxu0 %v3871_v26 }
 0x520   : > { %11717 = vmatpush3.msra.mxu1 %v3907_v32  ;;  %11686 = vmatpush3.msra.mxu0 %v17339_v28  ;;  %v940_v28 = vld [vmem:[%s14969_s6 + $0x13b0] sm:$0xff]  ;;  %v981_v32 = vld [vmem:[%s14969_s6 + $0x14f8] sm:$0xff] }
 0x521   : > { %3998 = vrot.lane.b32.xlu0 %v908_v7, %s14778_s30 }
 0x522   : > { %4064 = vrot.lane.b32.xlu1 %v941_v39, %s14778_s30  ;;  %v3905_v13 = vpop.permute.xlu1 %3904 }
 0x523   : > { %v3937_v45 = vpop.permute.xlu0 %3936 }
 0x524   : > { %11718 = vmatprep.subr.mxu1 %v3937_v45  ;;  %v965_v45 = vld [vmem:[%s14969_s6 + $0x1478] sm:$0xff] }
 0x525   : > { %3966 = vrot.lane.b32.xlu0 %v892_v18, %s14778_s30  ;;  %11719 = vmatpush3.msra.mxu1 %v3905_v13  ;;  %v918_v13 = vld [vmem:[%s14969_s6 + $0x1300] sm:$0xff] }
 0x526   : > { %4032 = vrot.lane.b32.xlu1 %v925_v9, %s14778_s30  ;;  %v3935_v44 = vpop.permute.xlu1 %3934 }
 0x527   : > { %v3869_v42 = vpop.permute.xlu0 %3868  ;;  %11720 = vmatprep.subr.mxu1 %v3935_v44  ;;  %v980_v44 = vld [vmem:[%s14969_s6 + $0x14f0] sm:$0xff] }
 0x528   : > { %11687 = vmatprep.subr.mxu0 %v3869_v42  ;;  %v1013_v42 = vld [vmem:[%s14969_s6 + $0x15f8] sm:$0xff] }
 0x529   : > { %3996 = vrot.lane.b32.xlu0 %v907_v46, %s14778_s30  ;;  %11688 = vmatpush3.msra.mxu0 %v17323_v25  ;;  %v939_v25 = vld [vmem:[%s14969_s6 + $0x13a8] sm:$0xff] }
 0x52a   : > { %4062 = vrot.lane.b32.xlu1 %v940_v28, %s14778_s30  ;;  %v3867_v50 = vpop.permute.xlu1 %3866 }
 0x52b   : > { %v3903_v30 = vpop.permute.xlu0 %3902  ;;  %11689 = vmatprep.subr.mxu0 %v3867_v50  ;;  %v964_v50 = vld [vmem:[%s14969_s6 + $0x1470] sm:$0xff] }
 0x52c   : > { %11721 = vmatpush3.msra.mxu1 %v3903_v30  ;;  %11690 = vmatpush3.msra.mxu0 %v17327_v43  ;;  %v923_v43 = vld [vmem:[%s14969_s6 + $0x1328] sm:$0xff]  ;;  %v997_v30 = vld [vmem:[%s14969_s6 + $0x1578] sm:$0xff] }
 0x52d   : > { %3964 = vrot.lane.b32.xlu0 %v891_v48, %s14778_s30 }
 0x52e   : > { %4030 = vrot.lane.b32.xlu1 %v924_v49, %s14778_s30  ;;  %v3901_v51 = vpop.permute.xlu1 %3900 }
 0x52f   : > { %v3933_v52 = vpop.permute.xlu0 %3932 }
 0x530   : > { %11722 = vmatprep.subr.mxu1 %v3933_v52  ;;  %v1012_v52 = vld [vmem:[%s14969_s6 + $0x15f0] sm:$0xff] }
 0x531   : > { %3994 = vrot.lane.b32.xlu0 %v906_v54, %s14778_s30  ;;  %11723 = vmatpush3.msra.mxu1 %v3901_v51  ;;  %v979_v51 = vld [vmem:[%s14969_s6 + $0x14e8] sm:$0xff] }
 0x532   : > { %4060 = vrot.lane.b32.xlu1 %v939_v25, %s14778_s30  ;;  %v3931_v47 = vpop.permute.xlu1 %3930 }
 0x533   : > { %v3865_v55 = vpop.permute.xlu0 %3864  ;;  %11724 = vmatprep.subr.mxu1 %v3931_v47  ;;  %v963_v47 = vld [vmem:[%s14969_s6 + $0x1468] sm:$0xff] }
 0x534   : > { %11691 = vmatprep.subr.mxu0 %v3865_v55  ;;  %v996_v55 = vld [vmem:[%s14969_s6 + $0x1570] sm:$0xff] }
 0x535   : > { %3962 = vrot.lane.b32.xlu0 %v890_v53, %s14778_s30  ;;  %11692 = vmatpush3.msra.mxu0 %v17313_v17  ;;  %v922_v17 = vld [vmem:[%s14969_s6 + $0x1320] sm:$0xff] }
 0x536   : > { %4028 = vrot.lane.b32.xlu1 %v923_v43, %s14778_s30  ;;  %v3863_v58 = vpop.permute.xlu1 %3862 }
 0x537   : > { %v3899_v57 = vpop.permute.xlu0 %3898  ;;  %11693 = vmatprep.subr.mxu0 %v3863_v58  ;;  %v978_v58 = vld [vmem:[%s14969_s6 + $0x14e0] sm:$0xff] }
 0x538   : > { %11725 = vmatpush3.msra.mxu1 %v3899_v57  ;;  %11694 = vmatpush3.msra.mxu0 %v17317_v20  ;;  %v937_v20 = vld [vmem:[%s14969_s6 + $0x1398] sm:$0xff]  ;;  %v1011_v57 = vld [vmem:[%s14969_s6 + $0x15e8] sm:$0xff] }
 0x539   : > { %3992 = vrot.lane.b32.xlu0 %v905_v56, %s14778_s30 }
 0x53a   : > { %4058 = vrot.lane.b32.xlu1 %v938_v63, %s14778_s30  ;;  %v3897_v6 = vpop.permute.xlu1 %3896 }
 0x53b   : > { %v3929_v19 = vpop.permute.xlu0 %3928 }
 0x53c   : > { %11726 = vmatprep.subr.mxu1 %v3929_v19  ;;  %v995_v19 = vld [vmem:[%s14969_s6 + $0x1568] sm:$0xff] }
 0x53d   : > { %3960 = vrot.lane.b32.xlu0 %v889_v2, %s14778_s30  ;;  %11727 = vmatpush3.msra.mxu1 %v3897_v6  ;;  %v962_v6 = vld [vmem:[%s14969_s6 + $0x1460] sm:$0xff] }
 0x53e   : > { %4026 = vrot.lane.b32.xlu1 %v922_v17, %s14778_s30  ;;  %v3927_v3 = vpop.permute.xlu1 %3926 }
 0x53f   : > { %v3861_v14 = vpop.permute.xlu0 %3860  ;;  %11728 = vmatprep.subr.mxu1 %v3927_v3  ;;  %v977_v3 = vld [vmem:[%s14969_s6 + $0x14d8] sm:$0xff] }
 0x540   : > { %11695 = vmatprep.subr.mxu0 %v3861_v14  ;;  %v1010_v14 = vld [vmem:[%s14969_s6 + $0x15e0] sm:$0xff] }
 0x541   : > { %3990 = vrot.lane.b32.xlu0 %v904_v61, %s14778_s30  ;;  %11696 = vmatpush3.msra.mxu0 %v17301_v35 }
 0x542   : > { %4056 = vrot.lane.b32.xlu1 %v937_v20, %s14778_s30  ;;  %v3859_v60 = vpop.permute.xlu1 %3858  ;;  %v961_v20 = vld [vmem:[%s14969_s6 + $0x1458] sm:$0xff] }
 0x543   : > { %v3895_v11 = vpop.permute.xlu0 %3894  ;;  %11697 = vmatprep.subr.mxu0 %v3859_v60 }
 0x544   : > { %11729 = vmatpush3.msra.mxu1 %v3895_v11  ;;  %11698 = vmatpush3.msra.mxu0 %v17307_v24  ;;  %v994_v11 = vld [vmem:[%s14969_s6 + $0x1560] sm:$0xff] }
 0x545   : > { %3958 = vrot.lane.b32.xlu0 %v888_v33, %s14778_s30  ;;  %7155 = vmatmul.mubr.f32.vlgmr.msra.gmra.mxu0 %v17296_v10  ;;  %v1375_v10 = vld [vmem:[%s14963_s25 + $0x48] sm:$0xff] }
 0x546   : > { %4024 = vrot.lane.b32.xlu1 %v921_v23, %s14778_s30  ;;  %v3893_v35 = vpop.permute.xlu1 %3892  ;;  %v17493_v5 = vrot.slane %v1375_v10, %v15195_v59  ;;  %v1553_v37 = vcombine.high %v1375_v10, %v1375_v10  ;;  %v976_v23 = vld [vmem:[%s14969_s6 + $0x14d0] sm:$0xff] }
 0x547   : > { %v3925_v22 = vpop.permute.xlu0 %3924 }
 0x548   : > { %11730 = vmatprep.subr.mxu1 %v3925_v22  ;;  %v1568_v34 = vcombine.high %v17493_v5, %v17493_v5  ;;  %v17507_v15 = vrot.slane %v1553_v37, %v15195_v59 }
 0x549   : > { %3988 = vrot.lane.b32.xlu0 %v903_v21, %s14778_s30  ;;  %11731 = vmatpush3.msra.mxu1 %v3893_v35  ;;  %v1009_v21 = vld [vmem:[%s14969_s6 + $0x15d8] sm:$0xff] }
 0x54a   : > { %4054 = vrot.lane.b32.xlu1 %v936_v62, %s14778_s30  ;;  %v4017_v24 = vpop.permute.xlu1 %4016  ;;  %7294 = vmatprep.mubr.f32.mxu0 %v1568_v34  ;;  %v1569_v26 = vcombine.high %v17507_v15, %v17507_v15  ;;  %v960_v62 = vld [vmem:[%s14969_s6 + $0x1450] sm:$0xff]  ;;  %v959_v34 = vld [vmem:[%s14969_s6 + $0x1448] sm:$0xff] }
 0x54b   : > { %v3923_v12 = vpop.permute.xlu0 %3922  ;;  %11737 = vmatprep.subr.mxu0 %v4017_v24 }
 0x54c   : > { %11732 = vmatprep.subr.mxu1 %v3923_v12 }
 0x54d   : > { %3956 = vrot.lane.b32.xlu0 %v887_v31, %s14778_s30  ;;  %v993_v31 = vld [vmem:[%s14969_s6 + $0x1558] sm:$0xff] }
 0x54e   : > { %4022 = vrot.lane.b32.xlu1 %v920_v1, %s14778_s30  ;;  %v3985_v27 = vpop.permute.xlu1 %3984  ;;  %v975_v1 = vld [vmem:[%s14969_s6 + $0x14c8] sm:$0xff] }
 0x54f   : > { %v3891_v4 = vpop.permute.xlu0 %3890  ;;  %11738 = vmatpush3.msra.mxu0 %v3985_v27  ;;  %v1008_v27 = vld [vmem:[%s14969_s6 + $0x15d0] sm:$0xff] }
 0x550   : > { %11733 = vmatpush3.msra.mxu1 %v3891_v4 }
 0x551   : > { %3986 = vrot.lane.b32.xlu0 %v902_v41, %s14778_s30  ;;  %7225 = vmatmul.mubr.f32.vlgmr.msra.gmra.mxu1 %v17366_v0 }
 0x552   : > { %4052 = vrot.lane.b32.xlu1 %v935_v16, %s14778_s30  ;;  %v4081_v40 = vpop.permute.xlu1 %4080  ;;  %7364 = vmatprep.mubr.f32.mxu1 %v1569_v26  ;;  %v992_v16 = vld [vmem:[%s14969_s6 + $0x1550] sm:$0xff]  ;;  %v991_v26 = vld [vmem:[%s14969_s6 + $0x1548] sm:$0xff] }
 0x553   : > { %v4015_v36 = vpop.permute.xlu0 %4014  ;;  %11772 = vmatprep.subr.mxu1 %v4081_v40 }
 0x554   : > { %11739 = vmatprep.subr.mxu0 %v4015_v36  ;;  %v1007_v36 = vld [vmem:[%s14969_s6 + $0x15c8] sm:$0xff] }
 0x555   : > { %3954 = vrot.lane.b32.xlu0 %v886_v8, %s14778_s30  ;;  %v974_v8 = vld [vmem:[%s14969_s6 + $0x14c0] sm:$0xff] }
 0x556   : > { %4020 = vrot.lane.b32.xlu1 %v919_v29, %s14778_s30  ;;  %v4049_v0 = vpop.permute.xlu1 %4048 }
 0x557   : > { %v3983_v7 = vpop.permute.xlu0 %3982  ;;  %11773 = vmatpush3.msra.mxu1 %v4049_v0  ;;  %v958_v0 = vld [vmem:[%s14969_s6 + $0x1440] sm:$0xff] }
 0x558   : > { %11740 = vmatpush3.msra.mxu0 %v3983_v7 }
 0x559   : > { %4050 = vrot.lane.b32.xlu0 %v934_v38, %s14778_s30 }
 0x55a   : > { %4144 = vrot.lane.b32.xlu1 %v981_v32, %s14778_s30  ;;  %v4079_v39 = vpop.permute.xlu1 %4078  ;;  %v973_v32 = vld [vmem:[%s14969_s6 + $0x14b8] sm:$0xff] }
 0x55b   : > { %v4013_v18 = vpop.permute.xlu0 %4012  ;;  %11774 = vmatprep.subr.mxu1 %v4079_v39 }
 0x55c   : > { %11741 = vmatprep.subr.mxu0 %v4013_v18 }
 0x55d   : > { %4018 = vrot.lane.b32.xlu0 %v918_v13, %s14778_s30  ;;  %v1006_v13 = vld [vmem:[%s14969_s6 + $0x15c0] sm:$0xff] }
 0x55e   : > { %4112 = vrot.lane.b32.xlu1 %v965_v45, %s14778_s30  ;;  %v4047_v9 = vpop.permute.xlu1 %4046  ;;  %v957_v45 = vld [vmem:[%s14969_s6 + $0x1438] sm:$0xff] }
 0x55f   : > { %v3981_v46 = vpop.permute.xlu0 %3980  ;;  %11775 = vmatpush3.msra.mxu1 %v4047_v9 }
 0x560   : > { %11742 = vmatpush3.msra.mxu0 %v3981_v46 }
 0x561   : > { %4142 = vrot.lane.b32.xlu0 %v980_v44, %s14778_s30  ;;  %v990_v44 = vld [vmem:[%s14969_s6 + $0x1540] sm:$0xff] }
 0x562   : > { %4208 = vrot.lane.b32.xlu1 %v1013_v42, %s14778_s30  ;;  %v4077_v28 = vpop.permute.xlu1 %4076  ;;  %v972_v42 = vld [vmem:[%s14969_s6 + $0x14b0] sm:$0xff] }
 0x563   : > { %v4011_v48 = vpop.permute.xlu0 %4010  ;;  %11776 = vmatprep.subr.mxu1 %v4077_v28 }
 0x564   : > { %11743 = vmatprep.subr.mxu0 %v4011_v48 }
 0x565   : > { %4110 = vrot.lane.b32.xlu0 %v964_v50, %s14778_s30  ;;  %v1005_v50 = vld [vmem:[%s14969_s6 + $0x15b8] sm:$0xff] }
 0x566   : > { %4176 = vrot.lane.b32.xlu1 %v997_v30, %s14778_s30  ;;  %v4045_v49 = vpop.permute.xlu1 %4044  ;;  %v956_v30 = vld [vmem:[%s14969_s6 + $0x1430] sm:$0xff] }
 0x567   : > { %v3979_v54 = vpop.permute.xlu0 %3978  ;;  %11777 = vmatpush3.msra.mxu1 %v4045_v49 }
 0x568   : > { %11744 = vmatpush3.msra.mxu0 %v3979_v54 }
 0x569   : > { %4140 = vrot.lane.b32.xlu0 %v979_v51, %s14778_s30  ;;  %v989_v51 = vld [vmem:[%s14969_s6 + $0x1538] sm:$0xff] }
 0x56a   : > { %4206 = vrot.lane.b32.xlu1 %v1012_v52, %s14778_s30  ;;  %v4075_v25 = vpop.permute.xlu1 %4074  ;;  %v971_v52 = vld [vmem:[%s14969_s6 + $0x14a8] sm:$0xff] }
 0x56b   : > { %v4009_v53 = vpop.permute.xlu0 %4008  ;;  %11778 = vmatprep.subr.mxu1 %v4075_v25 }
 0x56c   : > { %11745 = vmatprep.subr.mxu0 %v4009_v53 }
 0x56d   : > { %4108 = vrot.lane.b32.xlu0 %v963_v47, %s14778_s30  ;;  %v1004_v47 = vld [vmem:[%s14969_s6 + $0x15b0] sm:$0xff] }
 0x56e   : > { %4174 = vrot.lane.b32.xlu1 %v996_v55, %s14778_s30  ;;  %v4043_v43 = vpop.permute.xlu1 %4042  ;;  %v955_v55 = vld [vmem:[%s14969_s6 + $0x1428] sm:$0xff] }
 0x56f   : > { %v3977_v56 = vpop.permute.xlu0 %3976  ;;  %11779 = vmatpush3.msra.mxu1 %v4043_v43 }
 0x570   : > { %11746 = vmatpush3.msra.mxu0 %v3977_v56 }
 0x571   : > { %4138 = vrot.lane.b32.xlu0 %v978_v58, %s14778_s30  ;;  %v988_v58 = vld [vmem:[%s14969_s6 + $0x1530] sm:$0xff] }
 0x572   : > { %4204 = vrot.lane.b32.xlu1 %v1011_v57, %s14778_s30  ;;  %v4073_v63 = vpop.permute.xlu1 %4072  ;;  %v970_v57 = vld [vmem:[%s14969_s6 + $0x14a0] sm:$0xff] }
 0x573   : > { %v4007_v2 = vpop.permute.xlu0 %4006  ;;  %11780 = vmatprep.subr.mxu1 %v4073_v63 }
 0x574   : > { %11747 = vmatprep.subr.mxu0 %v4007_v2 }
 0x575   : > { %4106 = vrot.lane.b32.xlu0 %v962_v6, %s14778_s30  ;;  %v1003_v6 = vld [vmem:[%s14969_s6 + $0x15a8] sm:$0xff] }
 0x576   : > { %4172 = vrot.lane.b32.xlu1 %v995_v19, %s14778_s30  ;;  %v4041_v17 = vpop.permute.xlu1 %4040  ;;  %v954_v19 = vld [vmem:[%s14969_s6 + $0x1420] sm:$0xff] }
 0x577   : > { %v3975_v61 = vpop.permute.xlu0 %3974  ;;  %11781 = vmatpush3.msra.mxu1 %v4041_v17 }
 0x578   : > { %11748 = vmatpush3.msra.mxu0 %v3975_v61 }
 0x579   : > { %4136 = vrot.lane.b32.xlu0 %v977_v3, %s14778_s30  ;;  %v987_v3 = vld [vmem:[%s14969_s6 + $0x1528] sm:$0xff] }
 0x57a   : > { %4202 = vrot.lane.b32.xlu1 %v1010_v14, %s14778_s30  ;;  %v969_v14 = vld [vmem:[%s14969_s6 + $0x1498] sm:$0xff] }
 0x57b   : > { %v4005_v60 = vpop.permute.xlu0 %4004  ;;  %v4071_v33 = vpop.permute.xlu1 %4070 }
 0x57c   : > { %11749 = vmatprep.subr.mxu0 %v4005_v60  ;;  %11782 = vmatprep.subr.mxu1 %v4071_v33  ;;  %v1002_v60 = vld [vmem:[%s14969_s6 + $0x15a0] sm:$0xff] }
 0x57d   : > { %4104 = vrot.lane.b32.xlu0 %v961_v20, %s14778_s30 }
 0x57e   : > { %4170 = vrot.lane.b32.xlu1 %v994_v11, %s14778_s30  ;;  %v953_v11 = vld [vmem:[%s14969_s6 + $0x1418] sm:$0xff] }
 0x57f   : > { %v3973_v35 = vpop.permute.xlu0 %3972 }
 0x580   : > { %v4039_v22 = vpop.permute.xlu1 %4038  ;;  %11750 = vmatpush3.msra.mxu0 %v3973_v35  ;;  %v986_v35 = vld [vmem:[%s14969_s6 + $0x1520] sm:$0xff] }
 0x581   : > { %4134 = vrot.lane.b32.xlu0 %v976_v23, %s14778_s30  ;;  %11783 = vmatpush3.msra.mxu1 %v4039_v22  ;;  %v968_v22 = vld [vmem:[%s14969_s6 + $0x1490] sm:$0xff] }
 0x582   : > { %4200 = vrot.lane.b32.xlu1 %v1009_v21, %s14778_s30 }
 0x583   : > { %v4003_v24 = vpop.permute.xlu0 %4002 }
 0x584   : > { %v4069_v12 = vpop.permute.xlu1 %4068  ;;  %11751 = vmatprep.subr.mxu0 %v4003_v24  ;;  %v1001_v24 = vld [vmem:[%s14969_s6 + $0x1598] sm:$0xff] }
 0x585   : > { %4102 = vrot.lane.b32.xlu0 %v960_v62, %s14778_s30  ;;  %11784 = vmatprep.subr.mxu1 %v4069_v12  ;;  %v952_v12 = vld [vmem:[%s14969_s6 + $0x1410] sm:$0xff] }
 0x586   : > { %4168 = vrot.lane.b32.xlu1 %v993_v31, %s14778_s30 }
 0x587   : > { %v3971_v10 = vpop.permute.xlu0 %3970 }
 0x588   : > { %v4037_v41 = vpop.permute.xlu1 %4036  ;;  %11752 = vmatpush3.msra.mxu0 %v3971_v10  ;;  %v985_v10 = vld [vmem:[%s14969_s6 + $0x1518] sm:$0xff] }
 0x589   : > { %4132 = vrot.lane.b32.xlu0 %v975_v1, %s14778_s30  ;;  %11785 = vmatpush3.msra.mxu1 %v4037_v41  ;;  %v967_v41 = vld [vmem:[%s14969_s6 + $0x1488] sm:$0xff] }
 0x58a   : > { %4198 = vrot.lane.b32.xlu1 %v1008_v27, %s14778_s30 }
 0x58b   : > { %v4001_v4 = vpop.permute.xlu0 %4000 }
 0x58c   : > { %v4067_v40 = vpop.permute.xlu1 %4066  ;;  %11753 = vmatprep.subr.mxu0 %v4001_v4  ;;  %v1000_v4 = vld [vmem:[%s14969_s6 + $0x1590] sm:$0xff] }
 0x58d   : > { %4100 = vrot.lane.b32.xlu0 %v959_v34, %s14778_s30  ;;  %11786 = vmatprep.subr.mxu1 %v4067_v40  ;;  %v951_v40 = vld [vmem:[%s14969_s6 + $0x1408] sm:$0xff] }
 0x58e   : > { %4166 = vrot.lane.b32.xlu1 %v992_v16, %s14778_s30 }
 0x58f   : > { %v3969_v37 = vpop.permute.xlu0 %3968 }
 0x590   : > { %v4035_v29 = vpop.permute.xlu1 %4034  ;;  %11754 = vmatpush3.msra.mxu0 %v3969_v37  ;;  %v984_v37 = vld [vmem:[%s14969_s6 + $0x1510] sm:$0xff] }
 0x591   : > { %4130 = vrot.lane.b32.xlu0 %v974_v8, %s14778_s30  ;;  %11787 = vmatpush3.msra.mxu1 %v4035_v29 }
 0x592   : > { %4196 = vrot.lane.b32.xlu1 %v1007_v36, %s14778_s30  ;;  %v1376_v36 = vld [vmem:[%s14963_s25 + $0x50] sm:$0xff] }
 0x593   : > { %v3999_v38 = vpop.permute.xlu0 %3998 }
 0x594   : > { %v4065_v7 = vpop.permute.xlu1 %4064  ;;  %11755 = vmatprep.subr.mxu0 %v3999_v38  ;;  %v966_v38 = vld [vmem:[%s14969_s6 + $0x1480] sm:$0xff] }
 0x595   : > { %4098 = vrot.lane.b32.xlu0 %v958_v0, %s14778_s30  ;;  %11788 = vmatprep.subr.mxu1 %v4065_v7  ;;  %v17634_v0 = vrot.slane %v1376_v36, %v15195_v59  ;;  %v999_v7 = vld [vmem:[%s14969_s6 + $0x1588] sm:$0xff] }
 0x596   : > { %4164 = vrot.lane.b32.xlu1 %v991_v26, %s14778_s30 }
 0x597   : > { %v3967_v39 = vpop.permute.xlu0 %3966  ;;  %v1585_v26 = vcombine.high %v17634_v0, %v17634_v0 }
 0x598   : > { %v4033_v18 = vpop.permute.xlu1 %4032  ;;  %11756 = vmatpush3.msra.mxu0 %v3967_v39  ;;  %v950_v39 = vld [vmem:[%s14969_s6 + $0x1400] sm:$0xff] }
 0x599   : > { %4128 = vrot.lane.b32.xlu0 %v973_v32, %s14778_s30  ;;  %11789 = vmatpush3.msra.mxu1 %v4033_v18 }
 0x59a   : > { %4194 = vrot.lane.b32.xlu1 %v1006_v13, %s14778_s30  ;;  %v1570_v13 = vcombine.high %v1376_v36, %v1376_v36  ;;  %v1039_v36 = vld [vmem:[%s14969_s6 + $0x16c8] sm:$0xff] }
 0x59b   : > { %v3997_v9 = vpop.permute.xlu0 %3996 }
 0x59c   : > { %v4063_v46 = vpop.permute.xlu1 %4062  ;;  %11757 = vmatprep.subr.mxu0 %v3997_v9 }
 0x59d   : > { %4096 = vrot.lane.b32.xlu0 %v957_v45, %s14778_s30  ;;  %11790 = vmatprep.subr.mxu1 %v4063_v46  ;;  %v983_v45 = vld [vmem:[%s14969_s6 + $0x1508] sm:$0xff]  ;;  %v998_v46 = vld [vmem:[%s14969_s6 + $0x1580] sm:$0xff] }
 0x59e   : > { %4162 = vrot.lane.b32.xlu1 %v990_v44, %s14778_s30  ;;  %v17648_v44 = vrot.slane %v1570_v13, %v15195_v59  ;;  %v1038_v13 = vld [vmem:[%s14969_s6 + $0x16c0] sm:$0xff] }
 0x59f   : > { %v3965_v28 = vpop.permute.xlu0 %3964 }
 0x5a0   : > { %v4031_v48 = vpop.permute.xlu1 %4030  ;;  %11758 = vmatpush3.msra.mxu0 %v3965_v28  ;;  %v1045_v28 = vld [vmem:[%s14969_s6 + $0x16f8] sm:$0xff] }
 0x5a1   : > { %11791 = vmatpush3.msra.mxu1 %v4031_v48  ;;  %4126 = vrot.lane.b32.xlu0 %v972_v42, %s14778_s30  ;;  %v1586_v42 = vcombine.high %v17648_v44, %v17648_v44  ;;  %v982_v48 = vld [vmem:[%s14969_s6 + $0x1500] sm:$0xff] }
 0x5a2   : > { %4192 = vrot.lane.b32.xlu1 %v1005_v50, %s14778_s30 }
 0x5a3   : > { %v3995_v49 = vpop.permute.xlu0 %3994 }
 0x5a4   : > { %v4061_v54 = vpop.permute.xlu1 %4060  ;;  %11759 = vmatprep.subr.mxu0 %v3995_v49  ;;  %v1029_v49 = vld [vmem:[%s14969_s6 + $0x1678] sm:$0xff] }
 0x5a5   : > { %11792 = vmatprep.subr.mxu1 %v4061_v54  ;;  %4094 = vrot.lane.b32.xlu0 %v956_v30, %s14778_s30  ;;  %v1044_v54 = vld [vmem:[%s14969_s6 + $0x16f0] sm:$0xff] }
 0x5a6   : > { %4160 = vrot.lane.b32.xlu1 %v989_v51, %s14778_s30 }
 0x5a7   : > { %v3963_v25 = vpop.permute.xlu0 %3962 }
 0x5a8   : > { %v4029_v53 = vpop.permute.xlu1 %4028  ;;  %11760 = vmatpush3.msra.mxu0 %v3963_v25  ;;  %v1077_v25 = vld [vmem:[%s14969_s6 + $0x17f8] sm:$0xff] }
 0x5a9   : > { %11793 = vmatpush3.msra.mxu1 %v4029_v53  ;;  %4124 = vrot.lane.b32.xlu0 %v971_v52, %s14778_s30  ;;  %v1028_v53 = vld [vmem:[%s14969_s6 + $0x1670] sm:$0xff] }
 0x5aa   : > { %4190 = vrot.lane.b32.xlu1 %v1004_v47, %s14778_s30 }
 0x5ab   : > { %v3993_v43 = vpop.permute.xlu0 %3992 }
 0x5ac   : > { %v4059_v56 = vpop.permute.xlu1 %4058  ;;  %11761 = vmatprep.subr.mxu0 %v3993_v43  ;;  %v1061_v43 = vld [vmem:[%s14969_s6 + $0x1778] sm:$0xff] }
 0x5ad   : > { %11794 = vmatprep.subr.mxu1 %v4059_v56  ;;  %4092 = vrot.lane.b32.xlu0 %v955_v55, %s14778_s30  ;;  %v1043_v56 = vld [vmem:[%s14969_s6 + $0x16e8] sm:$0xff] }
 0x5ae   : > { %4158 = vrot.lane.b32.xlu1 %v988_v58, %s14778_s30 }
 0x5af   : > { %v3961_v63 = vpop.permute.xlu0 %3960 }
 0x5b0   : > { %v4027_v2 = vpop.permute.xlu1 %4026  ;;  %11762 = vmatpush3.msra.mxu0 %v3961_v63  ;;  %v1076_v63 = vld [vmem:[%s14969_s6 + $0x17f0] sm:$0xff] }
 0x5b1   : > { %11795 = vmatpush3.msra.mxu1 %v4027_v2  ;;  %4122 = vrot.lane.b32.xlu0 %v970_v57, %s14778_s30  ;;  %v1027_v2 = vld [vmem:[%s14969_s6 + $0x1668] sm:$0xff] }
 0x5b2   : > { %4188 = vrot.lane.b32.xlu1 %v1003_v6, %s14778_s30 }
 0x5b3   : > { %v3991_v17 = vpop.permute.xlu0 %3990 }
 0x5b4   : > { %v4057_v61 = vpop.permute.xlu1 %4056  ;;  %11763 = vmatprep.subr.mxu0 %v3991_v17  ;;  %v1060_v17 = vld [vmem:[%s14969_s6 + $0x1770] sm:$0xff] }
 0x5b5   : > { %11796 = vmatprep.subr.mxu1 %v4057_v61  ;;  %4090 = vrot.lane.b32.xlu0 %v954_v19, %s14778_s30  ;;  %v1042_v61 = vld [vmem:[%s14969_s6 + $0x16e0] sm:$0xff] }
 0x5b6   : > { %4156 = vrot.lane.b32.xlu1 %v987_v3, %s14778_s30 }
 0x5b7   : > { %v3959_v20 = vpop.permute.xlu0 %3958 }
 0x5b8   : > { %v4025_v33 = vpop.permute.xlu1 %4024  ;;  %11764 = vmatpush3.msra.mxu0 %v3959_v20  ;;  %v1075_v20 = vld [vmem:[%s14969_s6 + $0x17e8] sm:$0xff] }
 0x5b9   : > { %11797 = vmatpush3.msra.mxu1 %v4025_v33  ;;  %4120 = vrot.lane.b32.xlu0 %v969_v14, %s14778_s30  ;;  %v1026_v33 = vld [vmem:[%s14969_s6 + $0x1660] sm:$0xff] }
 0x5ba   : > { %4186 = vrot.lane.b32.xlu1 %v1002_v60, %s14778_s30 }
 0x5bb   : > { %v3989_v23 = vpop.permute.xlu0 %3988 }
 0x5bc   : > { %v4055_v21 = vpop.permute.xlu1 %4054  ;;  %11765 = vmatprep.subr.mxu0 %v3989_v23  ;;  %v1059_v23 = vld [vmem:[%s14969_s6 + $0x1768] sm:$0xff] }
 0x5bd   : > { %11798 = vmatprep.subr.mxu1 %v4055_v21  ;;  %4088 = vrot.lane.b32.xlu0 %v953_v11, %s14778_s30  ;;  %v1041_v21 = vld [vmem:[%s14969_s6 + $0x16d8] sm:$0xff] }
 0x5be   : > { %4154 = vrot.lane.b32.xlu1 %v986_v35, %s14778_s30 }
 0x5bf   : > { %v3957_v62 = vpop.permute.xlu0 %3956 }
 0x5c0   : > { %v4023_v31 = vpop.permute.xlu1 %4022  ;;  %11766 = vmatpush3.msra.mxu0 %v3957_v62  ;;  %v1074_v62 = vld [vmem:[%s14969_s6 + $0x17e0] sm:$0xff] }
 0x5c1   : > { %11799 = vmatpush3.msra.mxu1 %v4023_v31  ;;  %4118 = vrot.lane.b32.xlu0 %v968_v22, %s14778_s30  ;;  %v1025_v31 = vld [vmem:[%s14969_s6 + $0x1658] sm:$0xff] }
 0x5c2   : > { %4184 = vrot.lane.b32.xlu1 %v1001_v24, %s14778_s30 }
 0x5c3   : > { %v3987_v1 = vpop.permute.xlu0 %3986 }
 0x5c4   : > { %v4053_v27 = vpop.permute.xlu1 %4052  ;;  %11767 = vmatprep.subr.mxu0 %v3987_v1  ;;  %v1058_v1 = vld [vmem:[%s14969_s6 + $0x1760] sm:$0xff] }
 0x5c5   : > { %11800 = vmatprep.subr.mxu1 %v4053_v27  ;;  %4086 = vrot.lane.b32.xlu0 %v952_v12, %s14778_s30  ;;  %v1040_v27 = vld [vmem:[%s14969_s6 + $0x16d0] sm:$0xff] }
 0x5c6   : > { %4152 = vrot.lane.b32.xlu1 %v985_v10, %s14778_s30 }
 0x5c7   : > { %v3955_v34 = vpop.permute.xlu0 %3954 }
 0x5c8   : > { %v4021_v16 = vpop.permute.xlu1 %4020  ;;  %11768 = vmatpush3.msra.mxu0 %v3955_v34  ;;  %v1073_v34 = vld [vmem:[%s14969_s6 + $0x17d8] sm:$0xff] }
 0x5c9   : > { %11801 = vmatpush3.msra.mxu1 %v4021_v16  ;;  %4116 = vrot.lane.b32.xlu0 %v967_v41, %s14778_s30  ;;  %v1024_v16 = vld [vmem:[%s14969_s6 + $0x1650] sm:$0xff] }
 0x5ca   : > { %4182 = vrot.lane.b32.xlu1 %v1000_v4, %s14778_s30  ;;  %7295 = vmatmul.mubr.f32.vlgmr.msra.gmra.mxu0 %v17493_v5 }
 0x5cb   : > { %v4051_v8 = vpop.permute.xlu0 %4050  ;;  %7434 = vmatprep.mubr.f32.mxu0 %v1585_v26 }
 0x5cc   : > { %v4145_v29 = vpop.permute.xlu1 %4144  ;;  %11802 = vmatprep.subr.mxu1 %v4051_v8  ;;  %v1057_v8 = vld [vmem:[%s14969_s6 + $0x1758] sm:$0xff] }
 0x5cd   : > { %4084 = vrot.lane.b32.xlu0 %v951_v40, %s14778_s30  ;;  %11807 = vmatprep.subr.mxu0 %v4145_v29 }
 0x5ce   : > { %4150 = vrot.lane.b32.xlu1 %v984_v37, %s14778_s30 }
 0x5cf   : > { %v4019_v5 = vpop.permute.xlu0 %4018 }
 0x5d0   : > { %v4113_v32 = vpop.permute.xlu1 %4112  ;;  %11803 = vmatpush3.msra.mxu1 %v4019_v5  ;;  %v1023_v5 = vld [vmem:[%s14969_s6 + $0x1648] sm:$0xff] }
 0x5d1   : > { %4114 = vrot.lane.b32.xlu0 %v966_v38, %s14778_s30  ;;  %11808 = vmatpush3.msra.mxu0 %v4113_v32  ;;  %v1072_v38 = vld [vmem:[%s14969_s6 + $0x17d0] sm:$0xff] }
 0x5d2   : > { %4180 = vrot.lane.b32.xlu1 %v999_v7, %s14778_s30  ;;  %7365 = vmatmul.mubr.f32.vlgmr.msra.gmra.mxu1 %v17507_v15  ;;  %v1056_v32 = vld [vmem:[%s14969_s6 + $0x1750] sm:$0xff] }
 0x5d3   : > { %v4143_v18 = vpop.permute.xlu0 %4142  ;;  %7504 = vmatprep.mubr.f32.mxu1 %v1586_v42 }
 0x5d4   : > { %v4209_v9 = vpop.permute.xlu1 %4208  ;;  %11809 = vmatprep.subr.mxu0 %v4143_v18 }
 0x5d5   : > { %4082 = vrot.lane.b32.xlu0 %v950_v39, %s14778_s30  ;;  %11842 = vmatprep.subr.mxu1 %v4209_v9 }
 0x5d6   : > { %4148 = vrot.lane.b32.xlu1 %v983_v45, %s14778_s30  ;;  %v1071_v45 = vld [vmem:[%s14969_s6 + $0x17c8] sm:$0xff] }
 0x5d7   : > { %v4111_v15 = vpop.permute.xlu0 %4110 }
 0x5d8   : > { %v4177_v50 = vpop.permute.xlu1 %4176  ;;  %11810 = vmatpush3.msra.mxu0 %v4111_v15  ;;  %v1055_v15 = vld [vmem:[%s14969_s6 + $0x1748] sm:$0xff] }
 0x5d9   : > { %4178 = vrot.lane.b32.xlu0 %v998_v46, %s14778_s30  ;;  %11843 = vmatpush3.msra.mxu1 %v4177_v50  ;;  %v1022_v46 = vld [vmem:[%s14969_s6 + $0x1640] sm:$0xff]  ;;  %v1037_v50 = vld [vmem:[%s14969_s6 + $0x16b8] sm:$0xff] }
 0x5da   : > { %4272 = vrot.lane.b32.xlu1 %v1045_v28, %s14778_s30 }
 0x5db   : > { %v4141_v30 = vpop.permute.xlu0 %4140 }
 0x5dc   : > { %v4207_v51 = vpop.permute.xlu1 %4206  ;;  %11811 = vmatprep.subr.mxu0 %v4141_v30  ;;  %v1070_v30 = vld [vmem:[%s14969_s6 + $0x17c0] sm:$0xff] }
 0x5dd   : > { %4146 = vrot.lane.b32.xlu0 %v982_v48, %s14778_s30  ;;  %11844 = vmatprep.subr.mxu1 %v4207_v51  ;;  %v1021_v51 = vld [vmem:[%s14969_s6 + $0x1638] sm:$0xff] }
 0x5de   : > { %4240 = vrot.lane.b32.xlu1 %v1029_v49, %s14778_s30 }
 0x5df   : > { %v4109_v52 = vpop.permute.xlu0 %4108 }
 0x5e0   : > { %v4175_v47 = vpop.permute.xlu1 %4174  ;;  %11812 = vmatpush3.msra.mxu0 %v4109_v52  ;;  %v1054_v52 = vld [vmem:[%s14969_s6 + $0x1740] sm:$0xff] }
 0x5e1   : > { %4270 = vrot.lane.b32.xlu0 %v1044_v54, %s14778_s30  ;;  %11845 = vmatpush3.msra.mxu1 %v4175_v47  ;;  %v1036_v47 = vld [vmem:[%s14969_s6 + $0x16b0] sm:$0xff] }
 0x5e2   : > { %4336 = vrot.lane.b32.xlu1 %v1077_v25, %s14778_s30 }
 0x5e3   : > { %v4139_v55 = vpop.permute.xlu0 %4138 }
 0x5e4   : > { %v4205_v58 = vpop.permute.xlu1 %4204  ;;  %11813 = vmatprep.subr.mxu0 %v4139_v55  ;;  %v1069_v55 = vld [vmem:[%s14969_s6 + $0x17b8] sm:$0xff] }
 0x5e5   : > { %4238 = vrot.lane.b32.xlu0 %v1028_v53, %s14778_s30  ;;  %11846 = vmatprep.subr.mxu1 %v4205_v58  ;;  %v1020_v58 = vld [vmem:[%s14969_s6 + $0x1630] sm:$0xff] }
 0x5e6   : > { %4304 = vrot.lane.b32.xlu1 %v1061_v43, %s14778_s30 }
 0x5e7   : > { %v4107_v57 = vpop.permute.xlu0 %4106 }
 0x5e8   : > { %v4173_v6 = vpop.permute.xlu1 %4172  ;;  %11814 = vmatpush3.msra.mxu0 %v4107_v57  ;;  %v1053_v57 = vld [vmem:[%s14969_s6 + $0x1738] sm:$0xff] }
 0x5e9   : > { %4268 = vrot.lane.b32.xlu0 %v1043_v56, %s14778_s30  ;;  %11847 = vmatpush3.msra.mxu1 %v4173_v6  ;;  %v1035_v6 = vld [vmem:[%s14969_s6 + $0x16a8] sm:$0xff] }
 0x5ea   : > { %4334 = vrot.lane.b32.xlu1 %v1076_v63, %s14778_s30 }
 0x5eb   : > { %v4137_v19 = vpop.permute.xlu0 %4136 }
 0x5ec   : > { %v4203_v3 = vpop.permute.xlu1 %4202  ;;  %11815 = vmatprep.subr.mxu0 %v4137_v19  ;;  %v1068_v19 = vld [vmem:[%s14969_s6 + $0x17b0] sm:$0xff] }
 0x5ed   : > { %4236 = vrot.lane.b32.xlu0 %v1027_v2, %s14778_s30  ;;  %11848 = vmatprep.subr.mxu1 %v4203_v3  ;;  %v1019_v3 = vld [vmem:[%s14969_s6 + $0x1628] sm:$0xff] }
 0x5ee   : > { %4302 = vrot.lane.b32.xlu1 %v1060_v17, %s14778_s30 }
 0x5ef   : > { %v4105_v14 = vpop.permute.xlu0 %4104 }
 0x5f0   : > { %v4171_v60 = vpop.permute.xlu1 %4170  ;;  %11816 = vmatpush3.msra.mxu0 %v4105_v14  ;;  %v1052_v14 = vld [vmem:[%s14969_s6 + $0x1730] sm:$0xff] }
 0x5f1   : > { %4266 = vrot.lane.b32.xlu0 %v1042_v61, %s14778_s30  ;;  %11849 = vmatpush3.msra.mxu1 %v4171_v60  ;;  %v1034_v60 = vld [vmem:[%s14969_s6 + $0x16a0] sm:$0xff] }
 0x5f2   : > { %4332 = vrot.lane.b32.xlu1 %v1075_v20, %s14778_s30 }
 0x5f3   : > { %v4135_v11 = vpop.permute.xlu0 %4134 }
 0x5f4   : > { %v4201_v35 = vpop.permute.xlu1 %4200  ;;  %11817 = vmatprep.subr.mxu0 %v4135_v11  ;;  %v1067_v11 = vld [vmem:[%s14969_s6 + $0x17a8] sm:$0xff] }
 0x5f5   : > { %4234 = vrot.lane.b32.xlu0 %v1026_v33, %s14778_s30  ;;  %11850 = vmatprep.subr.mxu1 %v4201_v35  ;;  %v1018_v35 = vld [vmem:[%s14969_s6 + $0x1620] sm:$0xff] }
 0x5f6   : > { %4300 = vrot.lane.b32.xlu1 %v1059_v23, %s14778_s30 }
 0x5f7   : > { %v4103_v22 = vpop.permute.xlu0 %4102 }
 0x5f8   : > { %v4169_v24 = vpop.permute.xlu1 %4168  ;;  %11818 = vmatpush3.msra.mxu0 %v4103_v22  ;;  %v1051_v22 = vld [vmem:[%s14969_s6 + $0x1728] sm:$0xff] }
 0x5f9   : > { %4264 = vrot.lane.b32.xlu0 %v1041_v21, %s14778_s30  ;;  %11851 = vmatpush3.msra.mxu1 %v4169_v24  ;;  %v1033_v24 = vld [vmem:[%s14969_s6 + $0x1698] sm:$0xff] }
 0x5fa   : > { %4330 = vrot.lane.b32.xlu1 %v1074_v62, %s14778_s30 }
 0x5fb   : > { %v4133_v12 = vpop.permute.xlu0 %4132 }
 0x5fc   : > { %v4199_v10 = vpop.permute.xlu1 %4198  ;;  %11819 = vmatprep.subr.mxu0 %v4133_v12  ;;  %v1066_v12 = vld [vmem:[%s14969_s6 + $0x17a0] sm:$0xff] }
 0x5fd   : > { %4232 = vrot.lane.b32.xlu0 %v1025_v31, %s14778_s30  ;;  %11852 = vmatprep.subr.mxu1 %v4199_v10  ;;  %v1017_v10 = vld [vmem:[%s14969_s6 + $0x1618] sm:$0xff] }
 0x5fe   : > { %4298 = vrot.lane.b32.xlu1 %v1058_v1, %s14778_s30 }
 0x5ff   : > { %v4101_v41 = vpop.permute.xlu0 %4100 }
 0x600   : > { %v4167_v4 = vpop.permute.xlu1 %4166  ;;  %11820 = vmatpush3.msra.mxu0 %v4101_v41  ;;  %v1050_v41 = vld [vmem:[%s14969_s6 + $0x1720] sm:$0xff] }
 0x601   : > { %4262 = vrot.lane.b32.xlu0 %v1040_v27, %s14778_s30  ;;  %11853 = vmatpush3.msra.mxu1 %v4167_v4  ;;  %v1032_v4 = vld [vmem:[%s14969_s6 + $0x1690] sm:$0xff] }
 0x602   : > { %4328 = vrot.lane.b32.xlu1 %v1073_v34, %s14778_s30 }
 0x603   : > { %v4131_v40 = vpop.permute.xlu0 %4130 }
 0x604   : > { %v4197_v37 = vpop.permute.xlu1 %4196  ;;  %11821 = vmatprep.subr.mxu0 %v4131_v40  ;;  %v1065_v40 = vld [vmem:[%s14969_s6 + $0x1798] sm:$0xff] }
 0x605   : > { %4230 = vrot.lane.b32.xlu0 %v1024_v16, %s14778_s30  ;;  %11854 = vmatprep.subr.mxu1 %v4197_v37  ;;  %v1016_v37 = vld [vmem:[%s14969_s6 + $0x1610] sm:$0xff] }
 0x606   : > { %4296 = vrot.lane.b32.xlu1 %v1057_v8, %s14778_s30 }
 0x607   : > { %v4099_v29 = vpop.permute.xlu0 %4098 }
 0x608   : > { %v4165_v26 = vpop.permute.xlu1 %4164  ;;  %11822 = vmatpush3.msra.mxu0 %v4099_v29  ;;  %v1049_v29 = vld [vmem:[%s14969_s6 + $0x1718] sm:$0xff] }
 0x609   : > { %4260 = vrot.lane.b32.xlu0 %v1039_v36, %s14778_s30  ;;  %11855 = vmatpush3.msra.mxu1 %v4165_v26  ;;  %v1031_v26 = vld [vmem:[%s14969_s6 + $0x1688] sm:$0xff] }
 0x60a   : > { %4326 = vrot.lane.b32.xlu1 %v1072_v38, %s14778_s30 }
 0x60b   : > { %v4129_v7 = vpop.permute.xlu0 %4128 }
 0x60c   : > { %v4195_v39 = vpop.permute.xlu1 %4194  ;;  %11823 = vmatprep.subr.mxu0 %v4129_v7  ;;  %v1064_v7 = vld [vmem:[%s14969_s6 + $0x1790] sm:$0xff] }
 0x60d   : > { %4228 = vrot.lane.b32.xlu0 %v1023_v5, %s14778_s30  ;;  %11856 = vmatprep.subr.mxu1 %v4195_v39  ;;  %v1015_v39 = vld [vmem:[%s14969_s6 + $0x1608] sm:$0xff] }
 0x60e   : > { %4294 = vrot.lane.b32.xlu1 %v1056_v32, %s14778_s30 }
 0x60f   : > { %v4097_v18 = vpop.permute.xlu0 %4096 }
 0x610   : > { %v4163_v9 = vpop.permute.xlu1 %4162  ;;  %11824 = vmatpush3.msra.mxu0 %v4097_v18  ;;  %v1048_v18 = vld [vmem:[%s14969_s6 + $0x1710] sm:$0xff] }
 0x611   : > { %4258 = vrot.lane.b32.xlu0 %v1038_v13, %s14778_s30  ;;  %11857 = vmatpush3.msra.mxu1 %v4163_v9 }
 0x612   : > { %4324 = vrot.lane.b32.xlu1 %v1071_v45, %s14778_s30  ;;  %v1377_v45 = vld [vmem:[%s14963_s25 + $0x58] sm:$0xff] }
 0x613   : > { %v4127_v42 = vpop.permute.xlu0 %4126 }
 0x614   : > { %v4193_v28 = vpop.permute.xlu1 %4192  ;;  %11825 = vmatprep.subr.mxu0 %v4127_v42  ;;  %v1030_v42 = vld [vmem:[%s14969_s6 + $0x1680] sm:$0xff] }
 0x615   : > { %4226 = vrot.lane.b32.xlu0 %v1022_v46, %s14778_s30  ;;  %11858 = vmatprep.subr.mxu1 %v4193_v28  ;;  %v17775_v46 = vrot.slane %v1377_v45, %v15195_v59  ;;  %v1063_v28 = vld [vmem:[%s14969_s6 + $0x1788] sm:$0xff] }
 0x616   : > { %4292 = vrot.lane.b32.xlu1 %v1055_v15, %s14778_s30 }
 0x617   : > { %v4095_v48 = vpop.permute.xlu0 %4094  ;;  %v1602_v15 = vcombine.high %v17775_v46, %v17775_v46 }
 0x618   : > { %v4161_v49 = vpop.permute.xlu1 %4160  ;;  %11826 = vmatpush3.msra.mxu0 %v4095_v48  ;;  %v1014_v48 = vld [vmem:[%s14969_s6 + $0x1600] sm:$0xff] }
 0x619   : > { %4256 = vrot.lane.b32.xlu0 %v1037_v50, %s14778_s30  ;;  %11859 = vmatpush3.msra.mxu1 %v4161_v49 }
 0x61a   : > { %4322 = vrot.lane.b32.xlu1 %v1070_v30, %s14778_s30  ;;  %v1587_v30 = vcombine.high %v1377_v45, %v1377_v45  ;;  %v1103_v45 = vld [vmem:[%s14969_s6 + $0x18c8] sm:$0xff] }
 0x61b   : > { %v4125_v54 = vpop.permute.xlu0 %4124 }
 0x61c   : > { %v4191_v25 = vpop.permute.xlu1 %4190  ;;  %11827 = vmatprep.subr.mxu0 %v4125_v54 }
 0x61d   : > { %4224 = vrot.lane.b32.xlu0 %v1021_v51, %s14778_s30  ;;  %11860 = vmatprep.subr.mxu1 %v4191_v25  ;;  %v1047_v51 = vld [vmem:[%s14969_s6 + $0x1708] sm:$0xff]  ;;  %v1062_v25 = vld [vmem:[%s14969_s6 + $0x1780] sm:$0xff] }
 0x61e   : > { %4290 = vrot.lane.b32.xlu1 %v1054_v52, %s14778_s30  ;;  %v17789_v52 = vrot.slane %v1587_v30, %v15195_v59  ;;  %v1102_v30 = vld [vmem:[%s14969_s6 + $0x18c0] sm:$0xff] }
 0x61f   : > { %v4093_v53 = vpop.permute.xlu0 %4092 }
 0x620   : > { %v4159_v43 = vpop.permute.xlu1 %4158  ;;  %11828 = vmatpush3.msra.mxu0 %v4093_v53  ;;  %v1109_v53 = vld [vmem:[%s14969_s6 + $0x18f8] sm:$0xff] }
 0x621   : > { %11861 = vmatpush3.msra.mxu1 %v4159_v43  ;;  %4254 = vrot.lane.b32.xlu0 %v1036_v47, %s14778_s30  ;;  %v1603_v47 = vcombine.high %v17789_v52, %v17789_v52  ;;  %v1046_v43 = vld [vmem:[%s14969_s6 + $0x1700] sm:$0xff] }
 0x622   : > { %4320 = vrot.lane.b32.xlu1 %v1069_v55, %s14778_s30 }
 0x623   : > { %v4123_v56 = vpop.permute.xlu0 %4122 }
 0x624   : > { %v4189_v63 = vpop.permute.xlu1 %4188  ;;  %11829 = vmatprep.subr.mxu0 %v4123_v56  ;;  %v1093_v56 = vld [vmem:[%s14969_s6 + $0x1878] sm:$0xff] }
 0x625   : > { %11862 = vmatprep.subr.mxu1 %v4189_v63  ;;  %4222 = vrot.lane.b32.xlu0 %v1020_v58, %s14778_s30  ;;  %v1108_v63 = vld [vmem:[%s14969_s6 + $0x18f0] sm:$0xff] }
 0x626   : > { %4288 = vrot.lane.b32.xlu1 %v1053_v57, %s14778_s30 }
 0x627   : > { %v4091_v2 = vpop.permute.xlu0 %4090 }
 0x628   : > { %v4157_v17 = vpop.permute.xlu1 %4156  ;;  %11830 = vmatpush3.msra.mxu0 %v4091_v2  ;;  %v1141_v2 = vld [vmem:[%s14969_s6 + $0x19f8] sm:$0xff] }
 0x629   : > { %11863 = vmatpush3.msra.mxu1 %v4157_v17  ;;  %4252 = vrot.lane.b32.xlu0 %v1035_v6, %s14778_s30  ;;  %v1092_v17 = vld [vmem:[%s14969_s6 + $0x1870] sm:$0xff] }
 0x62a   : > { %4318 = vrot.lane.b32.xlu1 %v1068_v19, %s14778_s30 }
 0x62b   : > { %v4121_v61 = vpop.permute.xlu0 %4120 }
 0x62c   : > { %v4187_v20 = vpop.permute.xlu1 %4186  ;;  %11831 = vmatprep.subr.mxu0 %v4121_v61  ;;  %v1125_v61 = vld [vmem:[%s14969_s6 + $0x1978] sm:$0xff] }
 0x62d   : > { %11864 = vmatprep.subr.mxu1 %v4187_v20  ;;  %4220 = vrot.lane.b32.xlu0 %v1019_v3, %s14778_s30  ;;  %v1107_v20 = vld [vmem:[%s14969_s6 + $0x18e8] sm:$0xff] }
 0x62e   : > { %4286 = vrot.lane.b32.xlu1 %v1052_v14, %s14778_s30 }
 0x62f   : > { %v4089_v33 = vpop.permute.xlu0 %4088 }
 0x630   : > { %v4155_v23 = vpop.permute.xlu1 %4154  ;;  %11832 = vmatpush3.msra.mxu0 %v4089_v33  ;;  %v1140_v33 = vld [vmem:[%s14969_s6 + $0x19f0] sm:$0xff] }
 0x631   : > { %11865 = vmatpush3.msra.mxu1 %v4155_v23  ;;  %4250 = vrot.lane.b32.xlu0 %v1034_v60, %s14778_s30  ;;  %v1091_v23 = vld [vmem:[%s14969_s6 + $0x1868] sm:$0xff] }
 0x632   : > { %4316 = vrot.lane.b32.xlu1 %v1067_v11, %s14778_s30 }
 0x633   : > { %v4119_v21 = vpop.permute.xlu0 %4118 }
 0x634   : > { %v4185_v62 = vpop.permute.xlu1 %4184  ;;  %11833 = vmatprep.subr.mxu0 %v4119_v21  ;;  %v1124_v21 = vld [vmem:[%s14969_s6 + $0x1970] sm:$0xff] }
 0x635   : > { %11866 = vmatprep.subr.mxu1 %v4185_v62  ;;  %4218 = vrot.lane.b32.xlu0 %v1018_v35, %s14778_s30  ;;  %v1106_v62 = vld [vmem:[%s14969_s6 + $0x18e0] sm:$0xff] }
 0x636   : > { %4284 = vrot.lane.b32.xlu1 %v1051_v22, %s14778_s30 }
 0x637   : > { %v4087_v31 = vpop.permute.xlu0 %4086 }
 0x638   : > { %v4153_v1 = vpop.permute.xlu1 %4152  ;;  %11834 = vmatpush3.msra.mxu0 %v4087_v31  ;;  %v1139_v31 = vld [vmem:[%s14969_s6 + $0x19e8] sm:$0xff] }
 0x639   : > { %11867 = vmatpush3.msra.mxu1 %v4153_v1  ;;  %4248 = vrot.lane.b32.xlu0 %v1033_v24, %s14778_s30  ;;  %v1090_v1 = vld [vmem:[%s14969_s6 + $0x1860] sm:$0xff] }
 0x63a   : > { %4314 = vrot.lane.b32.xlu1 %v1066_v12, %s14778_s30 }
 0x63b   : > { %v4117_v27 = vpop.permute.xlu0 %4116 }
 0x63c   : > { %v4183_v34 = vpop.permute.xlu1 %4182  ;;  %11835 = vmatprep.subr.mxu0 %v4117_v27  ;;  %v1123_v27 = vld [vmem:[%s14969_s6 + $0x1968] sm:$0xff] }
 0x63d   : > { %11868 = vmatprep.subr.mxu1 %v4183_v34  ;;  %4216 = vrot.lane.b32.xlu0 %v1017_v10, %s14778_s30  ;;  %v1105_v34 = vld [vmem:[%s14969_s6 + $0x18d8] sm:$0xff] }
 0x63e   : > { %4282 = vrot.lane.b32.xlu1 %v1050_v41, %s14778_s30 }
 0x63f   : > { %v4085_v16 = vpop.permute.xlu0 %4084 }
 0x640   : > { %v4151_v8 = vpop.permute.xlu1 %4150  ;;  %11836 = vmatpush3.msra.mxu0 %v4085_v16  ;;  %v1138_v16 = vld [vmem:[%s14969_s6 + $0x19e0] sm:$0xff] }
 0x641   : > { %11869 = vmatpush3.msra.mxu1 %v4151_v8  ;;  %4246 = vrot.lane.b32.xlu0 %v1032_v4, %s14778_s30  ;;  %v1089_v8 = vld [vmem:[%s14969_s6 + $0x1858] sm:$0xff] }
 0x642   : > { %4312 = vrot.lane.b32.xlu1 %v1065_v40, %s14778_s30 }
 0x643   : > { %v4115_v36 = vpop.permute.xlu0 %4114 }
 0x644   : > { %v4181_v38 = vpop.permute.xlu1 %4180  ;;  %11837 = vmatprep.subr.mxu0 %v4115_v36  ;;  %v1122_v36 = vld [vmem:[%s14969_s6 + $0x1960] sm:$0xff] }
 0x645   : > { %11870 = vmatprep.subr.mxu1 %v4181_v38  ;;  %4214 = vrot.lane.b32.xlu0 %v1016_v37, %s14778_s30  ;;  %v1104_v38 = vld [vmem:[%s14969_s6 + $0x18d0] sm:$0xff] }
 0x646   : > { %4280 = vrot.lane.b32.xlu1 %v1049_v29, %s14778_s30 }
 0x647   : > { %v4083_v5 = vpop.permute.xlu0 %4082 }
 0x648   : > { %v4149_v32 = vpop.permute.xlu1 %4148  ;;  %11838 = vmatpush3.msra.mxu0 %v4083_v5  ;;  %v1137_v5 = vld [vmem:[%s14969_s6 + $0x19d8] sm:$0xff] }
 0x649   : > { %11871 = vmatpush3.msra.mxu1 %v4149_v32  ;;  %4244 = vrot.lane.b32.xlu0 %v1031_v26, %s14778_s30  ;;  %v1088_v32 = vld [vmem:[%s14969_s6 + $0x1850] sm:$0xff] }
 0x64a   : > { %4310 = vrot.lane.b32.xlu1 %v1064_v7, %s14778_s30  ;;  %7435 = vmatmul.mubr.f32.vlgmr.msra.gmra.mxu0 %v17634_v0 }
 0x64b   : > { %v4179_v13 = vpop.permute.xlu0 %4178  ;;  %7574 = vmatprep.mubr.f32.mxu0 %v1602_v15 }
 0x64c   : > { %v4273_v9 = vpop.permute.xlu1 %4272  ;;  %11872 = vmatprep.subr.mxu1 %v4179_v13  ;;  %v1121_v13 = vld [vmem:[%s14969_s6 + $0x1958] sm:$0xff] }
 0x64d   : > { %4212 = vrot.lane.b32.xlu0 %v1015_v39, %s14778_s30  ;;  %11877 = vmatprep.subr.mxu0 %v4273_v9 }
 0x64e   : > { %4278 = vrot.lane.b32.xlu1 %v1048_v18, %s14778_s30 }
 0x64f   : > { %v4147_v0 = vpop.permute.xlu0 %4146 }
 0x650   : > { %v4241_v50 = vpop.permute.xlu1 %4240  ;;  %11873 = vmatpush3.msra.mxu1 %v4147_v0  ;;  %v1087_v0 = vld [vmem:[%s14969_s6 + $0x1848] sm:$0xff] }
 0x651   : > { %4242 = vrot.lane.b32.xlu0 %v1030_v42, %s14778_s30  ;;  %11878 = vmatpush3.msra.mxu0 %v4241_v50  ;;  %v1136_v42 = vld [vmem:[%s14969_s6 + $0x19d0] sm:$0xff] }
 0x652   : > { %4308 = vrot.lane.b32.xlu1 %v1063_v28, %s14778_s30  ;;  %7505 = vmatmul.mubr.f32.vlgmr.msra.gmra.mxu1 %v17648_v44  ;;  %v1120_v50 = vld [vmem:[%s14969_s6 + $0x1950] sm:$0xff] }
 0x653   : > { %v4271_v49 = vpop.permute.xlu0 %4270  ;;  %7644 = vmatprep.mubr.f32.mxu1 %v1603_v47 }
 0x654   : > { %v4337_v54 = vpop.permute.xlu1 %4336  ;;  %11879 = vmatprep.subr.mxu0 %v4271_v49 }
 0x655   : > { %4210 = vrot.lane.b32.xlu0 %v1014_v48, %s14778_s30  ;;  %11912 = vmatprep.subr.mxu1 %v4337_v54 }
 0x656   : > { %4276 = vrot.lane.b32.xlu1 %v1047_v51, %s14778_s30  ;;  %v1135_v51 = vld [vmem:[%s14969_s6 + $0x19c8] sm:$0xff] }
 0x657   : > { %v4239_v44 = vpop.permute.xlu0 %4238 }
 0x658   : > { %v4305_v55 = vpop.permute.xlu1 %4304  ;;  %11880 = vmatpush3.msra.mxu0 %v4239_v44  ;;  %v1119_v44 = vld [vmem:[%s14969_s6 + $0x1948] sm:$0xff] }
 0x659   : > { %4306 = vrot.lane.b32.xlu0 %v1062_v25, %s14778_s30  ;;  %11913 = vmatpush3.msra.mxu1 %v4305_v55  ;;  %v1086_v25 = vld [vmem:[%s14969_s6 + $0x1840] sm:$0xff]  ;;  %v1101_v55 = vld [vmem:[%s14969_s6 + $0x18b8] sm:$0xff] }
 0x65a   : > { %4400 = vrot.lane.b32.xlu1 %v1109_v53, %s14778_s30 }
 0x65b   : > { %v4269_v58 = vpop.permute.xlu0 %4268 }
 0x65c   : > { %v4335_v57 = vpop.permute.xlu1 %4334  ;;  %11881 = vmatprep.subr.mxu0 %v4269_v58  ;;  %v1134_v58 = vld [vmem:[%s14969_s6 + $0x19c0] sm:$0xff] }
 0x65d   : > { %4274 = vrot.lane.b32.xlu0 %v1046_v43, %s14778_s30  ;;  %11914 = vmatprep.subr.mxu1 %v4335_v57  ;;  %v1085_v57 = vld [vmem:[%s14969_s6 + $0x1838] sm:$0xff] }
 0x65e   : > { %4368 = vrot.lane.b32.xlu1 %v1093_v56, %s14778_s30 }
 0x65f   : > { %v4237_v6 = vpop.permute.xlu0 %4236 }
 0x660   : > { %v4303_v19 = vpop.permute.xlu1 %4302  ;;  %11882 = vmatpush3.msra.mxu0 %v4237_v6  ;;  %v1118_v6 = vld [vmem:[%s14969_s6 + $0x1940] sm:$0xff] }
 0x661   : > { %4398 = vrot.lane.b32.xlu0 %v1108_v63, %s14778_s30  ;;  %11915 = vmatpush3.msra.mxu1 %v4303_v19  ;;  %v1100_v19 = vld [vmem:[%s14969_s6 + $0x18b0] sm:$0xff] }
 0x662   : > { %4464 = vrot.lane.b32.xlu1 %v1141_v2, %s14778_s30 }
 0x663   : > { %v4267_v3 = vpop.permute.xlu0 %4266 }
 0x664   : > { %v4333_v14 = vpop.permute.xlu1 %4332  ;;  %11883 = vmatprep.subr.mxu0 %v4267_v3  ;;  %v1133_v3 = vld [vmem:[%s14969_s6 + $0x19b8] sm:$0xff] }
 0x665   : > { %4366 = vrot.lane.b32.xlu0 %v1092_v17, %s14778_s30  ;;  %11916 = vmatprep.subr.mxu1 %v4333_v14  ;;  %v1084_v14 = vld [vmem:[%s14969_s6 + $0x1830] sm:$0xff] }
 0x666   : > { %4432 = vrot.lane.b32.xlu1 %v1125_v61, %s14778_s30 }
 0x667   : > { %v4235_v60 = vpop.permute.xlu0 %4234 }
 0x668   : > { %v4301_v11 = vpop.permute.xlu1 %4300  ;;  %11884 = vmatpush3.msra.mxu0 %v4235_v60  ;;  %v1117_v60 = vld [vmem:[%s14969_s6 + $0x1938] sm:$0xff] }
 0x669   : > { %4396 = vrot.lane.b32.xlu0 %v1107_v20, %s14778_s30  ;;  %11917 = vmatpush3.msra.mxu1 %v4301_v11  ;;  %v1099_v11 = vld [vmem:[%s14969_s6 + $0x18a8] sm:$0xff] }
 0x66a   : > { %4462 = vrot.lane.b32.xlu1 %v1140_v33, %s14778_s30 }
 0x66b   : > { %v4265_v35 = vpop.permute.xlu0 %4264 }
 0x66c   : > { %v4331_v22 = vpop.permute.xlu1 %4330  ;;  %11885 = vmatprep.subr.mxu0 %v4265_v35  ;;  %v1132_v35 = vld [vmem:[%s14969_s6 + $0x19b0] sm:$0xff] }
 0x66d   : > { %4364 = vrot.lane.b32.xlu0 %v1091_v23, %s14778_s30  ;;  %11918 = vmatprep.subr.mxu1 %v4331_v22  ;;  %v1083_v22 = vld [vmem:[%s14969_s6 + $0x1828] sm:$0xff] }
 0x66e   : > { %4430 = vrot.lane.b32.xlu1 %v1124_v21, %s14778_s30 }
 0x66f   : > { %v4233_v24 = vpop.permute.xlu0 %4232 }
 0x670   : > { %v4299_v12 = vpop.permute.xlu1 %4298  ;;  %11886 = vmatpush3.msra.mxu0 %v4233_v24  ;;  %v1116_v24 = vld [vmem:[%s14969_s6 + $0x1930] sm:$0xff] }
 0x671   : > { %4394 = vrot.lane.b32.xlu0 %v1106_v62, %s14778_s30  ;;  %11919 = vmatpush3.msra.mxu1 %v4299_v12  ;;  %v1098_v12 = vld [vmem:[%s14969_s6 + $0x18a0] sm:$0xff] }
 0x672   : > { %4460 = vrot.lane.b32.xlu1 %v1139_v31, %s14778_s30 }
 0x673   : > { %v4263_v10 = vpop.permute.xlu0 %4262 }
 0x674   : > { %v4329_v41 = vpop.permute.xlu1 %4328  ;;  %11887 = vmatprep.subr.mxu0 %v4263_v10  ;;  %v1131_v10 = vld [vmem:[%s14969_s6 + $0x19a8] sm:$0xff] }
 0x675   : > { %4362 = vrot.lane.b32.xlu0 %v1090_v1, %s14778_s30  ;;  %11920 = vmatprep.subr.mxu1 %v4329_v41  ;;  %v1082_v41 = vld [vmem:[%s14969_s6 + $0x1820] sm:$0xff] }
 0x676   : > { %4428 = vrot.lane.b32.xlu1 %v1123_v27, %s14778_s30 }
 0x677   : > { %v4231_v4 = vpop.permute.xlu0 %4230 }
 0x678   : > { %v4297_v40 = vpop.permute.xlu1 %4296  ;;  %11888 = vmatpush3.msra.mxu0 %v4231_v4  ;;  %v1115_v4 = vld [vmem:[%s14969_s6 + $0x1928] sm:$0xff] }
 0x679   : > { %4392 = vrot.lane.b32.xlu0 %v1105_v34, %s14778_s30  ;;  %11921 = vmatpush3.msra.mxu1 %v4297_v40  ;;  %v1097_v40 = vld [vmem:[%s14969_s6 + $0x1898] sm:$0xff] }
 0x67a   : > { %4458 = vrot.lane.b32.xlu1 %v1138_v16, %s14778_s30 }
 0x67b   : > { %v4261_v37 = vpop.permute.xlu0 %4260 }
 0x67c   : > { %v4327_v29 = vpop.permute.xlu1 %4326  ;;  %11889 = vmatprep.subr.mxu0 %v4261_v37  ;;  %v1130_v37 = vld [vmem:[%s14969_s6 + $0x19a0] sm:$0xff] }
 0x67d   : > { %4360 = vrot.lane.b32.xlu0 %v1089_v8, %s14778_s30  ;;  %11922 = vmatprep.subr.mxu1 %v4327_v29  ;;  %v1081_v29 = vld [vmem:[%s14969_s6 + $0x1818] sm:$0xff] }
 0x67e   : > { %4426 = vrot.lane.b32.xlu1 %v1122_v36, %s14778_s30 }
 0x67f   : > { %v4229_v26 = vpop.permute.xlu0 %4228 }
 0x680   : > { %v4295_v7 = vpop.permute.xlu1 %4294  ;;  %11890 = vmatpush3.msra.mxu0 %v4229_v26  ;;  %v1114_v26 = vld [vmem:[%s14969_s6 + $0x1920] sm:$0xff] }
 0x681   : > { %4390 = vrot.lane.b32.xlu0 %v1104_v38, %s14778_s30  ;;  %11923 = vmatpush3.msra.mxu1 %v4295_v7  ;;  %v1096_v7 = vld [vmem:[%s14969_s6 + $0x1890] sm:$0xff] }
 0x682   : > { %4456 = vrot.lane.b32.xlu1 %v1137_v5, %s14778_s30 }
 0x683   : > { %v4259_v39 = vpop.permute.xlu0 %4258 }
 0x684   : > { %v4325_v18 = vpop.permute.xlu1 %4324  ;;  %11891 = vmatprep.subr.mxu0 %v4259_v39  ;;  %v1129_v39 = vld [vmem:[%s14969_s6 + $0x1998] sm:$0xff] }
 0x685   : > { %4358 = vrot.lane.b32.xlu0 %v1088_v32, %s14778_s30  ;;  %11924 = vmatprep.subr.mxu1 %v4325_v18  ;;  %v1080_v18 = vld [vmem:[%s14969_s6 + $0x1810] sm:$0xff] }
 0x686   : > { %4424 = vrot.lane.b32.xlu1 %v1121_v13, %s14778_s30 }
 0x687   : > { %v4227_v9 = vpop.permute.xlu0 %4226 }
 0x688   : > { %v4293_v15 = vpop.permute.xlu1 %4292  ;;  %11892 = vmatpush3.msra.mxu0 %v4227_v9  ;;  %v1113_v9 = vld [vmem:[%s14969_s6 + $0x1918] sm:$0xff] }
 0x689   : > { %4388 = vrot.lane.b32.xlu0 %v1103_v45, %s14778_s30  ;;  %11925 = vmatpush3.msra.mxu1 %v4293_v15 }
 0x68a   : > { %4454 = vrot.lane.b32.xlu1 %v1136_v42, %s14778_s30  ;;  %v1378_v42 = vld [vmem:[%s14963_s25 + $0x60] sm:$0xff] }
 0x68b   : > { %v4257_v28 = vpop.permute.xlu0 %4256 }
 0x68c   : > { %v4323_v48 = vpop.permute.xlu1 %4322  ;;  %11893 = vmatprep.subr.mxu0 %v4257_v28  ;;  %v1095_v28 = vld [vmem:[%s14969_s6 + $0x1888] sm:$0xff] }
 0x68d   : > { %4356 = vrot.lane.b32.xlu0 %v1087_v0, %s14778_s30  ;;  %11926 = vmatprep.subr.mxu1 %v4323_v48  ;;  %v17907_v0 = vrot.slane %v1378_v42, %v15195_v59  ;;  %v1128_v48 = vld [vmem:[%s14969_s6 + $0x1990] sm:$0xff] }
 0x68e   : > { %4422 = vrot.lane.b32.xlu1 %v1120_v50, %s14778_s30 }
 0x68f   : > { %v4225_v49 = vpop.permute.xlu0 %4224 }
 0x690   : > { %v4291_v54 = vpop.permute.xlu1 %4290  ;;  %11894 = vmatpush3.msra.mxu0 %v4225_v49 }
 0x691   : > { %4386 = vrot.lane.b32.xlu0 %v1102_v30, %s14778_s30  ;;  %11927 = vmatpush3.msra.mxu1 %v4291_v54  ;;  %v1619_v30 = vcombine.high %v17907_v0, %v17907_v0 }
 0x692   : > { %4452 = vrot.lane.b32.xlu1 %v1135_v51, %s14778_s30  ;;  %v1079_v51 = vld [vmem:[%s14969_s6 + $0x1808] sm:$0xff] }
 0x693   : > { %v4255_v47 = vpop.permute.xlu0 %4254 }
 0x694   : > { %v4321_v53 = vpop.permute.xlu1 %4320  ;;  %11895 = vmatprep.subr.mxu0 %v4255_v47  ;;  %v1604_v47 = vcombine.high %v1378_v42, %v1378_v42  ;;  %v1168_v42 = vld [vmem:[%s14969_s6 + $0x1ad0] sm:$0xff] }
 0x695   : > { %4354 = vrot.lane.b32.xlu0 %v1086_v25, %s14778_s30  ;;  %11928 = vmatprep.subr.mxu1 %v4321_v53  ;;  %v1112_v25 = vld [vmem:[%s14969_s6 + $0x1910] sm:$0xff] }
 0x696   : > { %4420 = vrot.lane.b32.xlu1 %v1119_v44, %s14778_s30  ;;  %v17922_v53 = vrot.slane %v1604_v47, %v15195_v59  ;;  %v1200_v47 = vld [vmem:[%s14969_s6 + $0x1bd0] sm:$0xff] }
 0x697   : > { %v4223_v43 = vpop.permute.xlu0 %4222 }
 0x698   : > { %v4289_v56 = vpop.permute.xlu1 %4288  ;;  %11896 = vmatpush3.msra.mxu0 %v4223_v43 }
 0x699   : > { %4384 = vrot.lane.b32.xlu0 %v1101_v55, %s14778_s30  ;;  %11929 = vmatpush3.msra.mxu1 %v4289_v56  ;;  %v1094_v55 = vld [vmem:[%s14969_s6 + $0x1880] sm:$0xff] }
 0x69a   : > { %4450 = vrot.lane.b32.xlu1 %v1134_v58, %s14778_s30  ;;  %v1127_v58 = vld [vmem:[%s14969_s6 + $0x1988] sm:$0xff] }
 0x69b   : > { %v4253_v63 = vpop.permute.xlu0 %4252 }
 0x69c   : > { %v4319_v2 = vpop.permute.xlu1 %4318  ;;  %11897 = vmatprep.subr.mxu0 %v4253_v63 }
 0x69d   : > { %4352 = vrot.lane.b32.xlu0 %v1085_v57, %s14778_s30  ;;  %11930 = vmatprep.subr.mxu1 %v4319_v2  ;;  %v1078_v57 = vld [vmem:[%s14969_s6 + $0x1800] sm:$0xff] }
 0x69e   : > { %4418 = vrot.lane.b32.xlu1 %v1118_v6, %s14778_s30  ;;  %v1111_v6 = vld [vmem:[%s14969_s6 + $0x1908] sm:$0xff] }
 0x69f   : > { %v4221_v17 = vpop.permute.xlu0 %4220 }
 0x6a0   : > { %v4287_v61 = vpop.permute.xlu1 %4286  ;;  %11898 = vmatpush3.msra.mxu0 %v4221_v17 }
 0x6a1   : > { %11931 = vmatpush3.msra.mxu1 %v4287_v61  ;;  %4382 = vrot.lane.b32.xlu0 %v1100_v19, %s14778_s30  ;;  %v1126_v19 = vld [vmem:[%s14969_s6 + $0x1980] sm:$0xff] }
 0x6a2   : > { %4448 = vrot.lane.b32.xlu1 %v1133_v3, %s14778_s30  ;;  %v1173_v3 = vld [vmem:[%s14969_s6 + $0x1af8] sm:$0xff] }
 0x6a3   : > { %v4251_v20 = vpop.permute.xlu0 %4250 }
 0x6a4   : > { %v4317_v33 = vpop.permute.xlu1 %4316  ;;  %11899 = vmatprep.subr.mxu0 %v4251_v20  ;;  %v1157_v20 = vld [vmem:[%s14969_s6 + $0x1a78] sm:$0xff] }
 0x6a5   : > { %11932 = vmatprep.subr.mxu1 %v4317_v33  ;;  %4350 = vrot.lane.b32.xlu0 %v1084_v14, %s14778_s30  ;;  %v1172_v33 = vld [vmem:[%s14969_s6 + $0x1af0] sm:$0xff] }
 0x6a6   : > { %4416 = vrot.lane.b32.xlu1 %v1117_v60, %s14778_s30 }
 0x6a7   : > { %v4219_v23 = vpop.permute.xlu0 %4218 }
 0x6a8   : > { %v4285_v21 = vpop.permute.xlu1 %4284  ;;  %11900 = vmatpush3.msra.mxu0 %v4219_v23  ;;  %v1205_v23 = vld [vmem:[%s14969_s6 + $0x1bf8] sm:$0xff] }
 0x6a9   : > { %11933 = vmatpush3.msra.mxu1 %v4285_v21  ;;  %4380 = vrot.lane.b32.xlu0 %v1099_v11, %s14778_s30  ;;  %v1156_v21 = vld [vmem:[%s14969_s6 + $0x1a70] sm:$0xff] }
 0x6aa   : > { %4446 = vrot.lane.b32.xlu1 %v1132_v35, %s14778_s30 }
 0x6ab   : > { %v4249_v62 = vpop.permute.xlu0 %4248 }
 0x6ac   : > { %v4315_v31 = vpop.permute.xlu1 %4314  ;;  %11901 = vmatprep.subr.mxu0 %v4249_v62  ;;  %v1189_v62 = vld [vmem:[%s14969_s6 + $0x1b78] sm:$0xff] }
 0x6ad   : > { %11934 = vmatprep.subr.mxu1 %v4315_v31  ;;  %4348 = vrot.lane.b32.xlu0 %v1083_v22, %s14778_s30  ;;  %v1171_v31 = vld [vmem:[%s14969_s6 + $0x1ae8] sm:$0xff] }
 0x6ae   : > { %4414 = vrot.lane.b32.xlu1 %v1116_v24, %s14778_s30 }
 0x6af   : > { %v4217_v1 = vpop.permute.xlu0 %4216 }
 0x6b0   : > { %v4283_v27 = vpop.permute.xlu1 %4282  ;;  %11902 = vmatpush3.msra.mxu0 %v4217_v1  ;;  %v1204_v1 = vld [vmem:[%s14969_s6 + $0x1bf0] sm:$0xff] }
 0x6b1   : > { %11935 = vmatpush3.msra.mxu1 %v4283_v27  ;;  %4378 = vrot.lane.b32.xlu0 %v1098_v12, %s14778_s30  ;;  %v1155_v27 = vld [vmem:[%s14969_s6 + $0x1a68] sm:$0xff] }
 0x6b2   : > { %4444 = vrot.lane.b32.xlu1 %v1131_v10, %s14778_s30 }
 0x6b3   : > { %v4247_v34 = vpop.permute.xlu0 %4246 }
 0x6b4   : > { %v4313_v16 = vpop.permute.xlu1 %4312  ;;  %11903 = vmatprep.subr.mxu0 %v4247_v34  ;;  %v1188_v34 = vld [vmem:[%s14969_s6 + $0x1b70] sm:$0xff] }
 0x6b5   : > { %11936 = vmatprep.subr.mxu1 %v4313_v16  ;;  %4346 = vrot.lane.b32.xlu0 %v1082_v41, %s14778_s30  ;;  %v1170_v16 = vld [vmem:[%s14969_s6 + $0x1ae0] sm:$0xff] }
 0x6b6   : > { %4412 = vrot.lane.b32.xlu1 %v1115_v4, %s14778_s30 }
 0x6b7   : > { %v4215_v8 = vpop.permute.xlu0 %4214 }
 0x6b8   : > { %v4281_v36 = vpop.permute.xlu1 %4280  ;;  %11904 = vmatpush3.msra.mxu0 %v4215_v8  ;;  %v1203_v8 = vld [vmem:[%s14969_s6 + $0x1be8] sm:$0xff] }
 0x6b9   : > { %11937 = vmatpush3.msra.mxu1 %v4281_v36  ;;  %4376 = vrot.lane.b32.xlu0 %v1097_v40, %s14778_s30  ;;  %v1154_v36 = vld [vmem:[%s14969_s6 + $0x1a60] sm:$0xff] }
 0x6ba   : > { %4442 = vrot.lane.b32.xlu1 %v1130_v37, %s14778_s30 }
 0x6bb   : > { %v4245_v38 = vpop.permute.xlu0 %4244 }
 0x6bc   : > { %v4311_v5 = vpop.permute.xlu1 %4310  ;;  %11905 = vmatprep.subr.mxu0 %v4245_v38  ;;  %v1187_v38 = vld [vmem:[%s14969_s6 + $0x1b68] sm:$0xff] }
 0x6bd   : > { %11938 = vmatprep.subr.mxu1 %v4311_v5  ;;  %4344 = vrot.lane.b32.xlu0 %v1081_v29, %s14778_s30  ;;  %v1169_v5 = vld [vmem:[%s14969_s6 + $0x1ad8] sm:$0xff] }
 0x6be   : > { %4410 = vrot.lane.b32.xlu1 %v1114_v26, %s14778_s30 }
 0x6bf   : > { %v4213_v32 = vpop.permute.xlu0 %4212 }
 0x6c0   : > { %v4279_v13 = vpop.permute.xlu1 %4278  ;;  %11906 = vmatpush3.msra.mxu0 %v4213_v32  ;;  %v1202_v32 = vld [vmem:[%s14969_s6 + $0x1be0] sm:$0xff] }
 0x6c1   : > { %11939 = vmatpush3.msra.mxu1 %v4279_v13  ;;  %4374 = vrot.lane.b32.xlu0 %v1096_v7, %s14778_s30  ;;  %v1153_v13 = vld [vmem:[%s14969_s6 + $0x1a58] sm:$0xff] }
 0x6c2   : > { %4440 = vrot.lane.b32.xlu1 %v1129_v39, %s14778_s30 }
 0x6c3   : > { %v4243_v45 = vpop.permute.xlu0 %4242 }
 0x6c4   : > { %v4309_v15 = vpop.permute.xlu1 %4308  ;;  %11907 = vmatprep.subr.mxu0 %v4243_v45  ;;  %v1186_v45 = vld [vmem:[%s14969_s6 + $0x1b60] sm:$0xff] }
 0x6c5   : > { %11940 = vmatprep.subr.mxu1 %v4309_v15  ;;  %4342 = vrot.lane.b32.xlu0 %v1080_v18, %s14778_s30 }
 0x6c6   : > { %4408 = vrot.lane.b32.xlu1 %v1113_v9, %s14778_s30 }
 0x6c7   : > { %v4211_v50 = vpop.permute.xlu0 %4210 }
 0x6c8   : > { %v4277_v49 = vpop.permute.xlu1 %4276  ;;  %11908 = vmatpush3.msra.mxu0 %v4211_v50 }
 0x6c9   : > { %11941 = vmatpush3.msra.mxu1 %v4277_v49  ;;  %4372 = vrot.lane.b32.xlu0 %v1095_v28, %s14778_s30  ;;  %v1201_v28 = vld [vmem:[%s14969_s6 + $0x1bd8] sm:$0xff] }
 0x6ca   : > { %4438 = vrot.lane.b32.xlu1 %v1128_v48, %s14778_s30  ;;  %7575 = vmatmul.mubr.f32.vlgmr.msra.gmra.mxu0 %v17775_v46  ;;  %v1620_v46 = vcombine.high %v17922_v53, %v17922_v53  ;;  %v1152_v48 = vld [vmem:[%s14969_s6 + $0x1a50] sm:$0xff]  ;;  %v1185_v49 = vld [vmem:[%s14969_s6 + $0x1b58] sm:$0xff] }
 0x6cb   : > { %v4307_v54 = vpop.permute.xlu0 %4306  ;;  %7714 = vmatprep.mubr.f32.mxu0 %v1619_v30 }
 0x6cc   : > { %v4401_v44 = vpop.permute.xlu1 %4400  ;;  %11942 = vmatprep.subr.mxu1 %v4307_v54  ;;  %v1167_v54 = vld [vmem:[%s14969_s6 + $0x1ac8] sm:$0xff] }
 0x6cd   : > { %4340 = vrot.lane.b32.xlu0 %v1079_v51, %s14778_s30  ;;  %11947 = vmatprep.subr.mxu0 %v4401_v44 }
 0x6ce   : > { %4406 = vrot.lane.b32.xlu1 %v1112_v25, %s14778_s30 }
 0x6cf   : > { %v4275_v43 = vpop.permute.xlu0 %4274 }
 0x6d0   : > { %v4369_v56 = vpop.permute.xlu1 %4368  ;;  %11943 = vmatpush3.msra.mxu1 %v4275_v43 }
 0x6d1   : > { %4370 = vrot.lane.b32.xlu0 %v1094_v55, %s14778_s30  ;;  %11948 = vmatpush3.msra.mxu0 %v4369_v56  ;;  %v1151_v55 = vld [vmem:[%s14969_s6 + $0x1a48] sm:$0xff]  ;;  %v1166_v56 = vld [vmem:[%s14969_s6 + $0x1ac0] sm:$0xff] }
 0x6d2   : > { %4436 = vrot.lane.b32.xlu1 %v1127_v58, %s14778_s30  ;;  %7645 = vmatmul.mubr.f32.vlgmr.msra.gmra.mxu1 %v17789_v52  ;;  %v1110_v52 = vld [vmem:[%s14969_s6 + $0x1900] sm:$0xff]  ;;  %v1184_v58 = vld [vmem:[%s14969_s6 + $0x1b50] sm:$0xff] }
 0x6d3   : > { %v4399_v63 = vpop.permute.xlu0 %4398  ;;  %7784 = vmatprep.mubr.f32.mxu1 %v1620_v46 }
 0x6d4   : > { %v4465_v2 = vpop.permute.xlu1 %4464  ;;  %11949 = vmatprep.subr.mxu0 %v4399_v63  ;;  %v1199_v63 = vld [vmem:[%s14969_s6 + $0x1bc8] sm:$0xff] }
 0x6d5   : > { %4338 = vrot.lane.b32.xlu0 %v1078_v57, %s14778_s30  ;;  %11982 = vmatprep.subr.mxu1 %v4465_v2  ;;  %v1150_v2 = vld [vmem:[%s14969_s6 + $0x1a40] sm:$0xff] }
 0x6d6   : > { %4404 = vrot.lane.b32.xlu1 %v1111_v6, %s14778_s30 }
 0x6d7   : > { %v4367_v17 = vpop.permute.xlu0 %4366 }
 0x6d8   : > { %v4433_v61 = vpop.permute.xlu1 %4432  ;;  %11950 = vmatpush3.msra.mxu0 %v4367_v17  ;;  %v1183_v17 = vld [vmem:[%s14969_s6 + $0x1b48] sm:$0xff] }
 0x6d9   : > { %4434 = vrot.lane.b32.xlu0 %v1126_v19, %s14778_s30  ;;  %11983 = vmatpush3.msra.mxu1 %v4433_v61  ;;  %v1165_v61 = vld [vmem:[%s14969_s6 + $0x1ab8] sm:$0xff] }
 0x6da   : > { %4528 = vrot.lane.b32.xlu1 %v1173_v3, %s14778_s30 }
 0x6db   : > { %v4397_v14 = vpop.permute.xlu0 %4396 }
 0x6dc   : > { %v4463_v60 = vpop.permute.xlu1 %4462  ;;  %11951 = vmatprep.subr.mxu0 %v4397_v14  ;;  %v1198_v14 = vld [vmem:[%s14969_s6 + $0x1bc0] sm:$0xff] }
 0x6dd   : > { %4402 = vrot.lane.b32.xlu0 %v1110_v52, %s14778_s30  ;;  %11984 = vmatprep.subr.mxu1 %v4463_v60  ;;  %v1149_v60 = vld [vmem:[%s14969_s6 + $0x1a38] sm:$0xff] }
 0x6de   : > { %4496 = vrot.lane.b32.xlu1 %v1157_v20, %s14778_s30 }
 0x6df   : > { %v4365_v11 = vpop.permute.xlu0 %4364 }
 0x6e0   : > { %v4431_v35 = vpop.permute.xlu1 %4430  ;;  %11952 = vmatpush3.msra.mxu0 %v4365_v11  ;;  %v1182_v11 = vld [vmem:[%s14969_s6 + $0x1b40] sm:$0xff] }
 0x6e1   : > { %4526 = vrot.lane.b32.xlu0 %v1172_v33, %s14778_s30  ;;  %11985 = vmatpush3.msra.mxu1 %v4431_v35  ;;  %v1164_v35 = vld [vmem:[%s14969_s6 + $0x1ab0] sm:$0xff] }
 0x6e2   : > { %4592 = vrot.lane.b32.xlu1 %v1205_v23, %s14778_s30 }
 0x6e3   : > { %v4395_v22 = vpop.permute.xlu0 %4394 }
 0x6e4   : > { %v4461_v24 = vpop.permute.xlu1 %4460  ;;  %11953 = vmatprep.subr.mxu0 %v4395_v22  ;;  %v1197_v22 = vld [vmem:[%s14969_s6 + $0x1bb8] sm:$0xff] }
 0x6e5   : > { %4494 = vrot.lane.b32.xlu0 %v1156_v21, %s14778_s30  ;;  %11986 = vmatprep.subr.mxu1 %v4461_v24  ;;  %v1148_v24 = vld [vmem:[%s14969_s6 + $0x1a30] sm:$0xff] }
 0x6e6   : > { %4560 = vrot.lane.b32.xlu1 %v1189_v62, %s14778_s30 }
 0x6e7   : > { %v4363_v12 = vpop.permute.xlu0 %4362 }
 0x6e8   : > { %v4429_v10 = vpop.permute.xlu1 %4428  ;;  %11954 = vmatpush3.msra.mxu0 %v4363_v12  ;;  %v1181_v12 = vld [vmem:[%s14969_s6 + $0x1b38] sm:$0xff] }
 0x6e9   : > { %4524 = vrot.lane.b32.xlu0 %v1171_v31, %s14778_s30  ;;  %11987 = vmatpush3.msra.mxu1 %v4429_v10  ;;  %v1163_v10 = vld [vmem:[%s14969_s6 + $0x1aa8] sm:$0xff] }
 0x6ea   : > { %4590 = vrot.lane.b32.xlu1 %v1204_v1, %s14778_s30 }
 0x6eb   : > { %v4393_v41 = vpop.permute.xlu0 %4392 }
 0x6ec   : > { %v4459_v4 = vpop.permute.xlu1 %4458  ;;  %11955 = vmatprep.subr.mxu0 %v4393_v41  ;;  %v1196_v41 = vld [vmem:[%s14969_s6 + $0x1bb0] sm:$0xff] }
 0x6ed   : > { %4492 = vrot.lane.b32.xlu0 %v1155_v27, %s14778_s30  ;;  %11988 = vmatprep.subr.mxu1 %v4459_v4  ;;  %v1147_v4 = vld [vmem:[%s14969_s6 + $0x1a28] sm:$0xff] }
 0x6ee   : > { %4558 = vrot.lane.b32.xlu1 %v1188_v34, %s14778_s30 }
 0x6ef   : > { %v4361_v40 = vpop.permute.xlu0 %4360 }
 0x6f0   : > { %v4427_v37 = vpop.permute.xlu1 %4426  ;;  %11956 = vmatpush3.msra.mxu0 %v4361_v40  ;;  %v1180_v40 = vld [vmem:[%s14969_s6 + $0x1b30] sm:$0xff] }
 0x6f1   : > { %4522 = vrot.lane.b32.xlu0 %v1170_v16, %s14778_s30  ;;  %11989 = vmatpush3.msra.mxu1 %v4427_v37  ;;  %v1162_v37 = vld [vmem:[%s14969_s6 + $0x1aa0] sm:$0xff] }
 0x6f2   : > { %4588 = vrot.lane.b32.xlu1 %v1203_v8, %s14778_s30 }
 0x6f3   : > { %v4391_v29 = vpop.permute.xlu0 %4390 }
 0x6f4   : > { %v4457_v26 = vpop.permute.xlu1 %4456  ;;  %11957 = vmatprep.subr.mxu0 %v4391_v29  ;;  %v1195_v29 = vld [vmem:[%s14969_s6 + $0x1ba8] sm:$0xff] }
 0x6f5   : > { %4490 = vrot.lane.b32.xlu0 %v1154_v36, %s14778_s30  ;;  %11990 = vmatprep.subr.mxu1 %v4457_v26  ;;  %v1146_v26 = vld [vmem:[%s14969_s6 + $0x1a20] sm:$0xff] }
 0x6f6   : > { %4556 = vrot.lane.b32.xlu1 %v1187_v38, %s14778_s30 }
 0x6f7   : > { %v4359_v7 = vpop.permute.xlu0 %4358 }
 0x6f8   : > { %v4425_v39 = vpop.permute.xlu1 %4424  ;;  %11958 = vmatpush3.msra.mxu0 %v4359_v7  ;;  %v1179_v7 = vld [vmem:[%s14969_s6 + $0x1b28] sm:$0xff] }
 0x6f9   : > { %4520 = vrot.lane.b32.xlu0 %v1169_v5, %s14778_s30  ;;  %11991 = vmatpush3.msra.mxu1 %v4425_v39  ;;  %v1161_v39 = vld [vmem:[%s14969_s6 + $0x1a98] sm:$0xff] }
 0x6fa   : > { %4586 = vrot.lane.b32.xlu1 %v1202_v32, %s14778_s30 }
 0x6fb   : > { %v4389_v18 = vpop.permute.xlu0 %4388 }
 0x6fc   : > { %v4455_v9 = vpop.permute.xlu1 %4454  ;;  %11959 = vmatprep.subr.mxu0 %v4389_v18  ;;  %v1194_v18 = vld [vmem:[%s14969_s6 + $0x1ba0] sm:$0xff] }
 0x6fd   : > { %4488 = vrot.lane.b32.xlu0 %v1153_v13, %s14778_s30  ;;  %11992 = vmatprep.subr.mxu1 %v4455_v9  ;;  %v1145_v9 = vld [vmem:[%s14969_s6 + $0x1a18] sm:$0xff] }
 0x6fe   : > { %4554 = vrot.lane.b32.xlu1 %v1186_v45, %s14778_s30 }
 0x6ff   : > { %v4357_v15 = vpop.permute.xlu0 %4356 }
 0x700   : > { %v4423_v50 = vpop.permute.xlu1 %4422  ;;  %11960 = vmatpush3.msra.mxu0 %v4357_v15  ;;  %v1178_v15 = vld [vmem:[%s14969_s6 + $0x1b20] sm:$0xff] }
 0x701   : > { %4518 = vrot.lane.b32.xlu0 %v1168_v42, %s14778_s30  ;;  %11993 = vmatpush3.msra.mxu1 %v4423_v50  ;;  %v1160_v50 = vld [vmem:[%s14969_s6 + $0x1a90] sm:$0xff] }
 0x702   : > { %4584 = vrot.lane.b32.xlu1 %v1201_v28, %s14778_s30 }
 0x703   : > { %v4387_v30 = vpop.permute.xlu0 %4386 }
 0x704   : > { %v4453_v51 = vpop.permute.xlu1 %4452  ;;  %11961 = vmatprep.subr.mxu0 %v4387_v30  ;;  %v1193_v30 = vld [vmem:[%s14969_s6 + $0x1b98] sm:$0xff] }
 0x705   : > { %4486 = vrot.lane.b32.xlu0 %v1152_v48, %s14778_s30  ;;  %11994 = vmatprep.subr.mxu1 %v4453_v51  ;;  %v1144_v51 = vld [vmem:[%s14969_s6 + $0x1a10] sm:$0xff] }
 0x706   : > { %4552 = vrot.lane.b32.xlu1 %v1185_v49, %s14778_s30 }
 0x707   : > { %v4355_v25 = vpop.permute.xlu0 %4354 }
 0x708   : > { %v4421_v44 = vpop.permute.xlu1 %4420  ;;  %11962 = vmatpush3.msra.mxu0 %v4355_v25  ;;  %v1177_v25 = vld [vmem:[%s14969_s6 + $0x1b18] sm:$0xff] }
 0x709   : > { %4516 = vrot.lane.b32.xlu0 %v1167_v54, %s14778_s30  ;;  %11995 = vmatpush3.msra.mxu1 %v4421_v44  ;;  %v1379_v44 = vld [vmem:[%s14963_s25 + $0x68] sm:$0xff] }
 0x70a   : > { %4582 = vrot.lane.b32.xlu1 %v1200_v47, %s14778_s30 }
 0x70b   : > { %v4385_v43 = vpop.permute.xlu0 %4384 }
 0x70c   : > { %v4451_v46 = vpop.permute.xlu1 %4450  ;;  %11963 = vmatprep.subr.mxu0 %v4385_v43  ;;  %v1159_v43 = vld [vmem:[%s14969_s6 + $0x1a88] sm:$0xff] }
 0x70d   : > { %4484 = vrot.lane.b32.xlu0 %v1151_v55, %s14778_s30  ;;  %11996 = vmatprep.subr.mxu1 %v4451_v46  ;;  %v18049_v55 = vrot.slane %v1379_v44, %v15195_v59  ;;  %v1192_v46 = vld [vmem:[%s14969_s6 + $0x1b90] sm:$0xff] }
 0x70e   : > { %4550 = vrot.lane.b32.xlu1 %v1184_v58, %s14778_s30 }
 0x70f   : > { %v4353_v57 = vpop.permute.xlu0 %4352 }
 0x710   : > { %v4419_v6 = vpop.permute.xlu1 %4418  ;;  %11964 = vmatpush3.msra.mxu0 %v4353_v57 }
 0x711   : > { %4514 = vrot.lane.b32.xlu0 %v1166_v56, %s14778_s30  ;;  %11997 = vmatpush3.msra.mxu1 %v4419_v6  ;;  %v1636_v56 = vcombine.high %v18049_v55, %v18049_v55 }
 0x712   : > { %4580 = vrot.lane.b32.xlu1 %v1199_v63, %s14778_s30  ;;  %v1143_v63 = vld [vmem:[%s14969_s6 + $0x1a08] sm:$0xff] }
 0x713   : > { %v4383_v19 = vpop.permute.xlu0 %4382 }
 0x714   : > { %v4449_v3 = vpop.permute.xlu1 %4448  ;;  %11965 = vmatprep.subr.mxu0 %v4383_v19  ;;  %v1621_v19 = vcombine.high %v1379_v44, %v1379_v44 }
 0x715   : > { %4482 = vrot.lane.b32.xlu0 %v1150_v2, %s14778_s30  ;;  %11998 = vmatprep.subr.mxu1 %v4449_v3  ;;  %v1176_v2 = vld [vmem:[%s14969_s6 + $0x1b10] sm:$0xff] }
 0x716   : > { %4548 = vrot.lane.b32.xlu1 %v1183_v17, %s14778_s30  ;;  %v18063_v3 = vrot.slane %v1621_v19, %v15195_v59  ;;  %v1264_v19 = vld [vmem:[%s14969_s6 + $0x1dd0] sm:$0xff] }
 0x717   : > { %v4351_v52 = vpop.permute.xlu0 %4350 }
 0x718   : > { %v4417_v20 = vpop.permute.xlu1 %4416  ;;  %11966 = vmatpush3.msra.mxu0 %v4351_v52  ;;  %v1191_v52 = vld [vmem:[%s14969_s6 + $0x1b88] sm:$0xff] }
 0x719   : > { %4512 = vrot.lane.b32.xlu0 %v1165_v61, %s14778_s30  ;;  %11999 = vmatpush3.msra.mxu1 %v4417_v20 }
 0x71a   : > { %4578 = vrot.lane.b32.xlu1 %v1198_v14, %s14778_s30  ;;  %v1637_v14 = vcombine.high %v18063_v3, %v18063_v3 }
 0x71b   : > { %v4381_v33 = vpop.permute.xlu0 %4380 }
 0x71c   : > { %v4447_v23 = vpop.permute.xlu1 %4446  ;;  %11967 = vmatprep.subr.mxu0 %v4381_v33 }
 0x71d   : > { %4480 = vrot.lane.b32.xlu0 %v1149_v60, %s14778_s30  ;;  %12000 = vmatprep.subr.mxu1 %v4447_v23  ;;  %v1142_v60 = vld [vmem:[%s14969_s6 + $0x1a00] sm:$0xff] }
 0x71e   : > { %4546 = vrot.lane.b32.xlu1 %v1182_v11, %s14778_s30  ;;  %v1175_v11 = vld [vmem:[%s14969_s6 + $0x1b08] sm:$0xff] }
 0x71f   : > { %v4349_v21 = vpop.permute.xlu0 %4348 }
 0x720   : > { %v4415_v62 = vpop.permute.xlu1 %4414  ;;  %11968 = vmatpush3.msra.mxu0 %v4349_v21 }
 0x721   : > { %12001 = vmatpush3.msra.mxu1 %v4415_v62  ;;  %4510 = vrot.lane.b32.xlu0 %v1164_v35, %s14778_s30  ;;  %v1190_v35 = vld [vmem:[%s14969_s6 + $0x1b80] sm:$0xff] }
 0x722   : > { %4576 = vrot.lane.b32.xlu1 %v1197_v22, %s14778_s30  ;;  %v1174_v62 = vld [vmem:[%s14969_s6 + $0x1b00] sm:$0xff] }
 0x723   : > { %v4379_v31 = vpop.permute.xlu0 %4378 }
 0x724   : > { %v4445_v1 = vpop.permute.xlu1 %4444  ;;  %11969 = vmatprep.subr.mxu0 %v4379_v31  ;;  %v1221_v31 = vld [vmem:[%s14969_s6 + $0x1c78] sm:$0xff] }
 0x725   : > { %12002 = vmatprep.subr.mxu1 %v4445_v1  ;;  %4478 = vrot.lane.b32.xlu0 %v1148_v24, %s14778_s30  ;;  %v1236_v1 = vld [vmem:[%s14969_s6 + $0x1cf0] sm:$0xff] }
 0x726   : > { %4544 = vrot.lane.b32.xlu1 %v1181_v12, %s14778_s30 }
 0x727   : > { %v4347_v27 = vpop.permute.xlu0 %4346 }
 0x728   : > { %v4413_v34 = vpop.permute.xlu1 %4412  ;;  %11970 = vmatpush3.msra.mxu0 %v4347_v27  ;;  %v1269_v27 = vld [vmem:[%s14969_s6 + $0x1df8] sm:$0xff] }
 0x729   : > { %12003 = vmatpush3.msra.mxu1 %v4413_v34  ;;  %4508 = vrot.lane.b32.xlu0 %v1163_v10, %s14778_s30  ;;  %v1220_v34 = vld [vmem:[%s14969_s6 + $0x1c70] sm:$0xff] }
 0x72a   : > { %4574 = vrot.lane.b32.xlu1 %v1196_v41, %s14778_s30 }
 0x72b   : > { %v4377_v16 = vpop.permute.xlu0 %4376 }
 0x72c   : > { %v4443_v8 = vpop.permute.xlu1 %4442  ;;  %11971 = vmatprep.subr.mxu0 %v4377_v16  ;;  %v1253_v16 = vld [vmem:[%s14969_s6 + $0x1d78] sm:$0xff] }
 0x72d   : > { %12004 = vmatprep.subr.mxu1 %v4443_v8  ;;  %4476 = vrot.lane.b32.xlu0 %v1147_v4, %s14778_s30  ;;  %v1235_v8 = vld [vmem:[%s14969_s6 + $0x1ce8] sm:$0xff] }
 0x72e   : > { %4542 = vrot.lane.b32.xlu1 %v1180_v40, %s14778_s30 }
 0x72f   : > { %v4345_v36 = vpop.permute.xlu0 %4344 }
 0x730   : > { %v4411_v38 = vpop.permute.xlu1 %4410  ;;  %11972 = vmatpush3.msra.mxu0 %v4345_v36  ;;  %v1268_v36 = vld [vmem:[%s14969_s6 + $0x1df0] sm:$0xff] }
 0x731   : > { %12005 = vmatpush3.msra.mxu1 %v4411_v38  ;;  %4506 = vrot.lane.b32.xlu0 %v1162_v37, %s14778_s30  ;;  %v1219_v38 = vld [vmem:[%s14969_s6 + $0x1c68] sm:$0xff] }
 0x732   : > { %4572 = vrot.lane.b32.xlu1 %v1195_v29, %s14778_s30 }
 0x733   : > { %v4375_v5 = vpop.permute.xlu0 %4374 }
 0x734   : > { %v4441_v32 = vpop.permute.xlu1 %4440  ;;  %11973 = vmatprep.subr.mxu0 %v4375_v5  ;;  %v1252_v5 = vld [vmem:[%s14969_s6 + $0x1d70] sm:$0xff] }
 0x735   : > { %12006 = vmatprep.subr.mxu1 %v4441_v32  ;;  %4474 = vrot.lane.b32.xlu0 %v1146_v26, %s14778_s30  ;;  %v1234_v32 = vld [vmem:[%s14969_s6 + $0x1ce0] sm:$0xff] }
 0x736   : > { %4540 = vrot.lane.b32.xlu1 %v1179_v7, %s14778_s30 }
 0x737   : > { %v4343_v13 = vpop.permute.xlu0 %4342 }
 0x738   : > { %v4409_v45 = vpop.permute.xlu1 %4408  ;;  %11974 = vmatpush3.msra.mxu0 %v4343_v13  ;;  %v1267_v13 = vld [vmem:[%s14969_s6 + $0x1de8] sm:$0xff] }
 0x739   : > { %12007 = vmatpush3.msra.mxu1 %v4409_v45  ;;  %4504 = vrot.lane.b32.xlu0 %v1161_v39, %s14778_s30  ;;  %v1218_v45 = vld [vmem:[%s14969_s6 + $0x1c60] sm:$0xff] }
 0x73a   : > { %4570 = vrot.lane.b32.xlu1 %v1194_v18, %s14778_s30 }
 0x73b   : > { %v4373_v42 = vpop.permute.xlu0 %4372 }
 0x73c   : > { %v4439_v28 = vpop.permute.xlu1 %4438  ;;  %11975 = vmatprep.subr.mxu0 %v4373_v42  ;;  %v1251_v42 = vld [vmem:[%s14969_s6 + $0x1d68] sm:$0xff] }
 0x73d   : > { %12008 = vmatprep.subr.mxu1 %v4439_v28  ;;  %4472 = vrot.lane.b32.xlu0 %v1145_v9, %s14778_s30  ;;  %v1233_v28 = vld [vmem:[%s14969_s6 + $0x1cd8] sm:$0xff] }
 0x73e   : > { %4538 = vrot.lane.b32.xlu1 %v1178_v15, %s14778_s30 }
 0x73f   : > { %v4341_v48 = vpop.permute.xlu0 %4340 }
 0x740   : > { %v4407_v49 = vpop.permute.xlu1 %4406  ;;  %11976 = vmatpush3.msra.mxu0 %v4341_v48  ;;  %v1266_v48 = vld [vmem:[%s14969_s6 + $0x1de0] sm:$0xff] }
 0x741   : > { %12009 = vmatpush3.msra.mxu1 %v4407_v49  ;;  %4502 = vrot.lane.b32.xlu0 %v1160_v50, %s14778_s30  ;;  %v1217_v49 = vld [vmem:[%s14969_s6 + $0x1c58] sm:$0xff] }
 0x742   : > { %4568 = vrot.lane.b32.xlu1 %v1193_v30, %s14778_s30 }
 0x743   : > { %v4371_v54 = vpop.permute.xlu0 %4370 }
 0x744   : > { %v4437_v47 = vpop.permute.xlu1 %4436  ;;  %11977 = vmatprep.subr.mxu0 %v4371_v54  ;;  %v1250_v54 = vld [vmem:[%s14969_s6 + $0x1d60] sm:$0xff] }
 0x745   : > { %12010 = vmatprep.subr.mxu1 %v4437_v47  ;;  %4470 = vrot.lane.b32.xlu0 %v1144_v51, %s14778_s30  ;;  %v1232_v47 = vld [vmem:[%s14969_s6 + $0x1cd0] sm:$0xff] }
 0x746   : > { %4536 = vrot.lane.b32.xlu1 %v1177_v25, %s14778_s30 }
 0x747   : > { %v4339_v58 = vpop.permute.xlu0 %4338 }
 0x748   : > { %v4405_v57 = vpop.permute.xlu1 %4404  ;;  %11978 = vmatpush3.msra.mxu0 %v4339_v58 }
 0x749   : > { %12011 = vmatpush3.msra.mxu1 %v4405_v57  ;;  %4500 = vrot.lane.b32.xlu0 %v1159_v43, %s14778_s30  ;;  %v1265_v43 = vld [vmem:[%s14969_s6 + $0x1dd8] sm:$0xff] }
 0x74a   : > { %7715 = vmatmul.mubr.f32.vlgmr.msra.gmra.mxu0 %v17907_v0  ;;  %4566 = vrot.lane.b32.xlu1 %v1192_v46, %s14778_s30  ;;  %v1158_v0 = vld [vmem:[%s14969_s6 + $0x1a80] sm:$0xff]  ;;  %v1216_v46 = vld [vmem:[%s14969_s6 + $0x1c50] sm:$0xff]  ;;  %v1249_v57 = vld [vmem:[%s14969_s6 + $0x1d58] sm:$0xff] }
 0x74b   : > { %v4435_v6 = vpop.permute.xlu0 %4434  ;;  %7854 = vmatprep.mubr.f32.mxu0 %v1636_v56 }
 0x74c   : > { %v4529_v17 = vpop.permute.xlu1 %4528  ;;  %12012 = vmatprep.subr.mxu1 %v4435_v6  ;;  %v1231_v6 = vld [vmem:[%s14969_s6 + $0x1cc8] sm:$0xff] }
 0x74d   : > { %4468 = vrot.lane.b32.xlu0 %v1143_v63, %s14778_s30  ;;  %12017 = vmatprep.subr.mxu0 %v4529_v17 }
 0x74e   : > { %4534 = vrot.lane.b32.xlu1 %v1176_v2, %s14778_s30 }
 0x74f   : > { %v4403_v61 = vpop.permute.xlu0 %4402 }
 0x750   : > { %v4497_v20 = vpop.permute.xlu1 %4496  ;;  %12013 = vmatpush3.msra.mxu1 %v4403_v61 }
 0x751   : > { %4498 = vrot.lane.b32.xlu0 %v1158_v0, %s14778_s30  ;;  %7785 = vmatmul.mubr.f32.vlgmr.msra.gmra.mxu1 %v17922_v53  ;;  %v1237_v53 = vld [vmem:[%s14969_s6 + $0x1cf8] sm:$0xff]  ;;  %v1215_v0 = vld [vmem:[%s14969_s6 + $0x1c48] sm:$0xff] }
 0x752   : > { %12018 = vmatpush3.msra.mxu0 %v4497_v20  ;;  %4564 = vrot.lane.b32.xlu1 %v1191_v52, %s14778_s30  ;;  %v1248_v52 = vld [vmem:[%s14969_s6 + $0x1d50] sm:$0xff]  ;;  %v1230_v20 = vld [vmem:[%s14969_s6 + $0x1cc0] sm:$0xff] }
 0x753   : > { %v4527_v33 = vpop.permute.xlu0 %4526  ;;  %7924 = vmatprep.mubr.f32.mxu1 %v1637_v14 }
 0x754   : > { %v4593_v23 = vpop.permute.xlu1 %4592  ;;  %12019 = vmatprep.subr.mxu0 %v4527_v33  ;;  %v1263_v33 = vld [vmem:[%s14969_s6 + $0x1dc8] sm:$0xff] }
 0x755   : > { %4466 = vrot.lane.b32.xlu0 %v1142_v60, %s14778_s30  ;;  %12052 = vmatprep.subr.mxu1 %v4593_v23  ;;  %v1214_v23 = vld [vmem:[%s14969_s6 + $0x1c40] sm:$0xff] }
 0x756   : > { %4532 = vrot.lane.b32.xlu1 %v1175_v11, %s14778_s30 }
 0x757   : > { %v4495_v21 = vpop.permute.xlu0 %4494 }
 0x758   : > { %v4561_v22 = vpop.permute.xlu1 %4560  ;;  %12020 = vmatpush3.msra.mxu0 %v4495_v21  ;;  %v1247_v21 = vld [vmem:[%s14969_s6 + $0x1d48] sm:$0xff] }
 0x759   : > { %4562 = vrot.lane.b32.xlu0 %v1190_v35, %s14778_s30  ;;  %12053 = vmatpush3.msra.mxu1 %v4561_v22  ;;  %v1229_v22 = vld [vmem:[%s14969_s6 + $0x1cb8] sm:$0xff] }
 0x75a   : > { %4656 = vrot.lane.b32.xlu1 %v1237_v53, %s14778_s30 }
 0x75b   : > { %v4525_v24 = vpop.permute.xlu0 %4524 }
 0x75c   : > { %v4591_v12 = vpop.permute.xlu1 %4590  ;;  %12021 = vmatprep.subr.mxu0 %v4525_v24  ;;  %v1262_v24 = vld [vmem:[%s14969_s6 + $0x1dc0] sm:$0xff] }
 0x75d   : > { %4530 = vrot.lane.b32.xlu0 %v1174_v62, %s14778_s30  ;;  %12054 = vmatprep.subr.mxu1 %v4591_v12  ;;  %v1213_v12 = vld [vmem:[%s14969_s6 + $0x1c38] sm:$0xff] }
 0x75e   : > { %4624 = vrot.lane.b32.xlu1 %v1221_v31, %s14778_s30 }
 0x75f   : > { %v4493_v10 = vpop.permute.xlu0 %4492 }
 0x760   : > { %v4559_v41 = vpop.permute.xlu1 %4558  ;;  %12022 = vmatpush3.msra.mxu0 %v4493_v10  ;;  %v1246_v10 = vld [vmem:[%s14969_s6 + $0x1d40] sm:$0xff] }
 0x761   : > { %4654 = vrot.lane.b32.xlu0 %v1236_v1, %s14778_s30  ;;  %12055 = vmatpush3.msra.mxu1 %v4559_v41  ;;  %v1228_v41 = vld [vmem:[%s14969_s6 + $0x1cb0] sm:$0xff] }
 0x762   : > { %4720 = vrot.lane.b32.xlu1 %v1269_v27, %s14778_s30 }
 0x763   : > { %v4523_v4 = vpop.permute.xlu0 %4522 }
 0x764   : > { %v4589_v40 = vpop.permute.xlu1 %4588  ;;  %12023 = vmatprep.subr.mxu0 %v4523_v4  ;;  %v1261_v4 = vld [vmem:[%s14969_s6 + $0x1db8] sm:$0xff] }
 0x765   : > { %4622 = vrot.lane.b32.xlu0 %v1220_v34, %s14778_s30  ;;  %12056 = vmatprep.subr.mxu1 %v4589_v40  ;;  %v1212_v40 = vld [vmem:[%s14969_s6 + $0x1c30] sm:$0xff] }
 0x766   : > { %4688 = vrot.lane.b32.xlu1 %v1253_v16, %s14778_s30 }
 0x767   : > { %v4491_v37 = vpop.permute.xlu0 %4490 }
 0x768   : > { %v4557_v29 = vpop.permute.xlu1 %4556  ;;  %12024 = vmatpush3.msra.mxu0 %v4491_v37  ;;  %v1245_v37 = vld [vmem:[%s14969_s6 + $0x1d38] sm:$0xff] }
 0x769   : > { %4652 = vrot.lane.b32.xlu0 %v1235_v8, %s14778_s30  ;;  %12057 = vmatpush3.msra.mxu1 %v4557_v29  ;;  %v1227_v29 = vld [vmem:[%s14969_s6 + $0x1ca8] sm:$0xff] }
 0x76a   : > { %4718 = vrot.lane.b32.xlu1 %v1268_v36, %s14778_s30 }
 0x76b   : > { %v4521_v26 = vpop.permute.xlu0 %4520 }
 0x76c   : > { %v4587_v7 = vpop.permute.xlu1 %4586  ;;  %12025 = vmatprep.subr.mxu0 %v4521_v26  ;;  %v1260_v26 = vld [vmem:[%s14969_s6 + $0x1db0] sm:$0xff] }
 0x76d   : > { %4620 = vrot.lane.b32.xlu0 %v1219_v38, %s14778_s30  ;;  %12058 = vmatprep.subr.mxu1 %v4587_v7  ;;  %v1211_v7 = vld [vmem:[%s14969_s6 + $0x1c28] sm:$0xff] }
 0x76e   : > { %4686 = vrot.lane.b32.xlu1 %v1252_v5, %s14778_s30 }
 0x76f   : > { %v4489_v39 = vpop.permute.xlu0 %4488 }
 0x770   : > { %v4555_v18 = vpop.permute.xlu1 %4554  ;;  %12026 = vmatpush3.msra.mxu0 %v4489_v39  ;;  %v1244_v39 = vld [vmem:[%s14969_s6 + $0x1d30] sm:$0xff] }
 0x771   : > { %4650 = vrot.lane.b32.xlu0 %v1234_v32, %s14778_s30  ;;  %12059 = vmatpush3.msra.mxu1 %v4555_v18  ;;  %v1226_v18 = vld [vmem:[%s14969_s6 + $0x1ca0] sm:$0xff] }
 0x772   : > { %4716 = vrot.lane.b32.xlu1 %v1267_v13, %s14778_s30 }
 0x773   : > { %v4519_v9 = vpop.permute.xlu0 %4518 }
 0x774   : > { %v4585_v15 = vpop.permute.xlu1 %4584  ;;  %12027 = vmatprep.subr.mxu0 %v4519_v9  ;;  %v1259_v9 = vld [vmem:[%s14969_s6 + $0x1da8] sm:$0xff] }
 0x775   : > { %4618 = vrot.lane.b32.xlu0 %v1218_v45, %s14778_s30  ;;  %12060 = vmatprep.subr.mxu1 %v4585_v15  ;;  %v1210_v15 = vld [vmem:[%s14969_s6 + $0x1c20] sm:$0xff] }
 0x776   : > { %4684 = vrot.lane.b32.xlu1 %v1251_v42, %s14778_s30 }
 0x777   : > { %v4487_v50 = vpop.permute.xlu0 %4486 }
 0x778   : > { %v4553_v30 = vpop.permute.xlu1 %4552  ;;  %12028 = vmatpush3.msra.mxu0 %v4487_v50  ;;  %v1243_v50 = vld [vmem:[%s14969_s6 + $0x1d28] sm:$0xff] }
 0x779   : > { %4648 = vrot.lane.b32.xlu0 %v1233_v28, %s14778_s30  ;;  %12061 = vmatpush3.msra.mxu1 %v4553_v30  ;;  %v1225_v30 = vld [vmem:[%s14969_s6 + $0x1c98] sm:$0xff] }
 0x77a   : > { %4714 = vrot.lane.b32.xlu1 %v1266_v48, %s14778_s30 }
 0x77b   : > { %v4517_v51 = vpop.permute.xlu0 %4516 }
 0x77c   : > { %v4583_v25 = vpop.permute.xlu1 %4582  ;;  %12029 = vmatprep.subr.mxu0 %v4517_v51  ;;  %v1258_v51 = vld [vmem:[%s14969_s6 + $0x1da0] sm:$0xff] }
 0x77d   : > { %4616 = vrot.lane.b32.xlu0 %v1217_v49, %s14778_s30  ;;  %12062 = vmatprep.subr.mxu1 %v4583_v25  ;;  %v1209_v25 = vld [vmem:[%s14969_s6 + $0x1c18] sm:$0xff] }
 0x77e   : > { %4682 = vrot.lane.b32.xlu1 %v1250_v54, %s14778_s30 }
 0x77f   : > { %v4485_v44 = vpop.permute.xlu0 %4484 }
 0x780   : > { %v4551_v58 = vpop.permute.xlu1 %4550  ;;  %12030 = vmatpush3.msra.mxu0 %v4485_v44  ;;  %v1242_v44 = vld [vmem:[%s14969_s6 + $0x1d20] sm:$0xff] }
 0x781   : > { %4646 = vrot.lane.b32.xlu0 %v1232_v47, %s14778_s30  ;;  %12063 = vmatpush3.msra.mxu1 %v4551_v58  ;;  %v1224_v58 = vld [vmem:[%s14969_s6 + $0x1c90] sm:$0xff] }
 0x782   : > { %4712 = vrot.lane.b32.xlu1 %v1265_v43, %s14778_s30 }
 0x783   : > { %v4515_v56 = vpop.permute.xlu0 %4514 }
 0x784   : > { %v4581_v63 = vpop.permute.xlu1 %4580  ;;  %12031 = vmatprep.subr.mxu0 %v4515_v56  ;;  %v1257_v56 = vld [vmem:[%s14969_s6 + $0x1d98] sm:$0xff] }
 0x785   : > { %4614 = vrot.lane.b32.xlu0 %v1216_v46, %s14778_s30  ;;  %12064 = vmatprep.subr.mxu1 %v4581_v63  ;;  %v1208_v63 = vld [vmem:[%s14969_s6 + $0x1c10] sm:$0xff] }
 0x786   : > { %4680 = vrot.lane.b32.xlu1 %v1249_v57, %s14778_s30 }
 0x787   : > { %v4483_v2 = vpop.permute.xlu0 %4482 }
 0x788   : > { %v4549_v17 = vpop.permute.xlu1 %4548  ;;  %12032 = vmatpush3.msra.mxu0 %v4483_v2  ;;  %v1241_v2 = vld [vmem:[%s14969_s6 + $0x1d18] sm:$0xff] }
 0x789   : > { %4644 = vrot.lane.b32.xlu0 %v1231_v6, %s14778_s30  ;;  %12065 = vmatpush3.msra.mxu1 %v4549_v17  ;;  %v1380_v17 = vld [vmem:[%s14963_s25 + $0x70] sm:$0xff] }
 0x78a   : > { %4710 = vrot.lane.b32.xlu1 %v1264_v19, %s14778_s30 }
 0x78b   : > { %v4513_v61 = vpop.permute.xlu0 %4512 }
 0x78c   : > { %v4579_v14 = vpop.permute.xlu1 %4578  ;;  %12033 = vmatprep.subr.mxu0 %v4513_v61  ;;  %v1223_v61 = vld [vmem:[%s14969_s6 + $0x1c88] sm:$0xff] }
 0x78d   : > { %4612 = vrot.lane.b32.xlu0 %v1215_v0, %s14778_s30  ;;  %12066 = vmatprep.subr.mxu1 %v4579_v14  ;;  %v18190_v0 = vrot.slane %v1380_v17, %v15195_v59  ;;  %v1256_v14 = vld [vmem:[%s14969_s6 + $0x1d90] sm:$0xff] }
 0x78e   : > { %4678 = vrot.lane.b32.xlu1 %v1248_v52, %s14778_s30 }
 0x78f   : > { %v4481_v60 = vpop.permute.xlu0 %4480 }
 0x790   : > { %v4547_v11 = vpop.permute.xlu1 %4546  ;;  %12034 = vmatpush3.msra.mxu0 %v4481_v60 }
 0x791   : > { %4642 = vrot.lane.b32.xlu0 %v1230_v20, %s14778_s30  ;;  %12067 = vmatpush3.msra.mxu1 %v4547_v11  ;;  %v1653_v20 = vcombine.high %v18190_v0, %v18190_v0 }
 0x792   : > { %4708 = vrot.lane.b32.xlu1 %v1263_v33, %s14778_s30  ;;  %v1207_v33 = vld [vmem:[%s14969_s6 + $0x1c08] sm:$0xff] }
 0x793   : > { %v4511_v35 = vpop.permute.xlu0 %4510 }
 0x794   : > { %v4577_v53 = vpop.permute.xlu1 %4576  ;;  %12035 = vmatprep.subr.mxu0 %v4511_v35  ;;  %v1638_v35 = vcombine.high %v1380_v17, %v1380_v17 }
 0x795   : > { %4610 = vrot.lane.b32.xlu0 %v1214_v23, %s14778_s30  ;;  %12068 = vmatprep.subr.mxu1 %v4577_v53  ;;  %v1240_v23 = vld [vmem:[%s14969_s6 + $0x1d10] sm:$0xff] }
 0x796   : > { %4676 = vrot.lane.b32.xlu1 %v1247_v21, %s14778_s30  ;;  %v18204_v53 = vrot.slane %v1638_v35, %v15195_v59  ;;  %v1328_v35 = vld [vmem:[%s14969_s6 + $0x1fd0] sm:$0xff] }
 0x797   : > { %v4479_v62 = vpop.permute.xlu0 %4478 }
 0x798   : > { %v4545_v31 = vpop.permute.xlu1 %4544  ;;  %12036 = vmatpush3.msra.mxu0 %v4479_v62  ;;  %v1255_v62 = vld [vmem:[%s14969_s6 + $0x1d88] sm:$0xff] }
 0x799   : > { %4640 = vrot.lane.b32.xlu0 %v1229_v22, %s14778_s30  ;;  %12069 = vmatpush3.msra.mxu1 %v4545_v31 }
 0x79a   : > { %4706 = vrot.lane.b32.xlu1 %v1262_v24, %s14778_s30  ;;  %v1654_v24 = vcombine.high %v18204_v53, %v18204_v53 }
 0x79b   : > { %v4509_v1 = vpop.permute.xlu0 %4508 }
 0x79c   : > { %v4575_v27 = vpop.permute.xlu1 %4574  ;;  %12037 = vmatprep.subr.mxu0 %v4509_v1 }
 0x79d   : > { %4608 = vrot.lane.b32.xlu0 %v1213_v12, %s14778_s30  ;;  %12070 = vmatprep.subr.mxu1 %v4575_v27  ;;  %v1206_v12 = vld [vmem:[%s14969_s6 + $0x1c00] sm:$0xff] }
 0x79e   : > { %4674 = vrot.lane.b32.xlu1 %v1246_v10, %s14778_s30  ;;  %v1239_v10 = vld [vmem:[%s14969_s6 + $0x1d08] sm:$0xff] }
 0x79f   : > { %v4477_v34 = vpop.permute.xlu0 %4476 }
 0x7a0   : > { %v4543_v16 = vpop.permute.xlu1 %4542  ;;  %12038 = vmatpush3.msra.mxu0 %v4477_v34 }
 0x7a1   : > { %12071 = vmatpush3.msra.mxu1 %v4543_v16  ;;  %4638 = vrot.lane.b32.xlu0 %v1228_v41, %s14778_s30  ;;  %v1254_v41 = vld [vmem:[%s14969_s6 + $0x1d80] sm:$0xff] }
 0x7a2   : > { %4704 = vrot.lane.b32.xlu1 %v1261_v4, %s14778_s30  ;;  %v1238_v16 = vld [vmem:[%s14969_s6 + $0x1d00] sm:$0xff] }
 0x7a3   : > { %v4507_v8 = vpop.permute.xlu0 %4506 }
 0x7a4   : > { %v4573_v36 = vpop.permute.xlu1 %4572  ;;  %12039 = vmatprep.subr.mxu0 %v4507_v8  ;;  %v1285_v8 = vld [vmem:[%s14969_s6 + $0x1e78] sm:$0xff] }
 0x7a5   : > { %12072 = vmatprep.subr.mxu1 %v4573_v36  ;;  %4606 = vrot.lane.b32.xlu0 %v1212_v40, %s14778_s30  ;;  %v1300_v36 = vld [vmem:[%s14969_s6 + $0x1ef0] sm:$0xff] }
 0x7a6   : > { %4672 = vrot.lane.b32.xlu1 %v1245_v37, %s14778_s30 }
 0x7a7   : > { %v4475_v38 = vpop.permute.xlu0 %4474 }
 0x7a8   : > { %v4541_v5 = vpop.permute.xlu1 %4540  ;;  %12040 = vmatpush3.msra.mxu0 %v4475_v38  ;;  %v1333_v38 = vld [vmem:[%s14969_s6 + $0x1ff8] sm:$0xff] }
 0x7a9   : > { %12073 = vmatpush3.msra.mxu1 %v4541_v5  ;;  %4636 = vrot.lane.b32.xlu0 %v1227_v29, %s14778_s30  ;;  %v1284_v5 = vld [vmem:[%s14969_s6 + $0x1e70] sm:$0xff] }
 0x7aa   : > { %4702 = vrot.lane.b32.xlu1 %v1260_v26, %s14778_s30 }
 0x7ab   : > { %v4505_v32 = vpop.permute.xlu0 %4504 }
 0x7ac   : > { %v4571_v13 = vpop.permute.xlu1 %4570  ;;  %12041 = vmatprep.subr.mxu0 %v4505_v32  ;;  %v1317_v32 = vld [vmem:[%s14969_s6 + $0x1f78] sm:$0xff] }
 0x7ad   : > { %12074 = vmatprep.subr.mxu1 %v4571_v13  ;;  %4604 = vrot.lane.b32.xlu0 %v1211_v7, %s14778_s30  ;;  %v1299_v13 = vld [vmem:[%s14969_s6 + $0x1ee8] sm:$0xff] }
 0x7ae   : > { %4670 = vrot.lane.b32.xlu1 %v1244_v39, %s14778_s30 }
 0x7af   : > { %v4473_v45 = vpop.permute.xlu0 %4472 }
 0x7b0   : > { %v4539_v42 = vpop.permute.xlu1 %4538  ;;  %12042 = vmatpush3.msra.mxu0 %v4473_v45  ;;  %v1332_v45 = vld [vmem:[%s14969_s6 + $0x1ff0] sm:$0xff] }
 0x7b1   : > { %12075 = vmatpush3.msra.mxu1 %v4539_v42  ;;  %4634 = vrot.lane.b32.xlu0 %v1226_v18, %s14778_s30  ;;  %v1283_v42 = vld [vmem:[%s14969_s6 + $0x1e68] sm:$0xff] }
 0x7b2   : > { %4700 = vrot.lane.b32.xlu1 %v1259_v9, %s14778_s30 }
 0x7b3   : > { %v4503_v28 = vpop.permute.xlu0 %4502 }
 0x7b4   : > { %v4569_v48 = vpop.permute.xlu1 %4568  ;;  %12043 = vmatprep.subr.mxu0 %v4503_v28  ;;  %v1316_v28 = vld [vmem:[%s14969_s6 + $0x1f70] sm:$0xff] }
 0x7b5   : > { %12076 = vmatprep.subr.mxu1 %v4569_v48  ;;  %4602 = vrot.lane.b32.xlu0 %v1210_v15, %s14778_s30  ;;  %v1298_v48 = vld [vmem:[%s14969_s6 + $0x1ee0] sm:$0xff] }
 0x7b6   : > { %4668 = vrot.lane.b32.xlu1 %v1243_v50, %s14778_s30 }
 0x7b7   : > { %v4471_v49 = vpop.permute.xlu0 %4470 }
 0x7b8   : > { %v4537_v54 = vpop.permute.xlu1 %4536  ;;  %12044 = vmatpush3.msra.mxu0 %v4471_v49  ;;  %v1331_v49 = vld [vmem:[%s14969_s6 + $0x1fe8] sm:$0xff] }
 0x7b9   : > { %12077 = vmatpush3.msra.mxu1 %v4537_v54  ;;  %4632 = vrot.lane.b32.xlu0 %v1225_v30, %s14778_s30  ;;  %v1282_v54 = vld [vmem:[%s14969_s6 + $0x1e60] sm:$0xff] }
 0x7ba   : > { %4698 = vrot.lane.b32.xlu1 %v1258_v51, %s14778_s30 }
 0x7bb   : > { %v4501_v47 = vpop.permute.xlu0 %4500 }
 0x7bc   : > { %v4567_v43 = vpop.permute.xlu1 %4566  ;;  %12045 = vmatprep.subr.mxu0 %v4501_v47  ;;  %v1315_v47 = vld [vmem:[%s14969_s6 + $0x1f68] sm:$0xff] }
 0x7bd   : > { %12078 = vmatprep.subr.mxu1 %v4567_v43  ;;  %4600 = vrot.lane.b32.xlu0 %v1209_v25, %s14778_s30  ;;  %v1297_v43 = vld [vmem:[%s14969_s6 + $0x1ed8] sm:$0xff] }
 0x7be   : > { %4666 = vrot.lane.b32.xlu1 %v1242_v44, %s14778_s30 }
 0x7bf   : > { %v4469_v46 = vpop.permute.xlu0 %4468 }
 0x7c0   : > { %v4535_v57 = vpop.permute.xlu1 %4534  ;;  %12046 = vmatpush3.msra.mxu0 %v4469_v46  ;;  %v1330_v46 = vld [vmem:[%s14969_s6 + $0x1fe0] sm:$0xff] }
 0x7c1   : > { %12079 = vmatpush3.msra.mxu1 %v4535_v57  ;;  %4630 = vrot.lane.b32.xlu0 %v1224_v58, %s14778_s30  ;;  %v1281_v57 = vld [vmem:[%s14969_s6 + $0x1e58] sm:$0xff] }
 0x7c2   : > { %4696 = vrot.lane.b32.xlu1 %v1257_v56, %s14778_s30 }
 0x7c3   : > { %v4499_v6 = vpop.permute.xlu0 %4498 }
 0x7c4   : > { %v4565_v19 = vpop.permute.xlu1 %4564  ;;  %12047 = vmatprep.subr.mxu0 %v4499_v6  ;;  %v1314_v6 = vld [vmem:[%s14969_s6 + $0x1f60] sm:$0xff] }
 0x7c5   : > { %12080 = vmatprep.subr.mxu1 %v4565_v19  ;;  %4598 = vrot.lane.b32.xlu0 %v1208_v63, %s14778_s30  ;;  %v1296_v19 = vld [vmem:[%s14969_s6 + $0x1ed0] sm:$0xff] }
 0x7c6   : > { %4664 = vrot.lane.b32.xlu1 %v1241_v2, %s14778_s30 }
 0x7c7   : > { %v4467_v52 = vpop.permute.xlu0 %4466 }
 0x7c8   : > { %v4533_v60 = vpop.permute.xlu1 %4532  ;;  %12048 = vmatpush3.msra.mxu0 %v4467_v52 }
 0x7c9   : > { %12081 = vmatpush3.msra.mxu1 %v4533_v60  ;;  %4628 = vrot.lane.b32.xlu0 %v1223_v61, %s14778_s30  ;;  %v1329_v61 = vld [vmem:[%s14969_s6 + $0x1fd8] sm:$0xff] }
 0x7ca   : > { %7855 = vmatmul.mubr.f32.vlgmr.msra.gmra.mxu0 %v18049_v55  ;;  %4694 = vrot.lane.b32.xlu1 %v1256_v14, %s14778_s30  ;;  %v1222_v55 = vld [vmem:[%s14969_s6 + $0x1c80] sm:$0xff]  ;;  %v1280_v14 = vld [vmem:[%s14969_s6 + $0x1e50] sm:$0xff]  ;;  %v1313_v60 = vld [vmem:[%s14969_s6 + $0x1f58] sm:$0xff] }
 0x7cb   : > { %v4563_v11 = vpop.permute.xlu0 %4562  ;;  %7994 = vmatprep.mubr.f32.mxu0 %v1653_v20 }
 0x7cc   : > { %v4657_v21 = vpop.permute.xlu1 %4656  ;;  %12082 = vmatprep.subr.mxu1 %v4563_v11  ;;  %v1295_v11 = vld [vmem:[%s14969_s6 + $0x1ec8] sm:$0xff] }
 0x7cd   : > { %4596 = vrot.lane.b32.xlu0 %v1207_v33, %s14778_s30  ;;  %12087 = vmatprep.subr.mxu0 %v4657_v21 }
 0x7ce   : > { %4662 = vrot.lane.b32.xlu1 %v1240_v23, %s14778_s30 }
 0x7cf   : > { %v4531_v22 = vpop.permute.xlu0 %4530 }
 0x7d0   : > { %v4625_v31 = vpop.permute.xlu1 %4624  ;;  %12083 = vmatpush3.msra.mxu1 %v4531_v22 }
 0x7d1   : > { %4626 = vrot.lane.b32.xlu0 %v1222_v55, %s14778_s30  ;;  %7925 = vmatmul.mubr.f32.vlgmr.msra.gmra.mxu1 %v18063_v3  ;;  %v1301_v3 = vld [vmem:[%s14969_s6 + $0x1ef8] sm:$0xff]  ;;  %v1279_v55 = vld [vmem:[%s14969_s6 + $0x1e48] sm:$0xff] }
 0x7d2   : > { %12088 = vmatpush3.msra.mxu0 %v4625_v31  ;;  %4692 = vrot.lane.b32.xlu1 %v1255_v62, %s14778_s30  ;;  %v1312_v62 = vld [vmem:[%s14969_s6 + $0x1f50] sm:$0xff]  ;;  %v1294_v31 = vld [vmem:[%s14969_s6 + $0x1ec0] sm:$0xff] }
 0x7d3   : > { %v4655_v1 = vpop.permute.xlu0 %4654  ;;  %8064 = vmatprep.mubr.f32.mxu1 %v1654_v24 }
 0x7d4   : > { %v4721_v27 = vpop.permute.xlu1 %4720  ;;  %12089 = vmatprep.subr.mxu0 %v4655_v1  ;;  %v1327_v1 = vld [vmem:[%s14969_s6 + $0x1fc8] sm:$0xff] }
 0x7d5   : > { %4594 = vrot.lane.b32.xlu0 %v1206_v12, %s14778_s30  ;;  %12122 = vmatprep.subr.mxu1 %v4721_v27  ;;  %v1278_v27 = vld [vmem:[%s14969_s6 + $0x1e40] sm:$0xff] }
 0x7d6   : > { %4660 = vrot.lane.b32.xlu1 %v1239_v10, %s14778_s30 }
 0x7d7   : > { %v4623_v34 = vpop.permute.xlu0 %4622 }
 0x7d8   : > { %v4689_v4 = vpop.permute.xlu1 %4688  ;;  %12090 = vmatpush3.msra.mxu0 %v4623_v34  ;;  %v1311_v34 = vld [vmem:[%s14969_s6 + $0x1f48] sm:$0xff] }
 0x7d9   : > { %4690 = vrot.lane.b32.xlu0 %v1254_v41, %s14778_s30  ;;  %12123 = vmatpush3.msra.mxu1 %v4689_v4  ;;  %v1293_v4 = vld [vmem:[%s14969_s6 + $0x1eb8] sm:$0xff] }
 0x7da   : > { %4784 = vrot.lane.b32.xlu1 %v1301_v3, %s14778_s30 }
 0x7db   : > { %v4653_v40 = vpop.permute.xlu0 %4652 }
 0x7dc   : > { %v4719_v37 = vpop.permute.xlu1 %4718  ;;  %12091 = vmatprep.subr.mxu0 %v4653_v40  ;;  %v1326_v40 = vld [vmem:[%s14969_s6 + $0x1fc0] sm:$0xff] }
 0x7dd   : > { %4658 = vrot.lane.b32.xlu0 %v1238_v16, %s14778_s30  ;;  %12124 = vmatprep.subr.mxu1 %v4719_v37  ;;  %v1277_v37 = vld [vmem:[%s14969_s6 + $0x1e38] sm:$0xff] }
 0x7de   : > { %4752 = vrot.lane.b32.xlu1 %v1285_v8, %s14778_s30 }
 0x7df   : > { %v4621_v29 = vpop.permute.xlu0 %4620 }
 0x7e0   : > { %v4687_v26 = vpop.permute.xlu1 %4686  ;;  %12092 = vmatpush3.msra.mxu0 %v4621_v29  ;;  %v1310_v29 = vld [vmem:[%s14969_s6 + $0x1f40] sm:$0xff] }
 0x7e1   : > { %4782 = vrot.lane.b32.xlu0 %v1300_v36, %s14778_s30  ;;  %12125 = vmatpush3.msra.mxu1 %v4687_v26  ;;  %v1292_v26 = vld [vmem:[%s14969_s6 + $0x1eb0] sm:$0xff] }
 0x7e2   : > { %4848 = vrot.lane.b32.xlu1 %v1333_v38, %s14778_s30 }
 0x7e3   : > { %v4651_v7 = vpop.permute.xlu0 %4650 }
 0x7e4   : > { %v4717_v39 = vpop.permute.xlu1 %4716  ;;  %12093 = vmatprep.subr.mxu0 %v4651_v7  ;;  %v1325_v7 = vld [vmem:[%s14969_s6 + $0x1fb8] sm:$0xff] }
 0x7e5   : > { %4750 = vrot.lane.b32.xlu0 %v1284_v5, %s14778_s30  ;;  %12126 = vmatprep.subr.mxu1 %v4717_v39  ;;  %v1276_v39 = vld [vmem:[%s14969_s6 + $0x1e30] sm:$0xff] }
 0x7e6   : > { %4816 = vrot.lane.b32.xlu1 %v1317_v32, %s14778_s30 }
 0x7e7   : > { %v4619_v18 = vpop.permute.xlu0 %4618 }
 0x7e8   : > { %v4685_v9 = vpop.permute.xlu1 %4684  ;;  %12094 = vmatpush3.msra.mxu0 %v4619_v18  ;;  %v1309_v18 = vld [vmem:[%s14969_s6 + $0x1f38] sm:$0xff] }
 0x7e9   : > { %4780 = vrot.lane.b32.xlu0 %v1299_v13, %s14778_s30  ;;  %12127 = vmatpush3.msra.mxu1 %v4685_v9  ;;  %v1291_v9 = vld [vmem:[%s14969_s6 + $0x1ea8] sm:$0xff] }
 0x7ea   : > { %4846 = vrot.lane.b32.xlu1 %v1332_v45, %s14778_s30 }
 0x7eb   : > { %v4649_v15 = vpop.permute.xlu0 %4648 }
 0x7ec   : > { %v4715_v50 = vpop.permute.xlu1 %4714  ;;  %12095 = vmatprep.subr.mxu0 %v4649_v15  ;;  %v1324_v15 = vld [vmem:[%s14969_s6 + $0x1fb0] sm:$0xff] }
 0x7ed   : > { %4748 = vrot.lane.b32.xlu0 %v1283_v42, %s14778_s30  ;;  %12128 = vmatprep.subr.mxu1 %v4715_v50  ;;  %v1275_v50 = vld [vmem:[%s14969_s6 + $0x1e28] sm:$0xff] }
 0x7ee   : > { %4814 = vrot.lane.b32.xlu1 %v1316_v28, %s14778_s30 }
 0x7ef   : > { %v4617_v30 = vpop.permute.xlu0 %4616 }
 0x7f0   : > { %v4683_v51 = vpop.permute.xlu1 %4682  ;;  %12096 = vmatpush3.msra.mxu0 %v4617_v30  ;;  %v1308_v30 = vld [vmem:[%s14969_s6 + $0x1f30] sm:$0xff] }
 0x7f1   : > { %4778 = vrot.lane.b32.xlu0 %v1298_v48, %s14778_s30  ;;  %12129 = vmatpush3.msra.mxu1 %v4683_v51  ;;  %v1290_v51 = vld [vmem:[%s14969_s6 + $0x1ea0] sm:$0xff] }
 0x7f2   : > { %4844 = vrot.lane.b32.xlu1 %v1331_v49, %s14778_s30 }
 0x7f3   : > { %v4647_v25 = vpop.permute.xlu0 %4646 }
 0x7f4   : > { %v4713_v44 = vpop.permute.xlu1 %4712  ;;  %12097 = vmatprep.subr.mxu0 %v4647_v25  ;;  %v1323_v25 = vld [vmem:[%s14969_s6 + $0x1fa8] sm:$0xff] }
 0x7f5   : > { %4746 = vrot.lane.b32.xlu0 %v1282_v54, %s14778_s30  ;;  %12130 = vmatprep.subr.mxu1 %v4713_v44  ;;  %v1274_v44 = vld [vmem:[%s14969_s6 + $0x1e20] sm:$0xff] }
 0x7f6   : > { %4812 = vrot.lane.b32.xlu1 %v1315_v47, %s14778_s30 }
 0x7f7   : > { %v4615_v58 = vpop.permute.xlu0 %4614 }
 0x7f8   : > { %v4681_v56 = vpop.permute.xlu1 %4680  ;;  %12098 = vmatpush3.msra.mxu0 %v4615_v58  ;;  %v1307_v58 = vld [vmem:[%s14969_s6 + $0x1f28] sm:$0xff] }
 0x7f9   : > { %4776 = vrot.lane.b32.xlu0 %v1297_v43, %s14778_s30  ;;  %12131 = vmatpush3.msra.mxu1 %v4681_v56  ;;  %v1289_v56 = vld [vmem:[%s14969_s6 + $0x1e98] sm:$0xff] }
 0x7fa   : > { %4842 = vrot.lane.b32.xlu1 %v1330_v46, %s14778_s30 }
 0x7fb   : > { %v4645_v63 = vpop.permute.xlu0 %4644 }
 0x7fc   : > { %v4711_v2 = vpop.permute.xlu1 %4710  ;;  %12099 = vmatprep.subr.mxu0 %v4645_v63  ;;  %v1322_v63 = vld [vmem:[%s14969_s6 + $0x1fa0] sm:$0xff] }
 0x7fd   : > { %4744 = vrot.lane.b32.xlu0 %v1281_v57, %s14778_s30  ;;  %12132 = vmatprep.subr.mxu1 %v4711_v2  ;;  %v1273_v2 = vld [vmem:[%s14969_s6 + $0x1e18] sm:$0xff] }
 0x7fe   : > { %4810 = vrot.lane.b32.xlu1 %v1314_v6, %s14778_s30 }
 0x7ff   : > { %v4613_v17 = vpop.permute.xlu0 %4612 }
 0x800   : > { %v4679_v52 = vpop.permute.xlu1 %4678  ;;  %12100 = vmatpush3.msra.mxu0 %v4613_v17  ;;  %v1306_v17 = vld [vmem:[%s14969_s6 + $0x1f20] sm:$0xff] }
 0x801   : > { %4774 = vrot.lane.b32.xlu0 %v1296_v19, %s14778_s30  ;;  %12133 = vmatpush3.msra.mxu1 %v4679_v52  ;;  %v1288_v52 = vld [vmem:[%s14969_s6 + $0x1e90] sm:$0xff] }
 0x802   : > { %4840 = vrot.lane.b32.xlu1 %v1329_v61, %s14778_s30 }
 0x803   : > { %v4643_v20 = vpop.permute.xlu0 %4642 }
 0x804   : > { %v4709_v33 = vpop.permute.xlu1 %4708  ;;  %12101 = vmatprep.subr.mxu0 %v4643_v20  ;;  %v1321_v20 = vld [vmem:[%s14969_s6 + $0x1f98] sm:$0xff] }
 0x805   : > { %4742 = vrot.lane.b32.xlu0 %v1280_v14, %s14778_s30  ;;  %12134 = vmatprep.subr.mxu1 %v4709_v33  ;;  %v1272_v33 = vld [vmem:[%s14969_s6 + $0x1e10] sm:$0xff] }
 0x806   : > { %4808 = vrot.lane.b32.xlu1 %v1313_v60, %s14778_s30 }
 0x807   : > { %v4611_v23 = vpop.permute.xlu0 %4610 }
 0x808   : > { %v4677_v21 = vpop.permute.xlu1 %4676  ;;  %12102 = vmatpush3.msra.mxu0 %v4611_v23  ;;  %v1305_v23 = vld [vmem:[%s14969_s6 + $0x1f18] sm:$0xff] }
 0x809   : > { %4772 = vrot.lane.b32.xlu0 %v1295_v11, %s14778_s30  ;;  %12135 = vmatpush3.msra.mxu1 %v4677_v21  ;;  %v1381_v21 = vld [vmem:[%s14963_s25 + $0x78] sm:$0xff] }
 0x80a   : > { %4838 = vrot.lane.b32.xlu1 %v1328_v35, %s14778_s30 }
 0x80b   : > { %v4641_v22 = vpop.permute.xlu0 %4640 }
 0x80c   : > { %v4707_v24 = vpop.permute.xlu1 %4706  ;;  %12103 = vmatprep.subr.mxu0 %v4641_v22  ;;  %v1287_v22 = vld [vmem:[%s14969_s6 + $0x1e88] sm:$0xff] }
 0x80d   : > { %4740 = vrot.lane.b32.xlu0 %v1279_v55, %s14778_s30  ;;  %12136 = vmatprep.subr.mxu1 %v4707_v24  ;;  %v18331_v55 = vrot.slane %v1381_v21, %v15195_v59  ;;  %v1320_v24 = vld [vmem:[%s14969_s6 + $0x1f90] sm:$0xff] }
 0x80e   : > { %4806 = vrot.lane.b32.xlu1 %v1312_v62, %s14778_s30 }
 0x80f   : > { %v4609_v12 = vpop.permute.xlu0 %4608 }
 0x810   : > { %v4675_v10 = vpop.permute.xlu1 %4674  ;;  %12104 = vmatpush3.msra.mxu0 %v4609_v12 }
 0x811   : > { %4770 = vrot.lane.b32.xlu0 %v1294_v31, %s14778_s30  ;;  %12137 = vmatpush3.msra.mxu1 %v4675_v10  ;;  %v1670_v31 = vcombine.high %v18331_v55, %v18331_v55 }
 0x812   : > { %4836 = vrot.lane.b32.xlu1 %v1327_v1, %s14778_s30  ;;  %v1271_v1 = vld [vmem:[%s14969_s6 + $0x1e08] sm:$0xff] }
 0x813   : > { %v4639_v41 = vpop.permute.xlu0 %4638 }
 0x814   : > { %v4705_v3 = vpop.permute.xlu1 %4704  ;;  %12105 = vmatprep.subr.mxu0 %v4639_v41  ;;  %v1655_v41 = vcombine.high %v1381_v21, %v1381_v21 }
 0x815   : > { %4738 = vrot.lane.b32.xlu0 %v1278_v27, %s14778_s30  ;;  %12138 = vmatprep.subr.mxu1 %v4705_v3  ;;  %v1304_v27 = vld [vmem:[%s14969_s6 + $0x1f10] sm:$0xff] }
 0x816   : > { %4804 = vrot.lane.b32.xlu1 %v1311_v34, %s14778_s30  ;;  %v18345_v3 = vrot.slane %v1655_v41, %v15195_v59  ;;  %v1338_v41 = vld [vmem:[%s14969_s6 + $0x2020] sm:$0xff] }
 0x817   : > { %v4607_v16 = vpop.permute.xlu0 %4606 }
 0x818   : > { %v4673_v8 = vpop.permute.xlu1 %4672  ;;  %12106 = vmatpush3.msra.mxu0 %v4607_v16  ;;  %v1319_v16 = vld [vmem:[%s14969_s6 + $0x1f88] sm:$0xff] }
 0x819   : > { %4768 = vrot.lane.b32.xlu0 %v1293_v4, %s14778_s30  ;;  %12139 = vmatpush3.msra.mxu1 %v4673_v8 }
 0x81a   : > { %4834 = vrot.lane.b32.xlu1 %v1326_v40, %s14778_s30  ;;  %v1671_v40 = vcombine.high %v18345_v3, %v18345_v3 }
 0x81b   : > { %v4637_v36 = vpop.permute.xlu0 %4636 }
 0x81c   : > { %v4703_v38 = vpop.permute.xlu1 %4702  ;;  %12107 = vmatprep.subr.mxu0 %v4637_v36 }
 0x81d   : > { %4736 = vrot.lane.b32.xlu0 %v1277_v37, %s14778_s30  ;;  %12140 = vmatprep.subr.mxu1 %v4703_v38  ;;  %v1270_v37 = vld [vmem:[%s14969_s6 + $0x1e00] sm:$0xff] }
 0x81e   : > { %4802 = vrot.lane.b32.xlu1 %v1310_v29, %s14778_s30  ;;  %v1303_v29 = vld [vmem:[%s14969_s6 + $0x1f08] sm:$0xff] }
 0x81f   : > { %v4605_v5 = vpop.permute.xlu0 %4604 }
 0x820   : > { %v4671_v32 = vpop.permute.xlu1 %4670  ;;  %12108 = vmatpush3.msra.mxu0 %v4605_v5 }
 0x821   : > { %12141 = vmatpush3.msra.mxu1 %v4671_v32  ;;  %4766 = vrot.lane.b32.xlu0 %v1292_v26, %s14778_s30  ;;  %v1318_v26 = vld [vmem:[%s14969_s6 + $0x1f80] sm:$0xff] }
 0x822   : > { %4832 = vrot.lane.b32.xlu1 %v1325_v7, %s14778_s30  ;;  %v1302_v32 = vld [vmem:[%s14969_s6 + $0x1f00] sm:$0xff] }
 0x823   : > { %v4635_v13 = vpop.permute.xlu0 %4634 }
 0x824   : > { %v4701_v45 = vpop.permute.xlu1 %4700  ;;  %12109 = vmatprep.subr.mxu0 %v4635_v13  ;;  %v1349_v13 = vld [vmem:[%s14969_s6 + $0x2078] sm:$0xff] }
 0x825   : > { %12142 = vmatprep.subr.mxu1 %v4701_v45  ;;  %4734 = vrot.lane.b32.xlu0 %v1276_v39, %s14778_s30  ;;  %v1364_v45 = vld [vmem:[%s14969_s6 + $0x20f0] sm:$0xff] }
 0x826   : > { %4800 = vrot.lane.b32.xlu1 %v1309_v18, %s14778_s30 }
 0x827   : > { %v4603_v42 = vpop.permute.xlu0 %4602 }
 0x828   : > { %v4669_v28 = vpop.permute.xlu1 %4668  ;;  %12110 = vmatpush3.msra.mxu0 %v4603_v42  ;;  %v1348_v42 = vld [vmem:[%s14969_s6 + $0x2070] sm:$0xff] }
 0x829   : > { %12143 = vmatpush3.msra.mxu1 %v4669_v28  ;;  %4764 = vrot.lane.b32.xlu0 %v1291_v9, %s14778_s30  ;;  %v1363_v28 = vld [vmem:[%s14969_s6 + $0x20e8] sm:$0xff] }
 0x82a   : > { %4830 = vrot.lane.b32.xlu1 %v1324_v15, %s14778_s30 }
 0x82b   : > { %v4633_v48 = vpop.permute.xlu0 %4632 }
 0x82c   : > { %v4699_v49 = vpop.permute.xlu1 %4698  ;;  %12111 = vmatprep.subr.mxu0 %v4633_v48  ;;  %v1347_v48 = vld [vmem:[%s14969_s6 + $0x2068] sm:$0xff] }
 0x82d   : > { %12144 = vmatprep.subr.mxu1 %v4699_v49  ;;  %4732 = vrot.lane.b32.xlu0 %v1275_v50, %s14778_s30  ;;  %v1362_v49 = vld [vmem:[%s14969_s6 + $0x20e0] sm:$0xff] }
 0x82e   : > { %4798 = vrot.lane.b32.xlu1 %v1308_v30, %s14778_s30 }
 0x82f   : > { %v4601_v54 = vpop.permute.xlu0 %4600 }
 0x830   : > { %v4667_v47 = vpop.permute.xlu1 %4666  ;;  %12112 = vmatpush3.msra.mxu0 %v4601_v54  ;;  %v1346_v54 = vld [vmem:[%s14969_s6 + $0x2060] sm:$0xff] }
 0x831   : > { %12145 = vmatpush3.msra.mxu1 %v4667_v47  ;;  %4762 = vrot.lane.b32.xlu0 %v1290_v51, %s14778_s30  ;;  %v1361_v47 = vld [vmem:[%s14969_s6 + $0x20d8] sm:$0xff] }
 0x832   : > { %4828 = vrot.lane.b32.xlu1 %v1323_v25, %s14778_s30 }
 0x833   : > { %v4631_v43 = vpop.permute.xlu0 %4630 }
 0x834   : > { %v4697_v46 = vpop.permute.xlu1 %4696  ;;  %12113 = vmatprep.subr.mxu0 %v4631_v43  ;;  %v1345_v43 = vld [vmem:[%s14969_s6 + $0x2058] sm:$0xff] }
 0x835   : > { %12146 = vmatprep.subr.mxu1 %v4697_v46  ;;  %4730 = vrot.lane.b32.xlu0 %v1274_v44, %s14778_s30  ;;  %v1360_v46 = vld [vmem:[%s14969_s6 + $0x20d0] sm:$0xff] }
 0x836   : > { %4796 = vrot.lane.b32.xlu1 %v1307_v58, %s14778_s30 }
 0x837   : > { %v4599_v57 = vpop.permute.xlu0 %4598 }
 0x838   : > { %v4665_v6 = vpop.permute.xlu1 %4664  ;;  %12114 = vmatpush3.msra.mxu0 %v4599_v57  ;;  %v1344_v57 = vld [vmem:[%s14969_s6 + $0x2050] sm:$0xff] }
 0x839   : > { %12147 = vmatpush3.msra.mxu1 %v4665_v6  ;;  %4760 = vrot.lane.b32.xlu0 %v1289_v56, %s14778_s30  ;;  %v1359_v6 = vld [vmem:[%s14969_s6 + $0x20c8] sm:$0xff] }
 0x83a   : > { %4826 = vrot.lane.b32.xlu1 %v1322_v63, %s14778_s30 }
 0x83b   : > { %v4629_v19 = vpop.permute.xlu0 %4628 }
 0x83c   : > { %v4695_v61 = vpop.permute.xlu1 %4694  ;;  %12115 = vmatprep.subr.mxu0 %v4629_v19  ;;  %v1343_v19 = vld [vmem:[%s14969_s6 + $0x2048] sm:$0xff] }
 0x83d   : > { %12148 = vmatprep.subr.mxu1 %v4695_v61  ;;  %4728 = vrot.lane.b32.xlu0 %v1273_v2, %s14778_s30  ;;  %v1358_v61 = vld [vmem:[%s14969_s6 + $0x20c0] sm:$0xff] }
 0x83e   : > { %4794 = vrot.lane.b32.xlu1 %v1306_v17, %s14778_s30 }
 0x83f   : > { %v4597_v14 = vpop.permute.xlu0 %4596 }
 0x840   : > { %v4663_v60 = vpop.permute.xlu1 %4662  ;;  %12116 = vmatpush3.msra.mxu0 %v4597_v14  ;;  %v1342_v14 = vld [vmem:[%s14969_s6 + $0x2040] sm:$0xff] }
 0x841   : > { %12149 = vmatpush3.msra.mxu1 %v4663_v60  ;;  %4758 = vrot.lane.b32.xlu0 %v1288_v52, %s14778_s30  ;;  %v1357_v60 = vld [vmem:[%s14969_s6 + $0x20b8] sm:$0xff] }
 0x842   : > { %4824 = vrot.lane.b32.xlu1 %v1321_v20, %s14778_s30 }
 0x843   : > { %v4627_v11 = vpop.permute.xlu0 %4626 }
 0x844   : > { %v4693_v35 = vpop.permute.xlu1 %4692  ;;  %12117 = vmatprep.subr.mxu0 %v4627_v11  ;;  %v1341_v11 = vld [vmem:[%s14969_s6 + $0x2038] sm:$0xff] }
 0x845   : > { %12150 = vmatprep.subr.mxu1 %v4693_v35  ;;  %4726 = vrot.lane.b32.xlu0 %v1272_v33, %s14778_s30  ;;  %v1356_v35 = vld [vmem:[%s14969_s6 + $0x20b0] sm:$0xff] }
 0x846   : > { %4792 = vrot.lane.b32.xlu1 %v1305_v23, %s14778_s30 }
 0x847   : > { %v4595_v62 = vpop.permute.xlu0 %4594 }
 0x848   : > { %v4661_v12 = vpop.permute.xlu1 %4660  ;;  %12118 = vmatpush3.msra.mxu0 %v4595_v62 }
 0x849   : > { %12151 = vmatpush3.msra.mxu1 %v4661_v12  ;;  %4756 = vrot.lane.b32.xlu0 %v1287_v22, %s14778_s30  ;;  %v1340_v22 = vld [vmem:[%s14969_s6 + $0x2030] sm:$0xff]  ;;  %v1339_v12 = vld [vmem:[%s14969_s6 + $0x2028] sm:$0xff] }
 0x84a   : > { %7995 = vmatmul.mubr.f32.vlgmr.msra.gmra.mxu0 %v18190_v0  ;;  %4822 = vrot.lane.b32.xlu1 %v1320_v24, %s14778_s30  ;;  %v1286_v0 = vld [vmem:[%s14969_s6 + $0x1e80] sm:$0xff]  ;;  %v1355_v24 = vld [vmem:[%s14969_s6 + $0x20a8] sm:$0xff] }
 0x84b   : > { %v4691_v10 = vpop.permute.xlu0 %4690  ;;  %8134 = vmatprep.mubr.f32.mxu0 %v1670_v31 }
 0x84c   : > { %v4785_v34 = vpop.permute.xlu1 %4784  ;;  %12152 = vmatprep.subr.mxu1 %v4691_v10  ;;  %v1354_v10 = vld [vmem:[%s14969_s6 + $0x20a0] sm:$0xff] }
 0x84d   : > { %4724 = vrot.lane.b32.xlu0 %v1271_v1, %s14778_s30  ;;  %12157 = vmatprep.subr.mxu0 %v4785_v34 }
 0x84e   : > { %4790 = vrot.lane.b32.xlu1 %v1304_v27, %s14778_s30 }
 0x84f   : > { %v4659_v4 = vpop.permute.xlu0 %4658 }
 0x850   : > { %v4753_v8 = vpop.permute.xlu1 %4752  ;;  %12153 = vmatpush3.msra.mxu1 %v4659_v4 }
 0x851   : > { %4754 = vrot.lane.b32.xlu0 %v1286_v0, %s14778_s30  ;;  %8065 = vmatmul.mubr.f32.vlgmr.msra.gmra.mxu1 %v18204_v53  ;;  %v1365_v53 = vld [vmem:[%s14969_s6 + $0x20f8] sm:$0xff] }
 0x852   : > { %12158 = vmatpush3.msra.mxu0 %v4753_v8  ;;  %4820 = vrot.lane.b32.xlu1 %v1319_v16, %s14778_s30  ;;  %v1353_v0 = vld [vmem:[%s14969_s6 + $0x2098] sm:$0xff]  ;;  %v1352_v8 = vld [vmem:[%s14969_s6 + $0x2090] sm:$0xff] }
 0x853   : > { %v4783_v36 = vpop.permute.xlu0 %4782  ;;  %8204 = vmatprep.mubr.f32.mxu1 %v1671_v40  ;;  %v1337_v16 = vld [vmem:[%s14969_s6 + $0x2018] sm:$0xff] }
 0x854   : > { %v4849_v38 = vpop.permute.xlu1 %4848  ;;  %12159 = vmatprep.subr.mxu0 %v4783_v36  ;;  %v1336_v36 = vld [vmem:[%s14969_s6 + $0x2010] sm:$0xff] }
 0x855   : > { %4722 = vrot.lane.b32.xlu0 %v1270_v37, %s14778_s30  ;;  %12192 = vmatprep.subr.mxu1 %v4849_v38  ;;  %v1351_v38 = vld [vmem:[%s14969_s6 + $0x2088] sm:$0xff] }
 0x856   : > { %4788 = vrot.lane.b32.xlu1 %v1303_v29, %s14778_s30 }
 0x857   : > { %v4751_v5 = vpop.permute.xlu0 %4750 }
 0x858   : > { %v4817_v7 = vpop.permute.xlu1 %4816  ;;  %12160 = vmatpush3.msra.mxu0 %v4751_v5  ;;  %v1335_v5 = vld [vmem:[%s14969_s6 + $0x2008] sm:$0xff] }
 0x859   : > { %4818 = vrot.lane.b32.xlu0 %v1318_v26, %s14778_s30  ;;  %12193 = vmatpush3.msra.mxu1 %v4817_v7  ;;  %v1350_v7 = vld [vmem:[%s14969_s6 + $0x2080] sm:$0xff] }
 0x85a   : > { %4912 = vrot.lane.b32.xlu1 %v1365_v53, %s14778_s30 }
 0x85b   : > { %v4781_v39 = vpop.permute.xlu0 %4780 }
 0x85c   : > { %v4847_v18 = vpop.permute.xlu1 %4846  ;;  %12161 = vmatprep.subr.mxu0 %v4781_v39  ;;  %v1334_v39 = vld [vmem:[%s14969_s6 + $0x2000] sm:$0xff] }
 0x85d   : > { %4786 = vrot.lane.b32.xlu0 %v1302_v32, %s14778_s30  ;;  %12194 = vmatprep.subr.mxu1 %v4847_v18 }
 0x85e   : > { %4880 = vrot.lane.b32.xlu1 %v1349_v13, %s14778_s30 }
 0x85f   : > { %v4749_v9 = vpop.permute.xlu0 %4748 }
 0x860   : > { %v4815_v15 = vpop.permute.xlu1 %4814  ;;  %12162 = vmatpush3.msra.mxu0 %v4749_v9 }
 0x861   : > { %4910 = vrot.lane.b32.xlu0 %v1364_v45, %s14778_s30  ;;  %12195 = vmatpush3.msra.mxu1 %v4815_v15 }
 0x862   : > { %4878 = vrot.lane.b32.xlu1 %v1348_v42, %s14778_s30 }
 0x863   : > { %v4779_v50 = vpop.permute.xlu0 %4778 }
 0x864   : > { %v4845_v30 = vpop.permute.xlu1 %4844  ;;  %12163 = vmatprep.subr.mxu0 %v4779_v50 }
 0x865   : > { %4908 = vrot.lane.b32.xlu0 %v1363_v28, %s14778_s30  ;;  %12196 = vmatprep.subr.mxu1 %v4845_v30 }
 0x866   : > { %4876 = vrot.lane.b32.xlu1 %v1347_v48, %s14778_s30 }
 0x867   : > { %v4747_v51 = vpop.permute.xlu0 %4746 }
 0x868   : > { %v4813_v25 = vpop.permute.xlu1 %4812  ;;  %12164 = vmatpush3.msra.mxu0 %v4747_v51 }
 0x869   : > { %4906 = vrot.lane.b32.xlu0 %v1362_v49, %s14778_s30  ;;  %12197 = vmatpush3.msra.mxu1 %v4813_v25 }
 0x86a   : > { %4874 = vrot.lane.b32.xlu1 %v1346_v54, %s14778_s30 }
 0x86b   : > { %v4777_v44 = vpop.permute.xlu0 %4776 }
 0x86c   : > { %v4843_v58 = vpop.permute.xlu1 %4842  ;;  %12165 = vmatprep.subr.mxu0 %v4777_v44 }
 0x86d   : > { %4904 = vrot.lane.b32.xlu0 %v1361_v47, %s14778_s30  ;;  %12198 = vmatprep.subr.mxu1 %v4843_v58 }
 0x86e   : > { %4872 = vrot.lane.b32.xlu1 %v1345_v43, %s14778_s30 }
 0x86f   : > { %v4745_v56 = vpop.permute.xlu0 %4744 }
 0x870   : > { %v4811_v63 = vpop.permute.xlu1 %4810  ;;  %12166 = vmatpush3.msra.mxu0 %v4745_v56 }
 0x871   : > { %4902 = vrot.lane.b32.xlu0 %v1360_v46, %s14778_s30  ;;  %12199 = vmatpush3.msra.mxu1 %v4811_v63 }
 0x872   : > { %4870 = vrot.lane.b32.xlu1 %v1344_v57, %s14778_s30 }
 0x873   : > { %v4775_v2 = vpop.permute.xlu0 %4774 }
 0x874   : > { %v4841_v17 = vpop.permute.xlu1 %4840  ;;  %12167 = vmatprep.subr.mxu0 %v4775_v2 }
 0x875   : > { %4900 = vrot.lane.b32.xlu0 %v1359_v6, %s14778_s30  ;;  %12200 = vmatprep.subr.mxu1 %v4841_v17  ;;  %v18428_v6 = vld.sshfl [vmem:[%s14963_s25 + $0x80] sm:$0x33 pattern:$0x76325410] }
 0x876   : > { %4868 = vrot.lane.b32.xlu1 %v1343_v19, %s14778_s30  ;;  %v1679_v19 = vcombine.high %v18428_v6, %v18428_v6 }
 0x877   : > { %v4743_v52 = vpop.permute.xlu0 %4742 }
 0x878   : > { %v4809_v20 = vpop.permute.xlu1 %4808  ;;  %12168 = vmatpush3.msra.mxu0 %v4743_v52 }
 0x879   : > { %4898 = vrot.lane.b32.xlu0 %v1358_v61, %s14778_s30  ;;  %12201 = vmatpush3.msra.mxu1 %v4809_v20  ;;  %v18433_v61 = vld [vmem:[%s14954_s7] sm:$0xff] }
 0x87a   : > { %4866 = vrot.lane.b32.xlu1 %v1342_v14, %s14778_s30  ;;  %v18438_v14 = vrot.slane %v18433_v61, %v15195_v59 }
 0x87b   : > { %v4773_v33 = vpop.permute.xlu0 %4772 }
 0x87c   : > { %v4839_v23 = vpop.permute.xlu1 %4838  ;;  %12169 = vmatprep.subr.mxu0 %v4773_v33  ;;  %v8312_v33 = vcombine.high %v18438_v14, %v18438_v14 }
 0x87d   : > { %4896 = vrot.lane.b32.xlu0 %v1357_v60, %s14778_s30  ;;  %12202 = vmatprep.subr.mxu1 %v4839_v23 }
 0x87e   : > { %4864 = vrot.lane.b32.xlu1 %v1341_v11, %s14778_s30 }
 0x87f   : > { %v4741_v21 = vpop.permute.xlu0 %4740 }
 0x880   : > { %v4807_v62 = vpop.permute.xlu1 %4806  ;;  %12170 = vmatpush3.msra.mxu0 %v4741_v21  ;;  %v13549_v21 = vld [vmem:[%s14969_s6 + $0x78] sm:$0xff] }
 0x881   : > { %4894 = vrot.lane.b32.xlu0 %v1356_v35, %s14778_s30  ;;  %12203 = vmatpush3.msra.mxu1 %v4807_v62  ;;  %v13550_v62 = vld [vmem:[%s14969_s6 + $0xf0] sm:$0xff] }
 0x882   : > { %4862 = vrot.lane.b32.xlu1 %v1340_v22, %s14778_s30 }
 0x883   : > { %v4771_v31 = vpop.permute.xlu0 %4770 }
 0x884   : > { %v4837_v1 = vpop.permute.xlu1 %4836  ;;  %12171 = vmatprep.subr.mxu0 %v4771_v31 }
 0x885   : > { %4892 = vrot.lane.b32.xlu0 %v1355_v24, %s14778_s30  ;;  %12204 = vmatprep.subr.mxu1 %v4837_v1  ;;  %v13551_v24 = vld [vmem:[%s14969_s6 + $0x70] sm:$0xff] }
 0x886   : > { %4860 = vrot.lane.b32.xlu1 %v1339_v12, %s14778_s30  ;;  %v13553_v12 = vld [vmem:[%s14969_s6 + $0x68] sm:$0xff] }
 0x887   : > { %v4739_v27 = vpop.permute.xlu0 %4738 }
 0x888   : > { %v4805_v34 = vpop.permute.xlu1 %4804  ;;  %12172 = vmatpush3.msra.mxu0 %v4739_v27  ;;  %v13555_v27 = vld [vmem:[%s14969_s6 + $0x60] sm:$0xff] }
 0x889   : > { %4890 = vrot.lane.b32.xlu0 %v1354_v10, %s14778_s30  ;;  %12205 = vmatpush3.msra.mxu1 %v4805_v34  ;;  %v13554_v10 = vld [vmem:[%s14969_s6 + $0xe0] sm:$0xff] }
 0x88a   : > { %4858 = vrot.lane.b32.xlu1 %v1338_v41, %s14778_s30  ;;  %v13556_v41 = vld [vmem:[%s14969_s6 + $0xd8] sm:$0xff] }
 0x88b   : > { %v4769_v4 = vpop.permute.xlu0 %4768 }
 0x88c   : > { %v4835_v40 = vpop.permute.xlu1 %4834  ;;  %12173 = vmatprep.subr.mxu0 %v4769_v4 }
 0x88d   : > { %4888 = vrot.lane.b32.xlu0 %v1353_v0, %s14778_s30  ;;  %12206 = vmatprep.subr.mxu1 %v4835_v40  ;;  %v13557_v0 = vld [vmem:[%s14969_s6 + $0x58] sm:$0xff]  ;;  %v13559_v40 = vld [vmem:[%s14969_s6 + $0x50] sm:$0xff] }
 0x88e   : > { %4856 = vrot.lane.b32.xlu1 %v1337_v16, %s14778_s30  ;;  %v13558_v16 = vld [vmem:[%s14969_s6 + $0xd0] sm:$0xff] }
 0x88f   : > { %v4737_v37 = vpop.permute.xlu0 %4736 }
 0x890   : > { %v4803_v29 = vpop.permute.xlu1 %4802  ;;  %12174 = vmatpush3.msra.mxu0 %v4737_v37 }
 0x891   : > { %4886 = vrot.lane.b32.xlu0 %v1352_v8, %s14778_s30  ;;  %12207 = vmatpush3.msra.mxu1 %v4803_v29  ;;  %v13560_v8 = vld [vmem:[%s14969_s6 + $0xc8] sm:$0xff] }
 0x892   : > { %4854 = vrot.lane.b32.xlu1 %v1336_v36, %s14778_s30  ;;  %v13561_v36 = vld [vmem:[%s14969_s6 + $0x48] sm:$0xff] }
 0x893   : > { %v4767_v26 = vpop.permute.xlu0 %4766 }
 0x894   : > { %v4833_v53 = vpop.permute.xlu1 %4832  ;;  %12175 = vmatprep.subr.mxu0 %v4767_v26  ;;  %v13563_v26 = vld [vmem:[%s14969_s6 + $0x40] sm:$0xff] }
 0x895   : > { %4884 = vrot.lane.b32.xlu0 %v1351_v38, %s14778_s30  ;;  %12208 = vmatprep.subr.mxu1 %v4833_v53  ;;  %v13562_v38 = vld [vmem:[%s14969_s6 + $0xc0] sm:$0xff] }
 0x896   : > { %4852 = vrot.lane.b32.xlu1 %v1335_v5, %s14778_s30  ;;  %v13564_v5 = vld [vmem:[%s14969_s6 + $0xb8] sm:$0xff] }
 0x897   : > { %v4735_v32 = vpop.permute.xlu0 %4734 }
 0x898   : > { %v4801_v13 = vpop.permute.xlu1 %4800  ;;  %12176 = vmatpush3.msra.mxu0 %v4735_v32 }
 0x899   : > { %4882 = vrot.lane.b32.xlu0 %v1350_v7, %s14778_s30  ;;  %12209 = vmatpush3.msra.mxu1 %v4801_v13  ;;  %v13565_v7 = vld [vmem:[%s14969_s6 + $0x38] sm:$0xff]  ;;  %v13567_v13 = vld [vmem:[%s14969_s6 + $0x30] sm:$0xff] }
 0x89a   : > { %4850 = vrot.lane.b32.xlu1 %v1334_v39, %s14778_s30  ;;  %v13566_v39 = vld [vmem:[%s14969_s6 + $0xb0] sm:$0xff] }
 0x89b   : > { %v4765_v18 = vpop.permute.xlu0 %4764 }
 0x89c   : > { %v4831_v45 = vpop.permute.xlu1 %4830  ;;  %12177 = vmatprep.subr.mxu0 %v4765_v18  ;;  %v13568_v18 = vld [vmem:[%s14969_s6 + $0xa8] sm:$0xff] }
 0x89d   : > { %12210 = vmatprep.subr.mxu1 %v4831_v45 }
 0x89f   : > { %v4733_v9 = vpop.permute.xlu0 %4732 }
 0x8a0   : > { %v4799_v42 = vpop.permute.xlu1 %4798  ;;  %12178 = vmatpush3.msra.mxu0 %v4733_v9  ;;  %v13569_v9 = vld [vmem:[%s14969_s6 + $0x28] sm:$0xff] }
 0x8a1   : > { %12211 = vmatpush3.msra.mxu1 %v4799_v42 }
 0x8a3   : > { %v4763_v15 = vpop.permute.xlu0 %4762 }
 0x8a4   : > { %v4829_v28 = vpop.permute.xlu1 %4828  ;;  %12179 = vmatprep.subr.mxu0 %v4763_v15  ;;  %v13570_v15 = vld [vmem:[%s14969_s6 + $0xa0] sm:$0xff] }
 0x8a5   : > { %12212 = vmatprep.subr.mxu1 %v4829_v28  ;;  %v18467_v28 = vld [vmem:[%s14954_s7 + $0x8] sm:$0xff] }
 0x8a7   : > { %v4731_v50 = vpop.permute.xlu0 %4730 }
 0x8a8   : > { %v4797_v48 = vpop.permute.xlu1 %4796  ;;  %12180 = vmatpush3.msra.mxu0 %v4731_v50  ;;  %v13571_v50 = vld [vmem:[%s14969_s6 + $0x20] sm:$0xff] }
 0x8a9   : > { %12213 = vmatpush3.msra.mxu1 %v4797_v48  ;;  %v13572_v48 = vld [vmem:[%s14969_s6 + $0x98] sm:$0xff] }
 0x8ab   : > { %v4761_v30 = vpop.permute.xlu0 %4760 }
 0x8ac   : > { %v4827_v49 = vpop.permute.xlu1 %4826  ;;  %12181 = vmatprep.subr.mxu0 %v4761_v30 }
 0x8ad   : > { %12214 = vmatprep.subr.mxu1 %v4827_v49  ;;  %v13573_v49 = vld [vmem:[%s14969_s6 + $0x18] sm:$0xff] }
 0x8af   : > { %v4729_v51 = vpop.permute.xlu0 %4728 }
 0x8b0   : > { %v4795_v54 = vpop.permute.xlu1 %4794  ;;  %12182 = vmatpush3.msra.mxu0 %v4729_v51  ;;  %v18474_v51 = vrot.slane %v18467_v28, %v15195_v59 }
 0x8b1   : > { %12215 = vmatpush3.msra.mxu1 %v4795_v54 }
 0x8b3   : > { %v4759_v25 = vpop.permute.xlu0 %4758 }
 0x8b4   : > { %v4825_v47 = vpop.permute.xlu1 %4824  ;;  %12183 = vmatprep.subr.mxu0 %v4759_v25  ;;  %v13574_v25 = vld [vmem:[%s14969_s6 + $0x90] sm:$0xff] }
 0x8b5   : > { %12216 = vmatprep.subr.mxu1 %v4825_v47  ;;  %v13575_v47 = vld [vmem:[%s14969_s6 + $0x10] sm:$0xff] }
 0x8b7   : > { %v4727_v44 = vpop.permute.xlu0 %4726 }
 0x8b8   : > { %v4793_v43 = vpop.permute.xlu1 %4792  ;;  %12184 = vmatpush3.msra.mxu0 %v4727_v44  ;;  %v13576_v44 = vld [vmem:[%s14969_s6 + $0x88] sm:$0xff] }
 0x8b9   : > { %12217 = vmatpush3.msra.mxu1 %v4793_v43 }
 0x8bb   : > { %v4757_v58 = vpop.permute.xlu0 %4756 }
 0x8bc   : > { %v4823_v46 = vpop.permute.xlu1 %4822  ;;  %12185 = vmatprep.subr.mxu0 %v4757_v58  ;;  %v13577_v58 = vld [vmem:[%s14969_s6 + $0x8] sm:$0xff] }
 0x8bd   : > { %12218 = vmatprep.subr.mxu1 %v4823_v46  ;;  %v8329_v46 = vcombine.high %v18474_v51, %v18474_v51 }
 0x8bf   : > { %v4725_v56 = vpop.permute.xlu0 %4724 }
 0x8c0   : > { %v4791_v57 = vpop.permute.xlu1 %4790  ;;  %12186 = vmatpush3.msra.mxu0 %v4725_v56 }
 0x8c1   : > { %12219 = vmatpush3.msra.mxu1 %v4791_v57  ;;  %v13578_v57 = vld [vmem:[%s14969_s6 + $0x80] sm:$0xff] }
 0x8c3   : > { %v4755_v63 = vpop.permute.xlu0 %4754 }
 0x8c4   : > { %v4821_v2 = vpop.permute.xlu1 %4820  ;;  %12187 = vmatprep.subr.mxu0 %v4755_v63  ;;  %v13579_v63 = vld [vmem:[%s14969_s6] sm:$0xff] }
 0x8c5   : > { %12220 = vmatprep.subr.mxu1 %v4821_v2  ;;  %v13580_v2 = vld [vmem:[%s14969_s6 + $0x2f8] sm:$0xff] }
 0x8c7   : > { %v4723_v17 = vpop.permute.xlu0 %4722 }
 0x8c8   : > { %v4789_v52 = vpop.permute.xlu1 %4788  ;;  %12188 = vmatpush3.msra.mxu0 %v4723_v17  ;;  %v13581_v17 = vld [vmem:[%s14969_s6 + $0x278] sm:$0xff] }
 0x8c9   : > { %8135 = vmatmul.mubr.f32.vlgmr.msra.gmra.mxu0 %v18331_v55  ;;  %12221 = vmatpush3.msra.mxu1 %v4789_v52  ;;  %v13548_v55 = vld [vmem:[%s14969_s6 + $0xf8] sm:$0xff] }
 0x8ca   : > { %8274 = vmatprep.mubr.f32.mxu0 %v1679_v19 }
 0x8cb   : > { %v4819_v20 = vpop.permute.xlu0 %4818 }
 0x8cc   : > { %v4913_v60 = vpop.permute.xlu1 %4912  ;;  %12222 = vmatprep.subr.mxu1 %v4819_v20  ;;  %v13582_v20 = vld [vmem:[%s14969_s6 + $0x2f0] sm:$0xff] }
 0x8cd   : > { %12227 = vmatprep.subr.mxu0 %v4913_v60  ;;  %v13583_v60 = vld [vmem:[%s14969_s6 + $0x270] sm:$0xff] }
 0x8cf   : > { %v4787_v11 = vpop.permute.xlu0 %4786 }
 0x8d0   : > { %v4881_v23 = vpop.permute.xlu1 %4880  ;;  %12223 = vmatpush3.msra.mxu1 %v4787_v11 }
 0x8d1   : > { %8205 = vmatmul.mubr.f32.vlgmr.msra.gmra.mxu1 %v18345_v3  ;;  %12228 = vmatpush3.msra.mxu0 %v4881_v23  ;;  %v13552_v3 = vld [vmem:[%s14969_s6 + $0xe8] sm:$0xff] }
 0x8d2   : > { %12262 = vmatprep.subr.mxu1 %v13548_v55  ;;  %8707 = vmatprep.mubr.f32.mxu1 %v8312_v33  ;;  %v13584_v33 = vld [vmem:[%s14969_s6 + $0x2e8] sm:$0xff]  ;;  %v13586_v55 = vld [vmem:[%s14969_s6 + $0x2e0] sm:$0xff] }
 0x8d3   : > { %v4911_v35 = vpop.permute.xlu0 %4910  ;;  %12263 = vmatpush3.msra.mxu1 %v13549_v21  ;;  %v13585_v23 = vld [vmem:[%s14969_s6 + $0x268] sm:$0xff]  ;;  %v13588_v21 = vld [vmem:[%s14969_s6 + $0x2d8] sm:$0xff] }
 0x8d4   : > { %v4879_v22 = vpop.permute.xlu1 %4878  ;;  %12229 = vmatprep.subr.mxu0 %v4911_v35  ;;  %12264 = vmatprep.subr.mxu1 %v13550_v62  ;;  %v13587_v35 = vld [vmem:[%s14969_s6 + $0x260] sm:$0xff]  ;;  %v13589_v62 = vld [vmem:[%s14969_s6 + $0x258] sm:$0xff] }
 0x8d5   : > { %12230 = vmatpush3.msra.mxu0 %v4879_v22  ;;  %12265 = vmatpush3.msra.mxu1 %v13551_v24 }
 0x8d6   : > { %12266 = vmatprep.subr.mxu1 %v13552_v3  ;;  %v13590_v3 = vld [vmem:[%s14969_s6 + $0x2d0] sm:$0xff] }
 0x8d7   : > { %v4909_v31 = vpop.permute.xlu0 %4908  ;;  %12267 = vmatpush3.msra.mxu1 %v13553_v12  ;;  %v13592_v12 = vld [vmem:[%s14969_s6 + $0x2c8] sm:$0xff] }
 0x8d8   : > { %v4877_v1 = vpop.permute.xlu1 %4876  ;;  %12231 = vmatprep.subr.mxu0 %v4909_v31  ;;  %12268 = vmatprep.subr.mxu1 %v13554_v10  ;;  %v13591_v31 = vld [vmem:[%s14969_s6 + $0x250] sm:$0xff]  ;;  %v13593_v10 = vld [vmem:[%s14969_s6 + $0x248] sm:$0xff] }
 0x8d9   : > { %12232 = vmatpush3.msra.mxu0 %v4877_v1  ;;  %12269 = vmatpush3.msra.mxu1 %v13555_v27 }
 0x8da   : > { %12270 = vmatprep.subr.mxu1 %v13556_v41  ;;  %v13594_v41 = vld [vmem:[%s14969_s6 + $0x2c0] sm:$0xff] }
 0x8db   : > { %v4907_v34 = vpop.permute.xlu0 %4906  ;;  %12271 = vmatpush3.msra.mxu1 %v13557_v0  ;;  %v13596_v0 = vld [vmem:[%s14969_s6 + $0x2b8] sm:$0xff] }
 0x8dc   : > { %v4875_v4 = vpop.permute.xlu1 %4874  ;;  %12233 = vmatprep.subr.mxu0 %v4907_v34  ;;  %12272 = vmatprep.subr.mxu1 %v13558_v16  ;;  %v13595_v34 = vld [vmem:[%s14969_s6 + $0x240] sm:$0xff]  ;;  %v13597_v16 = vld [vmem:[%s14969_s6 + $0x238] sm:$0xff] }
 0x8dd   : > { %12234 = vmatpush3.msra.mxu0 %v4875_v4  ;;  %12273 = vmatpush3.msra.mxu1 %v13559_v40 }
 0x8de   : > { %12274 = vmatprep.subr.mxu1 %v13560_v8  ;;  %v13598_v8 = vld [vmem:[%s14969_s6 + $0x2b0] sm:$0xff] }
 0x8df   : > { %v4905_v37 = vpop.permute.xlu0 %4904  ;;  %12275 = vmatpush3.msra.mxu1 %v13561_v36  ;;  %v13600_v36 = vld [vmem:[%s14969_s6 + $0x2a8] sm:$0xff] }
 0x8e0   : > { %v4873_v29 = vpop.permute.xlu1 %4872  ;;  %12235 = vmatprep.subr.mxu0 %v4905_v37  ;;  %12276 = vmatprep.subr.mxu1 %v13562_v38  ;;  %v13599_v37 = vld [vmem:[%s14969_s6 + $0x230] sm:$0xff] }
 0x8e1   : > { %12236 = vmatpush3.msra.mxu0 %v4873_v29  ;;  %12277 = vmatpush3.msra.mxu1 %v13563_v26  ;;  %v8297_v29 = vcombine.high %v18433_v61, %v18433_v61  ;;  %v13601_v26 = vld [vmem:[%s14969_s6 + $0x228] sm:$0xff] }
 0x8e2   : > { %12278 = vmatprep.subr.mxu1 %v13564_v5 }
 0x8e3   : > { %v4903_v53 = vpop.permute.xlu0 %4902  ;;  %12279 = vmatpush3.msra.mxu1 %v13565_v7  ;;  %v13603_v7 = vld [vmem:[%s14969_s6 + $0x220] sm:$0xff] }
 0x8e4   : > { %v4871_v32 = vpop.permute.xlu1 %4870  ;;  %12237 = vmatprep.subr.mxu0 %v4903_v53  ;;  %12280 = vmatprep.subr.mxu1 %v13566_v39  ;;  %v13602_v53 = vld [vmem:[%s14969_s6 + $0x2a0] sm:$0xff]  ;;  %v18513_v39 = vrot.slane %v8297_v29, %v15195_v59  ;;  %v13656_v29 = vld [vmem:[%s14969_s6 + $0x4b0] sm:$0xff] }
 0x8e5   : > { %12238 = vmatpush3.msra.mxu0 %v4871_v32  ;;  %12281 = vmatpush3.msra.mxu1 %v13567_v13  ;;  %v13604_v32 = vld [vmem:[%s14969_s6 + $0x298] sm:$0xff] }
 0x8e6   : > { %12282 = vmatprep.subr.mxu1 %v13568_v18  ;;  %v13605_v13 = vld [vmem:[%s14969_s6 + $0x218] sm:$0xff] }
 0x8e7   : > { %v4901_v45 = vpop.permute.xlu0 %4900  ;;  %12283 = vmatpush3.msra.mxu1 %v13569_v9  ;;  %v13607_v9 = vld [vmem:[%s14969_s6 + $0x210] sm:$0xff] }
 0x8e8   : > { %v4869_v42 = vpop.permute.xlu1 %4868  ;;  %12239 = vmatprep.subr.mxu0 %v4901_v45  ;;  %12284 = vmatprep.subr.mxu1 %v13570_v15  ;;  %v13606_v45 = vld [vmem:[%s14969_s6 + $0x290] sm:$0xff]  ;;  %v8313_v15 = vcombine.high %v18513_v39, %v18513_v39 }
 0x8e9   : > { %12240 = vmatpush3.msra.mxu0 %v4869_v42  ;;  %12285 = vmatpush3.msra.mxu1 %v13571_v50  ;;  %v13608_v42 = vld [vmem:[%s14969_s6 + $0x1f8] sm:$0xff] }
 0x8ea   : > { %12286 = vmatprep.subr.mxu1 %v13572_v48  ;;  %v13609_v50 = vld [vmem:[%s14969_s6 + $0x178] sm:$0xff]  ;;  %v13610_v48 = vld [vmem:[%s14969_s6 + $0x288] sm:$0xff] }
 0x8eb   : > { %v4899_v30 = vpop.permute.xlu0 %4898  ;;  %12287 = vmatpush3.msra.mxu1 %v13573_v49  ;;  %v13612_v49 = vld [vmem:[%s14969_s6 + $0x208] sm:$0xff] }
 0x8ec   : > { %v4867_v54 = vpop.permute.xlu1 %4866  ;;  %12241 = vmatprep.subr.mxu0 %v4899_v30  ;;  %12288 = vmatprep.subr.mxu1 %v13574_v25  ;;  %v13611_v30 = vld [vmem:[%s14969_s6 + $0x1f0] sm:$0xff]  ;;  %v13615_v25 = vld [vmem:[%s14969_s6 + $0x1e8] sm:$0xff] }
 0x8ed   : > { %12242 = vmatpush3.msra.mxu0 %v4867_v54  ;;  %12289 = vmatpush3.msra.mxu1 %v13575_v47  ;;  %v13614_v54 = vld [vmem:[%s14969_s6 + $0x280] sm:$0xff]  ;;  %v13616_v47 = vld [vmem:[%s14969_s6 + $0x168] sm:$0xff] }
 0x8ee   : > { %12290 = vmatprep.subr.mxu1 %v13576_v44  ;;  %v13617_v44 = vld [vmem:[%s14969_s6 + $0x200] sm:$0xff] }
 0x8ef   : > { %v4897_v43 = vpop.permute.xlu0 %4896  ;;  %12291 = vmatpush3.msra.mxu1 %v13577_v58  ;;  %v13619_v58 = vld [vmem:[%s14969_s6 + $0x4f8] sm:$0xff] }
 0x8f0   : > { %v4865_v56 = vpop.permute.xlu1 %4864  ;;  %12243 = vmatprep.subr.mxu0 %v4897_v43  ;;  %12292 = vmatprep.subr.mxu1 %v13578_v57  ;;  %v13618_v43 = vld [vmem:[%s14969_s6 + $0x1e0] sm:$0xff]  ;;  %v13622_v57 = vld [vmem:[%s14969_s6 + $0x478] sm:$0xff] }
 0x8f1   : > { %12244 = vmatpush3.msra.mxu0 %v4865_v56  ;;  %12293 = vmatpush3.msra.mxu1 %v13579_v63  ;;  %v13621_v56 = vld [vmem:[%s14969_s6 + $0x1d8] sm:$0xff] }
 0x8f2   : > { %12332 = vmatprep.subr.mxu1 %v13580_v2  ;;  %8708 = vmatmul.mubr.f32.vlgmr.msra.gmra.mxu1 %v18438_v14  ;;  %v13623_v63 = vld [vmem:[%s14969_s6 + $0x158] sm:$0xff]  ;;  %v13624_v2 = vld [vmem:[%s14969_s6 + $0x4f0] sm:$0xff] }
 0x8f3   : > { %v4895_v19 = vpop.permute.xlu0 %4894  ;;  %12333 = vmatpush3.msra.mxu1 %v13581_v17  ;;  %8847 = vmatprep.mubr.f32.mxu1 %v8329_v46  ;;  %v13620_v46 = vld [vmem:[%s14969_s6 + $0x160] sm:$0xff]  ;;  %v13626_v17 = vld [vmem:[%s14969_s6 + $0x470] sm:$0xff] }
 0x8f4   : > { %v4863_v52 = vpop.permute.xlu1 %4862  ;;  %12245 = vmatprep.subr.mxu0 %v4895_v19  ;;  %12334 = vmatprep.subr.mxu1 %v13582_v20  ;;  %v13625_v19 = vld [vmem:[%s14969_s6 + $0x1d0] sm:$0xff]  ;;  %v13629_v20 = vld [vmem:[%s14969_s6 + $0x1c8] sm:$0xff] }
 0x8f5   : > { %12246 = vmatpush3.msra.mxu0 %v4863_v52  ;;  %12335 = vmatpush3.msra.mxu1 %v13583_v60  ;;  %v13627_v52 = vld [vmem:[%s14969_s6 + $0x150] sm:$0xff]  ;;  %v13630_v60 = vld [vmem:[%s14969_s6 + $0x468] sm:$0xff] }
 0x8f6   : > { %12336 = vmatprep.subr.mxu1 %v13584_v33  ;;  %v13631_v33 = vld [vmem:[%s14969_s6 + $0x148] sm:$0xff] }
 0x8f7   : > { %v4893_v11 = vpop.permute.xlu0 %4892  ;;  %12337 = vmatpush3.msra.mxu1 %v13585_v23  ;;  %v13633_v23 = vld [vmem:[%s14969_s6 + $0x1c0] sm:$0xff] }
 0x8f8   : > { %v4861_v14 = vpop.permute.xlu1 %4860  ;;  %12247 = vmatprep.subr.mxu0 %v4893_v11  ;;  %12338 = vmatprep.subr.mxu1 %v13586_v55  ;;  %v13632_v11 = vld [vmem:[%s14969_s6 + $0x4e0] sm:$0xff] }
 0x8f9   : > { %12248 = vmatpush3.msra.mxu0 %v4861_v14  ;;  %12339 = vmatpush3.msra.mxu1 %v13587_v35  ;;  %v13634_v14 = vld [vmem:[%s14969_s6 + $0x460] sm:$0xff]  ;;  %v13636_v35 = vld [vmem:[%s14969_s6 + $0x4d8] sm:$0xff] }
 0x8fa   : > { %12340 = vmatprep.subr.mxu1 %v13588_v21  ;;  %v13635_v55 = vld [vmem:[%s14969_s6 + $0x140] sm:$0xff]  ;;  %v13637_v21 = vld [vmem:[%s14969_s6 + $0x1b8] sm:$0xff] }
 0x8fb   : > { %v4891_v22 = vpop.permute.xlu0 %4890  ;;  %12341 = vmatpush3.msra.mxu1 %v13589_v62  ;;  %v13639_v62 = vld [vmem:[%s14969_s6 + $0x138] sm:$0xff] }
 0x8fc   : > { %v4859_v24 = vpop.permute.xlu1 %4858  ;;  %12249 = vmatprep.subr.mxu0 %v4891_v22  ;;  %12342 = vmatprep.subr.mxu1 %v13590_v3  ;;  %v13638_v22 = vld [vmem:[%s14969_s6 + $0x458] sm:$0xff]  ;;  %v13641_v3 = vld [vmem:[%s14969_s6 + $0x1b0] sm:$0xff] }
 0x8fd   : > { %12250 = vmatpush3.msra.mxu0 %v4859_v24  ;;  %12343 = vmatpush3.msra.mxu1 %v13591_v31  ;;  %v13640_v24 = vld [vmem:[%s14969_s6 + $0x4d0] sm:$0xff] }
 0x8fe   : > { %12344 = vmatprep.subr.mxu1 %v13592_v12  ;;  %v13642_v31 = vld [vmem:[%s14969_s6 + $0x450] sm:$0xff] }
 0x8ff   : > { %v4889_v1 = vpop.permute.xlu0 %4888  ;;  %12345 = vmatpush3.msra.mxu1 %v13593_v10  ;;  %v13643_v12 = vld [vmem:[%s14969_s6 + $0x130] sm:$0xff]  ;;  %v13645_v10 = vld [vmem:[%s14969_s6 + $0x1a8] sm:$0xff] }
 0x900   : > { %v4857_v27 = vpop.permute.xlu1 %4856  ;;  %12251 = vmatprep.subr.mxu0 %v4889_v1  ;;  %12346 = vmatprep.subr.mxu1 %v13594_v41  ;;  %v13644_v1 = vld [vmem:[%s14969_s6 + $0x4c8] sm:$0xff] }
 0x901   : > { %12252 = vmatpush3.msra.mxu0 %v4857_v27  ;;  %12347 = vmatpush3.msra.mxu1 %v13595_v34  ;;  %v13646_v27 = vld [vmem:[%s14969_s6 + $0x448] sm:$0xff]  ;;  %v13648_v34 = vld [vmem:[%s14969_s6 + $0x4c0] sm:$0xff] }
 0x902   : > { %12348 = vmatprep.subr.mxu1 %v13596_v0  ;;  %v13647_v41 = vld [vmem:[%s14969_s6 + $0x128] sm:$0xff]  ;;  %v13649_v0 = vld [vmem:[%s14969_s6 + $0x1a0] sm:$0xff] }
 0x903   : > { %v4887_v4 = vpop.permute.xlu0 %4886  ;;  %12349 = vmatpush3.msra.mxu1 %v13597_v16  ;;  %v13651_v16 = vld [vmem:[%s14969_s6 + $0x120] sm:$0xff] }
 0x904   : > { %v4855_v40 = vpop.permute.xlu1 %4854  ;;  %12253 = vmatprep.subr.mxu0 %v4887_v4  ;;  %12350 = vmatprep.subr.mxu1 %v13598_v8  ;;  %v13650_v4 = vld [vmem:[%s14969_s6 + $0x440] sm:$0xff]  ;;  %v13653_v8 = vld [vmem:[%s14969_s6 + $0x198] sm:$0xff] }
 0x905   : > { %12254 = vmatpush3.msra.mxu0 %v4855_v40  ;;  %12351 = vmatpush3.msra.mxu1 %v13599_v37  ;;  %v13652_v40 = vld [vmem:[%s14969_s6 + $0x4b8] sm:$0xff] }
 0x906   : > { %12352 = vmatprep.subr.mxu1 %v13600_v36  ;;  %v13654_v37 = vld [vmem:[%s14969_s6 + $0x438] sm:$0xff] }
 0x907   : > { %v4885_v38 = vpop.permute.xlu0 %4884  ;;  %12353 = vmatpush3.msra.mxu1 %v13601_v26  ;;  %v13655_v36 = vld [vmem:[%s14969_s6 + $0x118] sm:$0xff]  ;;  %v13658_v26 = vld [vmem:[%s14969_s6 + $0x430] sm:$0xff] }
 0x908   : > { %v4853_v5 = vpop.permute.xlu1 %4852  ;;  %12255 = vmatprep.subr.mxu0 %v4885_v38  ;;  %12354 = vmatprep.subr.mxu1 %v13602_v53  ;;  %v13657_v38 = vld [vmem:[%s14969_s6 + $0x190] sm:$0xff]  ;;  %v13660_v53 = vld [vmem:[%s14969_s6 + $0x4a8] sm:$0xff] }
 0x909   : > { %12256 = vmatpush3.msra.mxu0 %v4853_v5  ;;  %12355 = vmatpush3.msra.mxu1 %v13603_v7  ;;  %v13659_v5 = vld [vmem:[%s14969_s6 + $0x110] sm:$0xff]  ;;  %v8314_v7 = vcombine.high %v18467_v28, %v18467_v28  ;;  %v13667_v28 = vld [vmem:[%s14969_s6 + $0x100] sm:$0xff] }
 0x90a   : > { %12356 = vmatprep.subr.mxu1 %v13604_v32  ;;  %v13661_v32 = vld [vmem:[%s14969_s6 + $0x188] sm:$0xff] }
 0x90b   : > { %v4883_v61 = vpop.permute.xlu0 %4882  ;;  %12357 = vmatpush3.msra.mxu1 %v13605_v13  ;;  %v13663_v13 = vld [vmem:[%s14969_s6 + $0x108] sm:$0xff] }
 0x90c   : > { %v4851_v18 = vpop.permute.xlu1 %4850  ;;  %12257 = vmatprep.subr.mxu0 %v4883_v61  ;;  %12358 = vmatprep.subr.mxu1 %v13606_v45  ;;  %v13662_v61 = vld [vmem:[%s14969_s6 + $0x428] sm:$0xff]  ;;  %v13665_v45 = vld [vmem:[%s14969_s6 + $0x180] sm:$0xff] }
 0x90d   : > { %12258 = vmatpush3.msra.mxu0 %v4851_v18  ;;  %12359 = vmatpush3.msra.mxu1 %v13607_v9  ;;  %v13664_v18 = vld [vmem:[%s14969_s6 + $0x4a0] sm:$0xff] }
 0x90e   : > { %8275 = vmatmul.mubr.f32.vlgmr.msra.gmra.mxu0 %v18428_v6  ;;  %12297 = vmatprep.subr.mxu0 %v13608_v42  ;;  %v13613_v6 = vld [vmem:[%s14969_s6 + $0x170] sm:$0xff]  ;;  %v13666_v9 = vld [vmem:[%s14969_s6 + $0x420] sm:$0xff] }
 0x90f   : > { %12298 = vmatpush3.msra.mxu0 %v13609_v50  ;;  %12360 = vmatprep.subr.mxu1 %v13610_v48  ;;  %v18584_v42 = vld [vmem:[%s14954_s7 + $0x10] sm:$0xff]  ;;  %v18589_v50 = vrot.slane %v8314_v7, %v15195_v59  ;;  %v13669_v48 = vld [vmem:[%s14969_s6 + $0x3f8] sm:$0xff] }
 0x910   : > { %12299 = vmatprep.subr.mxu0 %v13611_v30  ;;  %12361 = vmatpush3.msra.mxu1 %v13612_v49  ;;  %v13670_v30 = vld [vmem:[%s14969_s6 + $0x378] sm:$0xff]  ;;  %v13718_v7 = vld [vmem:[%s14969_s6 + $0x640] sm:$0xff] }
 0x911   : > { %12300 = vmatpush3.msra.mxu0 %v13613_v6  ;;  %12362 = vmatprep.subr.mxu1 %v13614_v54  ;;  %v13671_v49 = vld [vmem:[%s14969_s6 + $0x418] sm:$0xff]  ;;  %v8338_v6 = vrot.slane %v18584_v42, %v15195_v59  ;;  %v13672_v54 = vld [vmem:[%s14969_s6 + $0x3f0] sm:$0xff] }
 0x912   : > { %12301 = vmatprep.subr.mxu0 %v13615_v25  ;;  %8777 = vmatprep.mubr.f32.mxu0 %v8313_v15  ;;  %v13668_v15 = vld [vmem:[%s14969_s6 + $0x498] sm:$0xff]  ;;  %v13673_v25 = vld [vmem:[%s14969_s6 + $0x490] sm:$0xff] }
 0x913   : > { %12302 = vmatpush3.msra.mxu0 %v13616_v47  ;;  %12363 = vmatpush3.msra.mxu1 %v13617_v44  ;;  %v13674_v47 = vld [vmem:[%s14969_s6 + $0x370] sm:$0xff]  ;;  %v8330_v44 = vcombine.high %v18589_v50, %v18589_v50 }
 0x914   : > { %12303 = vmatprep.subr.mxu0 %v13618_v43  ;;  %12402 = vmatprep.subr.mxu1 %v13619_v58  ;;  %v13676_v43 = vld [vmem:[%s14969_s6 + $0x3e8] sm:$0xff] }
 0x915   : > { %12304 = vmatpush3.msra.mxu0 %v13620_v46  ;;  %8848 = vmatmul.mubr.f32.vlgmr.msra.gmra.mxu1 %v18474_v51  ;;  %v13628_v51 = vld [vmem:[%s14969_s6 + $0x4e8] sm:$0xff] }
 0x916   : > { %12305 = vmatprep.subr.mxu0 %v13621_v56  ;;  %12403 = vmatpush3.msra.mxu1 %v13622_v57  ;;  %v13677_v58 = vld [vmem:[%s14969_s6 + $0x488] sm:$0xff]  ;;  %v8346_v57 = vcombine.high %v8338_v6, %v8338_v6 }
 0x917   : > { %12306 = vmatpush3.msra.mxu0 %v13623_v63  ;;  %12404 = vmatprep.subr.mxu1 %v13624_v2  ;;  %v13678_v46 = vld [vmem:[%s14969_s6 + $0x368] sm:$0xff]  ;;  %v13680_v63 = vld [vmem:[%s14969_s6 + $0x3e0] sm:$0xff] }
 0x918   : > { %12307 = vmatprep.subr.mxu0 %v13625_v19  ;;  %12405 = vmatpush3.msra.mxu1 %v13626_v17  ;;  %v13679_v56 = vld [vmem:[%s14969_s6 + $0x408] sm:$0xff]  ;;  %v13681_v2 = vld [vmem:[%s14969_s6 + $0x480] sm:$0xff]  ;;  %v13683_v17 = vld [vmem:[%s14969_s6 + $0x3d8] sm:$0xff] }
 0x919   : > { %12308 = vmatpush3.msra.mxu0 %v13627_v52  ;;  %12406 = vmatprep.subr.mxu1 %v13628_v51  ;;  %v13682_v19 = vld [vmem:[%s14969_s6 + $0x360] sm:$0xff]  ;;  %v13685_v51 = vld [vmem:[%s14969_s6 + $0x358] sm:$0xff] }
 0x91a   : > { %12309 = vmatprep.subr.mxu0 %v13629_v20  ;;  %12407 = vmatpush3.msra.mxu1 %v13630_v60  ;;  %v13684_v52 = vld [vmem:[%s14969_s6 + $0x400] sm:$0xff]  ;;  %v13686_v20 = vld [vmem:[%s14969_s6 + $0x3d0] sm:$0xff]  ;;  %v13687_v60 = vld [vmem:[%s14969_s6 + $0x6f8] sm:$0xff] }
 0x91b   : > { %12310 = vmatpush3.msra.mxu0 %v13631_v33  ;;  %12408 = vmatprep.subr.mxu1 %v13632_v11  ;;  %v13688_v33 = vld [vmem:[%s14969_s6 + $0x350] sm:$0xff]  ;;  %v13689_v11 = vld [vmem:[%s14969_s6 + $0x3c8] sm:$0xff] }
 0x91c   : > { %12311 = vmatprep.subr.mxu0 %v13633_v23  ;;  %12409 = vmatpush3.msra.mxu1 %v13634_v14  ;;  %v13690_v23 = vld [vmem:[%s14969_s6 + $0x678] sm:$0xff]  ;;  %v13691_v14 = vld [vmem:[%s14969_s6 + $0x348] sm:$0xff] }
 0x91d   : > { %12312 = vmatpush3.msra.mxu0 %v13635_v55  ;;  %12410 = vmatprep.subr.mxu1 %v13636_v35  ;;  %v13692_v55 = vld [vmem:[%s14969_s6 + $0x6f0] sm:$0xff]  ;;  %v13693_v35 = vld [vmem:[%s14969_s6 + $0x3c0] sm:$0xff] }
 0x91e   : > { %12313 = vmatprep.subr.mxu0 %v13637_v21  ;;  %12411 = vmatpush3.msra.mxu1 %v13638_v22  ;;  %v13694_v21 = vld [vmem:[%s14969_s6 + $0x670] sm:$0xff]  ;;  %v13695_v22 = vld [vmem:[%s14969_s6 + $0x340] sm:$0xff] }
 0x91f   : > { %12314 = vmatpush3.msra.mxu0 %v13639_v62  ;;  %12412 = vmatprep.subr.mxu1 %v13640_v24  ;;  %v13696_v62 = vld [vmem:[%s14969_s6 + $0x6e8] sm:$0xff]  ;;  %v13697_v24 = vld [vmem:[%s14969_s6 + $0x3b8] sm:$0xff] }
 0x920   : > { %12315 = vmatprep.subr.mxu0 %v13641_v3  ;;  %12413 = vmatpush3.msra.mxu1 %v13642_v31  ;;  %v13698_v3 = vld [vmem:[%s14969_s6 + $0x668] sm:$0xff]  ;;  %v13699_v31 = vld [vmem:[%s14969_s6 + $0x338] sm:$0xff] }
 0x921   : > { %12316 = vmatpush3.msra.mxu0 %v13643_v12  ;;  %12414 = vmatprep.subr.mxu1 %v13644_v1  ;;  %v13700_v12 = vld [vmem:[%s14969_s6 + $0x6e0] sm:$0xff]  ;;  %v13701_v1 = vld [vmem:[%s14969_s6 + $0x3b0] sm:$0xff] }
 0x922   : > { %12317 = vmatprep.subr.mxu0 %v13645_v10  ;;  %12415 = vmatpush3.msra.mxu1 %v13646_v27  ;;  %v13702_v10 = vld [vmem:[%s14969_s6 + $0x660] sm:$0xff]  ;;  %v13703_v27 = vld [vmem:[%s14969_s6 + $0x330] sm:$0xff] }
 0x923   : > { %12318 = vmatpush3.msra.mxu0 %v13647_v41  ;;  %12416 = vmatprep.subr.mxu1 %v13648_v34  ;;  %v13704_v41 = vld [vmem:[%s14969_s6 + $0x6d8] sm:$0xff]  ;;  %v13705_v34 = vld [vmem:[%s14969_s6 + $0x3a8] sm:$0xff] }
 0x924   : > { %12319 = vmatprep.subr.mxu0 %v13649_v0  ;;  %12417 = vmatpush3.msra.mxu1 %v13650_v4  ;;  %v13706_v0 = vld [vmem:[%s14969_s6 + $0x658] sm:$0xff]  ;;  %v13707_v4 = vld [vmem:[%s14969_s6 + $0x328] sm:$0xff] }
 0x925   : > { %12320 = vmatpush3.msra.mxu0 %v13651_v16  ;;  %12418 = vmatprep.subr.mxu1 %v13652_v40  ;;  %v13708_v16 = vld [vmem:[%s14969_s6 + $0x6d0] sm:$0xff]  ;;  %v13709_v40 = vld [vmem:[%s14969_s6 + $0x3a0] sm:$0xff] }
 0x926   : > { %12321 = vmatprep.subr.mxu0 %v13653_v8  ;;  %12419 = vmatpush3.msra.mxu1 %v13654_v37  ;;  %v13710_v8 = vld [vmem:[%s14969_s6 + $0x650] sm:$0xff]  ;;  %v13711_v37 = vld [vmem:[%s14969_s6 + $0x320] sm:$0xff] }
 0x927   : > { %12322 = vmatpush3.msra.mxu0 %v13655_v36  ;;  %12420 = vmatprep.subr.mxu1 %v13656_v29  ;;  %v13712_v36 = vld [vmem:[%s14969_s6 + $0x6c8] sm:$0xff]  ;;  %v13713_v29 = vld [vmem:[%s14969_s6 + $0x398] sm:$0xff] }
 0x928   : > { %12323 = vmatprep.subr.mxu0 %v13657_v38  ;;  %12421 = vmatpush3.msra.mxu1 %v13658_v26  ;;  %v13714_v38 = vld [vmem:[%s14969_s6 + $0x648] sm:$0xff]  ;;  %v13715_v26 = vld [vmem:[%s14969_s6 + $0x318] sm:$0xff] }
 0x929   : > { %12324 = vmatpush3.msra.mxu0 %v13659_v5  ;;  %12422 = vmatprep.subr.mxu1 %v13660_v53  ;;  %v13716_v5 = vld [vmem:[%s14969_s6 + $0x6c0] sm:$0xff]  ;;  %v13717_v53 = vld [vmem:[%s14969_s6 + $0x390] sm:$0xff] }
 0x92a   : > { %12325 = vmatprep.subr.mxu0 %v13661_v32  ;;  %12423 = vmatpush3.msra.mxu1 %v13662_v61  ;;  %v13719_v32 = vld [vmem:[%s14969_s6 + $0x310] sm:$0xff]  ;;  %v13720_v61 = vld [vmem:[%s14969_s6 + $0x6b8] sm:$0xff] }
 0x92b   : > { %12326 = vmatpush3.msra.mxu0 %v13663_v13  ;;  %12424 = vmatprep.subr.mxu1 %v13664_v18  ;;  %v13721_v13 = vld [vmem:[%s14969_s6 + $0x388] sm:$0xff]  ;;  %v13722_v18 = vld [vmem:[%s14969_s6 + $0x638] sm:$0xff] }
 0x92c   : > { %12327 = vmatprep.subr.mxu0 %v13665_v45  ;;  %12425 = vmatpush3.msra.mxu1 %v13666_v9  ;;  %v13723_v45 = vld [vmem:[%s14969_s6 + $0x308] sm:$0xff]  ;;  %v13724_v9 = vld [vmem:[%s14969_s6 + $0x6b0] sm:$0xff] }
 0x92d   : > { %12328 = vmatpush3.msra.mxu0 %v13667_v28  ;;  %12426 = vmatprep.subr.mxu1 %v13668_v15  ;;  %v13725_v28 = vld [vmem:[%s14969_s6 + $0x380] sm:$0xff]  ;;  %v13726_v15 = vld [vmem:[%s14969_s6 + $0x630] sm:$0xff] }
 0x92e   : > { %8778 = vmatmul.mubr.f32.vlgmr.msra.gmra.mxu0 %v18513_v39  ;;  %12367 = vmatprep.subr.mxu0 %v13669_v48  ;;  %v13675_v39 = vld [vmem:[%s14969_s6 + $0x410] sm:$0xff]  ;;  %v13727_v48 = vld [vmem:[%s14969_s6 + $0x300] sm:$0xff] }
 0x92f   : > { %12368 = vmatpush3.msra.mxu0 %v13670_v30  ;;  %12427 = vmatpush3.msra.mxu1 %v13671_v49  ;;  %v13728_v30 = vld [vmem:[%s14969_s6 + $0x6a8] sm:$0xff]  ;;  %v8331_v49 = vcombine.high %v18584_v42, %v18584_v42  ;;  %v13734_v42 = vld [vmem:[%s14969_s6 + $0x570] sm:$0xff] }
 0x930   : > { %12369 = vmatprep.subr.mxu0 %v13672_v54  ;;  %12428 = vmatprep.subr.mxu1 %v13673_v25  ;;  %v13730_v54 = vld [vmem:[%s14969_s6 + $0x578] sm:$0xff]  ;;  %v13731_v25 = vld [vmem:[%s14969_s6 + $0x628] sm:$0xff] }
 0x931   : > { %12370 = vmatpush3.msra.mxu0 %v13674_v47  ;;  %12429 = vmatpush3.msra.mxu1 %v13675_v39  ;;  %v13732_v47 = vld [vmem:[%s14969_s6 + $0x5f0] sm:$0xff]  ;;  %v13733_v39 = vld [vmem:[%s14969_s6 + $0x6a0] sm:$0xff] }
 0x932   : > { %12371 = vmatprep.subr.mxu0 %v13676_v43  ;;  %12430 = vmatprep.subr.mxu1 %v13677_v58  ;;  %v18670_v43 = vrot.slane %v8331_v49, %v15195_v59  ;;  %v13736_v58 = vld [vmem:[%s14969_s6 + $0x5e8] sm:$0xff]  ;;  %v13786_v49 = vld [vmem:[%s14969_s6 + $0x840] sm:$0xff] }
 0x933   : > { %12372 = vmatpush3.msra.mxu0 %v13678_v46  ;;  %12431 = vmatpush3.msra.mxu1 %v13679_v56  ;;  %v13737_v46 = vld [vmem:[%s14969_s6 + $0x698] sm:$0xff]  ;;  %v13738_v56 = vld [vmem:[%s14969_s6 + $0x568] sm:$0xff] }
 0x934   : > { %12373 = vmatprep.subr.mxu0 %v13680_v63  ;;  %12432 = vmatprep.subr.mxu1 %v13681_v2  ;;  %v13740_v2 = vld [vmem:[%s14969_s6 + $0x5e0] sm:$0xff] }
 0x935   : > { %12374 = vmatpush3.msra.mxu0 %v13682_v19  ;;  %8917 = vmatprep.mubr.f32.mxu0 %v8330_v44  ;;  %v18665_v44 = vld [vmem:[%s14954_s7 + $0x18] sm:$0xff] }
 0x936   : > { %12375 = vmatprep.subr.mxu0 %v13683_v17  ;;  %12433 = vmatpush3.msra.mxu1 %v13684_v52  ;;  %v8355_v63 = vrot.slane %v18665_v44, %v15195_v59  ;;  %v13741_v19 = vld [vmem:[%s14969_s6 + $0x690] sm:$0xff]  ;;  %v13742_v17 = vld [vmem:[%s14969_s6 + $0x560] sm:$0xff] }
 0x937   : > { %12376 = vmatpush3.msra.mxu0 %v13685_v51  ;;  %8987 = vmatprep.mubr.f32.mxu1 %v8346_v57  ;;  %v13739_v57 = vld [vmem:[%s14969_s6 + $0x618] sm:$0xff]  ;;  %v13743_v52 = vld [vmem:[%s14969_s6 + $0x610] sm:$0xff]  ;;  %v8347_v51 = vcombine.high %v18670_v43, %v18670_v43 }
 0x938   : > { %12377 = vmatprep.subr.mxu0 %v13686_v20  ;;  %12472 = vmatprep.subr.mxu1 %v13687_v60  ;;  %v13744_v20 = vld [vmem:[%s14969_s6 + $0x5d8] sm:$0xff]  ;;  %v13745_v60 = vld [vmem:[%s14969_s6 + $0x688] sm:$0xff] }
 0x939   : > { %12378 = vmatpush3.msra.mxu0 %v13688_v33  ;;  %8988 = vmatmul.mubr.f32.vlgmr.msra.gmra.mxu1 %v8338_v6  ;;  %v13729_v6 = vld [vmem:[%s14969_s6 + $0x5f8] sm:$0xff] }
 0x93a   : > { %12379 = vmatprep.subr.mxu0 %v13689_v11  ;;  %12473 = vmatpush3.msra.mxu1 %v13690_v23  ;;  %v13746_v33 = vld [vmem:[%s14969_s6 + $0x558] sm:$0xff]  ;;  %v13747_v11 = vld [vmem:[%s14969_s6 + $0x608] sm:$0xff]  ;;  %v8363_v23 = vcombine.high %v8355_v63, %v8355_v63 }
 0x93b   : > { %12380 = vmatpush3.msra.mxu0 %v13691_v14  ;;  %12474 = vmatprep.subr.mxu1 %v13692_v55  ;;  %v13748_v14 = vld [vmem:[%s14969_s6 + $0x5d0] sm:$0xff]  ;;  %v13749_v55 = vld [vmem:[%s14969_s6 + $0x680] sm:$0xff] }
 0x93c   : > { %12381 = vmatprep.subr.mxu0 %v13693_v35  ;;  %12475 = vmatpush3.msra.mxu1 %v13694_v21  ;;  %v13750_v35 = vld [vmem:[%s14969_s6 + $0x550] sm:$0xff]  ;;  %v13751_v21 = vld [vmem:[%s14969_s6 + $0x5c8] sm:$0xff] }
 0x93d   : > { %12382 = vmatpush3.msra.mxu0 %v13695_v22  ;;  %12476 = vmatprep.subr.mxu1 %v13696_v62  ;;  %v13752_v22 = vld [vmem:[%s14969_s6 + $0x600] sm:$0xff]  ;;  %v13753_v62 = vld [vmem:[%s14969_s6 + $0x548] sm:$0xff] }
 0x93e   : > { %12383 = vmatprep.subr.mxu0 %v13697_v24  ;;  %12477 = vmatpush3.msra.mxu1 %v13698_v3  ;;  %v13754_v24 = vld [vmem:[%s14969_s6 + $0x5c0] sm:$0xff]  ;;  %v13755_v3 = vld [vmem:[%s14969_s6 + $0x8f8] sm:$0xff] }
 0x93f   : > { %12384 = vmatpush3.msra.mxu0 %v13699_v31  ;;  %12478 = vmatprep.subr.mxu1 %v13700_v12  ;;  %v13756_v31 = vld [vmem:[%s14969_s6 + $0x540] sm:$0xff]  ;;  %v13757_v12 = vld [vmem:[%s14969_s6 + $0x5b8] sm:$0xff] }
 0x940   : > { %12385 = vmatprep.subr.mxu0 %v13701_v1  ;;  %12479 = vmatpush3.msra.mxu1 %v13702_v10  ;;  %v13758_v1 = vld [vmem:[%s14969_s6 + $0x878] sm:$0xff] }
 0x941   : > { %12386 = vmatpush3.msra.mxu0 %v13703_v27  ;;  %12480 = vmatprep.subr.mxu1 %v13704_v41  ;;  %v13759_v10 = vld [vmem:[%s14969_s6 + $0x538] sm:$0xff]  ;;  %v13760_v27 = vld [vmem:[%s14969_s6 + $0x8f0] sm:$0xff] }
 0x942   : > { %12387 = vmatprep.subr.mxu0 %v13705_v34  ;;  %12481 = vmatpush3.msra.mxu1 %v13706_v0  ;;  %v13761_v41 = vld [vmem:[%s14969_s6 + $0x5b0] sm:$0xff] }
 0x943   : > { %12388 = vmatpush3.msra.mxu0 %v13707_v4  ;;  %12482 = vmatprep.subr.mxu1 %v13708_v16  ;;  %v13762_v34 = vld [vmem:[%s14969_s6 + $0x870] sm:$0xff]  ;;  %v13764_v4 = vld [vmem:[%s14969_s6 + $0x8e8] sm:$0xff] }
 0x944   : > { %12389 = vmatprep.subr.mxu0 %v13709_v40  ;;  %12483 = vmatpush3.msra.mxu1 %v13710_v8  ;;  %v13763_v0 = vld [vmem:[%s14969_s6 + $0x530] sm:$0xff]  ;;  %v13765_v16 = vld [vmem:[%s14969_s6 + $0x5a8] sm:$0xff] }
 0x945   : > { %12390 = vmatpush3.msra.mxu0 %v13711_v37  ;;  %12484 = vmatprep.subr.mxu1 %v13712_v36  ;;  %v13766_v40 = vld [vmem:[%s14969_s6 + $0x868] sm:$0xff]  ;;  %v13768_v37 = vld [vmem:[%s14969_s6 + $0x8e0] sm:$0xff] }
 0x946   : > { %12391 = vmatprep.subr.mxu0 %v13713_v29  ;;  %12485 = vmatpush3.msra.mxu1 %v13714_v38  ;;  %v13767_v8 = vld [vmem:[%s14969_s6 + $0x528] sm:$0xff]  ;;  %v13769_v36 = vld [vmem:[%s14969_s6 + $0x5a0] sm:$0xff] }
 0x947   : > { %12392 = vmatpush3.msra.mxu0 %v13715_v26  ;;  %12486 = vmatprep.subr.mxu1 %v13716_v5  ;;  %v13770_v29 = vld [vmem:[%s14969_s6 + $0x860] sm:$0xff]  ;;  %v13772_v26 = vld [vmem:[%s14969_s6 + $0x8d8] sm:$0xff] }
 0x948   : > { %12393 = vmatprep.subr.mxu0 %v13717_v53  ;;  %12487 = vmatpush3.msra.mxu1 %v13718_v7  ;;  %v13771_v38 = vld [vmem:[%s14969_s6 + $0x520] sm:$0xff]  ;;  %v13773_v5 = vld [vmem:[%s14969_s6 + $0x598] sm:$0xff] }
 0x949   : > { %12394 = vmatpush3.msra.mxu0 %v13719_v32  ;;  %12488 = vmatprep.subr.mxu1 %v13720_v61  ;;  %v13774_v53 = vld [vmem:[%s14969_s6 + $0x858] sm:$0xff]  ;;  %v13776_v32 = vld [vmem:[%s14969_s6 + $0x8d0] sm:$0xff] }
 0x94a   : > { %12395 = vmatprep.subr.mxu0 %v13721_v13  ;;  %12489 = vmatpush3.msra.mxu1 %v13722_v18  ;;  %v13775_v7 = vld [vmem:[%s14969_s6 + $0x518] sm:$0xff]  ;;  %v13777_v61 = vld [vmem:[%s14969_s6 + $0x590] sm:$0xff] }
 0x94b   : > { %12396 = vmatpush3.msra.mxu0 %v13723_v45  ;;  %12490 = vmatprep.subr.mxu1 %v13724_v9  ;;  %v13778_v13 = vld [vmem:[%s14969_s6 + $0x850] sm:$0xff]  ;;  %v13780_v45 = vld [vmem:[%s14969_s6 + $0x8c8] sm:$0xff] }
 0x94c   : > { %12397 = vmatprep.subr.mxu0 %v13725_v28  ;;  %12491 = vmatpush3.msra.mxu1 %v13726_v15  ;;  %v13779_v18 = vld [vmem:[%s14969_s6 + $0x510] sm:$0xff]  ;;  %v13781_v9 = vld [vmem:[%s14969_s6 + $0x588] sm:$0xff] }
 0x94d   : > { %12398 = vmatpush3.msra.mxu0 %v13727_v48  ;;  %12492 = vmatprep.subr.mxu1 %v13728_v30  ;;  %v13782_v28 = vld [vmem:[%s14969_s6 + $0x848] sm:$0xff]  ;;  %v13784_v48 = vld [vmem:[%s14969_s6 + $0x8c0] sm:$0xff] }
 0x94e   : > { %8918 = vmatmul.mubr.f32.vlgmr.msra.gmra.mxu0 %v18589_v50  ;;  %12437 = vmatprep.subr.mxu0 %v13729_v6  ;;  %v13735_v50 = vld [vmem:[%s14969_s6 + $0x620] sm:$0xff]  ;;  %v13783_v15 = vld [vmem:[%s14969_s6 + $0x508] sm:$0xff] }
 0x94f   : > { %12438 = vmatpush3.msra.mxu0 %v13730_v54  ;;  %12493 = vmatpush3.msra.mxu1 %v13731_v25  ;;  %v13785_v30 = vld [vmem:[%s14969_s6 + $0x580] sm:$0xff]  ;;  %v13788_v54 = vld [vmem:[%s14969_s6 + $0x8b8] sm:$0xff] }
 0x950   : > { %12439 = vmatprep.subr.mxu0 %v13732_v47  ;;  %12494 = vmatprep.subr.mxu1 %v13733_v39  ;;  %v13787_v6 = vld [vmem:[%s14969_s6 + $0x500] sm:$0xff]  ;;  %v13789_v25 = vld [vmem:[%s14969_s6 + $0x7f8] sm:$0xff] }
 0x951   : > { %12440 = vmatpush3.msra.mxu0 %v13734_v42  ;;  %12495 = vmatpush3.msra.mxu1 %v13735_v50  ;;  %v13790_v47 = vld [vmem:[%s14969_s6 + $0x778] sm:$0xff]  ;;  %v13792_v42 = vld [vmem:[%s14969_s6 + $0x7f0] sm:$0xff] }
 0x952   : > { %12441 = vmatprep.subr.mxu0 %v13736_v58  ;;  %12496 = vmatprep.subr.mxu1 %v13737_v46  ;;  %v13791_v39 = vld [vmem:[%s14969_s6 + $0x838] sm:$0xff]  ;;  %v13793_v50 = vld [vmem:[%s14969_s6 + $0x8b0] sm:$0xff]  ;;  %v8348_v46 = vcombine.high %v18665_v44, %v18665_v44  ;;  %v13802_v44 = vld [vmem:[%s14969_s6 + $0x760] sm:$0xff] }
 0x953   : > { %12442 = vmatpush3.msra.mxu0 %v13738_v56  ;;  %12497 = vmatpush3.msra.mxu1 %v13739_v57  ;;  %v13794_v58 = vld [vmem:[%s14969_s6 + $0x770] sm:$0xff]  ;;  %v13796_v56 = vld [vmem:[%s14969_s6 + $0x7e8] sm:$0xff] }
 0x954   : > { %12443 = vmatprep.subr.mxu0 %v13740_v2  ;;  %12498 = vmatprep.subr.mxu1 %v13741_v19  ;;  %v13797_v57 = vld [vmem:[%s14969_s6 + $0x8a8] sm:$0xff]  ;;  %v13800_v19 = vld [vmem:[%s14969_s6 + $0x7e0] sm:$0xff] }
 0x955   : > { %12444 = vmatpush3.msra.mxu0 %v13742_v17  ;;  %12499 = vmatpush3.msra.mxu1 %v13743_v52  ;;  %v13799_v2 = vld [vmem:[%s14969_s6 + $0x828] sm:$0xff]  ;;  %v13801_v17 = vld [vmem:[%s14969_s6 + $0x8a0] sm:$0xff]  ;;  %v18746_v52 = vld [vmem:[%s14954_s7 + $0x20] sm:$0xff] }
 0x956   : > { %12445 = vmatprep.subr.mxu0 %v13744_v20  ;;  %12500 = vmatprep.subr.mxu1 %v13745_v60  ;;  %v18751_v20 = vrot.slane %v8348_v46, %v15195_v59  ;;  %v13804_v60 = vld [vmem:[%s14969_s6 + $0x7d8] sm:$0xff]  ;;  %v13853_v46 = vld [vmem:[%s14969_s6 + $0xac0] sm:$0xff] }
 0x957   : > { %12446 = vmatpush3.msra.mxu0 %v13746_v33  ;;  %12501 = vmatpush3.msra.mxu1 %v13747_v11  ;;  %v13805_v33 = vld [vmem:[%s14969_s6 + $0x898] sm:$0xff] }
 0x958   : > { %12447 = vmatprep.subr.mxu0 %v13748_v14  ;;  %12502 = vmatprep.subr.mxu1 %v13749_v55  ;;  %v13806_v11 = vld [vmem:[%s14969_s6 + $0x758] sm:$0xff]  ;;  %v8372_v14 = vrot.slane %v18746_v52, %v15195_v59  ;;  %v13808_v55 = vld [vmem:[%s14969_s6 + $0x7d0] sm:$0xff] }
 0x959   : > { %12448 = vmatpush3.msra.mxu0 %v13750_v35  ;;  %9057 = vmatprep.mubr.f32.mxu0 %v8347_v51  ;;  %v13803_v51 = vld [vmem:[%s14969_s6 + $0x820] sm:$0xff]  ;;  %v13809_v35 = vld [vmem:[%s14969_s6 + $0x890] sm:$0xff] }
 0x95a   : > { %12449 = vmatprep.subr.mxu0 %v13751_v21  ;;  %12503 = vmatpush3.msra.mxu1 %v13752_v22  ;;  %v13810_v21 = vld [vmem:[%s14969_s6 + $0x750] sm:$0xff] }
 0x95b   : > { %12450 = vmatpush3.msra.mxu0 %v13753_v62  ;;  %9127 = vmatprep.mubr.f32.mxu1 %v8363_v23  ;;  %v13807_v23 = vld [vmem:[%s14969_s6 + $0x818] sm:$0xff]  ;;  %v13811_v22 = vld [vmem:[%s14969_s6 + $0x810] sm:$0xff]  ;;  %v8364_v62 = vcombine.high %v18751_v20, %v18751_v20 }
 0x95c   : > { %12451 = vmatprep.subr.mxu0 %v13754_v24  ;;  %12542 = vmatprep.subr.mxu1 %v13755_v3  ;;  %v13812_v24 = vld [vmem:[%s14969_s6 + $0x7c8] sm:$0xff] }
 0x95d   : > { %12452 = vmatpush3.msra.mxu0 %v13756_v31  ;;  %9128 = vmatmul.mubr.f32.vlgmr.msra.gmra.mxu1 %v8355_v63  ;;  %v13798_v63 = vld [vmem:[%s14969_s6 + $0x768] sm:$0xff] }
 0x95e   : > { %12453 = vmatprep.subr.mxu0 %v13757_v12  ;;  %12543 = vmatpush3.msra.mxu1 %v13758_v1  ;;  %v13813_v3 = vld [vmem:[%s14969_s6 + $0x888] sm:$0xff]  ;;  %v8380_v1 = vcombine.high %v8372_v14, %v8372_v14 }
 0x95f   : > { %12454 = vmatpush3.msra.mxu0 %v13759_v10  ;;  %12544 = vmatprep.subr.mxu1 %v13760_v27  ;;  %v13814_v31 = vld [vmem:[%s14969_s6 + $0x748] sm:$0xff]  ;;  %v13816_v10 = vld [vmem:[%s14969_s6 + $0x7c0] sm:$0xff] }
 0x960   : > { %12455 = vmatprep.subr.mxu0 %v13761_v41  ;;  %12545 = vmatpush3.msra.mxu1 %v13762_v34  ;;  %v13815_v12 = vld [vmem:[%s14969_s6 + $0x808] sm:$0xff]  ;;  %v13817_v27 = vld [vmem:[%s14969_s6 + $0x880] sm:$0xff]  ;;  %v13819_v34 = vld [vmem:[%s14969_s6 + $0x7b8] sm:$0xff] }
 0x961   : > { %12456 = vmatpush3.msra.mxu0 %v13763_v0  ;;  %12546 = vmatprep.subr.mxu1 %v13764_v4  ;;  %v13818_v41 = vld [vmem:[%s14969_s6 + $0x740] sm:$0xff]  ;;  %v13821_v4 = vld [vmem:[%s14969_s6 + $0x738] sm:$0xff] }
 0x962   : > { %12457 = vmatprep.subr.mxu0 %v13765_v16  ;;  %12547 = vmatpush3.msra.mxu1 %v13766_v40  ;;  %v13820_v0 = vld [vmem:[%s14969_s6 + $0x800] sm:$0xff]  ;;  %v13822_v16 = vld [vmem:[%s14969_s6 + $0x7b0] sm:$0xff]  ;;  %v13823_v40 = vld [vmem:[%s14969_s6 + $0xaf8] sm:$0xff] }
 0x963   : > { %12458 = vmatpush3.msra.mxu0 %v13767_v8  ;;  %12548 = vmatprep.subr.mxu1 %v13768_v37  ;;  %v13824_v8 = vld [vmem:[%s14969_s6 + $0x730] sm:$0xff]  ;;  %v13825_v37 = vld [vmem:[%s14969_s6 + $0x7a8] sm:$0xff] }
 0x964   : > { %12459 = vmatprep.subr.mxu0 %v13769_v36  ;;  %12549 = vmatpush3.msra.mxu1 %v13770_v29  ;;  %v13826_v36 = vld [vmem:[%s14969_s6 + $0xa78] sm:$0xff]  ;;  %v13827_v29 = vld [vmem:[%s14969_s6 + $0x728] sm:$0xff] }
 0x965   : > { %12460 = vmatpush3.msra.mxu0 %v13771_v38  ;;  %12550 = vmatprep.subr.mxu1 %v13772_v26  ;;  %v13828_v38 = vld [vmem:[%s14969_s6 + $0xaf0] sm:$0xff]  ;;  %v13829_v26 = vld [vmem:[%s14969_s6 + $0x7a0] sm:$0xff] }
 0x966   : > { %12461 = vmatprep.subr.mxu0 %v13773_v5  ;;  %12551 = vmatpush3.msra.mxu1 %v13774_v53  ;;  %v13830_v5 = vld [vmem:[%s14969_s6 + $0xa70] sm:$0xff]  ;;  %v13831_v53 = vld [vmem:[%s14969_s6 + $0x720] sm:$0xff] }
 0x967   : > { %12462 = vmatpush3.msra.mxu0 %v13775_v7  ;;  %12552 = vmatprep.subr.mxu1 %v13776_v32  ;;  %v13832_v7 = vld [vmem:[%s14969_s6 + $0xae8] sm:$0xff]  ;;  %v13833_v32 = vld [vmem:[%s14969_s6 + $0x798] sm:$0xff] }
 0x968   : > { %12463 = vmatprep.subr.mxu0 %v13777_v61  ;;  %12553 = vmatpush3.msra.mxu1 %v13778_v13  ;;  %v13834_v61 = vld [vmem:[%s14969_s6 + $0xa68] sm:$0xff]  ;;  %v13835_v13 = vld [vmem:[%s14969_s6 + $0x718] sm:$0xff] }
 0x969   : > { %12464 = vmatpush3.msra.mxu0 %v13779_v18  ;;  %12554 = vmatprep.subr.mxu1 %v13780_v45  ;;  %v13836_v18 = vld [vmem:[%s14969_s6 + $0xae0] sm:$0xff]  ;;  %v13837_v45 = vld [vmem:[%s14969_s6 + $0x790] sm:$0xff] }
 0x96a   : > { %12465 = vmatprep.subr.mxu0 %v13781_v9  ;;  %12555 = vmatpush3.msra.mxu1 %v13782_v28  ;;  %v13838_v9 = vld [vmem:[%s14969_s6 + $0xa60] sm:$0xff]  ;;  %v13839_v28 = vld [vmem:[%s14969_s6 + $0x710] sm:$0xff] }
 0x96b   : > { %12466 = vmatpush3.msra.mxu0 %v13783_v15  ;;  %12556 = vmatprep.subr.mxu1 %v13784_v48  ;;  %v13840_v15 = vld [vmem:[%s14969_s6 + $0xad8] sm:$0xff]  ;;  %v13841_v48 = vld [vmem:[%s14969_s6 + $0x788] sm:$0xff] }
 0x96c   : > { %12467 = vmatprep.subr.mxu0 %v13785_v30  ;;  %12557 = vmatpush3.msra.mxu1 %v13786_v49  ;;  %v13842_v30 = vld [vmem:[%s14969_s6 + $0xa58] sm:$0xff]  ;;  %v13843_v49 = vld [vmem:[%s14969_s6 + $0x708] sm:$0xff] }
 0x96d   : > { %12468 = vmatpush3.msra.mxu0 %v13787_v6  ;;  %12558 = vmatprep.subr.mxu1 %v13788_v54  ;;  %v13844_v6 = vld [vmem:[%s14969_s6 + $0xad0] sm:$0xff]  ;;  %v13845_v54 = vld [vmem:[%s14969_s6 + $0x780] sm:$0xff] }
 0x96e   : > { %9058 = vmatmul.mubr.f32.vlgmr.msra.gmra.mxu0 %v18670_v43  ;;  %12507 = vmatprep.subr.mxu0 %v13789_v25  ;;  %v13795_v43 = vld [vmem:[%s14969_s6 + $0x830] sm:$0xff] }
 0x96f   : > { %12508 = vmatpush3.msra.mxu0 %v13790_v47  ;;  %12559 = vmatpush3.msra.mxu1 %v13791_v39  ;;  %v13846_v25 = vld [vmem:[%s14969_s6 + $0xa50] sm:$0xff]  ;;  %v13847_v47 = vld [vmem:[%s14969_s6 + $0x700] sm:$0xff]  ;;  %v13848_v39 = vld [vmem:[%s14969_s6 + $0xac8] sm:$0xff] }
 0x970   : > { %12509 = vmatprep.subr.mxu0 %v13792_v42  ;;  %12560 = vmatprep.subr.mxu1 %v13793_v50  ;;  %v13849_v42 = vld [vmem:[%s14969_s6 + $0x9f8] sm:$0xff] }
 0x971   : > { %12510 = vmatpush3.msra.mxu0 %v13794_v58  ;;  %12561 = vmatpush3.msra.mxu1 %v13795_v43  ;;  %v13850_v50 = vld [vmem:[%s14969_s6 + $0x978] sm:$0xff]  ;;  %v13851_v58 = vld [vmem:[%s14969_s6 + $0xa48] sm:$0xff]  ;;  %v13852_v43 = vld [vmem:[%s14969_s6 + $0x9f0] sm:$0xff] }
 0x972   : > { %12511 = vmatprep.subr.mxu0 %v13796_v56  ;;  %12562 = vmatprep.subr.mxu1 %v13797_v57  ;;  %v13854_v56 = vld [vmem:[%s14969_s6 + $0x970] sm:$0xff]  ;;  %v13855_v57 = vld [vmem:[%s14969_s6 + $0xa40] sm:$0xff] }
 0x973   : > { %12512 = vmatpush3.msra.mxu0 %v13798_v63  ;;  %12563 = vmatpush3.msra.mxu1 %v13799_v2  ;;  %v13856_v63 = vld [vmem:[%s14969_s6 + $0x9e8] sm:$0xff]  ;;  %v13857_v2 = vld [vmem:[%s14969_s6 + $0xab8] sm:$0xff] }
 0x974   : > { %12513 = vmatprep.subr.mxu0 %v13800_v19  ;;  %12564 = vmatprep.subr.mxu1 %v13801_v17  ;;  %v13858_v19 = vld [vmem:[%s14969_s6 + $0x968] sm:$0xff]  ;;  %v13859_v17 = vld [vmem:[%s14969_s6 + $0xa38] sm:$0xff] }
 0x975   : > { %12514 = vmatpush3.msra.mxu0 %v13802_v44  ;;  %12565 = vmatpush3.msra.mxu1 %v13803_v51  ;;  %v13860_v44 = vld [vmem:[%s14969_s6 + $0x9e0] sm:$0xff]  ;;  %v13861_v51 = vld [vmem:[%s14969_s6 + $0xab0] sm:$0xff] }
 0x976   : > { %12515 = vmatprep.subr.mxu0 %v13804_v60  ;;  %12566 = vmatprep.subr.mxu1 %v13805_v33  ;;  %v13863_v60 = vld [vmem:[%s14969_s6 + $0xa30] sm:$0xff]  ;;  %v8365_v33 = vcombine.high %v18746_v52, %v18746_v52 }
 0x977   : > { %12516 = vmatpush3.msra.mxu0 %v13806_v11  ;;  %12567 = vmatpush3.msra.mxu1 %v13807_v23  ;;  %v13864_v11 = vld [vmem:[%s14969_s6 + $0x9d8] sm:$0xff]  ;;  %v13865_v23 = vld [vmem:[%s14969_s6 + $0xaa8] sm:$0xff]  ;;  %v13870_v52 = vld [vmem:[%s14969_s6 + $0x950] sm:$0xff] }
 0x978   : > { %12517 = vmatprep.subr.mxu0 %v13808_v55  ;;  %12568 = vmatprep.subr.mxu1 %v13809_v35  ;;  %v13867_v55 = vld [vmem:[%s14969_s6 + $0xa28] sm:$0xff]  ;;  %v13868_v35 = vld [vmem:[%s14969_s6 + $0x9d0] sm:$0xff] }
 0x979   : > { %12518 = vmatpush3.msra.mxu0 %v13810_v21  ;;  %12569 = vmatpush3.msra.mxu1 %v13811_v22  ;;  %v13869_v21 = vld [vmem:[%s14969_s6 + $0xaa0] sm:$0xff] }
 0x97a   : > { %12519 = vmatprep.subr.mxu0 %v13812_v24  ;;  %12570 = vmatprep.subr.mxu1 %v13813_v3  ;;  %v18827_v22 = vld [vmem:[%s14954_s7 + $0x28] sm:$0xff]  ;;  %v18832_v24 = vrot.slane %v8365_v33, %v15195_v59  ;;  %v13872_v3 = vld [vmem:[%s14969_s6 + $0x9c8] sm:$0xff] }
 0x97b   : > { %12520 = vmatpush3.msra.mxu0 %v13814_v31  ;;  %12571 = vmatpush3.msra.mxu1 %v13815_v12  ;;  %v13873_v31 = vld [vmem:[%s14969_s6 + $0xa98] sm:$0xff]  ;;  %v13874_v12 = vld [vmem:[%s14969_s6 + $0x948] sm:$0xff]  ;;  %v13921_v33 = vld [vmem:[%s14969_s6 + $0xcc0] sm:$0xff] }
 0x97c   : > { %12521 = vmatprep.subr.mxu0 %v13816_v10  ;;  %12572 = vmatprep.subr.mxu1 %v13817_v27  ;;  %v8389_v10 = vrot.slane %v18827_v22, %v15195_v59  ;;  %v13876_v27 = vld [vmem:[%s14969_s6 + $0x9c0] sm:$0xff] }
 0x97d   : > { %12522 = vmatpush3.msra.mxu0 %v13818_v41  ;;  %9197 = vmatprep.mubr.f32.mxu0 %v8364_v62  ;;  %v13871_v62 = vld [vmem:[%s14969_s6 + $0xa20] sm:$0xff]  ;;  %v13877_v41 = vld [vmem:[%s14969_s6 + $0xa90] sm:$0xff] }
 0x97e   : > { %12523 = vmatprep.subr.mxu0 %v13819_v34  ;;  %12573 = vmatpush3.msra.mxu1 %v13820_v0  ;;  %v13878_v34 = vld [vmem:[%s14969_s6 + $0x940] sm:$0xff]  ;;  %v13879_v0 = vld [vmem:[%s14969_s6 + $0xa10] sm:$0xff] }
 0x97f   : > { %12524 = vmatpush3.msra.mxu0 %v13821_v4  ;;  %9267 = vmatprep.mubr.f32.mxu1 %v8380_v1  ;;  %v13875_v1 = vld [vmem:[%s14969_s6 + $0xa18] sm:$0xff]  ;;  %v8381_v4 = vcombine.high %v18832_v24, %v18832_v24 }
 0x980   : > { %12525 = vmatprep.subr.mxu0 %v13822_v16  ;;  %12612 = vmatprep.subr.mxu1 %v13823_v40  ;;  %v13880_v16 = vld [vmem:[%s14969_s6 + $0x9b8] sm:$0xff]  ;;  %v13881_v40 = vld [vmem:[%s14969_s6 + $0xa88] sm:$0xff] }
 0x981   : > { %12526 = vmatpush3.msra.mxu0 %v13824_v8  ;;  %9268 = vmatmul.mubr.f32.vlgmr.msra.gmra.mxu1 %v8372_v14  ;;  %v13866_v14 = vld [vmem:[%s14969_s6 + $0x958] sm:$0xff] }
 0x982   : > { %12527 = vmatprep.subr.mxu0 %v13825_v37  ;;  %12613 = vmatpush3.msra.mxu1 %v13826_v36  ;;  %v13882_v8 = vld [vmem:[%s14969_s6 + $0x938] sm:$0xff]  ;;  %v13883_v37 = vld [vmem:[%s14969_s6 + $0xa08] sm:$0xff]  ;;  %v8397_v36 = vcombine.high %v8389_v10, %v8389_v10 }
 0x983   : > { %12528 = vmatpush3.msra.mxu0 %v13827_v29  ;;  %12614 = vmatprep.subr.mxu1 %v13828_v38  ;;  %v13884_v29 = vld [vmem:[%s14969_s6 + $0x9b0] sm:$0xff]  ;;  %v13885_v38 = vld [vmem:[%s14969_s6 + $0xa80] sm:$0xff] }
 0x984   : > { %12529 = vmatprep.subr.mxu0 %v13829_v26  ;;  %12615 = vmatpush3.msra.mxu1 %v13830_v5  ;;  %v13886_v26 = vld [vmem:[%s14969_s6 + $0x930] sm:$0xff]  ;;  %v13887_v5 = vld [vmem:[%s14969_s6 + $0x9a8] sm:$0xff] }
 0x985   : > { %12530 = vmatpush3.msra.mxu0 %v13831_v53  ;;  %12616 = vmatprep.subr.mxu1 %v13832_v7  ;;  %v13888_v53 = vld [vmem:[%s14969_s6 + $0xa00] sm:$0xff]  ;;  %v13889_v7 = vld [vmem:[%s14969_s6 + $0x928] sm:$0xff] }
 0x986   : > { %12531 = vmatprep.subr.mxu0 %v13833_v32  ;;  %12617 = vmatpush3.msra.mxu1 %v13834_v61  ;;  %v13890_v32 = vld [vmem:[%s14969_s6 + $0x9a0] sm:$0xff]  ;;  %v13891_v61 = vld [vmem:[%s14969_s6 + $0xcf8] sm:$0xff] }
 0x987   : > { %12532 = vmatpush3.msra.mxu0 %v13835_v13  ;;  %12618 = vmatprep.subr.mxu1 %v13836_v18  ;;  %v13892_v13 = vld [vmem:[%s14969_s6 + $0x920] sm:$0xff]  ;;  %v13893_v18 = vld [vmem:[%s14969_s6 + $0x998] sm:$0xff] }
 0x988   : > { %12533 = vmatprep.subr.mxu0 %v13837_v45  ;;  %12619 = vmatpush3.msra.mxu1 %v13838_v9  ;;  %v13894_v45 = vld [vmem:[%s14969_s6 + $0xc78] sm:$0xff] }
 0x989   : > { %12534 = vmatpush3.msra.mxu0 %v13839_v28  ;;  %12620 = vmatprep.subr.mxu1 %v13840_v15  ;;  %v13895_v9 = vld [vmem:[%s14969_s6 + $0x918] sm:$0xff]  ;;  %v13896_v28 = vld [vmem:[%s14969_s6 + $0xcf0] sm:$0xff] }
 0x98a   : > { %12535 = vmatprep.subr.mxu0 %v13841_v48  ;;  %12621 = vmatpush3.msra.mxu1 %v13842_v30  ;;  %v13897_v15 = vld [vmem:[%s14969_s6 + $0x990] sm:$0xff] }
 0x98b   : > { %12536 = vmatpush3.msra.mxu0 %v13843_v49  ;;  %12622 = vmatprep.subr.mxu1 %v13844_v6  ;;  %v13898_v48 = vld [vmem:[%s14969_s6 + $0xc70] sm:$0xff]  ;;  %v13900_v49 = vld [vmem:[%s14969_s6 + $0xce8] sm:$0xff] }
 0x98c   : > { %12537 = vmatprep.subr.mxu0 %v13845_v54  ;;  %12623 = vmatpush3.msra.mxu1 %v13846_v25  ;;  %v13899_v30 = vld [vmem:[%s14969_s6 + $0x910] sm:$0xff]  ;;  %v13901_v6 = vld [vmem:[%s14969_s6 + $0x988] sm:$0xff] }
 0x98d   : > { %12538 = vmatpush3.msra.mxu0 %v13847_v47  ;;  %12624 = vmatprep.subr.mxu1 %v13848_v39  ;;  %v13902_v54 = vld [vmem:[%s14969_s6 + $0xc68] sm:$0xff]  ;;  %v13904_v47 = vld [vmem:[%s14969_s6 + $0xce0] sm:$0xff] }
 0x98e   : > { %9198 = vmatmul.mubr.f32.vlgmr.msra.gmra.mxu0 %v18751_v20  ;;  %12577 = vmatprep.subr.mxu0 %v13849_v42  ;;  %v13862_v20 = vld [vmem:[%s14969_s6 + $0x960] sm:$0xff]  ;;  %v13903_v25 = vld [vmem:[%s14969_s6 + $0x908] sm:$0xff] }
 0x98f   : > { %12578 = vmatpush3.msra.mxu0 %v13850_v50  ;;  %12625 = vmatpush3.msra.mxu1 %v13851_v58  ;;  %v13905_v39 = vld [vmem:[%s14969_s6 + $0x980] sm:$0xff]  ;;  %v13908_v58 = vld [vmem:[%s14969_s6 + $0xcd8] sm:$0xff] }
 0x990   : > { %12579 = vmatprep.subr.mxu0 %v13852_v43  ;;  %12626 = vmatprep.subr.mxu1 %v13853_v46  ;;  %v13906_v42 = vld [vmem:[%s14969_s6 + $0xc60] sm:$0xff]  ;;  %v13909_v43 = vld [vmem:[%s14969_s6 + $0xbf8] sm:$0xff] }
 0x991   : > { %12580 = vmatpush3.msra.mxu0 %v13854_v56  ;;  %12627 = vmatpush3.msra.mxu1 %v13855_v57  ;;  %v13907_v50 = vld [vmem:[%s14969_s6 + $0x900] sm:$0xff]  ;;  %v13910_v46 = vld [vmem:[%s14969_s6 + $0xb78] sm:$0xff]  ;;  %v13912_v57 = vld [vmem:[%s14969_s6 + $0xbf0] sm:$0xff] }
 0x992   : > { %12581 = vmatprep.subr.mxu0 %v13856_v63  ;;  %12628 = vmatprep.subr.mxu1 %v13857_v2  ;;  %v13911_v56 = vld [vmem:[%s14969_s6 + $0xc58] sm:$0xff]  ;;  %v13913_v63 = vld [vmem:[%s14969_s6 + $0xcd0] sm:$0xff] }
 0x993   : > { %12582 = vmatpush3.msra.mxu0 %v13858_v19  ;;  %12629 = vmatpush3.msra.mxu1 %v13859_v17  ;;  %v13914_v2 = vld [vmem:[%s14969_s6 + $0xb70] sm:$0xff]  ;;  %v13916_v17 = vld [vmem:[%s14969_s6 + $0xbe8] sm:$0xff] }
 0x994   : > { %12583 = vmatprep.subr.mxu0 %v13860_v44  ;;  %12630 = vmatprep.subr.mxu1 %v13861_v51  ;;  %v13915_v19 = vld [vmem:[%s14969_s6 + $0xc50] sm:$0xff]  ;;  %v13917_v44 = vld [vmem:[%s14969_s6 + $0xcc8] sm:$0xff] }
 0x995   : > { %12584 = vmatpush3.msra.mxu0 %v13862_v20  ;;  %12631 = vmatpush3.msra.mxu1 %v13863_v60  ;;  %v13918_v51 = vld [vmem:[%s14969_s6 + $0xb68] sm:$0xff]  ;;  %v13920_v60 = vld [vmem:[%s14969_s6 + $0xbe0] sm:$0xff] }
 0x996   : > { %12585 = vmatprep.subr.mxu0 %v13864_v11  ;;  %12632 = vmatprep.subr.mxu1 %v13865_v23  ;;  %v13919_v20 = vld [vmem:[%s14969_s6 + $0xc48] sm:$0xff]  ;;  %v13922_v11 = vld [vmem:[%s14969_s6 + $0xb60] sm:$0xff] }
 0x997   : > { %12586 = vmatpush3.msra.mxu0 %v13866_v14  ;;  %12633 = vmatpush3.msra.mxu1 %v13867_v55  ;;  %v13923_v23 = vld [vmem:[%s14969_s6 + $0xc40] sm:$0xff]  ;;  %v13924_v14 = vld [vmem:[%s14969_s6 + $0xbd8] sm:$0xff] }
 0x998   : > { %12587 = vmatprep.subr.mxu0 %v13868_v35  ;;  %12634 = vmatprep.subr.mxu1 %v13869_v21  ;;  %v13925_v55 = vld [vmem:[%s14969_s6 + $0xcb8] sm:$0xff] }
 0x999   : > { %12588 = vmatpush3.msra.mxu0 %v13870_v52  ;;  %12635 = vmatpush3.msra.mxu1 %v13871_v62  ;;  %v13926_v35 = vld [vmem:[%s14969_s6 + $0xb58] sm:$0xff]  ;;  %v13928_v52 = vld [vmem:[%s14969_s6 + $0xbd0] sm:$0xff] }
 0x99a   : > { %12589 = vmatprep.subr.mxu0 %v13872_v3  ;;  %12636 = vmatprep.subr.mxu1 %v13873_v31  ;;  %v13927_v21 = vld [vmem:[%s14969_s6 + $0xc38] sm:$0xff]  ;;  %v13929_v62 = vld [vmem:[%s14969_s6 + $0xcb0] sm:$0xff]  ;;  %v8382_v31 = vcombine.high %v18827_v22, %v18827_v22  ;;  %v13938_v22 = vld [vmem:[%s14969_s6 + $0xb40] sm:$0xff] }
 0x99b   : > { %12590 = vmatpush3.msra.mxu0 %v13874_v12  ;;  %12637 = vmatpush3.msra.mxu1 %v13875_v1  ;;  %v13931_v3 = vld [vmem:[%s14969_s6 + $0xc30] sm:$0xff]  ;;  %v13932_v12 = vld [vmem:[%s14969_s6 + $0xbc8] sm:$0xff] }
 0x99c   : > { %12591 = vmatprep.subr.mxu0 %v13876_v27  ;;  %12638 = vmatprep.subr.mxu1 %v13877_v41  ;;  %v13933_v1 = vld [vmem:[%s14969_s6 + $0xca8] sm:$0xff]  ;;  %v13936_v41 = vld [vmem:[%s14969_s6 + $0xbc0] sm:$0xff] }
 0x99d   : > { %12592 = vmatpush3.msra.mxu0 %v13878_v34  ;;  %12639 = vmatpush3.msra.mxu1 %v13879_v0  ;;  %v13935_v27 = vld [vmem:[%s14969_s6 + $0xc28] sm:$0xff]  ;;  %v13937_v34 = vld [vmem:[%s14969_s6 + $0xca0] sm:$0xff] }
 0x99e   : > { %12593 = vmatprep.subr.mxu0 %v13880_v16  ;;  %12640 = vmatprep.subr.mxu1 %v13881_v40  ;;  %v18908_v0 = vld [vmem:[%s14954_s7 + $0x30] sm:$0xff]  ;;  %v18913_v16 = vrot.slane %v8382_v31, %v15195_v59  ;;  %v13940_v40 = vld [vmem:[%s14969_s6 + $0xbb8] sm:$0xff] }
 0x99f   : > { %12594 = vmatpush3.msra.mxu0 %v13882_v8  ;;  %12641 = vmatpush3.msra.mxu1 %v13883_v37  ;;  %v13941_v8 = vld [vmem:[%s14969_s6 + $0xc98] sm:$0xff]  ;;  %v13989_v31 = vld [vmem:[%s14969_s6 + $0xec0] sm:$0xff] }
 0x9a0   : > { %12595 = vmatprep.subr.mxu0 %v13884_v29  ;;  %12642 = vmatprep.subr.mxu1 %v13885_v38  ;;  %v13942_v37 = vld [vmem:[%s14969_s6 + $0xb38] sm:$0xff]  ;;  %v8406_v29 = vrot.slane %v18908_v0, %v15195_v59  ;;  %v13944_v38 = vld [vmem:[%s14969_s6 + $0xbb0] sm:$0xff] }
 0x9a1   : > { %12596 = vmatpush3.msra.mxu0 %v13886_v26  ;;  %9337 = vmatprep.mubr.f32.mxu0 %v8381_v4  ;;  %v13939_v4 = vld [vmem:[%s14969_s6 + $0xc20] sm:$0xff]  ;;  %v13945_v26 = vld [vmem:[%s14969_s6 + $0xc90] sm:$0xff] }
 0x9a2   : > { %12597 = vmatprep.subr.mxu0 %v13887_v5  ;;  %12643 = vmatpush3.msra.mxu1 %v13888_v53  ;;  %v13946_v5 = vld [vmem:[%s14969_s6 + $0xb30] sm:$0xff] }
 0x9a3   : > { %12598 = vmatpush3.msra.mxu0 %v13889_v7  ;;  %9407 = vmatprep.mubr.f32.mxu1 %v8397_v36  ;;  %v13943_v36 = vld [vmem:[%s14969_s6 + $0xc18] sm:$0xff]  ;;  %v13947_v53 = vld [vmem:[%s14969_s6 + $0xc10] sm:$0xff]  ;;  %v8398_v7 = vcombine.high %v18913_v16, %v18913_v16 }
 0x9a4   : > { %12599 = vmatprep.subr.mxu0 %v13890_v32  ;;  %12682 = vmatprep.subr.mxu1 %v13891_v61  ;;  %v13948_v32 = vld [vmem:[%s14969_s6 + $0xba8] sm:$0xff] }
 0x9a5   : > { %12600 = vmatpush3.msra.mxu0 %v13892_v13  ;;  %9408 = vmatmul.mubr.f32.vlgmr.msra.gmra.mxu1 %v8389_v10  ;;  %v13934_v10 = vld [vmem:[%s14969_s6 + $0xb48] sm:$0xff] }
 0x9a6   : > { %12601 = vmatprep.subr.mxu0 %v13893_v18  ;;  %12683 = vmatpush3.msra.mxu1 %v13894_v45  ;;  %v13949_v61 = vld [vmem:[%s14969_s6 + $0xc88] sm:$0xff]  ;;  %v8414_v45 = vcombine.high %v8406_v29, %v8406_v29 }
 0x9a7   : > { %12602 = vmatpush3.msra.mxu0 %v13895_v9  ;;  %12684 = vmatprep.subr.mxu1 %v13896_v28  ;;  %v13950_v13 = vld [vmem:[%s14969_s6 + $0xb28] sm:$0xff]  ;;  %v13952_v9 = vld [vmem:[%s14969_s6 + $0xba0] sm:$0xff] }
 0x9a8   : > { %12603 = vmatprep.subr.mxu0 %v13897_v15  ;;  %12685 = vmatpush3.msra.mxu1 %v13898_v48  ;;  %v13951_v18 = vld [vmem:[%s14969_s6 + $0xc08] sm:$0xff]  ;;  %v13953_v28 = vld [vmem:[%s14969_s6 + $0xc80] sm:$0xff]  ;;  %v13955_v48 = vld [vmem:[%s14969_s6 + $0xb98] sm:$0xff] }
 0x9a9   : > { %12604 = vmatpush3.msra.mxu0 %v13899_v30  ;;  %12686 = vmatprep.subr.mxu1 %v13900_v49  ;;  %v13954_v15 = vld [vmem:[%s14969_s6 + $0xb20] sm:$0xff]  ;;  %v13957_v49 = vld [vmem:[%s14969_s6 + $0xb18] sm:$0xff] }
 0x9aa   : > { %12605 = vmatprep.subr.mxu0 %v13901_v6  ;;  %12687 = vmatpush3.msra.mxu1 %v13902_v54  ;;  %v13956_v30 = vld [vmem:[%s14969_s6 + $0xc00] sm:$0xff]  ;;  %v13958_v6 = vld [vmem:[%s14969_s6 + $0xb90] sm:$0xff]  ;;  %v13959_v54 = vld [vmem:[%s14969_s6 + $0xef8] sm:$0xff] }
 0x9ab   : > { %12606 = vmatpush3.msra.mxu0 %v13903_v25  ;;  %12688 = vmatprep.subr.mxu1 %v13904_v47  ;;  %v13960_v25 = vld [vmem:[%s14969_s6 + $0xb10] sm:$0xff]  ;;  %v13961_v47 = vld [vmem:[%s14969_s6 + $0xb88] sm:$0xff] }
 0x9ac   : > { %12607 = vmatprep.subr.mxu0 %v13905_v39  ;;  %12689 = vmatpush3.msra.mxu1 %v13906_v42  ;;  %v13962_v39 = vld [vmem:[%s14969_s6 + $0xe78] sm:$0xff]  ;;  %v13963_v42 = vld [vmem:[%s14969_s6 + $0xb08] sm:$0xff] }
 0x9ad   : > { %12608 = vmatpush3.msra.mxu0 %v13907_v50  ;;  %12690 = vmatprep.subr.mxu1 %v13908_v58  ;;  %v13964_v50 = vld [vmem:[%s14969_s6 + $0xef0] sm:$0xff]  ;;  %v13965_v58 = vld [vmem:[%s14969_s6 + $0xb80] sm:$0xff] }
 0x9ae   : > { %9338 = vmatmul.mubr.f32.vlgmr.msra.gmra.mxu0 %v18832_v24  ;;  %12647 = vmatprep.subr.mxu0 %v13909_v43  ;;  %v13930_v24 = vld [vmem:[%s14969_s6 + $0xb50] sm:$0xff] }
 0x9af   : > { %12648 = vmatpush3.msra.mxu0 %v13910_v46  ;;  %12691 = vmatpush3.msra.mxu1 %v13911_v56  ;;  %v13966_v43 = vld [vmem:[%s14969_s6 + $0xe70] sm:$0xff]  ;;  %v13967_v46 = vld [vmem:[%s14969_s6 + $0xb00] sm:$0xff]  ;;  %v13968_v56 = vld [vmem:[%s14969_s6 + $0xee8] sm:$0xff] }
 0x9b0   : > { %12649 = vmatprep.subr.mxu0 %v13912_v57  ;;  %12692 = vmatprep.subr.mxu1 %v13913_v63  ;;  %v13969_v57 = vld [vmem:[%s14969_s6 + $0xdf8] sm:$0xff] }
 0x9b1   : > { %12650 = vmatpush3.msra.mxu0 %v13914_v2  ;;  %12693 = vmatpush3.msra.mxu1 %v13915_v19  ;;  %v13970_v63 = vld [vmem:[%s14969_s6 + $0xd78] sm:$0xff]  ;;  %v13971_v2 = vld [vmem:[%s14969_s6 + $0xe68] sm:$0xff]  ;;  %v13972_v19 = vld [vmem:[%s14969_s6 + $0xdf0] sm:$0xff] }
 0x9b2   : > { %12651 = vmatprep.subr.mxu0 %v13916_v17  ;;  %12694 = vmatprep.subr.mxu1 %v13917_v44  ;;  %v13973_v17 = vld [vmem:[%s14969_s6 + $0xee0] sm:$0xff]  ;;  %v13974_v44 = vld [vmem:[%s14969_s6 + $0xd70] sm:$0xff] }
 0x9b3   : > { %12652 = vmatpush3.msra.mxu0 %v13918_v51  ;;  %12695 = vmatpush3.msra.mxu1 %v13919_v20  ;;  %v13975_v51 = vld [vmem:[%s14969_s6 + $0xe60] sm:$0xff]  ;;  %v13976_v20 = vld [vmem:[%s14969_s6 + $0xde8] sm:$0xff] }
 0x9b4   : > { %12653 = vmatprep.subr.mxu0 %v13920_v60  ;;  %12696 = vmatprep.subr.mxu1 %v13921_v33  ;;  %v13977_v60 = vld [vmem:[%s14969_s6 + $0xed8] sm:$0xff]  ;;  %v13978_v33 = vld [vmem:[%s14969_s6 + $0xd68] sm:$0xff] }
 0x9b5   : > { %12654 = vmatpush3.msra.mxu0 %v13922_v11  ;;  %12697 = vmatpush3.msra.mxu1 %v13923_v23  ;;  %v13979_v11 = vld [vmem:[%s14969_s6 + $0xe58] sm:$0xff]  ;;  %v13980_v23 = vld [vmem:[%s14969_s6 + $0xde0] sm:$0xff] }
 0x9b6   : > { %12655 = vmatprep.subr.mxu0 %v13924_v14  ;;  %12698 = vmatprep.subr.mxu1 %v13925_v55  ;;  %v13981_v14 = vld [vmem:[%s14969_s6 + $0xed0] sm:$0xff]  ;;  %v13982_v55 = vld [vmem:[%s14969_s6 + $0xd60] sm:$0xff] }
 0x9b7   : > { %12656 = vmatpush3.msra.mxu0 %v13926_v35  ;;  %12699 = vmatpush3.msra.mxu1 %v13927_v21  ;;  %v13983_v35 = vld [vmem:[%s14969_s6 + $0xe50] sm:$0xff]  ;;  %v13984_v21 = vld [vmem:[%s14969_s6 + $0xdd8] sm:$0xff] }
 0x9b8   : > { %12657 = vmatprep.subr.mxu0 %v13928_v52  ;;  %12700 = vmatprep.subr.mxu1 %v13929_v62  ;;  %v13985_v52 = vld [vmem:[%s14969_s6 + $0xec8] sm:$0xff]  ;;  %v13986_v62 = vld [vmem:[%s14969_s6 + $0xd58] sm:$0xff] }
 0x9b9   : > { %12658 = vmatpush3.msra.mxu0 %v13930_v24  ;;  %12701 = vmatpush3.msra.mxu1 %v13931_v3  ;;  %v13987_v24 = vld [vmem:[%s14969_s6 + $0xe48] sm:$0xff]  ;;  %v13988_v3 = vld [vmem:[%s14969_s6 + $0xdd0] sm:$0xff] }
 0x9ba   : > { %12659 = vmatprep.subr.mxu0 %v13932_v12  ;;  %12702 = vmatprep.subr.mxu1 %v13933_v1  ;;  %v13990_v12 = vld [vmem:[%s14969_s6 + $0xd50] sm:$0xff]  ;;  %v13991_v1 = vld [vmem:[%s14969_s6 + $0xe40] sm:$0xff] }
 0x9bb   : > { %12660 = vmatpush3.msra.mxu0 %v13934_v10  ;;  %12703 = vmatpush3.msra.mxu1 %v13935_v27  ;;  %v13992_v10 = vld [vmem:[%s14969_s6 + $0xdc8] sm:$0xff]  ;;  %v13993_v27 = vld [vmem:[%s14969_s6 + $0xeb8] sm:$0xff] }
 0x9bc   : > { %12661 = vmatprep.subr.mxu0 %v13936_v41  ;;  %12704 = vmatprep.subr.mxu1 %v13937_v34  ;;  %v13994_v41 = vld [vmem:[%s14969_s6 + $0xd48] sm:$0xff]  ;;  %v13995_v34 = vld [vmem:[%s14969_s6 + $0xe38] sm:$0xff] }
 0x9bd   : > { %12662 = vmatpush3.msra.mxu0 %v13938_v22  ;;  %12705 = vmatpush3.msra.mxu1 %v13939_v4  ;;  %v13996_v22 = vld [vmem:[%s14969_s6 + $0xdc0] sm:$0xff]  ;;  %v13997_v4 = vld [vmem:[%s14969_s6 + $0xeb0] sm:$0xff] }
 0x9be   : > { %12663 = vmatprep.subr.mxu0 %v13940_v40  ;;  %12706 = vmatprep.subr.mxu1 %v13941_v8  ;;  %v13999_v40 = vld [vmem:[%s14969_s6 + $0xe30] sm:$0xff]  ;;  %v8399_v8 = vcombine.high %v18908_v0, %v18908_v0 }
 0x9bf   : > { %12664 = vmatpush3.msra.mxu0 %v13942_v37  ;;  %12707 = vmatpush3.msra.mxu1 %v13943_v36  ;;  %v14000_v37 = vld [vmem:[%s14969_s6 + $0xdb8] sm:$0xff]  ;;  %v14001_v36 = vld [vmem:[%s14969_s6 + $0xea8] sm:$0xff]  ;;  %v14006_v0 = vld [vmem:[%s14969_s6 + $0xd30] sm:$0xff] }
 0x9c0   : > { %12665 = vmatprep.subr.mxu0 %v13944_v38  ;;  %12708 = vmatprep.subr.mxu1 %v13945_v26  ;;  %v14003_v38 = vld [vmem:[%s14969_s6 + $0xe28] sm:$0xff]  ;;  %v14004_v26 = vld [vmem:[%s14969_s6 + $0xdb0] sm:$0xff] }
 0x9c1   : > { %12666 = vmatpush3.msra.mxu0 %v13946_v5  ;;  %12709 = vmatpush3.msra.mxu1 %v13947_v53  ;;  %v14005_v5 = vld [vmem:[%s14969_s6 + $0xea0] sm:$0xff]  ;;  %v18989_v53 = vld [vmem:[%s14954_s7 + $0x38] sm:$0xff] }
 0x9c2   : > { %12667 = vmatprep.subr.mxu0 %v13948_v32  ;;  %12710 = vmatprep.subr.mxu1 %v13949_v61  ;;  %v8413_v32 = vrot.slane %v8399_v8, %v15195_v59  ;;  %v14008_v61 = vld [vmem:[%s14969_s6 + $0xda8] sm:$0xff]  ;;  %v14057_v8 = vld [vmem:[%s14969_s6 + $0x10c0] sm:$0xff] }
 0x9c3   : > { %12668 = vmatpush3.msra.mxu0 %v13950_v13  ;;  %12711 = vmatpush3.msra.mxu1 %v13951_v18  ;;  %v14009_v13 = vld [vmem:[%s14969_s6 + $0xe98] sm:$0xff]  ;;  %v14010_v18 = vld [vmem:[%s14969_s6 + $0xd28] sm:$0xff] }
 0x9c4   : > { %12669 = vmatprep.subr.mxu0 %v13952_v9  ;;  %12712 = vmatprep.subr.mxu1 %v13953_v28  ;;  %v8423_v9 = vrot.slane %v18989_v53, %v15195_v59  ;;  %v14012_v28 = vld [vmem:[%s14969_s6 + $0xda0] sm:$0xff] }
 0x9c5   : > { %12670 = vmatpush3.msra.mxu0 %v13954_v15  ;;  %9477 = vmatprep.mubr.f32.mxu0 %v8398_v7  ;;  %v14007_v7 = vld [vmem:[%s14969_s6 + $0xe20] sm:$0xff]  ;;  %v14013_v15 = vld [vmem:[%s14969_s6 + $0xe90] sm:$0xff] }
 0x9c6   : > { %12671 = vmatprep.subr.mxu0 %v13955_v48  ;;  %12713 = vmatpush3.msra.mxu1 %v13956_v30  ;;  %v14014_v48 = vld [vmem:[%s14969_s6 + $0xd20] sm:$0xff]  ;;  %v14015_v30 = vld [vmem:[%s14969_s6 + $0xe10] sm:$0xff] }
 0x9c7   : > { %12672 = vmatpush3.msra.mxu0 %v13957_v49  ;;  %9547 = vmatprep.mubr.f32.mxu1 %v8414_v45  ;;  %v14011_v45 = vld [vmem:[%s14969_s6 + $0xe18] sm:$0xff]  ;;  %v8415_v49 = vcombine.high %v8413_v32, %v8413_v32 }
 0x9c8   : > { %12673 = vmatprep.subr.mxu0 %v13958_v6  ;;  %12752 = vmatprep.subr.mxu1 %v13959_v54  ;;  %v14016_v6 = vld [vmem:[%s14969_s6 + $0xd98] sm:$0xff]  ;;  %v14017_v54 = vld [vmem:[%s14969_s6 + $0xe88] sm:$0xff] }
 0x9c9   : > { %12674 = vmatpush3.msra.mxu0 %v13960_v25  ;;  %9548 = vmatmul.mubr.f32.vlgmr.msra.gmra.mxu1 %v8406_v29  ;;  %v14002_v29 = vld [vmem:[%s14969_s6 + $0xd38] sm:$0xff] }
 0x9ca   : > { %12675 = vmatprep.subr.mxu0 %v13961_v47  ;;  %12753 = vmatpush3.msra.mxu1 %v13962_v39  ;;  %v14018_v25 = vld [vmem:[%s14969_s6 + $0xd18] sm:$0xff]  ;;  %v14019_v47 = vld [vmem:[%s14969_s6 + $0xe08] sm:$0xff]  ;;  %v8431_v39 = vcombine.high %v8423_v9, %v8423_v9 }
 0x9cb   : > { %12676 = vmatpush3.msra.mxu0 %v13963_v42  ;;  %12754 = vmatprep.subr.mxu1 %v13964_v50  ;;  %v14020_v42 = vld [vmem:[%s14969_s6 + $0xd90] sm:$0xff]  ;;  %v14021_v50 = vld [vmem:[%s14969_s6 + $0xe80] sm:$0xff] }
 0x9cc   : > { %12677 = vmatprep.subr.mxu0 %v13965_v58  ;;  %12755 = vmatpush3.msra.mxu1 %v13966_v43  ;;  %v14022_v58 = vld [vmem:[%s14969_s6 + $0xd10] sm:$0xff]  ;;  %v14023_v43 = vld [vmem:[%s14969_s6 + $0xd88] sm:$0xff] }
 0x9cd   : > { %12678 = vmatpush3.msra.mxu0 %v13967_v46  ;;  %12756 = vmatprep.subr.mxu1 %v13968_v56  ;;  %v14024_v46 = vld [vmem:[%s14969_s6 + $0xe00] sm:$0xff]  ;;  %v14025_v56 = vld [vmem:[%s14969_s6 + $0xd08] sm:$0xff] }
 0x9ce   : > { %9478 = vmatmul.mubr.f32.vlgmr.msra.gmra.mxu0 %v18913_v16  ;;  %12717 = vmatprep.subr.mxu0 %v13969_v57  ;;  %v13998_v16 = vld [vmem:[%s14969_s6 + $0xd40] sm:$0xff] }
 0x9cf   : > { %12718 = vmatpush3.msra.mxu0 %v13970_v63  ;;  %12757 = vmatpush3.msra.mxu1 %v13971_v2  ;;  %v14026_v57 = vld [vmem:[%s14969_s6 + $0xd80] sm:$0xff]  ;;  %v14027_v63 = vld [vmem:[%s14969_s6 + $0x10f8] sm:$0xff] }
 0x9d0   : > { %12719 = vmatprep.subr.mxu0 %v13972_v19  ;;  %12758 = vmatprep.subr.mxu1 %v13973_v17  ;;  %v14028_v2 = vld [vmem:[%s14969_s6 + $0xd00] sm:$0xff]  ;;  %v14029_v19 = vld [vmem:[%s14969_s6 + $0xff8] sm:$0xff] }
 0x9d1   : > { %12720 = vmatpush3.msra.mxu0 %v13974_v44  ;;  %12759 = vmatpush3.msra.mxu1 %v13975_v51  ;;  %v14030_v17 = vld [vmem:[%s14969_s6 + $0xf78] sm:$0xff]  ;;  %v14032_v51 = vld [vmem:[%s14969_s6 + $0xff0] sm:$0xff] }
 0x9d2   : > { %12721 = vmatprep.subr.mxu0 %v13976_v20  ;;  %12760 = vmatprep.subr.mxu1 %v13977_v60  ;;  %v14031_v44 = vld [vmem:[%s14969_s6 + $0x1078] sm:$0xff]  ;;  %v14033_v20 = vld [vmem:[%s14969_s6 + $0x10f0] sm:$0xff] }
 0x9d3   : > { %12722 = vmatpush3.msra.mxu0 %v13978_v33  ;;  %12761 = vmatpush3.msra.mxu1 %v13979_v11  ;;  %v14034_v60 = vld [vmem:[%s14969_s6 + $0xf70] sm:$0xff]  ;;  %v14036_v11 = vld [vmem:[%s14969_s6 + $0xfe8] sm:$0xff] }
 0x9d4   : > { %12723 = vmatprep.subr.mxu0 %v13980_v23  ;;  %12762 = vmatprep.subr.mxu1 %v13981_v14  ;;  %v14035_v33 = vld [vmem:[%s14969_s6 + $0x1070] sm:$0xff]  ;;  %v14037_v23 = vld [vmem:[%s14969_s6 + $0x10e8] sm:$0xff] }
 0x9d5   : > { %12724 = vmatpush3.msra.mxu0 %v13982_v55  ;;  %12763 = vmatpush3.msra.mxu1 %v13983_v35  ;;  %v14038_v14 = vld [vmem:[%s14969_s6 + $0xf68] sm:$0xff]  ;;  %v14040_v35 = vld [vmem:[%s14969_s6 + $0xfe0] sm:$0xff] }
 0x9d6   : > { %12725 = vmatprep.subr.mxu0 %v13984_v21  ;;  %12764 = vmatprep.subr.mxu1 %v13985_v52  ;;  %v14039_v55 = vld [vmem:[%s14969_s6 + $0x1068] sm:$0xff]  ;;  %v14041_v21 = vld [vmem:[%s14969_s6 + $0x10e0] sm:$0xff] }
 0x9d7   : > { %12726 = vmatpush3.msra.mxu0 %v13986_v62  ;;  %12765 = vmatpush3.msra.mxu1 %v13987_v24  ;;  %v14042_v52 = vld [vmem:[%s14969_s6 + $0xf60] sm:$0xff]  ;;  %v14044_v24 = vld [vmem:[%s14969_s6 + $0xfd8] sm:$0xff] }
 0x9d8   : > { %12727 = vmatprep.subr.mxu0 %v13988_v3  ;;  %12766 = vmatprep.subr.mxu1 %v13989_v31  ;;  %v14043_v62 = vld [vmem:[%s14969_s6 + $0x1060] sm:$0xff]  ;;  %v14045_v3 = vld [vmem:[%s14969_s6 + $0x10d8] sm:$0xff] }
 0x9d9   : > { %12728 = vmatpush3.msra.mxu0 %v13990_v12  ;;  %12767 = vmatpush3.msra.mxu1 %v13991_v1  ;;  %v14046_v31 = vld [vmem:[%s14969_s6 + $0xf58] sm:$0xff]  ;;  %v14048_v1 = vld [vmem:[%s14969_s6 + $0xfd0] sm:$0xff] }
 0x9da   : > { %12729 = vmatprep.subr.mxu0 %v13992_v10  ;;  %12768 = vmatprep.subr.mxu1 %v13993_v27  ;;  %v14047_v12 = vld [vmem:[%s14969_s6 + $0x1058] sm:$0xff]  ;;  %v14049_v10 = vld [vmem:[%s14969_s6 + $0x10d0] sm:$0xff] }
 0x9db   : > { %12730 = vmatpush3.msra.mxu0 %v13994_v41  ;;  %12769 = vmatpush3.msra.mxu1 %v13995_v34  ;;  %v14050_v27 = vld [vmem:[%s14969_s6 + $0xf50] sm:$0xff]  ;;  %v14052_v34 = vld [vmem:[%s14969_s6 + $0xfc8] sm:$0xff] }
 0x9dc   : > { %12731 = vmatprep.subr.mxu0 %v13996_v22  ;;  %12770 = vmatprep.subr.mxu1 %v13997_v4  ;;  %v14051_v41 = vld [vmem:[%s14969_s6 + $0x1050] sm:$0xff]  ;;  %v14053_v22 = vld [vmem:[%s14969_s6 + $0x10c8] sm:$0xff] }
 0x9dd   : > { %12732 = vmatpush3.msra.mxu0 %v13998_v16  ;;  %12771 = vmatpush3.msra.mxu1 %v13999_v40  ;;  %v14054_v4 = vld [vmem:[%s14969_s6 + $0xf48] sm:$0xff]  ;;  %v14056_v40 = vld [vmem:[%s14969_s6 + $0xfc0] sm:$0xff] }
 0x9de   : > { %12733 = vmatprep.subr.mxu0 %v14000_v37  ;;  %12772 = vmatprep.subr.mxu1 %v14001_v36  ;;  %v14055_v16 = vld [vmem:[%s14969_s6 + $0x1048] sm:$0xff]  ;;  %v14058_v37 = vld [vmem:[%s14969_s6 + $0xf40] sm:$0xff] }
 0x9df   : > { %12734 = vmatpush3.msra.mxu0 %v14002_v29  ;;  %12773 = vmatpush3.msra.mxu1 %v14003_v38  ;;  %v14059_v36 = vld [vmem:[%s14969_s6 + $0x1040] sm:$0xff]  ;;  %v14060_v29 = vld [vmem:[%s14969_s6 + $0xfb8] sm:$0xff] }
 0x9e0   : > { %12735 = vmatprep.subr.mxu0 %v14004_v26  ;;  %12774 = vmatprep.subr.mxu1 %v14005_v5  ;;  %v14061_v38 = vld [vmem:[%s14969_s6 + $0x10b8] sm:$0xff] }
 0x9e1   : > { %12736 = vmatpush3.msra.mxu0 %v14006_v0  ;;  %12775 = vmatpush3.msra.mxu1 %v14007_v7  ;;  %v14062_v26 = vld [vmem:[%s14969_s6 + $0xf38] sm:$0xff]  ;;  %v14064_v0 = vld [vmem:[%s14969_s6 + $0xfb0] sm:$0xff] }
 0x9e2   : > { %12737 = vmatprep.subr.mxu0 %v14008_v61  ;;  %12776 = vmatprep.subr.mxu1 %v14009_v13  ;;  %v14063_v5 = vld [vmem:[%s14969_s6 + $0x1038] sm:$0xff]  ;;  %v14065_v7 = vld [vmem:[%s14969_s6 + $0x10b0] sm:$0xff]  ;;  %v8416_v13 = vcombine.high %v18989_v53, %v18989_v53  ;;  %v14074_v53 = vld [vmem:[%s14969_s6 + $0xf20] sm:$0xff] }
 0x9e3   : > { %12738 = vmatpush3.msra.mxu0 %v14010_v18  ;;  %12777 = vmatpush3.msra.mxu1 %v14011_v45  ;;  %v14067_v61 = vld [vmem:[%s14969_s6 + $0x1030] sm:$0xff]  ;;  %v14068_v18 = vld [vmem:[%s14969_s6 + $0xfa8] sm:$0xff] }
 0x9e4   : > { %12739 = vmatprep.subr.mxu0 %v14012_v28  ;;  %12778 = vmatprep.subr.mxu1 %v14013_v15  ;;  %v14069_v45 = vld [vmem:[%s14969_s6 + $0x10a8] sm:$0xff]  ;;  %v14072_v15 = vld [vmem:[%s14969_s6 + $0xfa0] sm:$0xff] }
 0x9e5   : > { %12740 = vmatpush3.msra.mxu0 %v14014_v48  ;;  %12779 = vmatpush3.msra.mxu1 %v14015_v30  ;;  %v14071_v28 = vld [vmem:[%s14969_s6 + $0x1028] sm:$0xff]  ;;  %v14073_v48 = vld [vmem:[%s14969_s6 + $0x10a0] sm:$0xff]  ;;  %v19065_v30 = vld [vmem:[%s14954_s7 + $0x40] sm:$0xff] }
 0x9e6   : > { %12741 = vmatprep.subr.mxu0 %v14016_v6  ;;  %12780 = vmatprep.subr.mxu1 %v14017_v54  ;;  %v8430_v6 = vrot.slane %v8416_v13, %v15195_v59  ;;  %v14076_v54 = vld [vmem:[%s14969_s6 + $0xf98] sm:$0xff] }
 0x9e7   : > { %12742 = vmatpush3.msra.mxu0 %v14018_v25  ;;  %12781 = vmatpush3.msra.mxu1 %v14019_v47  ;;  %v14077_v25 = vld [vmem:[%s14969_s6 + $0x1098] sm:$0xff] }
 0x9e8   : > { %12743 = vmatprep.subr.mxu0 %v14020_v42  ;;  %12782 = vmatprep.subr.mxu1 %v14021_v50  ;;  %v14078_v47 = vld [vmem:[%s14969_s6 + $0xf18] sm:$0xff]  ;;  %v8440_v42 = vrot.slane %v19065_v30, %v15195_v59  ;;  %v14080_v50 = vld [vmem:[%s14969_s6 + $0xf90] sm:$0xff] }
 0x9e9   : > { %12744 = vmatpush3.msra.mxu0 %v14022_v58  ;;  %9617 = vmatprep.mubr.f32.mxu0 %v8415_v49  ;;  %v14075_v49 = vld [vmem:[%s14969_s6 + $0x1020] sm:$0xff]  ;;  %v14081_v58 = vld [vmem:[%s14969_s6 + $0x1090] sm:$0xff]  ;;  %v14125_v13 = vld [vmem:[%s14969_s6 + $0x12b8] sm:$0xff] }
 0x9ea   : > { %12745 = vmatprep.subr.mxu0 %v14023_v43  ;;  %12783 = vmatpush3.msra.mxu1 %v14024_v46  ;;  %v14082_v43 = vld [vmem:[%s14969_s6 + $0xf10] sm:$0xff] }
 0x9eb   : > { %12746 = vmatpush3.msra.mxu0 %v14025_v56  ;;  %9687 = vmatprep.mubr.f32.mxu1 %v8431_v39  ;;  %v14079_v39 = vld [vmem:[%s14969_s6 + $0x1018] sm:$0xff]  ;;  %v14083_v46 = vld [vmem:[%s14969_s6 + $0x1010] sm:$0xff]  ;;  %v8432_v56 = vcombine.high %v8430_v6, %v8430_v6 }
 0x9ec   : > { %12747 = vmatprep.subr.mxu0 %v14026_v57  ;;  %12822 = vmatprep.subr.mxu1 %v14027_v63  ;;  %v14084_v57 = vld [vmem:[%s14969_s6 + $0xf88] sm:$0xff] }
 0x9ed   : > { %12748 = vmatpush3.msra.mxu0 %v14028_v2  ;;  %9688 = vmatmul.mubr.f32.vlgmr.msra.gmra.mxu1 %v8423_v9  ;;  %v14070_v9 = vld [vmem:[%s14969_s6 + $0xf28] sm:$0xff] }
 0x9ee   : > { %9618 = vmatmul.mubr.f32.vlgmr.msra.gmra.mxu0 %v8413_v32  ;;  %12787 = vmatprep.subr.mxu0 %v14029_v19  ;;  %v14066_v32 = vld [vmem:[%s14969_s6 + $0xf30] sm:$0xff]  ;;  %v14085_v63 = vld [vmem:[%s14969_s6 + $0x1088] sm:$0xff] }
 0x9ef   : > { %12788 = vmatpush3.msra.mxu0 %v14030_v17  ;;  %12823 = vmatpush3.msra.mxu1 %v14031_v44  ;;  %v14086_v2 = vld [vmem:[%s14969_s6 + $0xf08] sm:$0xff]  ;;  %v8448_v17 = vcombine.high %v8440_v42, %v8440_v42  ;;  %v14088_v44 = vld [vmem:[%s14969_s6 + $0xf80] sm:$0xff] }
 0x9f0   : > { %12789 = vmatprep.subr.mxu0 %v14032_v51  ;;  %12824 = vmatprep.subr.mxu1 %v14033_v20  ;;  %v14087_v19 = vld [vmem:[%s14969_s6 + $0x1008] sm:$0xff]  ;;  %v14089_v51 = vld [vmem:[%s14969_s6 + $0x1080] sm:$0xff] }
 0x9f1   : > { %12790 = vmatpush3.msra.mxu0 %v14034_v60  ;;  %12825 = vmatpush3.msra.mxu1 %v14035_v33  ;;  %v14090_v20 = vld [vmem:[%s14969_s6 + $0xf00] sm:$0xff]  ;;  %v14092_v33 = vld [vmem:[%s14969_s6 + $0x11f8] sm:$0xff] }
 0x9f2   : > { %12791 = vmatprep.subr.mxu0 %v14036_v11  ;;  %12826 = vmatprep.subr.mxu1 %v14037_v23  ;;  %v14091_v60 = vld [vmem:[%s14969_s6 + $0x1000] sm:$0xff]  ;;  %v14093_v11 = vld [vmem:[%s14969_s6 + $0x12f8] sm:$0xff] }
 0x9f3   : > { %12792 = vmatpush3.msra.mxu0 %v14038_v14  ;;  %12827 = vmatpush3.msra.mxu1 %v14039_v55  ;;  %v14094_v23 = vld [vmem:[%s14969_s6 + $0x1178] sm:$0xff]  ;;  %v14096_v55 = vld [vmem:[%s14969_s6 + $0x11f0] sm:$0xff] }
 0x9f4   : > { %12793 = vmatprep.subr.mxu0 %v14040_v35  ;;  %12828 = vmatprep.subr.mxu1 %v14041_v21  ;;  %v14095_v14 = vld [vmem:[%s14969_s6 + $0x1278] sm:$0xff]  ;;  %v14097_v35 = vld [vmem:[%s14969_s6 + $0x12f0] sm:$0xff] }
 0x9f5   : > { %12794 = vmatpush3.msra.mxu0 %v14042_v52  ;;  %12829 = vmatpush3.msra.mxu1 %v14043_v62  ;;  %v14098_v21 = vld [vmem:[%s14969_s6 + $0x1170] sm:$0xff]  ;;  %v14100_v62 = vld [vmem:[%s14969_s6 + $0x11e8] sm:$0xff] }
 0x9f6   : > { %12795 = vmatprep.subr.mxu0 %v14044_v24  ;;  %12830 = vmatprep.subr.mxu1 %v14045_v3  ;;  %v14099_v52 = vld [vmem:[%s14969_s6 + $0x1270] sm:$0xff]  ;;  %v14101_v24 = vld [vmem:[%s14969_s6 + $0x12e8] sm:$0xff] }
 0x9f7   : > { %12796 = vmatpush3.msra.mxu0 %v14046_v31  ;;  %12831 = vmatpush3.msra.mxu1 %v14047_v12  ;;  %v14102_v3 = vld [vmem:[%s14969_s6 + $0x1168] sm:$0xff]  ;;  %v14104_v12 = vld [vmem:[%s14969_s6 + $0x11e0] sm:$0xff] }
 0x9f8   : > { %12797 = vmatprep.subr.mxu0 %v14048_v1  ;;  %12832 = vmatprep.subr.mxu1 %v14049_v10  ;;  %v14103_v31 = vld [vmem:[%s14969_s6 + $0x1268] sm:$0xff]  ;;  %v14105_v1 = vld [vmem:[%s14969_s6 + $0x12e0] sm:$0xff] }
 0x9f9   : > { %12798 = vmatpush3.msra.mxu0 %v14050_v27  ;;  %12833 = vmatpush3.msra.mxu1 %v14051_v41  ;;  %v14106_v10 = vld [vmem:[%s14969_s6 + $0x1160] sm:$0xff]  ;;  %v14108_v41 = vld [vmem:[%s14969_s6 + $0x11d8] sm:$0xff] }
 0x9fa   : > { %12799 = vmatprep.subr.mxu0 %v14052_v34  ;;  %12834 = vmatprep.subr.mxu1 %v14053_v22  ;;  %v14107_v27 = vld [vmem:[%s14969_s6 + $0x1260] sm:$0xff]  ;;  %v14109_v34 = vld [vmem:[%s14969_s6 + $0x12d8] sm:$0xff] }
 0x9fb   : > { %12800 = vmatpush3.msra.mxu0 %v14054_v4  ;;  %12835 = vmatpush3.msra.mxu1 %v14055_v16  ;;  %v14110_v22 = vld [vmem:[%s14969_s6 + $0x1158] sm:$0xff]  ;;  %v14112_v16 = vld [vmem:[%s14969_s6 + $0x11d0] sm:$0xff] }
 0x9fc   : > { %12801 = vmatprep.subr.mxu0 %v14056_v40  ;;  %12836 = vmatprep.subr.mxu1 %v14057_v8  ;;  %v14111_v4 = vld [vmem:[%s14969_s6 + $0x1258] sm:$0xff]  ;;  %v14113_v40 = vld [vmem:[%s14969_s6 + $0x12d0] sm:$0xff] }
 0x9fd   : > { %12802 = vmatpush3.msra.mxu0 %v14058_v37  ;;  %12837 = vmatpush3.msra.mxu1 %v14059_v36  ;;  %v14114_v8 = vld [vmem:[%s14969_s6 + $0x1150] sm:$0xff]  ;;  %v14116_v36 = vld [vmem:[%s14969_s6 + $0x11c8] sm:$0xff] }
 0x9fe   : > { %12803 = vmatprep.subr.mxu0 %v14060_v29  ;;  %12838 = vmatprep.subr.mxu1 %v14061_v38  ;;  %v14115_v37 = vld [vmem:[%s14969_s6 + $0x1250] sm:$0xff]  ;;  %v14117_v29 = vld [vmem:[%s14969_s6 + $0x12c8] sm:$0xff] }
 0x9ff   : > { %12804 = vmatpush3.msra.mxu0 %v14062_v26  ;;  %12839 = vmatpush3.msra.mxu1 %v14063_v5  ;;  %v14118_v38 = vld [vmem:[%s14969_s6 + $0x1148] sm:$0xff]  ;;  %v14120_v5 = vld [vmem:[%s14969_s6 + $0x11c0] sm:$0xff] }
 0xa00   : > { %12805 = vmatprep.subr.mxu0 %v14064_v0  ;;  %12840 = vmatprep.subr.mxu1 %v14065_v7  ;;  %v14119_v26 = vld [vmem:[%s14969_s6 + $0x1248] sm:$0xff]  ;;  %v14121_v0 = vld [vmem:[%s14969_s6 + $0x12c0] sm:$0xff] }
 0xa01   : > { %12806 = vmatpush3.msra.mxu0 %v14066_v32  ;;  %12841 = vmatpush3.msra.mxu1 %v14067_v61  ;;  %v14122_v7 = vld [vmem:[%s14969_s6 + $0x1140] sm:$0xff]  ;;  %v14124_v61 = vld [vmem:[%s14969_s6 + $0x11b8] sm:$0xff] }
 0xa02   : > { %12807 = vmatprep.subr.mxu0 %v14068_v18  ;;  %12842 = vmatprep.subr.mxu1 %v14069_v45  ;;  %v14123_v32 = vld [vmem:[%s14969_s6 + $0x1240] sm:$0xff]  ;;  %v14126_v18 = vld [vmem:[%s14969_s6 + $0x1138] sm:$0xff] }
 0xa03   : > { %12808 = vmatpush3.msra.mxu0 %v14070_v9  ;;  %12843 = vmatpush3.msra.mxu1 %v14071_v28  ;;  %v14127_v45 = vld [vmem:[%s14969_s6 + $0x1238] sm:$0xff]  ;;  %v14128_v9 = vld [vmem:[%s14969_s6 + $0x11b0] sm:$0xff] }
 0xa04   : > { %12809 = vmatprep.subr.mxu0 %v14072_v15  ;;  %12844 = vmatprep.subr.mxu1 %v14073_v48  ;;  %v14129_v28 = vld [vmem:[%s14969_s6 + $0x12b0] sm:$0xff] }
 0xa05   : > { %12810 = vmatpush3.msra.mxu0 %v14074_v53  ;;  %12845 = vmatpush3.msra.mxu1 %v14075_v49  ;;  %v14130_v15 = vld [vmem:[%s14969_s6 + $0x1130] sm:$0xff]  ;;  %v8433_v53 = vcombine.high %v19065_v30, %v19065_v30  ;;  %v14132_v49 = vld [vmem:[%s14969_s6 + $0x11a8] sm:$0xff]  ;;  %v14138_v30 = vld [vmem:[%s14969_s6 + $0x1120] sm:$0xff] }
 0xa06   : > { %12811 = vmatprep.subr.mxu0 %v14076_v54  ;;  %12846 = vmatprep.subr.mxu1 %v14077_v25  ;;  %v14131_v48 = vld [vmem:[%s14969_s6 + $0x1230] sm:$0xff]  ;;  %v14134_v54 = vld [vmem:[%s14969_s6 + $0x1128] sm:$0xff] }
 0xa07   : > { %12812 = vmatpush3.msra.mxu0 %v14078_v47  ;;  %12847 = vmatpush3.msra.mxu1 %v14079_v39  ;;  %v14135_v25 = vld [vmem:[%s14969_s6 + $0x1228] sm:$0xff]  ;;  %v14136_v47 = vld [vmem:[%s14969_s6 + $0x11a0] sm:$0xff] }
 0xa08   : > { %12813 = vmatprep.subr.mxu0 %v14080_v50  ;;  %12848 = vmatprep.subr.mxu1 %v14081_v58  ;;  %v14137_v39 = vld [vmem:[%s14969_s6 + $0x12a0] sm:$0xff]  ;;  %v8447_v58 = vrot.slane %v8433_v53, %v15195_v59  ;;  %v14189_v53 = vld [vmem:[%s14969_s6 + $0x14b8] sm:$0xff] }
 0xa09   : > { %12814 = vmatpush3.msra.mxu0 %v14082_v43  ;;  %12849 = vmatpush3.msra.mxu1 %v14083_v46  ;;  %v14139_v50 = vld [vmem:[%s14969_s6 + $0x1220] sm:$0xff]  ;;  %v14140_v43 = vld [vmem:[%s14969_s6 + $0x1198] sm:$0xff] }
 0xa0a   : > { %12815 = vmatprep.subr.mxu0 %v14084_v57  ;;  %12850 = vmatprep.subr.mxu1 %v14085_v63  ;;  %v14141_v46 = vld [vmem:[%s14969_s6 + $0x1298] sm:$0xff] }
 0xa0b   : > { %12816 = vmatpush3.msra.mxu0 %v14086_v2  ;;  %12851 = vmatpush3.msra.mxu1 %v14087_v19  ;;  %v14143_v57 = vld [vmem:[%s14969_s6 + $0x1218] sm:$0xff]  ;;  %v14144_v2 = vld [vmem:[%s14969_s6 + $0x1190] sm:$0xff] }
 0xa0c   : > { %12817 = vmatprep.subr.mxu0 %v14088_v44  ;;  %12852 = vmatprep.subr.mxu1 %v14089_v51  ;;  %v14145_v19 = vld [vmem:[%s14969_s6 + $0x1290] sm:$0xff]  ;;  %v8449_v51 = vcombine.high %v8447_v58, %v8447_v58 }
 0xa0d   : > { %12818 = vmatpush3.msra.mxu0 %v14090_v20  ;;  %9757 = vmatprep.mubr.f32.mxu0 %v8432_v56  ;;  %v14142_v56 = vld [vmem:[%s14969_s6 + $0x1118] sm:$0xff]  ;;  %v14147_v44 = vld [vmem:[%s14969_s6 + $0x1210] sm:$0xff]  ;;  %v14148_v20 = vld [vmem:[%s14969_s6 + $0x1188] sm:$0xff] }
 0xa0e   : > { %12853 = vmatpush3.msra.mxu1 %v14091_v60  ;;  %9758 = vmatmul.mubr.f32.vlgmr.msra.gmra.mxu0 %v8430_v6  ;;  %v14133_v6 = vld [vmem:[%s14969_s6 + $0x12a8] sm:$0xff] }
 0xa0f   : > { %9827 = vmatprep.mubr.f32.mxu1 %v8448_v17  ;;  %12857 = vmatprep.subr.mxu0 %v14092_v33  ;;  %v14146_v17 = vld [vmem:[%s14969_s6 + $0x1110] sm:$0xff]  ;;  %v14149_v60 = vld [vmem:[%s14969_s6 + $0x1288] sm:$0xff] }
 0xa10   : > { %12892 = vmatprep.subr.mxu1 %v14093_v11  ;;  %9828 = vmatmul.mubr.f32.vlgmr.msra.gmra.mxu1 %v8440_v42  ;;  %v19137_v42 = vld [vmem:[%s14954_s7 + $0x48] sm:$0xff]  ;;  %v14150_v33 = vld [vmem:[%s14969_s6 + $0x1108] sm:$0xff] }
 0xa11   : > { %12858 = vmatpush3.msra.mxu0 %v14094_v23  ;;  %12893 = vmatpush3.msra.mxu1 %v14095_v14  ;;  %v8457_v63 = vrot.slane %v19137_v42, %v15195_v59  ;;  %v14151_v11 = vld [vmem:[%s14969_s6 + $0x1208] sm:$0xff]  ;;  %v14152_v14 = vld [vmem:[%s14969_s6 + $0x1180] sm:$0xff] }
 0xa12   : > { %12859 = vmatprep.subr.mxu0 %v14096_v55  ;;  %12894 = vmatprep.subr.mxu1 %v14097_v35  ;;  %v14153_v55 = vld [vmem:[%s14969_s6 + $0x1280] sm:$0xff] }
 0xa13   : > { %12860 = vmatpush3.msra.mxu0 %v14098_v21  ;;  %12895 = vmatpush3.msra.mxu1 %v14099_v52  ;;  %v8465_v23 = vcombine.high %v8457_v63, %v8457_v63  ;;  %v14154_v35 = vld [vmem:[%s14969_s6 + $0x1100] sm:$0xff]  ;;  %v14156_v52 = vld [vmem:[%s14969_s6 + $0x13f8] sm:$0xff] }
 0xa14   : > { %12861 = vmatprep.subr.mxu0 %v14100_v62  ;;  %12896 = vmatprep.subr.mxu1 %v14101_v24  ;;  %v14155_v21 = vld [vmem:[%s14969_s6 + $0x1200] sm:$0xff]  ;;  %v14157_v62 = vld [vmem:[%s14969_s6 + $0x14f8] sm:$0xff] }
 0xa15   : > { %12862 = vmatpush3.msra.mxu0 %v14102_v3  ;;  %12897 = vmatpush3.msra.mxu1 %v14103_v31  ;;  %v14158_v24 = vld [vmem:[%s14969_s6 + $0x1378] sm:$0xff]  ;;  %v14160_v31 = vld [vmem:[%s14969_s6 + $0x13f0] sm:$0xff] }
 0xa16   : > { %12863 = vmatprep.subr.mxu0 %v14104_v12  ;;  %12898 = vmatprep.subr.mxu1 %v14105_v1  ;;  %v14159_v3 = vld [vmem:[%s14969_s6 + $0x1478] sm:$0xff]  ;;  %v14161_v12 = vld [vmem:[%s14969_s6 + $0x14f0] sm:$0xff] }
 0xa17   : > { %12864 = vmatpush3.msra.mxu0 %v14106_v10  ;;  %12899 = vmatpush3.msra.mxu1 %v14107_v27  ;;  %v14162_v1 = vld [vmem:[%s14969_s6 + $0x1370] sm:$0xff]  ;;  %v14164_v27 = vld [vmem:[%s14969_s6 + $0x13e8] sm:$0xff] }
 0xa18   : > { %12865 = vmatprep.subr.mxu0 %v14108_v41  ;;  %12900 = vmatprep.subr.mxu1 %v14109_v34  ;;  %v14163_v10 = vld [vmem:[%s14969_s6 + $0x1470] sm:$0xff]  ;;  %v14165_v41 = vld [vmem:[%s14969_s6 + $0x14e8] sm:$0xff] }
 0xa19   : > { %12866 = vmatpush3.msra.mxu0 %v14110_v22  ;;  %12901 = vmatpush3.msra.mxu1 %v14111_v4  ;;  %v14166_v34 = vld [vmem:[%s14969_s6 + $0x1368] sm:$0xff]  ;;  %v14168_v4 = vld [vmem:[%s14969_s6 + $0x13e0] sm:$0xff] }
 0xa1a   : > { %12867 = vmatprep.subr.mxu0 %v14112_v16  ;;  %12902 = vmatprep.subr.mxu1 %v14113_v40  ;;  %v14167_v22 = vld [vmem:[%s14969_s6 + $0x1468] sm:$0xff]  ;;  %v14169_v16 = vld [vmem:[%s14969_s6 + $0x14e0] sm:$0xff] }
 0xa1b   : > { %12868 = vmatpush3.msra.mxu0 %v14114_v8  ;;  %12903 = vmatpush3.msra.mxu1 %v14115_v37  ;;  %v14170_v40 = vld [vmem:[%s14969_s6 + $0x1360] sm:$0xff]  ;;  %v14172_v37 = vld [vmem:[%s14969_s6 + $0x13d8] sm:$0xff] }
 0xa1c   : > { %12869 = vmatprep.subr.mxu0 %v14116_v36  ;;  %12904 = vmatprep.subr.mxu1 %v14117_v29  ;;  %v14171_v8 = vld [vmem:[%s14969_s6 + $0x1460] sm:$0xff]  ;;  %v14173_v36 = vld [vmem:[%s14969_s6 + $0x14d8] sm:$0xff] }
 0xa1d   : > { %12870 = vmatpush3.msra.mxu0 %v14118_v38  ;;  %12905 = vmatpush3.msra.mxu1 %v14119_v26  ;;  %v14174_v29 = vld [vmem:[%s14969_s6 + $0x1358] sm:$0xff]  ;;  %v14176_v26 = vld [vmem:[%s14969_s6 + $0x13d0] sm:$0xff] }
 0xa1e   : > { %12871 = vmatprep.subr.mxu0 %v14120_v5  ;;  %12906 = vmatprep.subr.mxu1 %v14121_v0  ;;  %v14175_v38 = vld [vmem:[%s14969_s6 + $0x1458] sm:$0xff]  ;;  %v14177_v5 = vld [vmem:[%s14969_s6 + $0x14d0] sm:$0xff] }
 0xa1f   : > { %12872 = vmatpush3.msra.mxu0 %v14122_v7  ;;  %12907 = vmatpush3.msra.mxu1 %v14123_v32  ;;  %v14178_v0 = vld [vmem:[%s14969_s6 + $0x1350] sm:$0xff]  ;;  %v14180_v32 = vld [vmem:[%s14969_s6 + $0x13c8] sm:$0xff] }
 0xa20   : > { %12873 = vmatprep.subr.mxu0 %v14124_v61  ;;  %12908 = vmatprep.subr.mxu1 %v14125_v13  ;;  %v14179_v7 = vld [vmem:[%s14969_s6 + $0x1450] sm:$0xff]  ;;  %v14181_v61 = vld [vmem:[%s14969_s6 + $0x14c8] sm:$0xff] }
 0xa21   : > { %12874 = vmatpush3.msra.mxu0 %v14126_v18  ;;  %12909 = vmatpush3.msra.mxu1 %v14127_v45  ;;  %v14182_v13 = vld [vmem:[%s14969_s6 + $0x1348] sm:$0xff]  ;;  %v14184_v45 = vld [vmem:[%s14969_s6 + $0x13c0] sm:$0xff] }
 0xa22   : > { %12875 = vmatprep.subr.mxu0 %v14128_v9  ;;  %12910 = vmatprep.subr.mxu1 %v14129_v28  ;;  %v14183_v18 = vld [vmem:[%s14969_s6 + $0x1448] sm:$0xff]  ;;  %v14185_v9 = vld [vmem:[%s14969_s6 + $0x14c0] sm:$0xff] }
 0xa23   : > { %12876 = vmatpush3.msra.mxu0 %v14130_v15  ;;  %12911 = vmatpush3.msra.mxu1 %v14131_v48  ;;  %v14186_v28 = vld [vmem:[%s14969_s6 + $0x1340] sm:$0xff]  ;;  %v14188_v48 = vld [vmem:[%s14969_s6 + $0x13b8] sm:$0xff] }
 0xa24   : > { %12877 = vmatprep.subr.mxu0 %v14132_v49  ;;  %12912 = vmatprep.subr.mxu1 %v14133_v6  ;;  %v14187_v15 = vld [vmem:[%s14969_s6 + $0x1440] sm:$0xff]  ;;  %v14190_v49 = vld [vmem:[%s14969_s6 + $0x1338] sm:$0xff] }
 0xa25   : > { %12878 = vmatpush3.msra.mxu0 %v14134_v54  ;;  %12913 = vmatpush3.msra.mxu1 %v14135_v25  ;;  %v14191_v6 = vld [vmem:[%s14969_s6 + $0x1438] sm:$0xff]  ;;  %v14192_v54 = vld [vmem:[%s14969_s6 + $0x13b0] sm:$0xff] }
 0xa26   : > { %12879 = vmatprep.subr.mxu0 %v14136_v47  ;;  %12914 = vmatprep.subr.mxu1 %v14137_v39  ;;  %v14193_v25 = vld [vmem:[%s14969_s6 + $0x14b0] sm:$0xff] }
 0xa27   : > { %12880 = vmatpush3.msra.mxu0 %v14138_v30  ;;  %12915 = vmatpush3.msra.mxu1 %v14139_v50  ;;  %v14194_v47 = vld [vmem:[%s14969_s6 + $0x1330] sm:$0xff]  ;;  %v8450_v30 = vcombine.high %v19137_v42, %v19137_v42  ;;  %v14196_v50 = vld [vmem:[%s14969_s6 + $0x13a8] sm:$0xff]  ;;  %v14202_v42 = vld [vmem:[%s14969_s6 + $0x1320] sm:$0xff] }
 0xa28   : > { %12881 = vmatprep.subr.mxu0 %v14140_v43  ;;  %12916 = vmatprep.subr.mxu1 %v14141_v46  ;;  %v14195_v39 = vld [vmem:[%s14969_s6 + $0x1430] sm:$0xff]  ;;  %v14198_v43 = vld [vmem:[%s14969_s6 + $0x1328] sm:$0xff] }
 0xa29   : > { %12882 = vmatpush3.msra.mxu0 %v14142_v56  ;;  %12917 = vmatpush3.msra.mxu1 %v14143_v57  ;;  %v14199_v46 = vld [vmem:[%s14969_s6 + $0x1428] sm:$0xff]  ;;  %v14200_v56 = vld [vmem:[%s14969_s6 + $0x13a0] sm:$0xff] }
 0xa2a   : > { %12883 = vmatprep.subr.mxu0 %v14144_v2  ;;  %12918 = vmatprep.subr.mxu1 %v14145_v19  ;;  %v14201_v57 = vld [vmem:[%s14969_s6 + $0x14a0] sm:$0xff]  ;;  %v8464_v19 = vrot.slane %v8450_v30, %v15195_v59  ;;  %v14253_v30 = vld [vmem:[%s14969_s6 + $0x16b8] sm:$0xff] }
 0xa2b   : > { %12884 = vmatpush3.msra.mxu0 %v14146_v17  ;;  %12919 = vmatpush3.msra.mxu1 %v14147_v44  ;;  %v14203_v2 = vld [vmem:[%s14969_s6 + $0x1420] sm:$0xff]  ;;  %v14204_v17 = vld [vmem:[%s14969_s6 + $0x1398] sm:$0xff] }
 0xa2c   : > { %12885 = vmatprep.subr.mxu0 %v14148_v20  ;;  %12920 = vmatprep.subr.mxu1 %v14149_v60  ;;  %v14205_v44 = vld [vmem:[%s14969_s6 + $0x1498] sm:$0xff] }
 0xa2d   : > { %12886 = vmatpush3.msra.mxu0 %v14150_v33  ;;  %12921 = vmatpush3.msra.mxu1 %v14151_v11  ;;  %v14207_v20 = vld [vmem:[%s14969_s6 + $0x1418] sm:$0xff]  ;;  %v14208_v33 = vld [vmem:[%s14969_s6 + $0x1390] sm:$0xff] }
 0xa2e   : > { %12887 = vmatprep.subr.mxu0 %v14152_v14  ;;  %12922 = vmatprep.subr.mxu1 %v14153_v55  ;;  %v14209_v11 = vld [vmem:[%s14969_s6 + $0x1490] sm:$0xff]  ;;  %v8466_v55 = vcombine.high %v8464_v19, %v8464_v19 }
 0xa2f   : > { %12888 = vmatpush3.msra.mxu0 %v14154_v35  ;;  %9897 = vmatprep.mubr.f32.mxu0 %v8449_v51  ;;  %v14206_v51 = vld [vmem:[%s14969_s6 + $0x1318] sm:$0xff]  ;;  %v14211_v14 = vld [vmem:[%s14969_s6 + $0x1410] sm:$0xff]  ;;  %v14212_v35 = vld [vmem:[%s14969_s6 + $0x1388] sm:$0xff] }
 0xa30   : > { %12923 = vmatpush3.msra.mxu1 %v14155_v21  ;;  %9898 = vmatmul.mubr.f32.vlgmr.msra.gmra.mxu0 %v8447_v58  ;;  %v14197_v58 = vld [vmem:[%s14969_s6 + $0x14a8] sm:$0xff] }
 0xa31   : > { %9967 = vmatprep.mubr.f32.mxu1 %v8465_v23  ;;  %12927 = vmatprep.subr.mxu0 %v14156_v52  ;;  %v14210_v23 = vld [vmem:[%s14969_s6 + $0x1310] sm:$0xff]  ;;  %v14213_v21 = vld [vmem:[%s14969_s6 + $0x1488] sm:$0xff] }
 0xa32   : > { %12962 = vmatprep.subr.mxu1 %v14157_v62  ;;  %9968 = vmatmul.mubr.f32.vlgmr.msra.gmra.mxu1 %v8457_v63  ;;  %v19209_v63 = vld [vmem:[%s14954_s7 + $0x50] sm:$0xff] }
 0xa33   : > { %12928 = vmatpush3.msra.mxu0 %v14158_v24  ;;  %12963 = vmatpush3.msra.mxu1 %v14159_v3  ;;  %v8474_v60 = vrot.slane %v19209_v63, %v15195_v59  ;;  %v14214_v52 = vld [vmem:[%s14969_s6 + $0x1308] sm:$0xff]  ;;  %v14216_v3 = vld [vmem:[%s14969_s6 + $0x1380] sm:$0xff] }
 0xa34   : > { %12929 = vmatprep.subr.mxu0 %v14160_v31  ;;  %12964 = vmatprep.subr.mxu1 %v14161_v12  ;;  %v14215_v62 = vld [vmem:[%s14969_s6 + $0x1408] sm:$0xff]  ;;  %v14217_v31 = vld [vmem:[%s14969_s6 + $0x1480] sm:$0xff] }
 0xa35   : > { %12930 = vmatpush3.msra.mxu0 %v14162_v1  ;;  %12965 = vmatpush3.msra.mxu1 %v14163_v10  ;;  %v8482_v24 = vcombine.high %v8474_v60, %v8474_v60  ;;  %v14218_v12 = vld [vmem:[%s14969_s6 + $0x1300] sm:$0xff]  ;;  %v14220_v10 = vld [vmem:[%s14969_s6 + $0x15f8] sm:$0xff] }
 0xa36   : > { %12931 = vmatprep.subr.mxu0 %v14164_v27  ;;  %12966 = vmatprep.subr.mxu1 %v14165_v41  ;;  %v14219_v1 = vld [vmem:[%s14969_s6 + $0x1400] sm:$0xff]  ;;  %v14221_v27 = vld [vmem:[%s14969_s6 + $0x16f8] sm:$0xff] }
 0xa37   : > { %12932 = vmatpush3.msra.mxu0 %v14166_v34  ;;  %12967 = vmatpush3.msra.mxu1 %v14167_v22  ;;  %v14222_v41 = vld [vmem:[%s14969_s6 + $0x1578] sm:$0xff]  ;;  %v14224_v22 = vld [vmem:[%s14969_s6 + $0x15f0] sm:$0xff] }
 0xa38   : > { %12933 = vmatprep.subr.mxu0 %v14168_v4  ;;  %12968 = vmatprep.subr.mxu1 %v14169_v16  ;;  %v14223_v34 = vld [vmem:[%s14969_s6 + $0x1678] sm:$0xff]  ;;  %v14225_v4 = vld [vmem:[%s14969_s6 + $0x16f0] sm:$0xff] }
 0xa39   : > { %12934 = vmatpush3.msra.mxu0 %v14170_v40  ;;  %12969 = vmatpush3.msra.mxu1 %v14171_v8  ;;  %v14226_v16 = vld [vmem:[%s14969_s6 + $0x1570] sm:$0xff]  ;;  %v14228_v8 = vld [vmem:[%s14969_s6 + $0x15e8] sm:$0xff] }
 0xa3a   : > { %12935 = vmatprep.subr.mxu0 %v14172_v37  ;;  %12970 = vmatprep.subr.mxu1 %v14173_v36  ;;  %v14227_v40 = vld [vmem:[%s14969_s6 + $0x1670] sm:$0xff]  ;;  %v14229_v37 = vld [vmem:[%s14969_s6 + $0x16e8] sm:$0xff] }
 0xa3b   : > { %12936 = vmatpush3.msra.mxu0 %v14174_v29  ;;  %12971 = vmatpush3.msra.mxu1 %v14175_v38  ;;  %v14230_v36 = vld [vmem:[%s14969_s6 + $0x1568] sm:$0xff]  ;;  %v14232_v38 = vld [vmem:[%s14969_s6 + $0x15e0] sm:$0xff] }
 0xa3c   : > { %12937 = vmatprep.subr.mxu0 %v14176_v26  ;;  %12972 = vmatprep.subr.mxu1 %v14177_v5  ;;  %v14231_v29 = vld [vmem:[%s14969_s6 + $0x1668] sm:$0xff]  ;;  %v14233_v26 = vld [vmem:[%s14969_s6 + $0x16e0] sm:$0xff] }
 0xa3d   : > { %12938 = vmatpush3.msra.mxu0 %v14178_v0  ;;  %12973 = vmatpush3.msra.mxu1 %v14179_v7  ;;  %v14234_v5 = vld [vmem:[%s14969_s6 + $0x1560] sm:$0xff]  ;;  %v14236_v7 = vld [vmem:[%s14969_s6 + $0x15d8] sm:$0xff] }
 0xa3e   : > { %12939 = vmatprep.subr.mxu0 %v14180_v32  ;;  %12974 = vmatprep.subr.mxu1 %v14181_v61  ;;  %v14235_v0 = vld [vmem:[%s14969_s6 + $0x1660] sm:$0xff]  ;;  %v14237_v32 = vld [vmem:[%s14969_s6 + $0x16d8] sm:$0xff] }
 0xa3f   : > { %12940 = vmatpush3.msra.mxu0 %v14182_v13  ;;  %12975 = vmatpush3.msra.mxu1 %v14183_v18  ;;  %v14238_v61 = vld [vmem:[%s14969_s6 + $0x1558] sm:$0xff]  ;;  %v14240_v18 = vld [vmem:[%s14969_s6 + $0x15d0] sm:$0xff] }
 0xa40   : > { %12941 = vmatprep.subr.mxu0 %v14184_v45  ;;  %12976 = vmatprep.subr.mxu1 %v14185_v9  ;;  %v14239_v13 = vld [vmem:[%s14969_s6 + $0x1658] sm:$0xff]  ;;  %v14241_v45 = vld [vmem:[%s14969_s6 + $0x16d0] sm:$0xff] }
 0xa41   : > { %12942 = vmatpush3.msra.mxu0 %v14186_v28  ;;  %12977 = vmatpush3.msra.mxu1 %v14187_v15  ;;  %v14242_v9 = vld [vmem:[%s14969_s6 + $0x1550] sm:$0xff]  ;;  %v14244_v15 = vld [vmem:[%s14969_s6 + $0x15c8] sm:$0xff] }
 0xa42   : > { %12943 = vmatprep.subr.mxu0 %v14188_v48  ;;  %12978 = vmatprep.subr.mxu1 %v14189_v53  ;;  %v14243_v28 = vld [vmem:[%s14969_s6 + $0x1650] sm:$0xff]  ;;  %v14245_v48 = vld [vmem:[%s14969_s6 + $0x16c8] sm:$0xff] }
 0xa43   : > { %12944 = vmatpush3.msra.mxu0 %v14190_v49  ;;  %12979 = vmatpush3.msra.mxu1 %v14191_v6  ;;  %v14246_v53 = vld [vmem:[%s14969_s6 + $0x1548] sm:$0xff]  ;;  %v14248_v6 = vld [vmem:[%s14969_s6 + $0x15c0] sm:$0xff] }
 0xa44   : > { %12945 = vmatprep.subr.mxu0 %v14192_v54  ;;  %12980 = vmatprep.subr.mxu1 %v14193_v25  ;;  %v14247_v49 = vld [vmem:[%s14969_s6 + $0x1648] sm:$0xff]  ;;  %v14249_v54 = vld [vmem:[%s14969_s6 + $0x16c0] sm:$0xff] }
 0xa45   : > { %12946 = vmatpush3.msra.mxu0 %v14194_v47  ;;  %12981 = vmatpush3.msra.mxu1 %v14195_v39  ;;  %v14250_v25 = vld [vmem:[%s14969_s6 + $0x1540] sm:$0xff]  ;;  %v14252_v39 = vld [vmem:[%s14969_s6 + $0x15b8] sm:$0xff] }
 0xa46   : > { %12947 = vmatprep.subr.mxu0 %v14196_v50  ;;  %12982 = vmatprep.subr.mxu1 %v14197_v58  ;;  %v14251_v47 = vld [vmem:[%s14969_s6 + $0x1640] sm:$0xff]  ;;  %v14254_v50 = vld [vmem:[%s14969_s6 + $0x1538] sm:$0xff] }
 0xa47   : > { %12948 = vmatpush3.msra.mxu0 %v14198_v43  ;;  %12983 = vmatpush3.msra.mxu1 %v14199_v46  ;;  %v14255_v58 = vld [vmem:[%s14969_s6 + $0x1638] sm:$0xff]  ;;  %v14256_v43 = vld [vmem:[%s14969_s6 + $0x15b0] sm:$0xff] }
 0xa48   : > { %12949 = vmatprep.subr.mxu0 %v14200_v56  ;;  %12984 = vmatprep.subr.mxu1 %v14201_v57  ;;  %v14257_v46 = vld [vmem:[%s14969_s6 + $0x16b0] sm:$0xff] }
 0xa49   : > { %12950 = vmatpush3.msra.mxu0 %v14202_v42  ;;  %12985 = vmatpush3.msra.mxu1 %v14203_v2  ;;  %v14258_v56 = vld [vmem:[%s14969_s6 + $0x1530] sm:$0xff]  ;;  %v8467_v42 = vcombine.high %v19209_v63, %v19209_v63  ;;  %v14260_v2 = vld [vmem:[%s14969_s6 + $0x15a8] sm:$0xff]  ;;  %v14266_v63 = vld [vmem:[%s14969_s6 + $0x1520] sm:$0xff] }
 0xa4a   : > { %12951 = vmatprep.subr.mxu0 %v14204_v17  ;;  %12986 = vmatprep.subr.mxu1 %v14205_v44  ;;  %v14259_v57 = vld [vmem:[%s14969_s6 + $0x1630] sm:$0xff]  ;;  %v14262_v17 = vld [vmem:[%s14969_s6 + $0x1528] sm:$0xff] }
 0xa4b   : > { %12952 = vmatpush3.msra.mxu0 %v14206_v51  ;;  %12987 = vmatpush3.msra.mxu1 %v14207_v20  ;;  %v14263_v44 = vld [vmem:[%s14969_s6 + $0x1628] sm:$0xff]  ;;  %v14264_v51 = vld [vmem:[%s14969_s6 + $0x15a0] sm:$0xff] }
 0xa4c   : > { %12953 = vmatprep.subr.mxu0 %v14208_v33  ;;  %12988 = vmatprep.subr.mxu1 %v14209_v11  ;;  %v14265_v20 = vld [vmem:[%s14969_s6 + $0x16a0] sm:$0xff]  ;;  %v8481_v11 = vrot.slane %v8467_v42, %v15195_v59  ;;  %v14317_v42 = vld [vmem:[%s14969_s6 + $0x18b8] sm:$0xff] }
 0xa4d   : > { %12954 = vmatpush3.msra.mxu0 %v14210_v23  ;;  %12989 = vmatpush3.msra.mxu1 %v14211_v14  ;;  %v14267_v33 = vld [vmem:[%s14969_s6 + $0x1620] sm:$0xff]  ;;  %v14268_v23 = vld [vmem:[%s14969_s6 + $0x1598] sm:$0xff] }
 0xa4e   : > { %12955 = vmatprep.subr.mxu0 %v14212_v35  ;;  %12990 = vmatprep.subr.mxu1 %v14213_v21  ;;  %v14269_v14 = vld [vmem:[%s14969_s6 + $0x1698] sm:$0xff] }
 0xa4f   : > { %12956 = vmatpush3.msra.mxu0 %v14214_v52  ;;  %12991 = vmatpush3.msra.mxu1 %v14215_v62  ;;  %v14271_v35 = vld [vmem:[%s14969_s6 + $0x1618] sm:$0xff]  ;;  %v14272_v52 = vld [vmem:[%s14969_s6 + $0x1590] sm:$0xff] }
 0xa50   : > { %12957 = vmatprep.subr.mxu0 %v14216_v3  ;;  %12992 = vmatprep.subr.mxu1 %v14217_v31  ;;  %v14273_v62 = vld [vmem:[%s14969_s6 + $0x1690] sm:$0xff]  ;;  %v8483_v31 = vcombine.high %v8481_v11, %v8481_v11 }
 0xa51   : > { %12958 = vmatpush3.msra.mxu0 %v14218_v12  ;;  %10037 = vmatprep.mubr.f32.mxu0 %v8466_v55  ;;  %v14270_v55 = vld [vmem:[%s14969_s6 + $0x1518] sm:$0xff]  ;;  %v14275_v3 = vld [vmem:[%s14969_s6 + $0x1610] sm:$0xff]  ;;  %v14276_v12 = vld [vmem:[%s14969_s6 + $0x1588] sm:$0xff] }
 0xa52   : > { %12993 = vmatpush3.msra.mxu1 %v14219_v1  ;;  %10038 = vmatmul.mubr.f32.vlgmr.msra.gmra.mxu0 %v8464_v19  ;;  %v14261_v19 = vld [vmem:[%s14969_s6 + $0x16a8] sm:$0xff] }
 0xa53   : > { %10107 = vmatprep.mubr.f32.mxu1 %v8482_v24  ;;  %12997 = vmatprep.subr.mxu0 %v14220_v10  ;;  %v14274_v24 = vld [vmem:[%s14969_s6 + $0x1510] sm:$0xff]  ;;  %v14277_v1 = vld [vmem:[%s14969_s6 + $0x1688] sm:$0xff] }
 0xa54   : > { %13032 = vmatprep.subr.mxu1 %v14221_v27  ;;  %10108 = vmatmul.mubr.f32.vlgmr.msra.gmra.mxu1 %v8474_v60  ;;  %v19281_v60 = vld [vmem:[%s14954_s7 + $0x58] sm:$0xff] }
 0xa55   : > { %12998 = vmatpush3.msra.mxu0 %v14222_v41  ;;  %13033 = vmatpush3.msra.mxu1 %v14223_v34  ;;  %v8491_v21 = vrot.slane %v19281_v60, %v15195_v59  ;;  %v14278_v10 = vld [vmem:[%s14969_s6 + $0x1508] sm:$0xff]  ;;  %v14280_v34 = vld [vmem:[%s14969_s6 + $0x1580] sm:$0xff] }
 0xa56   : > { %12999 = vmatprep.subr.mxu0 %v14224_v22  ;;  %13034 = vmatprep.subr.mxu1 %v14225_v4  ;;  %v14279_v27 = vld [vmem:[%s14969_s6 + $0x1608] sm:$0xff]  ;;  %v14281_v22 = vld [vmem:[%s14969_s6 + $0x1680] sm:$0xff] }
 0xa57   : > { %13000 = vmatpush3.msra.mxu0 %v14226_v16  ;;  %13035 = vmatpush3.msra.mxu1 %v14227_v40  ;;  %v8499_v41 = vcombine.high %v8491_v21, %v8491_v21  ;;  %v14282_v4 = vld [vmem:[%s14969_s6 + $0x1500] sm:$0xff]  ;;  %v14284_v40 = vld [vmem:[%s14969_s6 + $0x17f8] sm:$0xff] }
 0xa58   : > { %13001 = vmatprep.subr.mxu0 %v14228_v8  ;;  %13036 = vmatprep.subr.mxu1 %v14229_v37  ;;  %v14283_v16 = vld [vmem:[%s14969_s6 + $0x1600] sm:$0xff]  ;;  %v14285_v8 = vld [vmem:[%s14969_s6 + $0x18f8] sm:$0xff] }
 0xa59   : > { %13002 = vmatpush3.msra.mxu0 %v14230_v36  ;;  %13037 = vmatpush3.msra.mxu1 %v14231_v29  ;;  %v14286_v37 = vld [vmem:[%s14969_s6 + $0x1778] sm:$0xff]  ;;  %v14288_v29 = vld [vmem:[%s14969_s6 + $0x17f0] sm:$0xff] }
 0xa5a   : > { %13003 = vmatprep.subr.mxu0 %v14232_v38  ;;  %13038 = vmatprep.subr.mxu1 %v14233_v26  ;;  %v14287_v36 = vld [vmem:[%s14969_s6 + $0x1878] sm:$0xff]  ;;  %v14289_v38 = vld [vmem:[%s14969_s6 + $0x18f0] sm:$0xff] }
 0xa5b   : > { %13004 = vmatpush3.msra.mxu0 %v14234_v5  ;;  %13039 = vmatpush3.msra.mxu1 %v14235_v0  ;;  %v14290_v26 = vld [vmem:[%s14969_s6 + $0x1770] sm:$0xff]  ;;  %v14292_v0 = vld [vmem:[%s14969_s6 + $0x17e8] sm:$0xff] }
 0xa5c   : > { %13005 = vmatprep.subr.mxu0 %v14236_v7  ;;  %13040 = vmatprep.subr.mxu1 %v14237_v32  ;;  %v14291_v5 = vld [vmem:[%s14969_s6 + $0x1870] sm:$0xff]  ;;  %v14293_v7 = vld [vmem:[%s14969_s6 + $0x18e8] sm:$0xff] }
 0xa5d   : > { %13006 = vmatpush3.msra.mxu0 %v14238_v61  ;;  %13041 = vmatpush3.msra.mxu1 %v14239_v13  ;;  %v14294_v32 = vld [vmem:[%s14969_s6 + $0x1768] sm:$0xff]  ;;  %v14296_v13 = vld [vmem:[%s14969_s6 + $0x17e0] sm:$0xff] }
 0xa5e   : > { %13007 = vmatprep.subr.mxu0 %v14240_v18  ;;  %13042 = vmatprep.subr.mxu1 %v14241_v45  ;;  %v14295_v61 = vld [vmem:[%s14969_s6 + $0x1868] sm:$0xff]  ;;  %v14297_v18 = vld [vmem:[%s14969_s6 + $0x18e0] sm:$0xff] }
 0xa5f   : > { %13008 = vmatpush3.msra.mxu0 %v14242_v9  ;;  %13043 = vmatpush3.msra.mxu1 %v14243_v28  ;;  %v14298_v45 = vld [vmem:[%s14969_s6 + $0x1760] sm:$0xff]  ;;  %v14300_v28 = vld [vmem:[%s14969_s6 + $0x17d8] sm:$0xff] }
 0xa60   : > { %13009 = vmatprep.subr.mxu0 %v14244_v15  ;;  %13044 = vmatprep.subr.mxu1 %v14245_v48  ;;  %v14299_v9 = vld [vmem:[%s14969_s6 + $0x1860] sm:$0xff]  ;;  %v14301_v15 = vld [vmem:[%s14969_s6 + $0x18d8] sm:$0xff] }
 0xa61   : > { %13010 = vmatpush3.msra.mxu0 %v14246_v53  ;;  %13045 = vmatpush3.msra.mxu1 %v14247_v49  ;;  %v14302_v48 = vld [vmem:[%s14969_s6 + $0x1758] sm:$0xff]  ;;  %v14304_v49 = vld [vmem:[%s14969_s6 + $0x17d0] sm:$0xff] }
 0xa62   : > { %13011 = vmatprep.subr.mxu0 %v14248_v6  ;;  %13046 = vmatprep.subr.mxu1 %v14249_v54  ;;  %v14303_v53 = vld [vmem:[%s14969_s6 + $0x1858] sm:$0xff]  ;;  %v14305_v6 = vld [vmem:[%s14969_s6 + $0x18d0] sm:$0xff] }
 0xa63   : > { %13012 = vmatpush3.msra.mxu0 %v14250_v25  ;;  %13047 = vmatpush3.msra.mxu1 %v14251_v47  ;;  %v14306_v54 = vld [vmem:[%s14969_s6 + $0x1750] sm:$0xff]  ;;  %v14308_v47 = vld [vmem:[%s14969_s6 + $0x17c8] sm:$0xff] }
 0xa64   : > { %13013 = vmatprep.subr.mxu0 %v14252_v39  ;;  %13048 = vmatprep.subr.mxu1 %v14253_v30  ;;  %v14307_v25 = vld [vmem:[%s14969_s6 + $0x1850] sm:$0xff]  ;;  %v14309_v39 = vld [vmem:[%s14969_s6 + $0x18c8] sm:$0xff] }
 0xa65   : > { %13014 = vmatpush3.msra.mxu0 %v14254_v50  ;;  %13049 = vmatpush3.msra.mxu1 %v14255_v58  ;;  %v14310_v30 = vld [vmem:[%s14969_s6 + $0x1748] sm:$0xff]  ;;  %v14312_v58 = vld [vmem:[%s14969_s6 + $0x17c0] sm:$0xff] }
 0xa66   : > { %13015 = vmatprep.subr.mxu0 %v14256_v43  ;;  %13050 = vmatprep.subr.mxu1 %v14257_v46  ;;  %v14311_v50 = vld [vmem:[%s14969_s6 + $0x1848] sm:$0xff]  ;;  %v14313_v43 = vld [vmem:[%s14969_s6 + $0x18c0] sm:$0xff] }
 0xa67   : > { %13016 = vmatpush3.msra.mxu0 %v14258_v56  ;;  %13051 = vmatpush3.msra.mxu1 %v14259_v57  ;;  %v14314_v46 = vld [vmem:[%s14969_s6 + $0x1740] sm:$0xff]  ;;  %v14316_v57 = vld [vmem:[%s14969_s6 + $0x17b8] sm:$0xff] }
 0xa68   : > { %13017 = vmatprep.subr.mxu0 %v14260_v2  ;;  %13052 = vmatprep.subr.mxu1 %v14261_v19  ;;  %v14315_v56 = vld [vmem:[%s14969_s6 + $0x1840] sm:$0xff]  ;;  %v14318_v2 = vld [vmem:[%s14969_s6 + $0x1738] sm:$0xff] }
 0xa69   : > { %13018 = vmatpush3.msra.mxu0 %v14262_v17  ;;  %13053 = vmatpush3.msra.mxu1 %v14263_v44  ;;  %v14319_v19 = vld [vmem:[%s14969_s6 + $0x1838] sm:$0xff]  ;;  %v14320_v17 = vld [vmem:[%s14969_s6 + $0x17b0] sm:$0xff] }
 0xa6a   : > { %13019 = vmatprep.subr.mxu0 %v14264_v51  ;;  %13054 = vmatprep.subr.mxu1 %v14265_v20  ;;  %v14321_v44 = vld [vmem:[%s14969_s6 + $0x18b0] sm:$0xff] }
 0xa6b   : > { %13020 = vmatpush3.msra.mxu0 %v14266_v63  ;;  %13055 = vmatpush3.msra.mxu1 %v14267_v33  ;;  %v14322_v51 = vld [vmem:[%s14969_s6 + $0x1730] sm:$0xff]  ;;  %v8484_v63 = vcombine.high %v19281_v60, %v19281_v60  ;;  %v14324_v33 = vld [vmem:[%s14969_s6 + $0x17a8] sm:$0xff]  ;;  %v14330_v60 = vld [vmem:[%s14969_s6 + $0x1720] sm:$0xff] }
 0xa6c   : > { %13021 = vmatprep.subr.mxu0 %v14268_v23  ;;  %13056 = vmatprep.subr.mxu1 %v14269_v14  ;;  %v14323_v20 = vld [vmem:[%s14969_s6 + $0x1830] sm:$0xff]  ;;  %v14326_v23 = vld [vmem:[%s14969_s6 + $0x1728] sm:$0xff] }
 0xa6d   : > { %13022 = vmatpush3.msra.mxu0 %v14270_v55  ;;  %13057 = vmatpush3.msra.mxu1 %v14271_v35  ;;  %v14327_v14 = vld [vmem:[%s14969_s6 + $0x1828] sm:$0xff]  ;;  %v14328_v55 = vld [vmem:[%s14969_s6 + $0x17a0] sm:$0xff] }
 0xa6e   : > { %13023 = vmatprep.subr.mxu0 %v14272_v52  ;;  %13058 = vmatprep.subr.mxu1 %v14273_v62  ;;  %v14329_v35 = vld [vmem:[%s14969_s6 + $0x18a0] sm:$0xff]  ;;  %v8498_v62 = vrot.slane %v8484_v63, %v15195_v59  ;;  %v14381_v63 = vld [vmem:[%s14969_s6 + $0x1ab8] sm:$0xff] }
 0xa6f   : > { %13024 = vmatpush3.msra.mxu0 %v14274_v24  ;;  %13059 = vmatpush3.msra.mxu1 %v14275_v3  ;;  %v14331_v52 = vld [vmem:[%s14969_s6 + $0x1820] sm:$0xff]  ;;  %v14332_v24 = vld [vmem:[%s14969_s6 + $0x1798] sm:$0xff] }
 0xa70   : > { %13025 = vmatprep.subr.mxu0 %v14276_v12  ;;  %13060 = vmatprep.subr.mxu1 %v14277_v1  ;;  %v14333_v3 = vld [vmem:[%s14969_s6 + $0x1898] sm:$0xff] }
 0xa71   : > { %13026 = vmatpush3.msra.mxu0 %v14278_v10  ;;  %13061 = vmatpush3.msra.mxu1 %v14279_v27  ;;  %v14335_v12 = vld [vmem:[%s14969_s6 + $0x1818] sm:$0xff]  ;;  %v14336_v10 = vld [vmem:[%s14969_s6 + $0x1790] sm:$0xff] }
 0xa72   : > { %13027 = vmatprep.subr.mxu0 %v14280_v34  ;;  %13062 = vmatprep.subr.mxu1 %v14281_v22  ;;  %v14337_v27 = vld [vmem:[%s14969_s6 + $0x1890] sm:$0xff]  ;;  %v8500_v22 = vcombine.high %v8498_v62, %v8498_v62 }
 0xa73   : > { %13028 = vmatpush3.msra.mxu0 %v14282_v4  ;;  %10177 = vmatprep.mubr.f32.mxu0 %v8483_v31  ;;  %v14334_v31 = vld [vmem:[%s14969_s6 + $0x1718] sm:$0xff]  ;;  %v14339_v34 = vld [vmem:[%s14969_s6 + $0x1810] sm:$0xff]  ;;  %v14340_v4 = vld [vmem:[%s14969_s6 + $0x1788] sm:$0xff] }
 0xa74   : > { %13063 = vmatpush3.msra.mxu1 %v14283_v16  ;;  %10178 = vmatmul.mubr.f32.vlgmr.msra.gmra.mxu0 %v8481_v11  ;;  %v14325_v11 = vld [vmem:[%s14969_s6 + $0x18a8] sm:$0xff] }
 0xa75   : > { %10247 = vmatprep.mubr.f32.mxu1 %v8499_v41  ;;  %13067 = vmatprep.subr.mxu0 %v14284_v40  ;;  %v14338_v41 = vld [vmem:[%s14969_s6 + $0x1710] sm:$0xff]  ;;  %v14341_v16 = vld [vmem:[%s14969_s6 + $0x1888] sm:$0xff] }
 0xa76   : > { %13102 = vmatprep.subr.mxu1 %v14285_v8  ;;  %10248 = vmatmul.mubr.f32.vlgmr.msra.gmra.mxu1 %v8491_v21  ;;  %v19353_v21 = vld [vmem:[%s14954_s7 + $0x60] sm:$0xff]  ;;  %v14342_v40 = vld [vmem:[%s14969_s6 + $0x1708] sm:$0xff] }
 0xa77   : > { %13068 = vmatpush3.msra.mxu0 %v14286_v37  ;;  %13103 = vmatpush3.msra.mxu1 %v14287_v36  ;;  %v8508_v1 = vrot.slane %v19353_v21, %v15195_v59  ;;  %v14343_v8 = vld [vmem:[%s14969_s6 + $0x1808] sm:$0xff]  ;;  %v14344_v36 = vld [vmem:[%s14969_s6 + $0x1780] sm:$0xff] }
 0xa78   : > { %13069 = vmatprep.subr.mxu0 %v14288_v29  ;;  %13104 = vmatprep.subr.mxu1 %v14289_v38  ;;  %v14345_v29 = vld [vmem:[%s14969_s6 + $0x1880] sm:$0xff] }
 0xa79   : > { %13070 = vmatpush3.msra.mxu0 %v14290_v26  ;;  %13105 = vmatpush3.msra.mxu1 %v14291_v5  ;;  %v8516_v37 = vcombine.high %v8508_v1, %v8508_v1  ;;  %v14346_v38 = vld [vmem:[%s14969_s6 + $0x1700] sm:$0xff]  ;;  %v14348_v5 = vld [vmem:[%s14969_s6 + $0x19f8] sm:$0xff] }
 0xa7a   : > { %13071 = vmatprep.subr.mxu0 %v14292_v0  ;;  %13106 = vmatprep.subr.mxu1 %v14293_v7  ;;  %v14347_v26 = vld [vmem:[%s14969_s6 + $0x1800] sm:$0xff]  ;;  %v14349_v0 = vld [vmem:[%s14969_s6 + $0x1af8] sm:$0xff] }
 0xa7b   : > { %13072 = vmatpush3.msra.mxu0 %v14294_v32  ;;  %13107 = vmatpush3.msra.mxu1 %v14295_v61  ;;  %v14350_v7 = vld [vmem:[%s14969_s6 + $0x1978] sm:$0xff]  ;;  %v14352_v61 = vld [vmem:[%s14969_s6 + $0x19f0] sm:$0xff] }
 0xa7c   : > { %13073 = vmatprep.subr.mxu0 %v14296_v13  ;;  %13108 = vmatprep.subr.mxu1 %v14297_v18  ;;  %v14351_v32 = vld [vmem:[%s14969_s6 + $0x1a78] sm:$0xff]  ;;  %v14353_v13 = vld [vmem:[%s14969_s6 + $0x1af0] sm:$0xff] }
 0xa7d   : > { %13074 = vmatpush3.msra.mxu0 %v14298_v45  ;;  %13109 = vmatpush3.msra.mxu1 %v14299_v9  ;;  %v14354_v18 = vld [vmem:[%s14969_s6 + $0x1970] sm:$0xff]  ;;  %v14356_v9 = vld [vmem:[%s14969_s6 + $0x19e8] sm:$0xff] }
 0xa7e   : > { %13075 = vmatprep.subr.mxu0 %v14300_v28  ;;  %13110 = vmatprep.subr.mxu1 %v14301_v15  ;;  %v14355_v45 = vld [vmem:[%s14969_s6 + $0x1a70] sm:$0xff]  ;;  %v14357_v28 = vld [vmem:[%s14969_s6 + $0x1ae8] sm:$0xff] }
 0xa7f   : > { %13076 = vmatpush3.msra.mxu0 %v14302_v48  ;;  %13111 = vmatpush3.msra.mxu1 %v14303_v53  ;;  %v14358_v15 = vld [vmem:[%s14969_s6 + $0x1968] sm:$0xff]  ;;  %v14360_v53 = vld [vmem:[%s14969_s6 + $0x19e0] sm:$0xff] }
 0xa80   : > { %13077 = vmatprep.subr.mxu0 %v14304_v49  ;;  %13112 = vmatprep.subr.mxu1 %v14305_v6  ;;  %v14359_v48 = vld [vmem:[%s14969_s6 + $0x1a68] sm:$0xff]  ;;  %v14361_v49 = vld [vmem:[%s14969_s6 + $0x1ae0] sm:$0xff] }
 0xa81   : > { %13078 = vmatpush3.msra.mxu0 %v14306_v54  ;;  %13113 = vmatpush3.msra.mxu1 %v14307_v25  ;;  %v14362_v6 = vld [vmem:[%s14969_s6 + $0x1960] sm:$0xff]  ;;  %v14364_v25 = vld [vmem:[%s14969_s6 + $0x19d8] sm:$0xff] }
 0xa82   : > { %13079 = vmatprep.subr.mxu0 %v14308_v47  ;;  %13114 = vmatprep.subr.mxu1 %v14309_v39  ;;  %v14363_v54 = vld [vmem:[%s14969_s6 + $0x1a60] sm:$0xff]  ;;  %v14365_v47 = vld [vmem:[%s14969_s6 + $0x1ad8] sm:$0xff] }
 0xa83   : > { %13080 = vmatpush3.msra.mxu0 %v14310_v30  ;;  %13115 = vmatpush3.msra.mxu1 %v14311_v50  ;;  %v14366_v39 = vld [vmem:[%s14969_s6 + $0x1958] sm:$0xff]  ;;  %v14368_v50 = vld [vmem:[%s14969_s6 + $0x19d0] sm:$0xff] }
 0xa84   : > { %13081 = vmatprep.subr.mxu0 %v14312_v58  ;;  %13116 = vmatprep.subr.mxu1 %v14313_v43  ;;  %v14367_v30 = vld [vmem:[%s14969_s6 + $0x1a58] sm:$0xff]  ;;  %v14369_v58 = vld [vmem:[%s14969_s6 + $0x1ad0] sm:$0xff] }
 0xa85   : > { %13082 = vmatpush3.msra.mxu0 %v14314_v46  ;;  %13117 = vmatpush3.msra.mxu1 %v14315_v56  ;;  %v14370_v43 = vld [vmem:[%s14969_s6 + $0x1950] sm:$0xff]  ;;  %v14372_v56 = vld [vmem:[%s14969_s6 + $0x19c8] sm:$0xff] }
 0xa86   : > { %13083 = vmatprep.subr.mxu0 %v14316_v57  ;;  %13118 = vmatprep.subr.mxu1 %v14317_v42  ;;  %v14371_v46 = vld [vmem:[%s14969_s6 + $0x1a50] sm:$0xff]  ;;  %v14373_v57 = vld [vmem:[%s14969_s6 + $0x1ac8] sm:$0xff] }
 0xa87   : > { %13084 = vmatpush3.msra.mxu0 %v14318_v2  ;;  %13119 = vmatpush3.msra.mxu1 %v14319_v19  ;;  %v14374_v42 = vld [vmem:[%s14969_s6 + $0x1948] sm:$0xff]  ;;  %v14376_v19 = vld [vmem:[%s14969_s6 + $0x19c0] sm:$0xff] }
 0xa88   : > { %13085 = vmatprep.subr.mxu0 %v14320_v17  ;;  %13120 = vmatprep.subr.mxu1 %v14321_v44  ;;  %v14375_v2 = vld [vmem:[%s14969_s6 + $0x1a48] sm:$0xff]  ;;  %v14377_v17 = vld [vmem:[%s14969_s6 + $0x1ac0] sm:$0xff] }
 0xa89   : > { %13086 = vmatpush3.msra.mxu0 %v14322_v51  ;;  %13121 = vmatpush3.msra.mxu1 %v14323_v20  ;;  %v14378_v44 = vld [vmem:[%s14969_s6 + $0x1940] sm:$0xff]  ;;  %v14380_v20 = vld [vmem:[%s14969_s6 + $0x19b8] sm:$0xff] }
 0xa8a   : > { %13087 = vmatprep.subr.mxu0 %v14324_v33  ;;  %13122 = vmatprep.subr.mxu1 %v14325_v11  ;;  %v14379_v51 = vld [vmem:[%s14969_s6 + $0x1a40] sm:$0xff]  ;;  %v14382_v33 = vld [vmem:[%s14969_s6 + $0x1938] sm:$0xff] }
 0xa8b   : > { %13088 = vmatpush3.msra.mxu0 %v14326_v23  ;;  %13123 = vmatpush3.msra.mxu1 %v14327_v14  ;;  %v14383_v11 = vld [vmem:[%s14969_s6 + $0x1a38] sm:$0xff]  ;;  %v14384_v23 = vld [vmem:[%s14969_s6 + $0x19b0] sm:$0xff] }
 0xa8c   : > { %13089 = vmatprep.subr.mxu0 %v14328_v55  ;;  %13124 = vmatprep.subr.mxu1 %v14329_v35  ;;  %v14385_v14 = vld [vmem:[%s14969_s6 + $0x1ab0] sm:$0xff] }
 0xa8d   : > { %13090 = vmatpush3.msra.mxu0 %v14330_v60  ;;  %13125 = vmatpush3.msra.mxu1 %v14331_v52  ;;  %v14386_v55 = vld [vmem:[%s14969_s6 + $0x1930] sm:$0xff]  ;;  %v8501_v60 = vcombine.high %v19353_v21, %v19353_v21  ;;  %v14388_v52 = vld [vmem:[%s14969_s6 + $0x19a8] sm:$0xff]  ;;  %v14394_v21 = vld [vmem:[%s14969_s6 + $0x1920] sm:$0xff] }
 0xa8e   : > { %13091 = vmatprep.subr.mxu0 %v14332_v24  ;;  %13126 = vmatprep.subr.mxu1 %v14333_v3  ;;  %v14387_v35 = vld [vmem:[%s14969_s6 + $0x1a30] sm:$0xff]  ;;  %v14390_v24 = vld [vmem:[%s14969_s6 + $0x1928] sm:$0xff] }
 0xa8f   : > { %13092 = vmatpush3.msra.mxu0 %v14334_v31  ;;  %13127 = vmatpush3.msra.mxu1 %v14335_v12  ;;  %v14391_v3 = vld [vmem:[%s14969_s6 + $0x1a28] sm:$0xff]  ;;  %v14392_v31 = vld [vmem:[%s14969_s6 + $0x19a0] sm:$0xff] }
 0xa90   : > { %13093 = vmatprep.subr.mxu0 %v14336_v10  ;;  %13128 = vmatprep.subr.mxu1 %v14337_v27  ;;  %v14393_v12 = vld [vmem:[%s14969_s6 + $0x1aa0] sm:$0xff]  ;;  %v8515_v27 = vrot.slane %v8501_v60, %v15195_v59  ;;  %v14445_v60 = vld [vmem:[%s14969_s6 + $0x1cb8] sm:$0xff] }
 0xa91   : > { %13094 = vmatpush3.msra.mxu0 %v14338_v41  ;;  %13129 = vmatpush3.msra.mxu1 %v14339_v34  ;;  %v14395_v10 = vld [vmem:[%s14969_s6 + $0x1a20] sm:$0xff]  ;;  %v14396_v41 = vld [vmem:[%s14969_s6 + $0x1998] sm:$0xff] }
 0xa92   : > { %13095 = vmatprep.subr.mxu0 %v14340_v4  ;;  %13130 = vmatprep.subr.mxu1 %v14341_v16  ;;  %v14397_v34 = vld [vmem:[%s14969_s6 + $0x1a98] sm:$0xff] }
 0xa93   : > { %13096 = vmatpush3.msra.mxu0 %v14342_v40  ;;  %13131 = vmatpush3.msra.mxu1 %v14343_v8  ;;  %v14399_v4 = vld [vmem:[%s14969_s6 + $0x1a18] sm:$0xff]  ;;  %v14400_v40 = vld [vmem:[%s14969_s6 + $0x1990] sm:$0xff] }
 0xa94   : > { %13097 = vmatprep.subr.mxu0 %v14344_v36  ;;  %13132 = vmatprep.subr.mxu1 %v14345_v29  ;;  %v14401_v8 = vld [vmem:[%s14969_s6 + $0x1a90] sm:$0xff]  ;;  %v8517_v29 = vcombine.high %v8515_v27, %v8515_v27 }
 0xa95   : > { %13098 = vmatpush3.msra.mxu0 %v14346_v38  ;;  %10317 = vmatprep.mubr.f32.mxu0 %v8500_v22  ;;  %v14398_v22 = vld [vmem:[%s14969_s6 + $0x1918] sm:$0xff]  ;;  %v14403_v36 = vld [vmem:[%s14969_s6 + $0x1a10] sm:$0xff]  ;;  %v14404_v38 = vld [vmem:[%s14969_s6 + $0x1988] sm:$0xff] }
 0xa96   : > { %13133 = vmatpush3.msra.mxu1 %v14347_v26  ;;  %10318 = vmatmul.mubr.f32.vlgmr.msra.gmra.mxu0 %v8498_v62  ;;  %v14389_v62 = vld [vmem:[%s14969_s6 + $0x1aa8] sm:$0xff] }
 0xa97   : > { %10387 = vmatprep.mubr.f32.mxu1 %v8516_v37  ;;  %13137 = vmatprep.subr.mxu0 %v14348_v5  ;;  %v14402_v37 = vld [vmem:[%s14969_s6 + $0x1910] sm:$0xff]  ;;  %v14405_v26 = vld [vmem:[%s14969_s6 + $0x1a88] sm:$0xff] }
 0xa98   : > { %13172 = vmatprep.subr.mxu1 %v14349_v0  ;;  %10388 = vmatmul.mubr.f32.vlgmr.msra.gmra.mxu1 %v8508_v1  ;;  %v19425_v1 = vld [vmem:[%s14954_s7 + $0x68] sm:$0xff]  ;;  %v14406_v5 = vld [vmem:[%s14969_s6 + $0x1908] sm:$0xff] }
 0xa99   : > { %13138 = vmatpush3.msra.mxu0 %v14350_v7  ;;  %13173 = vmatpush3.msra.mxu1 %v14351_v32  ;;  %v8525_v16 = vrot.slane %v19425_v1, %v15195_v59  ;;  %v14407_v0 = vld [vmem:[%s14969_s6 + $0x1a08] sm:$0xff]  ;;  %v14408_v32 = vld [vmem:[%s14969_s6 + $0x1980] sm:$0xff] }
 0xa9a   : > { %13139 = vmatprep.subr.mxu0 %v14352_v61  ;;  %13174 = vmatprep.subr.mxu1 %v14353_v13  ;;  %v14409_v61 = vld [vmem:[%s14969_s6 + $0x1a80] sm:$0xff] }
 0xa9b   : > { %13140 = vmatpush3.msra.mxu0 %v14354_v18  ;;  %13175 = vmatpush3.msra.mxu1 %v14355_v45  ;;  %v8533_v7 = vcombine.high %v8525_v16, %v8525_v16  ;;  %v14410_v13 = vld [vmem:[%s14969_s6 + $0x1900] sm:$0xff]  ;;  %v14412_v45 = vld [vmem:[%s14969_s6 + $0x1bf8] sm:$0xff] }
 0xa9c   : > { %13141 = vmatprep.subr.mxu0 %v14356_v9  ;;  %13176 = vmatprep.subr.mxu1 %v14357_v28  ;;  %v14411_v18 = vld [vmem:[%s14969_s6 + $0x1a00] sm:$0xff]  ;;  %v14413_v9 = vld [vmem:[%s14969_s6 + $0x1cf8] sm:$0xff] }
 0xa9d   : > { %13142 = vmatpush3.msra.mxu0 %v14358_v15  ;;  %13177 = vmatpush3.msra.mxu1 %v14359_v48  ;;  %v14414_v28 = vld [vmem:[%s14969_s6 + $0x1b78] sm:$0xff]  ;;  %v14416_v48 = vld [vmem:[%s14969_s6 + $0x1bf0] sm:$0xff] }
 0xa9e   : > { %13143 = vmatprep.subr.mxu0 %v14360_v53  ;;  %13178 = vmatprep.subr.mxu1 %v14361_v49  ;;  %v14415_v15 = vld [vmem:[%s14969_s6 + $0x1c78] sm:$0xff]  ;;  %v14417_v53 = vld [vmem:[%s14969_s6 + $0x1cf0] sm:$0xff] }
 0xa9f   : > { %13144 = vmatpush3.msra.mxu0 %v14362_v6  ;;  %13179 = vmatpush3.msra.mxu1 %v14363_v54  ;;  %v14418_v49 = vld [vmem:[%s14969_s6 + $0x1b70] sm:$0xff]  ;;  %v14420_v54 = vld [vmem:[%s14969_s6 + $0x1be8] sm:$0xff] }
 0xaa0   : > { %13145 = vmatprep.subr.mxu0 %v14364_v25  ;;  %13180 = vmatprep.subr.mxu1 %v14365_v47  ;;  %v14419_v6 = vld [vmem:[%s14969_s6 + $0x1c70] sm:$0xff]  ;;  %v14421_v25 = vld [vmem:[%s14969_s6 + $0x1ce8] sm:$0xff] }
 0xaa1   : > { %13146 = vmatpush3.msra.mxu0 %v14366_v39  ;;  %13181 = vmatpush3.msra.mxu1 %v14367_v30  ;;  %v14422_v47 = vld [vmem:[%s14969_s6 + $0x1b68] sm:$0xff]  ;;  %v14424_v30 = vld [vmem:[%s14969_s6 + $0x1be0] sm:$0xff] }
 0xaa2   : > { %13147 = vmatprep.subr.mxu0 %v14368_v50  ;;  %13182 = vmatprep.subr.mxu1 %v14369_v58  ;;  %v14423_v39 = vld [vmem:[%s14969_s6 + $0x1c68] sm:$0xff]  ;;  %v14425_v50 = vld [vmem:[%s14969_s6 + $0x1ce0] sm:$0xff] }
 0xaa3   : > { %13148 = vmatpush3.msra.mxu0 %v14370_v43  ;;  %13183 = vmatpush3.msra.mxu1 %v14371_v46  ;;  %v14426_v58 = vld [vmem:[%s14969_s6 + $0x1b60] sm:$0xff]  ;;  %v14428_v46 = vld [vmem:[%s14969_s6 + $0x1bd8] sm:$0xff] }
 0xaa4   : > { %13149 = vmatprep.subr.mxu0 %v14372_v56  ;;  %13184 = vmatprep.subr.mxu1 %v14373_v57  ;;  %v14427_v43 = vld [vmem:[%s14969_s6 + $0x1c60] sm:$0xff]  ;;  %v14429_v56 = vld [vmem:[%s14969_s6 + $0x1cd8] sm:$0xff] }
 0xaa5   : > { %13150 = vmatpush3.msra.mxu0 %v14374_v42  ;;  %13185 = vmatpush3.msra.mxu1 %v14375_v2  ;;  %v14430_v57 = vld [vmem:[%s14969_s6 + $0x1b58] sm:$0xff]  ;;  %v14432_v2 = vld [vmem:[%s14969_s6 + $0x1bd0] sm:$0xff] }
 0xaa6   : > { %13151 = vmatprep.subr.mxu0 %v14376_v19  ;;  %13186 = vmatprep.subr.mxu1 %v14377_v17  ;;  %v14431_v42 = vld [vmem:[%s14969_s6 + $0x1c58] sm:$0xff]  ;;  %v14433_v19 = vld [vmem:[%s14969_s6 + $0x1cd0] sm:$0xff] }
 0xaa7   : > { %13152 = vmatpush3.msra.mxu0 %v14378_v44  ;;  %13187 = vmatpush3.msra.mxu1 %v14379_v51  ;;  %v14434_v17 = vld [vmem:[%s14969_s6 + $0x1b50] sm:$0xff]  ;;  %v14436_v51 = vld [vmem:[%s14969_s6 + $0x1bc8] sm:$0xff] }
 0xaa8   : > { %13153 = vmatprep.subr.mxu0 %v14380_v20  ;;  %13188 = vmatprep.subr.mxu1 %v14381_v63  ;;  %v14435_v44 = vld [vmem:[%s14969_s6 + $0x1c50] sm:$0xff]  ;;  %v14437_v20 = vld [vmem:[%s14969_s6 + $0x1cc8] sm:$0xff] }
 0xaa9   : > { %13154 = vmatpush3.msra.mxu0 %v14382_v33  ;;  %13189 = vmatpush3.msra.mxu1 %v14383_v11  ;;  %v14438_v63 = vld [vmem:[%s14969_s6 + $0x1b48] sm:$0xff]  ;;  %v14440_v11 = vld [vmem:[%s14969_s6 + $0x1bc0] sm:$0xff] }
 0xaaa   : > { %13155 = vmatprep.subr.mxu0 %v14384_v23  ;;  %13190 = vmatprep.subr.mxu1 %v14385_v14  ;;  %v14439_v33 = vld [vmem:[%s14969_s6 + $0x1c48] sm:$0xff]  ;;  %v14441_v23 = vld [vmem:[%s14969_s6 + $0x1cc0] sm:$0xff] }
 0xaab   : > { %13156 = vmatpush3.msra.mxu0 %v14386_v55  ;;  %13191 = vmatpush3.msra.mxu1 %v14387_v35  ;;  %v14442_v14 = vld [vmem:[%s14969_s6 + $0x1b40] sm:$0xff]  ;;  %v14444_v35 = vld [vmem:[%s14969_s6 + $0x1bb8] sm:$0xff] }
 0xaac   : > { %13157 = vmatprep.subr.mxu0 %v14388_v52  ;;  %13192 = vmatprep.subr.mxu1 %v14389_v62  ;;  %v14443_v55 = vld [vmem:[%s14969_s6 + $0x1c40] sm:$0xff]  ;;  %v14446_v52 = vld [vmem:[%s14969_s6 + $0x1b38] sm:$0xff] }
 0xaad   : > { %13158 = vmatpush3.msra.mxu0 %v14390_v24  ;;  %13193 = vmatpush3.msra.mxu1 %v14391_v3  ;;  %v14447_v62 = vld [vmem:[%s14969_s6 + $0x1c38] sm:$0xff]  ;;  %v14448_v24 = vld [vmem:[%s14969_s6 + $0x1bb0] sm:$0xff] }
 0xaae   : > { %13159 = vmatprep.subr.mxu0 %v14392_v31  ;;  %13194 = vmatprep.subr.mxu1 %v14393_v12  ;;  %v14449_v3 = vld [vmem:[%s14969_s6 + $0x1cb0] sm:$0xff] }
 0xaaf   : > { %13160 = vmatpush3.msra.mxu0 %v14394_v21  ;;  %13195 = vmatpush3.msra.mxu1 %v14395_v10  ;;  %v14450_v31 = vld [vmem:[%s14969_s6 + $0x1b30] sm:$0xff]  ;;  %v8518_v21 = vcombine.high %v19425_v1, %v19425_v1  ;;  %v14452_v10 = vld [vmem:[%s14969_s6 + $0x1ba8] sm:$0xff]  ;;  %v14458_v1 = vld [vmem:[%s14969_s6 + $0x1b20] sm:$0xff] }
 0xab0   : > { %13161 = vmatprep.subr.mxu0 %v14396_v41  ;;  %13196 = vmatprep.subr.mxu1 %v14397_v34  ;;  %v14451_v12 = vld [vmem:[%s14969_s6 + $0x1c30] sm:$0xff]  ;;  %v14454_v41 = vld [vmem:[%s14969_s6 + $0x1b28] sm:$0xff] }
 0xab1   : > { %13162 = vmatpush3.msra.mxu0 %v14398_v22  ;;  %13197 = vmatpush3.msra.mxu1 %v14399_v4  ;;  %v14455_v34 = vld [vmem:[%s14969_s6 + $0x1c28] sm:$0xff]  ;;  %v14456_v22 = vld [vmem:[%s14969_s6 + $0x1ba0] sm:$0xff] }
 0xab2   : > { %13163 = vmatprep.subr.mxu0 %v14400_v40  ;;  %13198 = vmatprep.subr.mxu1 %v14401_v8  ;;  %v14457_v4 = vld [vmem:[%s14969_s6 + $0x1ca0] sm:$0xff]  ;;  %v8532_v8 = vrot.slane %v8518_v21, %v15195_v59  ;;  %v14509_v21 = vld [vmem:[%s14969_s6 + $0x1eb8] sm:$0xff] }
 0xab3   : > { %13164 = vmatpush3.msra.mxu0 %v14402_v37  ;;  %13199 = vmatpush3.msra.mxu1 %v14403_v36  ;;  %v14459_v40 = vld [vmem:[%s14969_s6 + $0x1c20] sm:$0xff]  ;;  %v14460_v37 = vld [vmem:[%s14969_s6 + $0x1b98] sm:$0xff] }
 0xab4   : > { %13165 = vmatprep.subr.mxu0 %v14404_v38  ;;  %13200 = vmatprep.subr.mxu1 %v14405_v26  ;;  %v14461_v36 = vld [vmem:[%s14969_s6 + $0x1c98] sm:$0xff] }
 0xab5   : > { %13166 = vmatpush3.msra.mxu0 %v14406_v5  ;;  %13201 = vmatpush3.msra.mxu1 %v14407_v0  ;;  %v14463_v38 = vld [vmem:[%s14969_s6 + $0x1c18] sm:$0xff]  ;;  %v14464_v5 = vld [vmem:[%s14969_s6 + $0x1b90] sm:$0xff] }
 0xab6   : > { %13167 = vmatprep.subr.mxu0 %v14408_v32  ;;  %13202 = vmatprep.subr.mxu1 %v14409_v61  ;;  %v14465_v0 = vld [vmem:[%s14969_s6 + $0x1c90] sm:$0xff]  ;;  %v8534_v61 = vcombine.high %v8532_v8, %v8532_v8 }
 0xab7   : > { %13168 = vmatpush3.msra.mxu0 %v14410_v13  ;;  %10457 = vmatprep.mubr.f32.mxu0 %v8517_v29  ;;  %v14462_v29 = vld [vmem:[%s14969_s6 + $0x1b18] sm:$0xff]  ;;  %v14467_v32 = vld [vmem:[%s14969_s6 + $0x1c10] sm:$0xff]  ;;  %v14468_v13 = vld [vmem:[%s14969_s6 + $0x1b88] sm:$0xff] }
 0xab8   : > { %13203 = vmatpush3.msra.mxu1 %v14411_v18  ;;  %10458 = vmatmul.mubr.f32.vlgmr.msra.gmra.mxu0 %v8515_v27  ;;  %v14453_v27 = vld [vmem:[%s14969_s6 + $0x1ca8] sm:$0xff] }
 0xab9   : > { %10527 = vmatprep.mubr.f32.mxu1 %v8533_v7  ;;  %13207 = vmatprep.subr.mxu0 %v14412_v45  ;;  %v14466_v7 = vld [vmem:[%s14969_s6 + $0x1b10] sm:$0xff]  ;;  %v14469_v18 = vld [vmem:[%s14969_s6 + $0x1c88] sm:$0xff] }
 0xaba   : > { %13242 = vmatprep.subr.mxu1 %v14413_v9  ;;  %10528 = vmatmul.mubr.f32.vlgmr.msra.gmra.mxu1 %v8525_v16  ;;  %v19497_v16 = vld [vmem:[%s14954_s7 + $0x70] sm:$0xff] }
 0xabb   : > { %13208 = vmatpush3.msra.mxu0 %v14414_v28  ;;  %13243 = vmatpush3.msra.mxu1 %v14415_v15  ;;  %v8542_v26 = vrot.slane %v19497_v16, %v15195_v59  ;;  %v14470_v45 = vld [vmem:[%s14969_s6 + $0x1b08] sm:$0xff]  ;;  %v14472_v15 = vld [vmem:[%s14969_s6 + $0x1b80] sm:$0xff] }
 0xabc   : > { %13209 = vmatprep.subr.mxu0 %v14416_v48  ;;  %13244 = vmatprep.subr.mxu1 %v14417_v53  ;;  %v14471_v9 = vld [vmem:[%s14969_s6 + $0x1c08] sm:$0xff]  ;;  %v14473_v48 = vld [vmem:[%s14969_s6 + $0x1c80] sm:$0xff] }
 0xabd   : > { %13210 = vmatpush3.msra.mxu0 %v14418_v49  ;;  %13245 = vmatpush3.msra.mxu1 %v14419_v6  ;;  %v8550_v28 = vcombine.high %v8542_v26, %v8542_v26  ;;  %v14474_v53 = vld [vmem:[%s14969_s6 + $0x1b00] sm:$0xff]  ;;  %v14476_v6 = vld [vmem:[%s14969_s6 + $0x1df8] sm:$0xff] }
 0xabe   : > { %13211 = vmatprep.subr.mxu0 %v14420_v54  ;;  %13246 = vmatprep.subr.mxu1 %v14421_v25  ;;  %v14475_v49 = vld [vmem:[%s14969_s6 + $0x1c00] sm:$0xff]  ;;  %v14477_v54 = vld [vmem:[%s14969_s6 + $0x1ef8] sm:$0xff] }
 0xabf   : > { %13212 = vmatpush3.msra.mxu0 %v14422_v47  ;;  %13247 = vmatpush3.msra.mxu1 %v14423_v39  ;;  %v14478_v25 = vld [vmem:[%s14969_s6 + $0x1d78] sm:$0xff]  ;;  %v14480_v39 = vld [vmem:[%s14969_s6 + $0x1df0] sm:$0xff] }
 0xac0   : > { %13213 = vmatprep.subr.mxu0 %v14424_v30  ;;  %13248 = vmatprep.subr.mxu1 %v14425_v50  ;;  %v14479_v47 = vld [vmem:[%s14969_s6 + $0x1e78] sm:$0xff]  ;;  %v14481_v30 = vld [vmem:[%s14969_s6 + $0x1ef0] sm:$0xff] }
 0xac1   : > { %13214 = vmatpush3.msra.mxu0 %v14426_v58  ;;  %13249 = vmatpush3.msra.mxu1 %v14427_v43  ;;  %v14482_v50 = vld [vmem:[%s14969_s6 + $0x1d70] sm:$0xff]  ;;  %v14484_v43 = vld [vmem:[%s14969_s6 + $0x1de8] sm:$0xff] }
 0xac2   : > { %13215 = vmatprep.subr.mxu0 %v14428_v46  ;;  %13250 = vmatprep.subr.mxu1 %v14429_v56  ;;  %v14483_v58 = vld [vmem:[%s14969_s6 + $0x1e70] sm:$0xff]  ;;  %v14485_v46 = vld [vmem:[%s14969_s6 + $0x1ee8] sm:$0xff] }
 0xac3   : > { %13216 = vmatpush3.msra.mxu0 %v14430_v57  ;;  %13251 = vmatpush3.msra.mxu1 %v14431_v42  ;;  %v14486_v56 = vld [vmem:[%s14969_s6 + $0x1d68] sm:$0xff]  ;;  %v14488_v42 = vld [vmem:[%s14969_s6 + $0x1de0] sm:$0xff] }
 0xac4   : > { %13217 = vmatprep.subr.mxu0 %v14432_v2  ;;  %13252 = vmatprep.subr.mxu1 %v14433_v19  ;;  %v14487_v57 = vld [vmem:[%s14969_s6 + $0x1e68] sm:$0xff]  ;;  %v14489_v2 = vld [vmem:[%s14969_s6 + $0x1ee0] sm:$0xff] }
 0xac5   : > { %13218 = vmatpush3.msra.mxu0 %v14434_v17  ;;  %13253 = vmatpush3.msra.mxu1 %v14435_v44  ;;  %v14490_v19 = vld [vmem:[%s14969_s6 + $0x1d60] sm:$0xff]  ;;  %v14492_v44 = vld [vmem:[%s14969_s6 + $0x1dd8] sm:$0xff] }
 0xac6   : > { %13219 = vmatprep.subr.mxu0 %v14436_v51  ;;  %13254 = vmatprep.subr.mxu1 %v14437_v20  ;;  %v14491_v17 = vld [vmem:[%s14969_s6 + $0x1e60] sm:$0xff]  ;;  %v14493_v51 = vld [vmem:[%s14969_s6 + $0x1ed8] sm:$0xff] }
 0xac7   : > { %13220 = vmatpush3.msra.mxu0 %v14438_v63  ;;  %13255 = vmatpush3.msra.mxu1 %v14439_v33  ;;  %v14494_v20 = vld [vmem:[%s14969_s6 + $0x1d58] sm:$0xff]  ;;  %v14496_v33 = vld [vmem:[%s14969_s6 + $0x1dd0] sm:$0xff] }
 0xac8   : > { %13221 = vmatprep.subr.mxu0 %v14440_v11  ;;  %13256 = vmatprep.subr.mxu1 %v14441_v23  ;;  %v14495_v63 = vld [vmem:[%s14969_s6 + $0x1e58] sm:$0xff]  ;;  %v14497_v11 = vld [vmem:[%s14969_s6 + $0x1ed0] sm:$0xff] }
 0xac9   : > { %13222 = vmatpush3.msra.mxu0 %v14442_v14  ;;  %13257 = vmatpush3.msra.mxu1 %v14443_v55  ;;  %v14498_v23 = vld [vmem:[%s14969_s6 + $0x1d50] sm:$0xff]  ;;  %v14500_v55 = vld [vmem:[%s14969_s6 + $0x1dc8] sm:$0xff] }
 0xaca   : > { %13223 = vmatprep.subr.mxu0 %v14444_v35  ;;  %13258 = vmatprep.subr.mxu1 %v14445_v60  ;;  %v14499_v14 = vld [vmem:[%s14969_s6 + $0x1e50] sm:$0xff]  ;;  %v14501_v35 = vld [vmem:[%s14969_s6 + $0x1ec8] sm:$0xff] }
 0xacb   : > { %13224 = vmatpush3.msra.mxu0 %v14446_v52  ;;  %13259 = vmatpush3.msra.mxu1 %v14447_v62  ;;  %v14502_v60 = vld [vmem:[%s14969_s6 + $0x1d48] sm:$0xff]  ;;  %v14504_v62 = vld [vmem:[%s14969_s6 + $0x1dc0] sm:$0xff] }
 0xacc   : > { %13225 = vmatprep.subr.mxu0 %v14448_v24  ;;  %13260 = vmatprep.subr.mxu1 %v14449_v3  ;;  %v14503_v52 = vld [vmem:[%s14969_s6 + $0x1e48] sm:$0xff]  ;;  %v14505_v24 = vld [vmem:[%s14969_s6 + $0x1ec0] sm:$0xff] }
 0xacd   : > { %13226 = vmatpush3.msra.mxu0 %v14450_v31  ;;  %13261 = vmatpush3.msra.mxu1 %v14451_v12  ;;  %v14506_v3 = vld [vmem:[%s14969_s6 + $0x1d40] sm:$0xff]  ;;  %v14508_v12 = vld [vmem:[%s14969_s6 + $0x1db8] sm:$0xff] }
 0xace   : > { %13227 = vmatprep.subr.mxu0 %v14452_v10  ;;  %13262 = vmatprep.subr.mxu1 %v14453_v27  ;;  %v14507_v31 = vld [vmem:[%s14969_s6 + $0x1e40] sm:$0xff]  ;;  %v14510_v10 = vld [vmem:[%s14969_s6 + $0x1d38] sm:$0xff] }
 0xacf   : > { %13228 = vmatpush3.msra.mxu0 %v14454_v41  ;;  %13263 = vmatpush3.msra.mxu1 %v14455_v34  ;;  %v14511_v27 = vld [vmem:[%s14969_s6 + $0x1e38] sm:$0xff]  ;;  %v14512_v41 = vld [vmem:[%s14969_s6 + $0x1db0] sm:$0xff] }
 0xad0   : > { %13229 = vmatprep.subr.mxu0 %v14456_v22  ;;  %13264 = vmatprep.subr.mxu1 %v14457_v4  ;;  %v14513_v34 = vld [vmem:[%s14969_s6 + $0x1eb0] sm:$0xff] }
 0xad1   : > { %13230 = vmatpush3.msra.mxu0 %v14458_v1  ;;  %13265 = vmatpush3.msra.mxu1 %v14459_v40  ;;  %v14514_v22 = vld [vmem:[%s14969_s6 + $0x1d30] sm:$0xff]  ;;  %v8535_v1 = vcombine.high %v19497_v16, %v19497_v16  ;;  %v14516_v40 = vld [vmem:[%s14969_s6 + $0x1da8] sm:$0xff]  ;;  %v14522_v16 = vld [vmem:[%s14969_s6 + $0x1d20] sm:$0xff] }
 0xad2   : > { %13231 = vmatprep.subr.mxu0 %v14460_v37  ;;  %13266 = vmatprep.subr.mxu1 %v14461_v36  ;;  %v14515_v4 = vld [vmem:[%s14969_s6 + $0x1e30] sm:$0xff]  ;;  %v14518_v37 = vld [vmem:[%s14969_s6 + $0x1d28] sm:$0xff] }
 0xad3   : > { %13232 = vmatpush3.msra.mxu0 %v14462_v29  ;;  %13267 = vmatpush3.msra.mxu1 %v14463_v38  ;;  %v14519_v36 = vld [vmem:[%s14969_s6 + $0x1e28] sm:$0xff]  ;;  %v14520_v29 = vld [vmem:[%s14969_s6 + $0x1da0] sm:$0xff] }
 0xad4   : > { %13233 = vmatprep.subr.mxu0 %v14464_v5  ;;  %13268 = vmatprep.subr.mxu1 %v14465_v0  ;;  %v14521_v38 = vld [vmem:[%s14969_s6 + $0x1ea0] sm:$0xff]  ;;  %v8549_v0 = vrot.slane %v8535_v1, %v15195_v59 }
 0xad5   : > { %13234 = vmatpush3.msra.mxu0 %v14466_v7  ;;  %13269 = vmatpush3.msra.mxu1 %v14467_v32  ;;  %v14523_v5 = vld [vmem:[%s14969_s6 + $0x1e20] sm:$0xff]  ;;  %v14524_v7 = vld [vmem:[%s14969_s6 + $0x1d98] sm:$0xff] }
 0xad6   : > { %13235 = vmatprep.subr.mxu0 %v14468_v13  ;;  %13270 = vmatprep.subr.mxu1 %v14469_v18  ;;  %v14525_v32 = vld [vmem:[%s14969_s6 + $0x1e98] sm:$0xff]  ;;  %v14568_v1 = vld [vmem:[%s14969_s6 + $0x1fc0] sm:$0xff] }
 0xad7   : > { %13236 = vmatpush3.msra.mxu0 %v14470_v45  ;;  %13271 = vmatpush3.msra.mxu1 %v14471_v9  ;;  %v14527_v13 = vld [vmem:[%s14969_s6 + $0x1e18] sm:$0xff]  ;;  %v14528_v45 = vld [vmem:[%s14969_s6 + $0x1d90] sm:$0xff] }
 0xad8   : > { %13237 = vmatprep.subr.mxu0 %v14472_v15  ;;  %13272 = vmatprep.subr.mxu1 %v14473_v48  ;;  %v14529_v9 = vld [vmem:[%s14969_s6 + $0x1e90] sm:$0xff]  ;;  %v8551_v48 = vcombine.high %v8549_v0, %v8549_v0 }
 0xad9   : > { %13238 = vmatpush3.msra.mxu0 %v14474_v53  ;;  %10597 = vmatprep.mubr.f32.mxu0 %v8534_v61  ;;  %v14526_v61 = vld [vmem:[%s14969_s6 + $0x1d18] sm:$0xff]  ;;  %v14531_v15 = vld [vmem:[%s14969_s6 + $0x1e10] sm:$0xff]  ;;  %v14532_v53 = vld [vmem:[%s14969_s6 + $0x1d88] sm:$0xff] }
 0xada   : > { %13273 = vmatpush3.msra.mxu1 %v14475_v49  ;;  %10598 = vmatmul.mubr.f32.vlgmr.msra.gmra.mxu0 %v8532_v8  ;;  %v14517_v8 = vld [vmem:[%s14969_s6 + $0x1ea8] sm:$0xff] }
 0xadb   : > { %10667 = vmatprep.mubr.f32.mxu1 %v8550_v28  ;;  %13277 = vmatprep.subr.mxu0 %v14476_v6  ;;  %v14530_v28 = vld [vmem:[%s14969_s6 + $0x1d10] sm:$0xff]  ;;  %v14533_v49 = vld [vmem:[%s14969_s6 + $0x1e88] sm:$0xff] }
 0xadc   : > { %13312 = vmatprep.subr.mxu1 %v14477_v54  ;;  %10668 = vmatmul.mubr.f32.vlgmr.msra.gmra.mxu1 %v8542_v26  ;;  %v19569_v26 = vld [vmem:[%s14954_s7 + $0x78] sm:$0xff] }
 0xadd   : > { %13278 = vmatpush3.msra.mxu0 %v14478_v25  ;;  %13313 = vmatpush3.msra.mxu1 %v14479_v47  ;;  %v8559_v18 = vrot.slane %v19569_v26, %v15195_v59  ;;  %v14534_v6 = vld [vmem:[%s14969_s6 + $0x1d08] sm:$0xff]  ;;  %v14536_v47 = vld [vmem:[%s14969_s6 + $0x1d80] sm:$0xff] }
 0xade   : > { %13279 = vmatprep.subr.mxu0 %v14480_v39  ;;  %13314 = vmatprep.subr.mxu1 %v14481_v30  ;;  %v14535_v54 = vld [vmem:[%s14969_s6 + $0x1e08] sm:$0xff]  ;;  %v14537_v39 = vld [vmem:[%s14969_s6 + $0x1e80] sm:$0xff] }
 0xadf   : > { %13280 = vmatpush3.msra.mxu0 %v14482_v50  ;;  %13315 = vmatpush3.msra.mxu1 %v14483_v58  ;;  %v8567_v25 = vcombine.high %v8559_v18, %v8559_v18  ;;  %v14538_v30 = vld [vmem:[%s14969_s6 + $0x1d00] sm:$0xff]  ;;  %v14540_v58 = vld [vmem:[%s14969_s6 + $0x1ff8] sm:$0xff] }
 0xae0   : > { %13281 = vmatprep.subr.mxu0 %v14484_v43  ;;  %13316 = vmatprep.subr.mxu1 %v14485_v46  ;;  %v14539_v50 = vld [vmem:[%s14969_s6 + $0x1e00] sm:$0xff]  ;;  %v14541_v43 = vld [vmem:[%s14969_s6 + $0x20f8] sm:$0xff] }
 0xae1   : > { %13282 = vmatpush3.msra.mxu0 %v14486_v56  ;;  %13317 = vmatpush3.msra.mxu1 %v14487_v57  ;;  %v14542_v46 = vld [vmem:[%s14969_s6 + $0x1f78] sm:$0xff]  ;;  %v14544_v57 = vld [vmem:[%s14969_s6 + $0x1ff0] sm:$0xff] }
 0xae2   : > { %13283 = vmatprep.subr.mxu0 %v14488_v42  ;;  %13318 = vmatprep.subr.mxu1 %v14489_v2  ;;  %v14543_v56 = vld [vmem:[%s14969_s6 + $0x2078] sm:$0xff]  ;;  %v14545_v42 = vld [vmem:[%s14969_s6 + $0x20f0] sm:$0xff] }
 0xae3   : > { %13284 = vmatpush3.msra.mxu0 %v14490_v19  ;;  %13319 = vmatpush3.msra.mxu1 %v14491_v17  ;;  %v14546_v2 = vld [vmem:[%s14969_s6 + $0x1f70] sm:$0xff]  ;;  %v14548_v17 = vld [vmem:[%s14969_s6 + $0x1fe8] sm:$0xff] }
 0xae4   : > { %13285 = vmatprep.subr.mxu0 %v14492_v44  ;;  %13320 = vmatprep.subr.mxu1 %v14493_v51  ;;  %v14547_v19 = vld [vmem:[%s14969_s6 + $0x2070] sm:$0xff]  ;;  %v14549_v44 = vld [vmem:[%s14969_s6 + $0x20e8] sm:$0xff]  ;;  %v19602_v51 = vpop.f32.mrf.mxu0 }
 0xae5   : > { %13286 = vmatpush3.msra.mxu0 %v14494_v20  ;;  %13321 = vmatpush3.msra.mxu1 %v14495_v63  ;;  %v14550_v20 = vld [vmem:[%s14969_s6 + $0x1f68] sm:$0xff] }
 0xae6   : > { %13287 = vmatprep.subr.mxu0 %v14496_v33  ;;  %13322 = vmatprep.subr.mxu1 %v14497_v11  ;;  %v14551_v63 = vld [vmem:[%s14969_s6 + $0x2068] sm:$0xff]  ;;  %v14552_v33 = vld [vmem:[%s14969_s6 + $0x1fe0] sm:$0xff] }
 0xae7   : > { %13288 = vmatpush3.msra.mxu0 %v14498_v23  ;;  %13323 = vmatpush3.msra.mxu1 %v14499_v14  ;;  %v14553_v11 = vld [vmem:[%s14969_s6 + $0x20e0] sm:$0xff] }
 0xae8   : > { %13289 = vmatprep.subr.mxu0 %v14500_v55  ;;  %13324 = vmatprep.subr.mxu1 %v14501_v35  ;;  %v14554_v23 = vld [vmem:[%s14969_s6 + $0x1f60] sm:$0xff]  ;;  %v14556_v55 = vld [vmem:[%s14969_s6 + $0x1fd8] sm:$0xff] }
 0xae9   : > { %13290 = vmatpush3.msra.mxu0 %v14502_v60  ;;  %13325 = vmatpush3.msra.mxu1 %v14503_v52  ;;  %v14555_v14 = vld [vmem:[%s14969_s6 + $0x2060] sm:$0xff]  ;;  %v14557_v35 = vld [vmem:[%s14969_s6 + $0x20d8] sm:$0xff]  ;;  %v19612_v60 = vpop.f32.mrf.mxu0  ;;  %v19614_v52 = vpop.f32.mrf.mxu1 }
 0xaea   : > { %13291 = vmatprep.subr.mxu0 %v14504_v62  ;;  %13326 = vmatprep.subr.mxu1 %v14505_v24  ;;  %v14558_v62 = vld [vmem:[%s14969_s6 + $0x1f58] sm:$0xff] }
 0xaeb   : > { %13292 = vmatpush3.msra.mxu0 %v14506_v3  ;;  %13327 = vmatpush3.msra.mxu1 %v14507_v31  ;;  %v14559_v24 = vld [vmem:[%s14969_s6 + $0x2058] sm:$0xff]  ;;  %v14560_v3 = vld [vmem:[%s14969_s6 + $0x1fd0] sm:$0xff] }
 0xaec   : > { %13293 = vmatprep.subr.mxu0 %v14508_v12  ;;  %13328 = vmatprep.subr.mxu1 %v14509_v21  ;;  %v14561_v31 = vld [vmem:[%s14969_s6 + $0x20d0] sm:$0xff] }
 0xaed   : > { %13294 = vmatpush3.msra.mxu0 %v14510_v10  ;;  %13329 = vmatpush3.msra.mxu1 %v14511_v27  ;;  %v14562_v12 = vld [vmem:[%s14969_s6 + $0x1f50] sm:$0xff]  ;;  %v14564_v10 = vld [vmem:[%s14969_s6 + $0x1fc8] sm:$0xff] }
 0xaee   : > { %13295 = vmatprep.subr.mxu0 %v14512_v41  ;;  %13330 = vmatprep.subr.mxu1 %v14513_v34  ;;  %v14563_v21 = vld [vmem:[%s14969_s6 + $0x2050] sm:$0xff]  ;;  %v14565_v27 = vld [vmem:[%s14969_s6 + $0x20c8] sm:$0xff]  ;;  %v11175_v41 = vpop.f32.mrf.mxu1  ;;  %v19624_v34 = vpop.f32.mrf.mxu0 }
 0xaef   : > { %13296 = vmatpush3.msra.mxu0 %v14514_v22  ;;  %13331 = vmatpush3.msra.mxu1 %v14515_v4  ;;  %v14566_v22 = vld [vmem:[%s14969_s6 + $0x1f48] sm:$0xff] }
 0xaf0   : > { %13297 = vmatprep.subr.mxu0 %v14516_v40  ;;  %13332 = vmatprep.subr.mxu1 %v14517_v8  ;;  %v14567_v4 = vld [vmem:[%s14969_s6 + $0x2048] sm:$0xff]  ;;  %v14569_v40 = vld [vmem:[%s14969_s6 + $0x20c0] sm:$0xff] }
 0xaf1   : > { %13298 = vmatpush3.msra.mxu0 %v14518_v37  ;;  %13333 = vmatpush3.msra.mxu1 %v14519_v36  ;;  %v14570_v8 = vld [vmem:[%s14969_s6 + $0x1f40] sm:$0xff]  ;;  %v14572_v36 = vld [vmem:[%s14969_s6 + $0x1fb8] sm:$0xff] }
 0xaf2   : > { %13299 = vmatprep.subr.mxu0 %v14520_v29  ;;  %13334 = vmatprep.subr.mxu1 %v14521_v38  ;;  %v14571_v37 = vld [vmem:[%s14969_s6 + $0x2040] sm:$0xff]  ;;  %v14573_v29 = vld [vmem:[%s14969_s6 + $0x20b8] sm:$0xff]  ;;  %v11210_v38 = vpop.f32.mrf.mxu0 }
 0xaf3   : > { %13300 = vmatpush3.msra.mxu0 %v14522_v16  ;;  %13335 = vmatpush3.msra.mxu1 %v14523_v5  ;;  %v19634_v16 = vpop.f32.mrf.mxu1  ;;  %v14574_v5 = vld [vmem:[%s14969_s6 + $0x1f38] sm:$0xff] }
 0xaf4   : > { %13301 = vmatprep.subr.mxu0 %v14524_v7  ;;  %13336 = vmatprep.subr.mxu1 %v14525_v32  ;;  %v14576_v7 = vld [vmem:[%s14969_s6 + $0x1fb0] sm:$0xff] }
 0xaf5   : > { %13302 = vmatpush3.msra.mxu0 %v14526_v61  ;;  %13337 = vmatpush3.msra.mxu1 %v14527_v13  ;;  %v14577_v32 = vld [vmem:[%s14969_s6 + $0x20b0] sm:$0xff] }
 0xaf6   : > { %13303 = vmatprep.subr.mxu0 %v14528_v45  ;;  %13338 = vmatprep.subr.mxu1 %v14529_v9  ;;  %v14578_v61 = vld [vmem:[%s14969_s6 + $0x1f30] sm:$0xff]  ;;  %v14580_v45 = vld [vmem:[%s14969_s6 + $0x1fa8] sm:$0xff] }
 0xaf7   : > { %13304 = vmatpush3.msra.mxu0 %v14530_v28  ;;  %13339 = vmatpush3.msra.mxu1 %v14531_v15  ;;  %v14579_v13 = vld [vmem:[%s14969_s6 + $0x2030] sm:$0xff]  ;;  %v14581_v9 = vld [vmem:[%s14969_s6 + $0x20a8] sm:$0xff]  ;;  %v11245_v28 = vpop.f32.mrf.mxu1  ;;  %v19646_v15 = vpop.f32.mrf.mxu0 }
 0xaf8   : > { %13305 = vmatprep.subr.mxu0 %v14532_v53  ;;  %13340 = vmatprep.subr.mxu1 %v14533_v49  ;;  %v14583_v53 = vld [vmem:[%s14969_s6 + $0x2028] sm:$0xff]  ;;  %v14584_v49 = vld [vmem:[%s14969_s6 + $0x1fa0] sm:$0xff] }
 0xaf9   : > { %13306 = vmatpush3.msra.mxu0 %v14534_v6  ;;  %13341 = vmatpush3.msra.mxu1 %v14535_v54  ;;  %v14585_v6 = vld [vmem:[%s14969_s6 + $0x20a0] sm:$0xff] }
 0xafa   : > { %13307 = vmatprep.subr.mxu0 %v14536_v47  ;;  %13342 = vmatprep.subr.mxu1 %v14537_v39  ;;  %v14587_v54 = vld [vmem:[%s14969_s6 + $0x2020] sm:$0xff]  ;;  %v11141_v47 = vadd.f32 %v19612_v60, %v19602_v51  ;;  %v11176_v39 = vadd.f32 %v11175_v41, %v19614_v52  ;;  %v11211_v51 = vadd.f32 %v11210_v38, %v19624_v34 }
 0xafb   : > { %13308 = vmatpush3.msra.mxu0 %v14538_v30  ;;  %10737 = vmatprep.mubr.f32.mxu0 %v8551_v48  ;;  %v14582_v48 = vld [vmem:[%s14969_s6 + $0x1f28] sm:$0xff]  ;;  %v14588_v30 = vld [vmem:[%s14969_s6 + $0x1f98] sm:$0xff]  ;;  %v14601_v60 = vld [vmem:[%s14969_s6 + $0x2080] sm:$0xff] }
 0xafc   : > { %13343 = vmatpush3.msra.mxu1 %v14539_v50  ;;  %10738 = vmatmul.mubr.f32.vlgmr.msra.gmra.mxu0 %v8549_v0  ;;  %v14575_v0 = vld [vmem:[%s14969_s6 + $0x2038] sm:$0xff]  ;;  %v14602_v52 = vld [vmem:[%s14969_s6 + $0x1f00] sm:$0xff] }
 0xafd   : > { %10807 = vmatprep.mubr.f32.mxu1 %v8567_v25  ;;  %13347 = vmatprep.subr.mxu0 %v14540_v58  ;;  %v14589_v50 = vld [vmem:[%s14969_s6 + $0x2098] sm:$0xff]  ;;  %v11280_v58 = vpop.f32.mrf.mxu0 }
 0xafe   : > { %13382 = vmatprep.subr.mxu1 %v14541_v43  ;;  %10808 = vmatmul.mubr.f32.vlgmr.msra.gmra.mxu1 %v8559_v18  ;;  %v8552_v18 = vcombine.high %v19569_v26, %v19569_v26  ;;  %v14586_v26 = vld [vmem:[%s14969_s6 + $0x1f20] sm:$0xff]  ;;  %v11314_v43 = vpop.f32.mrf.mxu1 }
 0xaff   : > { %13348 = vmatpush3.msra.mxu0 %v14542_v46  ;;  %13383 = vmatpush3.msra.mxu1 %v14543_v56  ;;  %v14590_v46 = vld [vmem:[%s14969_s6 + $0x1f18] sm:$0xff] }
 0xb00   : > { %13349 = vmatprep.subr.mxu0 %v14544_v57  ;;  %13384 = vmatprep.subr.mxu1 %v14545_v42  ;;  %v8566_v25 = vrot.slane %v8552_v18, %v15195_v59  ;;  %v14591_v56 = vld [vmem:[%s14969_s6 + $0x2018] sm:$0xff]  ;;  %v11102_v59 = vld.sshfl [vmem:[%s14954_s7 + $0x80] sm:$0x33 pattern:$0x76325410] }
 0xb01   : > { %13350 = vmatpush3.msra.mxu0 %v14546_v2  ;;  %13385 = vmatpush3.msra.mxu1 %v14547_v19  ;;  %v14592_v57 = vld [vmem:[%s14969_s6 + $0x1f90] sm:$0xff] }
 0xb02   : > { %13351 = vmatprep.subr.mxu0 %v14548_v17  ;;  %13386 = vmatprep.subr.mxu1 %v14549_v44  ;;  %v14593_v42 = vld [vmem:[%s14969_s6 + $0x2090] sm:$0xff]  ;;  %v8568_v17 = vcombine.high %v8566_v25, %v8566_v25  ;;  %v6107_v44 = vadd.f32 %v11176_v39, %v11141_v47 }
 0xb03   : > { %13352 = vmatpush3.msra.mxu0 %v14550_v20  ;;  %13387 = vmatpush3.msra.mxu1 %v14551_v63  ;;  %v14594_v2 = vld [vmem:[%s14969_s6 + $0x1f10] sm:$0xff]  ;;  %v14596_v20 = vld [vmem:[%s14969_s6 + $0x1f88] sm:$0xff] }
 0xb04   : > { %13353 = vmatprep.subr.mxu0 %v14552_v33  ;;  %13388 = vmatprep.subr.mxu1 %v14553_v11  ;;  %v14595_v19 = vld [vmem:[%s14969_s6 + $0x2010] sm:$0xff]  ;;  %v14597_v63 = vld [vmem:[%s14969_s6 + $0x2088] sm:$0xff]  ;;  %v8576_v33 = vcombine.high %v11102_v59, %v11102_v59  ;;  %v11315_v11 = vpop.f32.mrf.mxu1 }
 0xb05   : > { %13354 = vmatpush3.msra.mxu0 %v14554_v23  ;;  %13389 = vmatpush3.msra.mxu1 %v14555_v14  ;;  %v11349_v23 = vpop.f32.mrf.mxu0  ;;  %v14598_v14 = vld [vmem:[%s14969_s6 + $0x1f08] sm:$0xff] }
 0xb06   : > { %13355 = vmatprep.subr.mxu0 %v14556_v55  ;;  %13390 = vmatprep.subr.mxu1 %v14557_v35  ;;  %v14599_v55 = vld [vmem:[%s14969_s6 + $0x2008] sm:$0xff]  ;;  %v14600_v35 = vld [vmem:[%s14969_s6 + $0x1f80] sm:$0xff] }
 0xb07   : > { %13356 = vmatpush3.msra.mxu0 %v14558_v62  ;;  %13391 = vmatpush3.msra.mxu1 %v14559_v24  ;;  %v6177_v62 = vadd.f32 %v11211_v51, %v6107_v44  ;;  %v11246_v24 = vadd.f32 %v11245_v28, %v19634_v16 }
 0xb08   : > { %13357 = vmatprep.subr.mxu0 %v14560_v3  ;;  %13392 = vmatprep.subr.mxu1 %v14561_v31  ;;  %v14603_v3 = vld [vmem:[%s14969_s6 + $0x2000] sm:$0xff]  ;;  %v11350_v31 = vpop.f32.mrf.mxu0 }
 0xb09   : > { %13358 = vmatpush3.msra.mxu0 %v14562_v12  ;;  %13393 = vmatpush3.msra.mxu1 %v14563_v21  ;;  %v11384_v12 = vpop.f32.mrf.mxu1  ;;  %v6247_v21 = vadd.f32 %v11246_v24, %v6177_v62 }
 0xb0a   : > { %13359 = vmatprep.subr.mxu0 %v14564_v10  ;;  %13394 = vmatprep.subr.mxu1 %v14565_v27  ;;  %v11281_v10 = vadd.f32 %v11280_v58, %v19646_v15  ;;  %v11419_v41 = vpop.f32.mrf.mxu0 }
 0xb0b   : > { %13360 = vmatpush3.msra.mxu0 %v14566_v22  ;;  %13395 = vmatpush3.msra.mxu1 %v14567_v4  ;;  %v11385_v27 = vpop.f32.mrf.mxu1  ;;  %v11316_v22 = vadd.f32 %v11315_v11, %v11314_v43 }
 0xb0c   : > { %13361 = vmatprep.subr.mxu0 %v14568_v1  ;;  %13396 = vmatprep.subr.mxu1 %v14569_v40  ;;  %v6317_v34 = vadd.f32 %v11281_v10, %v6247_v21  ;;  %v11420_v4 = vpop.f32.mrf.mxu0  ;;  %v11386_v38 = vadd.f32 %v11385_v27, %v11384_v12 }
 0xb0d   : > { %13362 = vmatpush3.msra.mxu0 %v14570_v8  ;;  %13397 = vmatpush3.msra.mxu1 %v14571_v37  ;;  %v11454_v1 = vpop.f32.mrf.mxu1  ;;  %v11351_v8 = vadd.f32 %v11350_v31, %v11349_v23 }
 0xb0e   : > { %13363 = vmatprep.subr.mxu0 %v14572_v36  ;;  %13398 = vmatprep.subr.mxu1 %v14573_v29  ;;  %v6387_v40 = vadd.f32 %v11316_v22, %v6317_v34  ;;  %v11489_v36 = vpop.f32.mrf.mxu0 }
 0xb0f   : > { %13364 = vmatpush3.msra.mxu0 %v14574_v5  ;;  %13399 = vmatpush3.msra.mxu1 %v14575_v0  ;;  %v11455_v37 = vpop.f32.mrf.mxu1 }
 0xb10   : > { %13365 = vmatprep.subr.mxu0 %v14576_v7  ;;  %13400 = vmatprep.subr.mxu1 %v14577_v32  ;;  %v6457_v29 = vadd.f32 %v11351_v8, %v6387_v40  ;;  %v11490_v16 = vpop.f32.mrf.mxu0  ;;  %v11421_v7 = vadd.f32 %v11420_v4, %v11419_v41  ;;  %v11456_v18 = vadd.f32 %v11455_v37, %v11454_v1 }
 0xb11   : > { %13366 = vmatpush3.msra.mxu0 %v14578_v61  ;;  %13401 = vmatpush3.msra.mxu1 %v14579_v13  ;;  %v11524_v5 = vpop.f32.mrf.mxu1  ;;  %v11491_v15 = vadd.f32 %v11490_v16, %v11489_v36 }
 0xb12   : > { %13367 = vmatprep.subr.mxu0 %v14580_v45  ;;  %13402 = vmatprep.subr.mxu1 %v14581_v9  ;;  %v6527_v0 = vadd.f32 %v11386_v38, %v6457_v29  ;;  %v11559_v61 = vpop.f32.mrf.mxu0 }
 0xb13   : > { %13368 = vmatpush3.msra.mxu0 %v14582_v48  ;;  %13403 = vmatpush3.msra.mxu1 %v14583_v53  ;;  %v11525_v32 = vpop.f32.mrf.mxu1 }
 0xb14   : > { %13369 = vmatprep.subr.mxu0 %v14584_v49  ;;  %13404 = vmatprep.subr.mxu1 %v14585_v6  ;;  %v6597_v13 = vadd.f32 %v11421_v7, %v6527_v0  ;;  %v11560_v45 = vpop.f32.mrf.mxu0  ;;  %v11526_v6 = vadd.f32 %v11525_v32, %v11524_v5 }
 0xb15   : > { %13370 = vmatpush3.msra.mxu0 %v14586_v26  ;;  %13405 = vmatpush3.msra.mxu1 %v14587_v54  ;;  %v11594_v9 = vpop.f32.mrf.mxu1  ;;  %v11561_v47 = vadd.f32 %v11560_v45, %v11559_v61 }
 0xb16   : > { %13371 = vmatprep.subr.mxu0 %v14588_v30  ;;  %13406 = vmatprep.subr.mxu1 %v14589_v50  ;;  %v6667_v28 = vadd.f32 %v11456_v18, %v6597_v13  ;;  %v11629_v53 = vpop.f32.mrf.mxu0 }
 0xb17   : > { %13372 = vmatpush3.msra.mxu0 %v14590_v46  ;;  %13407 = vmatpush3.msra.mxu1 %v14591_v56  ;;  %v11595_v48 = vpop.f32.mrf.mxu1 }
 0xb18   : > { %13373 = vmatprep.subr.mxu0 %v14592_v57  ;;  %13408 = vmatprep.subr.mxu1 %v14593_v42  ;;  %v6737_v49 = vadd.f32 %v11491_v15, %v6667_v28  ;;  %v11630_v26 = vpop.f32.mrf.mxu0  ;;  %v11596_v58 = vadd.f32 %v11595_v48, %v11594_v9 }
 0xb19   : > { %13374 = vmatpush3.msra.mxu0 %v14594_v2  ;;  %13409 = vmatpush3.msra.mxu1 %v14595_v19  ;;  %v11664_v54 = vpop.f32.mrf.mxu1 }
 0xb1a   : > { %13375 = vmatprep.subr.mxu0 %v14596_v20  ;;  %13410 = vmatprep.subr.mxu1 %v14597_v63  ;;  %v11699_v30 = vpop.f32.mrf.mxu0 }
 0xb1b   : > { %13376 = vmatpush3.msra.mxu0 %v14598_v14  ;;  %13411 = vmatpush3.msra.mxu1 %v14599_v55  ;;  %v11665_v39 = vpop.f32.mrf.mxu1 }
 0xb1c   : > { %13377 = vmatprep.subr.mxu0 %v14600_v35  ;;  %13412 = vmatprep.subr.mxu1 %v14601_v60  ;;  %v11700_v43 = vpop.f32.mrf.mxu0  ;;  %v11666_v19 = vadd.f32 %v11665_v39, %v11664_v54 }
 0xb1d   : > { %13378 = vmatpush3.msra.mxu0 %v14602_v52  ;;  %10877 = vmatprep.mubr.f32.mxu0 %v8568_v17  ;;  %v11734_v46 = vpop.f32.mrf.mxu1  ;;  %v11701_v20 = vadd.f32 %v11700_v43, %v11699_v30 }
 0xb1e   : > { %13413 = vmatpush3.msra.mxu1 %v14603_v3  ;;  %10947 = vmatprep.mubr.f32.mxu1 %v8576_v33  ;;  %v11769_v42 = vpop.f32.mrf.mxu0 }
 0xb1f   : > { %10878 = vmatmul.mubr.f32.vlgmr.msra.gmra.mxu0 %v8566_v25  ;;  %10948 = vmatmul.mubr.f32.vlgmr.msra.gmra.mxu1 %v11102_v59  ;;  %v6807_v25 = vadd.f32 %v11526_v6, %v6737_v49  ;;  %v11631_v59 = vadd.f32 %v11630_v26, %v11629_v53  ;;  %v11735_v57 = vpop.f32.mrf.mxu1 }
 0xb20   : > { %v11770_v17 = vpop.f32.mrf.mxu0  ;;  %v11736_v23 = vadd.f32 %v11735_v57, %v11734_v46 }
 0xb21   : > { %v6877_v50 = vadd.f32 %v11561_v47, %v6807_v25  ;;  %v11804_v44 = vpop.f32.mrf.mxu1  ;;  %v11771_v60 = vadd.f32 %v11770_v17, %v11769_v42 }
 0xb22   : > { %v11839_v33 = vpop.f32.mrf.mxu0 }
 0xb23   : > { %v6947_v56 = vadd.f32 %v11596_v58, %v6877_v50  ;;  %v11805_v63 = vpop.f32.mrf.mxu1 }
 0xb24   : > { %v11840_v14 = vpop.f32.mrf.mxu0  ;;  %v11806_v3 = vadd.f32 %v11805_v63, %v11804_v44 }
 0xb25   : > { %v7017_v2 = vadd.f32 %v11631_v59, %v6947_v56  ;;  %v11874_v55 = vpop.f32.mrf.mxu1  ;;  %v11841_v27 = vadd.f32 %v11840_v14, %v11839_v33 }
 0xb26   : > { %v11909_v62 = vpop.f32.mrf.mxu0 }
 0xb27   : > { %v7087_v51 = vadd.f32 %v11666_v19, %v7017_v2  ;;  %v11875_v52 = vpop.f32.mrf.mxu1 }
 0xb28   : > { %v11910_v31 = vpop.f32.mrf.mxu0  ;;  %v11876_v1 = vadd.f32 %v11875_v52, %v11874_v55 }
 0xb29   : > { %v7157_v11 = vadd.f32 %v11701_v20, %v7087_v51  ;;  %v11944_v12 = vpop.f32.mrf.mxu1  ;;  %v11911_v36 = vadd.f32 %v11910_v31, %v11909_v62 }
 0xb2a   : > { %v11979_v21 = vpop.f32.mrf.mxu0 }
 0xb2b   : > { %v7227_v35 = vadd.f32 %v11736_v23, %v7157_v11  ;;  %v11945_v41 = vpop.f32.mrf.mxu1 }
 0xb2c   : > { %v11980_v34 = vpop.f32.mrf.mxu0  ;;  %v11946_v0 = vadd.f32 %v11945_v41, %v11944_v12 }
 0xb2d   : > { %v7297_v24 = vadd.f32 %v11771_v60, %v7227_v35  ;;  %v12014_v22 = vpop.f32.mrf.mxu1  ;;  %v11981_v32 = vadd.f32 %v11980_v34, %v11979_v21 }
 0xb2e   : > { %v12049_v40 = vpop.f32.mrf.mxu0 }
 0xb2f   : > { %v7367_v10 = vadd.f32 %v11806_v3, %v7297_v24  ;;  %v12015_v8 = vpop.f32.mrf.mxu1 }
 0xb30   : > { %v12050_v29 = vpop.f32.mrf.mxu0  ;;  %v12016_v45 = vadd.f32 %v12015_v8, %v12014_v22 }
 0xb31   : > { %v7437_v4 = vadd.f32 %v11841_v27, %v7367_v10  ;;  %v12084_v38 = vpop.f32.mrf.mxu1  ;;  %v12051_v15 = vadd.f32 %v12050_v29, %v12049_v40 }
 0xb32   : > { %v12119_v16 = vpop.f32.mrf.mxu0 }
 0xb33   : > { %v7507_v37 = vadd.f32 %v11876_v1, %v7437_v4  ;;  %v12085_v7 = vpop.f32.mrf.mxu1 }
 0xb34   : > { %v12120_v61 = vpop.f32.mrf.mxu0  ;;  %v12086_v49 = vadd.f32 %v12085_v7, %v12084_v38 }
 0xb35   : > { %v7577_v5 = vadd.f32 %v11911_v36, %v7507_v37  ;;  %v12154_v13 = vpop.f32.mrf.mxu1  ;;  %v12121_v25 = vadd.f32 %v12120_v61, %v12119_v16 }
 0xb36   : > { %v12189_v9 = vpop.f32.mrf.mxu0 }
 0xb37   : > { %v7647_v18 = vadd.f32 %v11946_v0, %v7577_v5  ;;  %v12155_v48 = vpop.f32.mrf.mxu1 }
 0xb38   : > { %v12190_v6 = vpop.f32.mrf.mxu0  ;;  %v12156_v30 = vadd.f32 %v12155_v48, %v12154_v13 }
 0xb39   : > { %v7717_v28 = vadd.f32 %v11981_v32, %v7647_v18  ;;  %v12224_v26 = vpop.f32.mrf.mxu1  ;;  %v12191_v43 = vadd.f32 %v12190_v6, %v12189_v9 }
 0xb3a   : > { %v12259_v47 = vpop.f32.mrf.mxu0 }
 0xb3b   : > { %v7787_v53 = vadd.f32 %v12016_v45, %v7717_v28  ;;  %v12225_v50 = vpop.f32.mrf.mxu1 }
 0xb3c   : > { %v12260_v56 = vpop.f32.mrf.mxu0  ;;  %v12226_v57 = vadd.f32 %v12225_v50, %v12224_v26 }
 0xb3d   : > { %v7857_v54 = vadd.f32 %v12051_v15, %v7787_v53  ;;  %v12294_v46 = vpop.f32.mrf.mxu1  ;;  %v12261_v19 = vadd.f32 %v12260_v56, %v12259_v47 }
 0xb3e   : > { %v12329_v42 = vpop.f32.mrf.mxu0 }
 0xb3f   : > { %v7927_v39 = vadd.f32 %v12086_v49, %v7857_v54  ;;  %v12295_v17 = vpop.f32.mrf.mxu1 }
 0xb40   : > { %v12330_v20 = vpop.f32.mrf.mxu0  ;;  %v12296_v33 = vadd.f32 %v12295_v17, %v12294_v46 }
 0xb41   : > { %v7997_v58 = vadd.f32 %v12121_v25, %v7927_v39  ;;  %v12364_v51 = vpop.f32.mrf.mxu1  ;;  %v12331_v23 = vadd.f32 %v12330_v20, %v12329_v42 }
 0xb42   : > { %v12399_v11 = vpop.f32.mrf.mxu0 }
 0xb43   : > { %v8067_v59 = vadd.f32 %v12156_v30, %v7997_v58  ;;  %v12365_v14 = vpop.f32.mrf.mxu1 }
 0xb44   : > { %v12400_v60 = vpop.f32.mrf.mxu0  ;;  %v12366_v62 = vadd.f32 %v12365_v14, %v12364_v51 }
 0xb45   : > { %v8137_v2 = vadd.f32 %v12191_v43, %v8067_v59  ;;  %v12434_v35 = vpop.f32.mrf.mxu1  ;;  %v12401_v3 = vadd.f32 %v12400_v60, %v12399_v11 }
 0xb46   : > { %v12469_v24 = vpop.f32.mrf.mxu0 }
 0xb47   : > { %v8207_v44 = vadd.f32 %v12226_v57, %v8137_v2  ;;  %v12435_v31 = vpop.f32.mrf.mxu1 }
 0xb48   : > { %v12470_v10 = vpop.f32.mrf.mxu0  ;;  %v12436_v41 = vadd.f32 %v12435_v31, %v12434_v35 }
 0xb49   : > { %v8277_v63 = vadd.f32 %v12261_v19, %v8207_v44  ;;  %v12504_v21 = vpop.f32.mrf.mxu1  ;;  %v12471_v22 = vadd.f32 %v12470_v10, %v12469_v24 }
 0xb4a   : > { %v12539_v34 = vpop.f32.mrf.mxu0 }
 0xb4b   : > { %v8710_v55 = vadd.f32 %v12296_v33, %v8277_v63  ;;  %v12505_v4 = vpop.f32.mrf.mxu1 }
 0xb4c   : > { %v12540_v8 = vpop.f32.mrf.mxu0  ;;  %v12506_v36 = vadd.f32 %v12505_v4, %v12504_v21 }
 0xb4d   : > { %v8780_v52 = vadd.f32 %v12331_v23, %v8710_v55  ;;  %v12574_v40 = vpop.f32.mrf.mxu1  ;;  %v12541_v38 = vadd.f32 %v12540_v8, %v12539_v34 }
 0xb4e   : > { %v12609_v29 = vpop.f32.mrf.mxu0 }
 0xb4f   : > { %v8850_v12 = vadd.f32 %v12366_v62, %v8780_v52  ;;  %v12575_v16 = vpop.f32.mrf.mxu1 }
 0xb50   : > { %v12610_v7 = vpop.f32.mrf.mxu0  ;;  %v12576_v61 = vadd.f32 %v12575_v16, %v12574_v40 }
 0xb51   : > { %v8920_v27 = vadd.f32 %v12401_v3, %v8850_v12  ;;  %v12644_v0 = vpop.f32.mrf.mxu1  ;;  %v12611_v18 = vadd.f32 %v12610_v7, %v12609_v29 }
 0xb52   : > { %v12679_v13 = vpop.f32.mrf.mxu0 }
 0xb53   : > { %v8990_v1 = vadd.f32 %v12436_v41, %v8920_v27  ;;  %v12645_v45 = vpop.f32.mrf.mxu1 }
 0xb54   : > { %v12680_v15 = vpop.f32.mrf.mxu0  ;;  %v12646_v53 = vadd.f32 %v12645_v45, %v12644_v0 }
 0xb55   : > { %v9060_v37 = vadd.f32 %v12471_v22, %v8990_v1  ;;  %v12714_v28 = vpop.f32.mrf.mxu1  ;;  %v12681_v6 = vadd.f32 %v12680_v15, %v12679_v13 }
 0xb56   : > { %v12749_v49 = vpop.f32.mrf.mxu0 }
 0xb57   : > { %v9130_v5 = vadd.f32 %v12506_v36, %v9060_v37  ;;  %v12715_v26 = vpop.f32.mrf.mxu1 }
 0xb58   : > { %v12750_v47 = vpop.f32.mrf.mxu0  ;;  %v12716_v30 = vadd.f32 %v12715_v26, %v12714_v28 }
 0xb59   : > { %v9200_v32 = vadd.f32 %v12541_v38, %v9130_v5  ;;  %v12784_v25 = vpop.f32.mrf.mxu1  ;;  %v12751_v58 = vadd.f32 %v12750_v47, %v12749_v49 }
 0xb5a   : > { %v12819_v50 = vpop.f32.mrf.mxu0 }
 0xb5b   : > { %v9270_v9 = vadd.f32 %v12576_v61, %v9200_v32  ;;  %v12785_v43 = vpop.f32.mrf.mxu1 }
 0xb5c   : > { %v12820_v59 = vpop.f32.mrf.mxu0  ;;  %v12786_v42 = vadd.f32 %v12785_v43, %v12784_v25 }
 0xb5d   : > { %v9340_v48 = vadd.f32 %v12611_v18, %v9270_v9  ;;  %v12854_v56 = vpop.f32.mrf.mxu1  ;;  %v12821_v19 = vadd.f32 %v12820_v59, %v12819_v50 }
 0xb5e   : > { %v12889_v2 = vpop.f32.mrf.mxu0 }
 0xb5f   : > { %v9410_v54 = vadd.f32 %v12646_v53, %v9340_v48  ;;  %v12855_v17 = vpop.f32.mrf.mxu1 }
 0xb60   : > { %v12890_v20 = vpop.f32.mrf.mxu0  ;;  %v12856_v33 = vadd.f32 %v12855_v17, %v12854_v56 }
 0xb61   : > { %v9480_v39 = vadd.f32 %v12681_v6, %v9410_v54  ;;  %v12924_v51 = vpop.f32.mrf.mxu1  ;;  %v12891_v23 = vadd.f32 %v12890_v20, %v12889_v2 }
 0xb62   : > { %v12959_v11 = vpop.f32.mrf.mxu0 }
 0xb63   : > { %v9550_v46 = vadd.f32 %v12716_v30, %v9480_v39  ;;  %v12925_v14 = vpop.f32.mrf.mxu1 }
 0xb64   : > { %v12960_v60 = vpop.f32.mrf.mxu0  ;;  %v12926_v62 = vadd.f32 %v12925_v14, %v12924_v51 }
 0xb65   : > { %v9620_v57 = vadd.f32 %v12751_v58, %v9550_v46  ;;  %v12994_v35 = vpop.f32.mrf.mxu1  ;;  %v12961_v3 = vadd.f32 %v12960_v60, %v12959_v11 }
 0xb66   : > { %v13029_v24 = vpop.f32.mrf.mxu0 }
 0xb67   : > { %v9690_v44 = vadd.f32 %v12786_v42, %v9620_v57  ;;  %v12995_v31 = vpop.f32.mrf.mxu1 }
 0xb68   : > { %v13030_v10 = vpop.f32.mrf.mxu0  ;;  %v12996_v41 = vadd.f32 %v12995_v31, %v12994_v35 }
 0xb69   : > { %v9760_v63 = vadd.f32 %v12821_v19, %v9690_v44  ;;  %v13064_v21 = vpop.f32.mrf.mxu1  ;;  %v13031_v22 = vadd.f32 %v13030_v10, %v13029_v24 }
 0xb6a   : > { %v13099_v34 = vpop.f32.mrf.mxu0 }
 0xb6b   : > { %v9830_v55 = vadd.f32 %v12856_v33, %v9760_v63  ;;  %v13065_v4 = vpop.f32.mrf.mxu1 }
 0xb6c   : > { %v13100_v8 = vpop.f32.mrf.mxu0  ;;  %v13066_v36 = vadd.f32 %v13065_v4, %v13064_v21 }
 0xb6d   : > { %v9900_v52 = vadd.f32 %v12891_v23, %v9830_v55  ;;  %v13134_v40 = vpop.f32.mrf.mxu1  ;;  %v13101_v38 = vadd.f32 %v13100_v8, %v13099_v34 }
 0xb6f   : > { %v9970_v12 = vadd.f32 %v12926_v62, %v9900_v52  ;;  %v13135_v16 = vpop.f32.mrf.mxu1 }
 0xb70   : > { %v13136_v61 = vadd.f32 %v13135_v16, %v13134_v40 }
 0xb71   : > { %v10040_v27 = vadd.f32 %v12961_v3, %v9970_v12 }
 0xb73   : > { %v10110_v1 = vadd.f32 %v12996_v41, %v10040_v27 }
 0xb75   : > { %v10180_v37 = vadd.f32 %v13031_v22, %v10110_v1 }
 0xb77   : > { %v10250_v5 = vadd.f32 %v13066_v36, %v10180_v37 }
 0xb78   : > { %v13169_v29 = vpop.f32.mrf.mxu0 }
 0xb79   : > { %v10320_v32 = vadd.f32 %v13101_v38, %v10250_v5 }
 0xb7a   : > { %v13204_v0 = vpop.f32.mrf.mxu1  ;;  %v13170_v7 = vpop.f32.mrf.mxu0 }
 0xb7b   : > { %v13171_v18 = vadd.f32 %v13170_v7, %v13169_v29  ;;  %v10390_v9 = vadd.f32 %v13136_v61, %v10320_v32 }
 0xb7c   : > { %v13205_v45 = vpop.f32.mrf.mxu1 }
 0xb7d   : > { %v10460_v48 = vadd.f32 %v13171_v18, %v10390_v9  ;;  %v13206_v53 = vadd.f32 %v13205_v45, %v13204_v0 }
 0xb7f   : > { %v10530_v54 = vadd.f32 %v13206_v53, %v10460_v48 }
 0xb9a   : > { %v13239_v13 = vpop.f32.mrf.mxu0 }
 0xb9c   : > { %v13274_v28 = vpop.f32.mrf.mxu1  ;;  %v13240_v15 = vpop.f32.mrf.mxu0 }
 0xb9d   : > { %v13241_v6 = vadd.f32 %v13240_v15, %v13239_v13 }
 0xb9e   : > { %v13275_v26 = vpop.f32.mrf.mxu1 }
 0xb9f   : > { %v10600_v39 = vadd.f32 %v13241_v6, %v10530_v54  ;;  %v13276_v30 = vadd.f32 %v13275_v26, %v13274_v28 }
 0xba1   : > { %v10670_v43 = vadd.f32 %v13276_v30, %v10600_v39 }
 0xbbc   : > { %v13309_v49 = vpop.f32.mrf.mxu0 }
 0xbbe   : > { %v13344_v25 = vpop.f32.mrf.mxu1  ;;  %v13310_v47 = vpop.f32.mrf.mxu0 }
 0xbbf   : > { %v13311_v50 = vadd.f32 %v13310_v47, %v13309_v49 }
 0xbc0   : > { %v13345_v58 = vpop.f32.mrf.mxu1 }
 0xbc1   : > { %v10740_v46 = vadd.f32 %v13311_v50, %v10670_v43  ;;  %v13346_v56 = vadd.f32 %v13345_v58, %v13344_v25 }
 0xbc3   : > { %v10810_v19 = vadd.f32 %v13346_v56, %v10740_v46 }
 0xbdf   : > { %v13379_v59 = vpop.f32.mrf.mxu0  ;;  %v13414_v57 = vpop.f32.mrf.mxu1 }
 0xbe1   : > { %v13380_v42 = vpop.f32.mrf.mxu0  ;;  %v13415_v2 = vpop.f32.mrf.mxu1 }
 0xbe2   : > { %v13381_v17 = vadd.f32 %v13380_v42, %v13379_v59  ;;  %v13416_v51 = vadd.f32 %v13415_v2, %v13414_v57 }
 0xbe4   : > { %v10880_v44 = vadd.f32 %v13381_v17, %v10810_v19 }
 0xbe6   : > { %v10950_v20 = vadd.f32 %v13416_v51, %v10880_v44 }
 0xbe8   : > { %10958 = vst.msk [vmem:[#allocation2] sm:$0x3] %vm10957_vm0, %v10950_v20 }
 0xbef   : > { %v10970_v63 = vld [vmem:[#allocation2] sm:$0x3] }
 0xbf0   : > { %10972 = vst.msk [vmem:[%s292_s4] sm:$0x3] %vm10957_vm0, %v10970_v63 }
 0xbf1 PF: > { %s19_s20 = sadd.s32 1, %s14771_s20   ;;  %s19728_s24 = sld [smem:[#allocation11_spill]] }
 0xbf2   : > { %p16_p12 = scmp.ge.s32.totalorder %s19_s20, 4   ;;  %s19729_s12 = smov %s14743_s13 }
 0xbf3   : > { %s19730_s13 = smov %s14747_s14  ;;  %s19731_s14 = smov %s14866_s29 }
 0xbf4   : > { %s19732_s15 = smov %s14755_s16  ;;  %s19733_s16 = smov %s14759_s17 }
 0xbf5   : > { %s19734_s17 = smov %s14912_s10  ;;  %s19735_s18 = smov %s14767_s19 }
 0xbf6   :  { %18 = sbr.rel (!%p16_p12) target bundleno = 11 (0xb), region = 108 }
 0xbf7   : > { %s19736_s19 = smov %s19728_s24 }
 0xbfb   :  { %10992 = vsyncpa [#allocation4], 1 }
 0xbfc   :  { %10994 = vsyncpa [#allocation4 + $0x1], 1 }
 0xbfd   :  { %10995 = vsyncpa [#allocation6], 1 }
 0xbfe   :  { %10997 = vsyncpa [#allocation6 + $0x1], 1 }

</bundles_post_ra>
